<compile_context>
chip_gen: v6e
topology: v6e:2x2x1
jax: 0.10.0
libtpu: 0.0.40
codegen_flags: <defaults>
</compile_context>

<pallas_src>
import functools

import jax
import jax.numpy as jnp
from jax import lax
from jax.experimental import pallas as pl
from jax.experimental.pallas import tpu as pltpu
import numpy as np


# ----------------------------------------------------------------------------
# One-off probe: validate strided-roll semantics on this hardware / jax build.
# Expected (np.roll convention, slice i gets shift + i*stride):
#   out[i, j] = x[i, (j - i) mod t]
# If the probe fails (or raises), we fall back to the concat shift network.
# ----------------------------------------------------------------------------
_ROLL_PROBE_CACHE = {}


def _strided_roll_supported(t):
    ok = _ROLL_PROBE_CACHE.get(t)
    if ok is not None:
        return ok
    try:
        def probe_kernel(x_ref, o_ref):
            o_ref[...] = pltpu.roll(x_ref[...], shift=0, axis=1,
                                    stride=1, stride_axis=0)

        x = jnp.broadcast_to(jnp.arange(t, dtype=jnp.float32), (t, t))
        out = pl.pallas_call(
            probe_kernel,
            out_shape=jax.ShapeDtypeStruct((t, t), jnp.float32),
        )(x)
        out = np.asarray(jax.block_until_ready(out))
        col = np.arange(t)
        expect = ((col[None, :] - col[:, None]) % t).astype(np.float32)
        ok = bool(np.array_equal(out, expect))
    except Exception:
        ok = False
    _ROLL_PROBE_CACHE[t] = ok
    return ok


# ----------------------------------------------------------------------------
# Kernel
# ----------------------------------------------------------------------------
def _make_kernel(heads, use_strided_roll):
    def kernel(x_ref, wq_ref, wk_ref, wv_ref, er_ref, wr_ref, b_ref, o_ref,
               q_scr, k_scr, v_scr, ctx_scr):
        t = x_ref.shape[1]
        e = x_ref.shape[2]
        s = e // heads

        xv = x_ref[0]                                               # (t, e) bf16

        # Full-width projections (128-deep, e-wide MXU), bf16 in / f32 acc.
        # Results parked in bf16 VMEM scratch so nothing big stays live
        # across the head loop.
        q_scr[...] = jnp.dot(xv, wq_ref[...],
                             preferred_element_type=jnp.float32).astype(jnp.bfloat16)
        k_scr[...] = jnp.dot(xv, wk_ref[...],
                             preferred_element_type=jnp.float32).astype(jnp.bfloat16)
        v_scr[...] = jnp.dot(xv, wv_ref[...],
                             preferred_element_type=jnp.float32).astype(jnp.bfloat16)

        for h in range(heads):
            sl = slice(h * s, (h + 1) * s)
            q_h = q_scr[:, sl]                                      # (t, s) bf16
            k_h = k_scr[:, sl]                                      # (t, s) bf16
            er_h = er_ref[:, sl]                                    # (t, s) bf16

            # Relative logits QEr = q_h @ er_h^T  (MXU, f32 accumulate).
            qer = lax.dot_general(q_h, er_h, (((1,), (1,)), ((), ())),
                                  preferred_element_type=jnp.float32)   # (t, t)

            if use_strided_roll:
                # SRel[i, j] = QEr_orig[i, (j + t-1-i) mod t].  With Er
                # pre-rolled by one time-step in the wrapper, this is exactly a
                # per-row rotate of qer by the row index (single XLU op).
                srel = pltpu.roll(qer, shift=0, axis=1, stride=1, stride_axis=0)
            else:
                # Fallback: log2(t)-stage cyclic shift network (concat+select).
                row = lax.broadcasted_iota(jnp.int32, (t, t), 0)
                shift_amt = (t - 1) - row
                srel = qer
                shift, bit = 1, 0
                while shift < t:
                    shifted = jnp.concatenate([srel[:, shift:], srel[:, :shift]],
                                              axis=1)
                    take = ((shift_amt >> bit) & 1) == 1
                    srel = jnp.where(take, shifted, srel)
                    shift *= 2
                    bit += 1

            # Content scores (MXU) + relative term + causal mask.
            scores = lax.dot_general(q_h, k_h, (((1,), (1,)), ((), ())),
                                     preferred_element_type=jnp.float32)  # (t, t)
            scores = scores + srel

            rowi = lax.broadcasted_iota(jnp.int32, (t, t), 0)
            colj = lax.broadcasted_iota(jnp.int32, (t, t), 1)
            scores = jnp.where(colj > rowi, jnp.float32(-1e9), scores)

            # Softmax over keys in f32; denominator reciprocal on the EUP.
            m = jnp.max(scores, axis=-1, keepdims=True)
            p = jnp.exp(scores - m)
            l = jnp.sum(p, axis=-1, keepdims=True)
            inv_l = pl.reciprocal(l, approx=True)                   # (t, 1)

            ctx = lax.dot_general(p.astype(jnp.bfloat16), v_scr[:, sl],
                                  (((1,), (0,)), ((), ())),
                                  preferred_element_type=jnp.float32)    # (t, s)
            # Write this head's context straight into its scratch stripe.
            ctx_scr[:, sl] = (ctx * inv_l).astype(jnp.bfloat16)

        # Single lane-dense recombine matmul + bias for all heads.
        out = jnp.dot(ctx_scr[...], wr_ref[...],
                      preferred_element_type=jnp.float32) + b_ref[...]
        o_ref[0] = out.astype(o_ref.dtype)

    return kernel


# ----------------------------------------------------------------------------
# Wrapper
# ----------------------------------------------------------------------------
@functools.partial(jax.jit,
                   static_argnames=("heads", "max_length", "use_strided_roll"))
def _rel_pos_mha_impl(x, Wq, Wk, Wv, Er, Wr, br, *, heads, max_length,
                      use_strided_roll):
    b, t, e = x.shape
    h = heads
    s = e // h
    scale = jnp.float32(e) ** jnp.float32(-0.25)

    # Block-diagonal full-width projection weights ((in, out) layout) with the
    # attention scale folded into Wq / Wk (compensated in Er below), cast bf16.
    eye = jnp.eye(h, dtype=jnp.float32)
    wq_big = (jnp.kron(eye, Wq.T) * scale).astype(jnp.bfloat16)      # (e, e)
    wk_big = (jnp.kron(eye, Wk.T) * scale).astype(jnp.bfloat16)      # (e, e)
    wv_big = jnp.kron(eye, Wv.T).astype(jnp.bfloat16)                # (e, e)
    wr_t = Wr.T.astype(jnp.bfloat16)                                 # (e, e)
    bias2 = br.reshape(1, e).astype(jnp.float32)

    # Relative-embedding window (scale-compensated), lane-dense (t, heads*s).
    er_win = Er[:, max_length - t:, :] / scale                       # (h, t, s)
    er_lanes = er_win.transpose(1, 0, 2).reshape(t, e)               # (t, e)
    if use_strided_roll:
        # Pre-roll by one time-step so the in-kernel skew is a per-row rotate
        # by exactly the row index (amounts 0..t-1, no wrap edge case).
        er_lanes = jnp.roll(er_lanes, 1, axis=0)
    er_lanes = er_lanes.astype(jnp.bfloat16)

    x_bf = x.astype(jnp.bfloat16)

    # Advisory cost estimate so XLA can overlap surrounding ops.
    flops = int(2 * b * (4 * t * e * e + 3 * t * t * e))
    transcendentals = int(b * h * t * t)
    bytes_accessed = int(2 * b * t * e + 2 * 4 * e * e + 2 * t * e + 4 * e
                         + 4 * b * t * e)
    cost = pl.CostEstimate(flops=flops, transcendentals=transcendentals,
                           bytes_accessed=bytes_accessed)

    kernel = _make_kernel(h, use_strided_roll)

    out = pl.pallas_call(
        kernel,
        out_shape=jax.ShapeDtypeStruct((b, t, e), jnp.float32),
        grid_spec=pltpu.PrefetchScalarGridSpec(
            num_scalar_prefetch=0,
            grid=(b,),
            in_specs=[
                pl.BlockSpec((1, t, e), lambda bi: (bi, 0, 0)),      # x (bf16)
                pl.BlockSpec((e, e), lambda bi: (0, 0)),             # Wq blockdiag
                pl.BlockSpec((e, e), lambda bi: (0, 0)),             # Wk blockdiag
                pl.BlockSpec((e, e), lambda bi: (0, 0)),             # Wv blockdiag
                pl.BlockSpec((t, e), lambda bi: (0, 0)),             # Er window
                pl.BlockSpec((e, e), lambda bi: (0, 0)),             # Wr^T
                pl.BlockSpec((1, e), lambda bi: (0, 0)),             # bias
            ],
            out_specs=pl.BlockSpec((1, t, e), lambda bi: (bi, 0, 0)),
            scratch_shapes=[
                pltpu.VMEM((t, e), jnp.bfloat16),                    # q
                pltpu.VMEM((t, e), jnp.bfloat16),                    # k
                pltpu.VMEM((t, e), jnp.bfloat16),                    # v
                pltpu.VMEM((t, e), jnp.bfloat16),                    # ctx stripes
            ],
        ),
        compiler_params=pltpu.CompilerParams(
            dimension_semantics=("parallel",)),
        cost_estimate=cost,
    )(x_bf, wq_big, wk_big, wv_big, er_lanes, wr_t, bias2)
    return out


def rel_pos_mha(x, Wq, Wk, Wv, Er, Wr, br, *, heads, max_length):
    """x: (b, t, d_model) float32 -> (b, t, d_model) float32."""
    t = x.shape[1]
    use_roll = _strided_roll_supported(t)
    return _rel_pos_mha_impl(x, Wq, Wk, Wv, Er, Wr, br, heads=heads,
                             max_length=max_length, use_strided_roll=use_roll)


# ----------------------------------------------------------------------------
# Pure-JAX reference (transcription of the PyTorch forward; mask=None, no
# dropout).
# ----------------------------------------------------------------------------
def reference(x, Wq, Wk, Wv, Er, Wr, br, *, heads, max_length):
    b, t, e = x.shape
    h = heads
    s = e // h
    emb_start = max_length - t

    xr = x.reshape(b, t, h, s)
    hp = jax.lax.Precision.HIGHEST
    q = jnp.einsum('bthd,od->btho', xr, Wq, precision=hp).transpose(0, 2, 1, 3)
    k = jnp.einsum('bthd,od->btho', xr, Wk, precision=hp).transpose(0, 2, 1, 3)
    v = jnp.einsum('bthd,od->btho', xr, Wv, precision=hp).transpose(0, 2, 1, 3)

    Er_s = Er[:, emb_start:, :]                                      # (h, t, s)
    QEr = jnp.einsum('bhtd,hkd->bhtk', q, Er_s, precision=hp)        # (b, h, t, t)
    maskM = jnp.flip(jnp.triu(jnp.ones((t, t), jnp.float32), 1), axis=1)
    QEr = jnp.where(maskM == 1, 0.0, QEr)
    padded = jnp.pad(QEr, ((0, 0), (0, 0), (0, 0), (1, 0)))
    padded = padded.reshape(b, h, t + 1, t)
    SRel = padded[:, :, 1:, :].reshape(b * h, t, t)

    qf = q.reshape(b * h, t, s) / (e ** 0.25)
    kf = k.reshape(b * h, t, s) / (e ** 0.25)
    vf = v.reshape(b * h, t, s)
    scores = jnp.einsum('bij,bkj->bik', qf, kf, precision=hp) + SRel
    causal = jnp.triu(jnp.ones((t, t), jnp.float32), 1)
    scores = jnp.where(causal == 1, -1e9, scores)
    attn = jax.nn.softmax(scores, axis=-1)
    out = jnp.einsum('bik,bkd->bid', attn, vf, precision=hp).reshape(b, h, t, s)
    out = out.transpose(0, 2, 1, 3).reshape(b, t, h * s)
    return jnp.einsum('btk,ok->bto', out, Wr, precision=hp) + br


if __name__ == "__main__":
    # Lane-dense small test: d_model = 128 (one full lane width), t = 128.
    b, heads, d_model, t, max_length = 2, 4, 128, 128, 192
    s = d_model // heads

    key = jax.random.PRNGKey(0)
    k1, k2, k3, k4, k5, k6, k7 = jax.random.split(key, 7)
    Wq = jax.random.normal(k1, (s, s), jnp.float32) / jnp.sqrt(s)
    Wk = jax.random.normal(k2, (s, s), jnp.float32) / jnp.sqrt(s)
    Wv = jax.random.normal(k3, (s, s), jnp.float32) / jnp.sqrt(s)
    Er = jax.random.normal(k4, (heads, max_length, s), jnp.float32) / jnp.sqrt(s)
    Wr = jax.random.normal(k5, (d_model, heads * s), jnp.float32) / jnp.sqrt(d_model)
    br = jax.random.normal(k6, (d_model,), jnp.float32) * 0.1
    x = jax.random.normal(k7, (b, t, d_model), jnp.float32)

    out = jax.block_until_ready(
        rel_pos_mha(x, Wq, Wk, Wv, Er, Wr, br, heads=heads, max_length=max_length))
    ref = jax.block_until_ready(
        reference(x, Wq, Wk, Wv, Er, Wr, br, heads=heads, max_length=max_length))

    assert out.shape == (b, t, d_model)
    # bf16 MXU operands (f32 accumulation) + approx reciprocal -> 3e-2 tolerance.
    np.testing.assert_allclose(np.asarray(out), np.asarray(ref),
                               rtol=3e-2, atol=3e-2)
    print("KERNEL_OK")
</pallas_src>

<mosaic_0001>
module attributes {stable_mosaic.version = 11 : i64} {
  func.func @probe_kernel(%arg0: memref<128x128xf32, #tpu.memory_space<vmem>>, %arg1: memref<128x128xf32, #tpu.memory_space<vmem>>) attributes {dimension_semantics = [], scalar_prefetch = 0 : i64, scratch_operands = 0 : i64, tpu.core_type = #tpu.core_type<tc>} {
    %c0 = arith.constant 0 : index
    %c0_0 = arith.constant 0 : index
    %0 = vector.load %arg0[%c0, %c0_0] : memref<128x128xf32, #tpu.memory_space<vmem>>, vector<128x128xf32>
    %c0_i32 = arith.constant 0 : i32
    %1 = tpu.dynamic_rotate %0 by %c0_i32 dim 1 {stride = 1 : si32, stride_dimension = 0 : si32} : vector<128x128xf32>, i32 -> vector<128x128xf32>
    %c0_1 = arith.constant 0 : index
    %c0_2 = arith.constant 0 : index
    %2 = vector.load %arg1[%c0_1, %c0_2] : memref<128x128xf32, #tpu.memory_space<vmem>>, vector<128x128xf32>
    tpu.vector_store %arg1[%c0_1, %c0_2], %1 {strides = array<i32>} : memref<128x128xf32, #tpu.memory_space<vmem>>, vector<128x128xf32>,
    return
  }
}

module attributes {stable_mosaic.version = 11 : i64} {
  func.func @kernel(%arg0: i32, %arg1: memref<1x128x128xbf16, #tpu.memory_space<vmem>>, %arg2: memref<128x128xbf16, #tpu.memory_space<vmem>>, %arg3: memref<128x128xbf16, #tpu.memory_space<vmem>>, %arg4: memref<128x128xbf16, #tpu.memory_space<vmem>>, %arg5: memref<128x128xbf16, #tpu.memory_space<vmem>>, %arg6: memref<128x128xbf16, #tpu.memory_space<vmem>>, %arg7: memref<1x128xf32, #tpu.memory_space<vmem>>, %arg8: memref<1x128x128xf32, #tpu.memory_space<vmem>>, %arg9: memref<128x128xbf16, #tpu.memory_space<vmem>>, %arg10: memref<128x128xbf16, #tpu.memory_space<vmem>>, %arg11: memref<128x128xbf16, #tpu.memory_space<vmem>>, %arg12: memref<128x128xbf16, #tpu.memory_space<vmem>>) attributes {dimension_semantics = [#tpu.dimension_semantics<parallel>], iteration_bounds = array<i64: 2>, scalar_prefetch = 0 : i64, scratch_operands = 4 : i64, tpu.core_type = #tpu.core_type<tc>, window_params = [{transform_indices = @transform_0, window_bounds = array<i64: 1, 128, 128>}, {pipeline_mode = #tpu.pipeline_mode<synchronous>, transform_indices = @transform_1, window_bounds = array<i64: 128, 128>}, {pipeline_mode = #tpu.pipeline_mode<synchronous>, transform_indices = @transform_2, window_bounds = array<i64: 128, 128>}, {pipeline_mode = #tpu.pipeline_mode<synchronous>, transform_indices = @transform_3, window_bounds = array<i64: 128, 128>}, {pipeline_mode = #tpu.pipeline_mode<synchronous>, transform_indices = @transform_4, window_bounds = array<i64: 128, 128>}, {pipeline_mode = #tpu.pipeline_mode<synchronous>, transform_indices = @transform_5, window_bounds = array<i64: 128, 128>}, {pipeline_mode = #tpu.pipeline_mode<synchronous>, transform_indices = @transform_6, window_bounds = array<i64: 1, 128>}, {transform_indices = @transform_7, window_bounds = array<i64: 1, 128, 128>}]} {
    %c0 = arith.constant 0 : index
    %c0_0 = arith.constant 0 : index
    %c0_1 = arith.constant 0 : index
    %0 = vector.load %arg1[%c0, %c0_0, %c0_1] : memref<1x128x128xbf16, #tpu.memory_space<vmem>>, vector<1x128x128xbf16>
    %1 = vector.shape_cast %0 : vector<1x128x128xbf16> to vector<128x128xbf16>
    %c0_2 = arith.constant 0 : index
    %c0_3 = arith.constant 0 : index
    %2 = vector.load %arg2[%c0_2, %c0_3] : memref<128x128xbf16, #tpu.memory_space<vmem>>, vector<128x128xbf16>
    %cst = arith.constant dense<0.000000e+00> : vector<128x128xf32>
    %3 = tpu.matmul %1, %2, %cst {dimension_numbers = #tpu.dot_dimension_numbers<[1], [0], [0], [1], [0, 0, 1, 1], [], []>} : vector<128x128xbf16>, vector<128x128xbf16>, vector<128x128xf32> -> vector<128x128xf32>
    %4 = arith.truncf %3 : vector<128x128xf32> to vector<128x128xbf16>
    %c0_4 = arith.constant 0 : index
    %c0_5 = arith.constant 0 : index
    %5 = vector.load %arg9[%c0_4, %c0_5] : memref<128x128xbf16, #tpu.memory_space<vmem>>, vector<128x128xbf16>
    tpu.vector_store %arg9[%c0_4, %c0_5], %4 {strides = array<i32>} : memref<128x128xbf16, #tpu.memory_space<vmem>>, vector<128x128xbf16>,
    %c0_6 = arith.constant 0 : index
    %c0_7 = arith.constant 0 : index
    %6 = vector.load %arg3[%c0_6, %c0_7] : memref<128x128xbf16, #tpu.memory_space<vmem>>, vector<128x128xbf16>
    %cst_8 = arith.constant dense<0.000000e+00> : vector<128x128xf32>
    %7 = tpu.matmul %1, %6, %cst_8 {dimension_numbers = #tpu.dot_dimension_numbers<[1], [0], [0], [1], [0, 0, 1, 1], [], []>} : vector<128x128xbf16>, vector<128x128xbf16>, vector<128x128xf32> -> vector<128x128xf32>
    %8 = arith.truncf %7 : vector<128x128xf32> to vector<128x128xbf16>
    %c0_9 = arith.constant 0 : index
    %c0_10 = arith.constant 0 : index
    %9 = vector.load %arg10[%c0_9, %c0_10] : memref<128x128xbf16, #tpu.memory_space<vmem>>, vector<128x128xbf16>
    tpu.vector_store %arg10[%c0_9, %c0_10], %8 {strides = array<i32>} : memref<128x128xbf16, #tpu.memory_space<vmem>>, vector<128x128xbf16>,
    %c0_11 = arith.constant 0 : index
    %c0_12 = arith.constant 0 : index
    %10 = vector.load %arg4[%c0_11, %c0_12] : memref<128x128xbf16, #tpu.memory_space<vmem>>, vector<128x128xbf16>
    %cst_13 = arith.constant dense<0.000000e+00> : vector<128x128xf32>
    %11 = tpu.matmul %1, %10, %cst_13 {dimension_numbers = #tpu.dot_dimension_numbers<[1], [0], [0], [1], [0, 0, 1, 1], [], []>} : vector<128x128xbf16>, vector<128x128xbf16>, vector<128x128xf32> -> vector<128x128xf32>
    %12 = arith.truncf %11 : vector<128x128xf32> to vector<128x128xbf16>
    %c0_14 = arith.constant 0 : index
    %c0_15 = arith.constant 0 : index
    %13 = vector.load %arg11[%c0_14, %c0_15] : memref<128x128xbf16, #tpu.memory_space<vmem>>, vector<128x128xbf16>
    tpu.vector_store %arg11[%c0_14, %c0_15], %12 {strides = array<i32>} : memref<128x128xbf16, #tpu.memory_space<vmem>>, vector<128x128xbf16>,
    %c0_16 = arith.constant 0 : index
    %c0_17 = arith.constant 0 : index
    %14 = vector.load %arg9[%c0_16, %c0_17] : memref<128x128xbf16, #tpu.memory_space<vmem>>, vector<128x32xbf16>
    %c0_18 = arith.constant 0 : index
    %c0_19 = arith.constant 0 : index
    %15 = vector.load %arg10[%c0_18, %c0_19] : memref<128x128xbf16, #tpu.memory_space<vmem>>, vector<128x32xbf16>
    %c0_20 = arith.constant 0 : index
    %c0_21 = arith.constant 0 : index
    %16 = vector.load %arg5[%c0_20, %c0_21] : memref<128x128xbf16, #tpu.memory_space<vmem>>, vector<128x32xbf16>
    %cst_22 = arith.constant dense<0.000000e+00> : vector<128x128xf32>
    %17 = tpu.matmul %14, %16, %cst_22 {dimension_numbers = #tpu.dot_dimension_numbers<[1], [1], [0], [0], [0, 0, 1, 0], [], []>} : vector<128x32xbf16>, vector<128x32xbf16>, vector<128x128xf32> -> vector<128x128xf32>
    %18 = tpu.iota {dimensions = array<i32: 0>} : vector<128x128xi32>
    %c127_i32 = arith.constant 127 : i32
    %19 = vector.broadcast %c127_i32 : i32 to vector<128x128xi32>
    %20 = arith.subi %19, %18 : vector<128x128xi32>
    %21 = vector.extract_strided_slice %17 {offsets = [0, 1], sizes = [128, 127], strides = [1, 1]} : vector<128x128xf32> to vector<128x127xf32>
    %22 = vector.extract_strided_slice %17 {offsets = [0, 0], sizes = [128, 1], strides = [1, 1]} : vector<128x128xf32> to vector<128x1xf32>
    %23 = tpu.concatenate %21, %22 in 1 : vector<128x127xf32>, vector<128x1xf32> -> vector<128x128xf32>
    %c0_i32 = arith.constant 0 : i32
    %24 = vector.broadcast %c0_i32 : i32 to vector<128x128xi32>
    %25 = arith.shrsi %20, %24 : vector<128x128xi32>
    %c1_i32 = arith.constant 1 : i32
    %26 = vector.broadcast %c1_i32 : i32 to vector<128x128xi32>
    %27 = arith.andi %25, %26 : vector<128x128xi32>
    %c1_i32_23 = arith.constant 1 : i32
    %28 = vector.broadcast %c1_i32_23 : i32 to vector<128x128xi32>
    %29 = arith.cmpi eq, %27, %28 : vector<128x128xi32>
    %30 = arith.select %29, %23, %17 : vector<128x128xi1>, vector<128x128xf32>
    %31 = vector.extract_strided_slice %30 {offsets = [0, 2], sizes = [128, 126], strides = [1, 1]} : vector<128x128xf32> to vector<128x126xf32>
    %32 = vector.extract_strided_slice %30 {offsets = [0, 0], sizes = [128, 2], strides = [1, 1]} : vector<128x128xf32> to vector<128x2xf32>
    %33 = tpu.concatenate %31, %32 in 1 : vector<128x126xf32>, vector<128x2xf32> -> vector<128x128xf32>
    %c1_i32_24 = arith.constant 1 : i32
    %34 = vector.broadcast %c1_i32_24 : i32 to vector<128x128xi32>
    %35 = arith.shrsi %20, %34 : vector<128x128xi32>
    %c1_i32_25 = arith.constant 1 : i32
    %36 = vector.broadcast %c1_i32_25 : i32 to vector<128x128xi32>
    %37 = arith.andi %35, %36 : vector<128x128xi32>
    %c1_i32_26 = arith.constant 1 : i32
    %38 = vector.broadcast %c1_i32_26 : i32 to vector<128x128xi32>
    %39 = arith.cmpi eq, %37, %38 : vector<128x128xi32>
    %40 = arith.select %39, %33, %30 : vector<128x128xi1>, vector<128x128xf32>
    %41 = vector.extract_strided_slice %40 {offsets = [0, 4], sizes = [128, 124], strides = [1, 1]} : vector<128x128xf32> to vector<128x124xf32>
    %42 = vector.extract_strided_slice %40 {offsets = [0, 0], sizes = [128, 4], strides = [1, 1]} : vector<128x128xf32> to vector<128x4xf32>
    %43 = tpu.concatenate %41, %42 in 1 : vector<128x124xf32>, vector<128x4xf32> -> vector<128x128xf32>
    %c2_i32 = arith.constant 2 : i32
    %44 = vector.broadcast %c2_i32 : i32 to vector<128x128xi32>
    %45 = arith.shrsi %20, %44 : vector<128x128xi32>
    %c1_i32_27 = arith.constant 1 : i32
    %46 = vector.broadcast %c1_i32_27 : i32 to vector<128x128xi32>
    %47 = arith.andi %45, %46 : vector<128x128xi32>
    %c1_i32_28 = arith.constant 1 : i32
    %48 = vector.broadcast %c1_i32_28 : i32 to vector<128x128xi32>
    %49 = arith.cmpi eq, %47, %48 : vector<128x128xi32>
    %50 = arith.select %49, %43, %40 : vector<128x128xi1>, vector<128x128xf32>
    %51 = vector.extract_strided_slice %50 {offsets = [0, 8], sizes = [128, 120], strides = [1, 1]} : vector<128x128xf32> to vector<128x120xf32>
    %52 = vector.extract_strided_slice %50 {offsets = [0, 0], sizes = [128, 8], strides = [1, 1]} : vector<128x128xf32> to vector<128x8xf32>
    %53 = tpu.concatenate %51, %52 in 1 : vector<128x120xf32>, vector<128x8xf32> -> vector<128x128xf32>
    %c3_i32 = arith.constant 3 : i32
    %54 = vector.broadcast %c3_i32 : i32 to vector<128x128xi32>
    %55 = arith.shrsi %20, %54 : vector<128x128xi32>
    %c1_i32_29 = arith.constant 1 : i32
    %56 = vector.broadcast %c1_i32_29 : i32 to vector<128x128xi32>
    %57 = arith.andi %55, %56 : vector<128x128xi32>
    %c1_i32_30 = arith.constant 1 : i32
    %58 = vector.broadcast %c1_i32_30 : i32 to vector<128x128xi32>
    %59 = arith.cmpi eq, %57, %58 : vector<128x128xi32>
    %60 = arith.select %59, %53, %50 : vector<128x128xi1>, vector<128x128xf32>
    %61 = vector.extract_strided_slice %60 {offsets = [0, 16], sizes = [128, 112], strides = [1, 1]} : vector<128x128xf32> to vector<128x112xf32>
    %62 = vector.extract_strided_slice %60 {offsets = [0, 0], sizes = [128, 16], strides = [1, 1]} : vector<128x128xf32> to vector<128x16xf32>
    %63 = tpu.concatenate %61, %62 in 1 : vector<128x112xf32>, vector<128x16xf32> -> vector<128x128xf32>
    %c4_i32 = arith.constant 4 : i32
    %64 = vector.broadcast %c4_i32 : i32 to vector<128x128xi32>
    %65 = arith.shrsi %20, %64 : vector<128x128xi32>
    %c1_i32_31 = arith.constant 1 : i32
    %66 = vector.broadcast %c1_i32_31 : i32 to vector<128x128xi32>
    %67 = arith.andi %65, %66 : vector<128x128xi32>
    %c1_i32_32 = arith.constant 1 : i32
    %68 = vector.broadcast %c1_i32_32 : i32 to vector<128x128xi32>
    %69 = arith.cmpi eq, %67, %68 : vector<128x128xi32>
    %70 = arith.select %69, %63, %60 : vector<128x128xi1>, vector<128x128xf32>
    %71 = vector.extract_strided_slice %70 {offsets = [0, 32], sizes = [128, 96], strides = [1, 1]} : vector<128x128xf32> to vector<128x96xf32>
    %72 = vector.extract_strided_slice %70 {offsets = [0, 0], sizes = [128, 32], strides = [1, 1]} : vector<128x128xf32> to vector<128x32xf32>
    %73 = tpu.concatenate %71, %72 in 1 : vector<128x96xf32>, vector<128x32xf32> -> vector<128x128xf32>
    %c5_i32 = arith.constant 5 : i32
    %74 = vector.broadcast %c5_i32 : i32 to vector<128x128xi32>
    %75 = arith.shrsi %20, %74 : vector<128x128xi32>
    %c1_i32_33 = arith.constant 1 : i32
    %76 = vector.broadcast %c1_i32_33 : i32 to vector<128x128xi32>
    %77 = arith.andi %75, %76 : vector<128x128xi32>
    %c1_i32_34 = arith.constant 1 : i32
    %78 = vector.broadcast %c1_i32_34 : i32 to vector<128x128xi32>
    %79 = arith.cmpi eq, %77, %78 : vector<128x128xi32>
    %80 = arith.select %79, %73, %70 : vector<128x128xi1>, vector<128x128xf32>
    %81 = vector.extract_strided_slice %80 {offsets = [0, 64], sizes = [128, 64], strides = [1, 1]} : vector<128x128xf32> to vector<128x64xf32>
    %82 = vector.extract_strided_slice %80 {offsets = [0, 0], sizes = [128, 64], strides = [1, 1]} : vector<128x128xf32> to vector<128x64xf32>
    %83 = tpu.concatenate %81, %82 in 1 : vector<128x64xf32>, vector<128x64xf32> -> vector<128x128xf32>
    %c6_i32 = arith.constant 6 : i32
    %84 = vector.broadcast %c6_i32 : i32 to vector<128x128xi32>
    %85 = arith.shrsi %20, %84 : vector<128x128xi32>
    %c1_i32_35 = arith.constant 1 : i32
    %86 = vector.broadcast %c1_i32_35 : i32 to vector<128x128xi32>
    %87 = arith.andi %85, %86 : vector<128x128xi32>
    %c1_i32_36 = arith.constant 1 : i32
    %88 = vector.broadcast %c1_i32_36 : i32 to vector<128x128xi32>
    %89 = arith.cmpi eq, %87, %88 : vector<128x128xi32>
    %90 = arith.select %89, %83, %80 : vector<128x128xi1>, vector<128x128xf32>
    %cst_37 = arith.constant dense<0.000000e+00> : vector<128x128xf32>
    %91 = tpu.matmul %14, %15, %cst_37 {dimension_numbers = #tpu.dot_dimension_numbers<[1], [1], [0], [0], [0, 0, 1, 0], [], []>} : vector<128x32xbf16>, vector<128x32xbf16>, vector<128x128xf32> -> vector<128x128xf32>
    %92 = arith.addf %91, %90 : vector<128x128xf32>
    %93 = tpu.iota {dimensions = array<i32: 0>} : vector<128x128xi32>
    %94 = tpu.iota {dimensions = array<i32: 1>} : vector<128x128xi32>
    %95 = arith.cmpi sgt, %94, %93 : vector<128x128xi32>
    %cst_38 = arith.constant -1.000000e+09 : f32
    %96 = vector.broadcast %cst_38 : f32 to vector<128x128xf32>
    %97 = arith.select %95, %96, %92 : vector<128x128xi1>, vector<128x128xf32>
    %cst_39 = arith.constant dense<0xFF800000> : vector<128xf32>
    %98 = vector.multi_reduction <maximumf>, %97, %cst_39 [1] : vector<128x128xf32> to vector<128xf32>
    %99 = vector.shape_cast %98 : vector<128xf32> to vector<128x1xf32>
    %100 = vector.broadcast %99 : vector<128x1xf32> to vector<128x128xf32>
    %101 = arith.subf %97, %100 : vector<128x128xf32>
    %102 = math.exp %101 : vector<128x128xf32>
    %cst_40 = arith.constant dense<0.000000e+00> : vector<128xf32>
    %103 = vector.multi_reduction <add>, %102, %cst_40 [1] : vector<128x128xf32> to vector<128xf32>
    %104 = vector.shape_cast %103 : vector<128xf32> to vector<128x1xf32>
    %105 = tpu.reciprocal %104 {approx = true} : vector<128x1xf32> -> vector<128x1xf32>
    %106 = arith.truncf %102 : vector<128x128xf32> to vector<128x128xbf16>
    %c0_41 = arith.constant 0 : index
    %c0_42 = arith.constant 0 : index
    %107 = vector.load %arg11[%c0_41, %c0_42] : memref<128x128xbf16, #tpu.memory_space<vmem>>, vector<128x32xbf16>
    %cst_43 = arith.constant dense<0.000000e+00> : vector<128x32xf32>
    %108 = tpu.matmul %106, %107, %cst_43 {dimension_numbers = #tpu.dot_dimension_numbers<[1], [0], [0], [1], [0, 0, 1, 1], [], []>} : vector<128x128xbf16>, vector<128x32xbf16>, vector<128x32xf32> -> vector<128x32xf32>
    %109 = vector.broadcast %105 : vector<128x1xf32> to vector<128x32xf32>
    %110 = arith.mulf %108, %109 : vector<128x32xf32>
    %111 = arith.truncf %110 : vector<128x32xf32> to vector<128x32xbf16>
    %c0_44 = arith.constant 0 : index
    %c0_45 = arith.constant 0 : index
    %112 = vector.load %arg12[%c0_44, %c0_45] : memref<128x128xbf16, #tpu.memory_space<vmem>>, vector<128x32xbf16>
    tpu.vector_store %arg12[%c0_44, %c0_45], %111 {strides = array<i32>} : memref<128x128xbf16, #tpu.memory_space<vmem>>, vector<128x32xbf16>,
    %c0_46 = arith.constant 0 : index
    %c32 = arith.constant 32 : index
    %113 = vector.load %arg9[%c0_46, %c32] : memref<128x128xbf16, #tpu.memory_space<vmem>>, vector<128x32xbf16>
    %c0_47 = arith.constant 0 : index
    %c32_48 = arith.constant 32 : index
    %114 = vector.load %arg10[%c0_47, %c32_48] : memref<128x128xbf16, #tpu.memory_space<vmem>>, vector<128x32xbf16>
    %c0_49 = arith.constant 0 : index
    %c32_50 = arith.constant 32 : index
    %115 = vector.load %arg5[%c0_49, %c32_50] : memref<128x128xbf16, #tpu.memory_space<vmem>>, vector<128x32xbf16>
    %cst_51 = arith.constant dense<0.000000e+00> : vector<128x128xf32>
    %116 = tpu.matmul %113, %115, %cst_51 {dimension_numbers = #tpu.dot_dimension_numbers<[1], [1], [0], [0], [0, 0, 1, 0], [], []>} : vector<128x32xbf16>, vector<128x32xbf16>, vector<128x128xf32> -> vector<128x128xf32>
    %117 = tpu.iota {dimensions = array<i32: 0>} : vector<128x128xi32>
    %c127_i32_52 = arith.constant 127 : i32
    %118 = vector.broadcast %c127_i32_52 : i32 to vector<128x128xi32>
    %119 = arith.subi %118, %117 : vector<128x128xi32>
    %120 = vector.extract_strided_slice %116 {offsets = [0, 1], sizes = [128, 127], strides = [1, 1]} : vector<128x128xf32> to vector<128x127xf32>
    %121 = vector.extract_strided_slice %116 {offsets = [0, 0], sizes = [128, 1], strides = [1, 1]} : vector<128x128xf32> to vector<128x1xf32>
    %122 = tpu.concatenate %120, %121 in 1 : vector<128x127xf32>, vector<128x1xf32> -> vector<128x128xf32>
    %c0_i32_53 = arith.constant 0 : i32
    %123 = vector.broadcast %c0_i32_53 : i32 to vector<128x128xi32>
    %124 = arith.shrsi %119, %123 : vector<128x128xi32>
    %c1_i32_54 = arith.constant 1 : i32
    %125 = vector.broadcast %c1_i32_54 : i32 to vector<128x128xi32>
    %126 = arith.andi %124, %125 : vector<128x128xi32>
    %c1_i32_55 = arith.constant 1 : i32
    %127 = vector.broadcast %c1_i32_55 : i32 to vector<128x128xi32>
    %128 = arith.cmpi eq, %126, %127 : vector<128x128xi32>
    %129 = arith.select %128, %122, %116 : vector<128x128xi1>, vector<128x128xf32>
    %130 = vector.extract_strided_slice %129 {offsets = [0, 2], sizes = [128, 126], strides = [1, 1]} : vector<128x128xf32> to vector<128x126xf32>
    %131 = vector.extract_strided_slice %129 {offsets = [0, 0], sizes = [128, 2], strides = [1, 1]} : vector<128x128xf32> to vector<128x2xf32>
    %132 = tpu.concatenate %130, %131 in 1 : vector<128x126xf32>, vector<128x2xf32> -> vector<128x128xf32>
    %c1_i32_56 = arith.constant 1 : i32
    %133 = vector.broadcast %c1_i32_56 : i32 to vector<128x128xi32>
    %134 = arith.shrsi %119, %133 : vector<128x128xi32>
    %c1_i32_57 = arith.constant 1 : i32
    %135 = vector.broadcast %c1_i32_57 : i32 to vector<128x128xi32>
    %136 = arith.andi %134, %135 : vector<128x128xi32>
    %c1_i32_58 = arith.constant 1 : i32
    %137 = vector.broadcast %c1_i32_58 : i32 to vector<128x128xi32>
    %138 = arith.cmpi eq, %136, %137 : vector<128x128xi32>
    %139 = arith.select %138, %132, %129 : vector<128x128xi1>, vector<128x128xf32>
    %140 = vector.extract_strided_slice %139 {offsets = [0, 4], sizes = [128, 124], strides = [1, 1]} : vector<128x128xf32> to vector<128x124xf32>
    %141 = vector.extract_strided_slice %139 {offsets = [0, 0], sizes = [128, 4], strides = [1, 1]} : vector<128x128xf32> to vector<128x4xf32>
    %142 = tpu.concatenate %140, %141 in 1 : vector<128x124xf32>, vector<128x4xf32> -> vector<128x128xf32>
    %c2_i32_59 = arith.constant 2 : i32
    %143 = vector.broadcast %c2_i32_59 : i32 to vector<128x128xi32>
    %144 = arith.shrsi %119, %143 : vector<128x128xi32>
    %c1_i32_60 = arith.constant 1 : i32
    %145 = vector.broadcast %c1_i32_60 : i32 to vector<128x128xi32>
    %146 = arith.andi %144, %145 : vector<128x128xi32>
    %c1_i32_61 = arith.constant 1 : i32
    %147 = vector.broadcast %c1_i32_61 : i32 to vector<128x128xi32>
    %148 = arith.cmpi eq, %146, %147 : vector<128x128xi32>
    %149 = arith.select %148, %142, %139 : vector<128x128xi1>, vector<128x128xf32>
    %150 = vector.extract_strided_slice %149 {offsets = [0, 8], sizes = [128, 120], strides = [1, 1]} : vector<128x128xf32> to vector<128x120xf32>
    %151 = vector.extract_strided_slice %149 {offsets = [0, 0], sizes = [128, 8], strides = [1, 1]} : vector<128x128xf32> to vector<128x8xf32>
    %152 = tpu.concatenate %150, %151 in 1 : vector<128x120xf32>, vector<128x8xf32> -> vector<128x128xf32>
    %c3_i32_62 = arith.constant 3 : i32
    %153 = vector.broadcast %c3_i32_62 : i32 to vector<128x128xi32>
    %154 = arith.shrsi %119, %153 : vector<128x128xi32>
    %c1_i32_63 = arith.constant 1 : i32
    %155 = vector.broadcast %c1_i32_63 : i32 to vector<128x128xi32>
    %156 = arith.andi %154, %155 : vector<128x128xi32>
    %c1_i32_64 = arith.constant 1 : i32
    %157 = vector.broadcast %c1_i32_64 : i32 to vector<128x128xi32>
    %158 = arith.cmpi eq, %156, %157 : vector<128x128xi32>
    %159 = arith.select %158, %152, %149 : vector<128x128xi1>, vector<128x128xf32>
    %160 = vector.extract_strided_slice %159 {offsets = [0, 16], sizes = [128, 112], strides = [1, 1]} : vector<128x128xf32> to vector<128x112xf32>
    %161 = vector.extract_strided_slice %159 {offsets = [0, 0], sizes = [128, 16], strides = [1, 1]} : vector<128x128xf32> to vector<128x16xf32>
    %162 = tpu.concatenate %160, %161 in 1 : vector<128x112xf32>, vector<128x16xf32> -> vector<128x128xf32>
    %c4_i32_65 = arith.constant 4 : i32
    %163 = vector.broadcast %c4_i32_65 : i32 to vector<128x128xi32>
    %164 = arith.shrsi %119, %163 : vector<128x128xi32>
    %c1_i32_66 = arith.constant 1 : i32
    %165 = vector.broadcast %c1_i32_66 : i32 to vector<128x128xi32>
    %166 = arith.andi %164, %165 : vector<128x128xi32>
    %c1_i32_67 = arith.constant 1 : i32
    %167 = vector.broadcast %c1_i32_67 : i32 to vector<128x128xi32>
    %168 = arith.cmpi eq, %166, %167 : vector<128x128xi32>
    %169 = arith.select %168, %162, %159 : vector<128x128xi1>, vector<128x128xf32>
    %170 = vector.extract_strided_slice %169 {offsets = [0, 32], sizes = [128, 96], strides = [1, 1]} : vector<128x128xf32> to vector<128x96xf32>
    %171 = vector.extract_strided_slice %169 {offsets = [0, 0], sizes = [128, 32], strides = [1, 1]} : vector<128x128xf32> to vector<128x32xf32>
    %172 = tpu.concatenate %170, %171 in 1 : vector<128x96xf32>, vector<128x32xf32> -> vector<128x128xf32>
    %c5_i32_68 = arith.constant 5 : i32
    %173 = vector.broadcast %c5_i32_68 : i32 to vector<128x128xi32>
    %174 = arith.shrsi %119, %173 : vector<128x128xi32>
    %c1_i32_69 = arith.constant 1 : i32
    %175 = vector.broadcast %c1_i32_69 : i32 to vector<128x128xi32>
    %176 = arith.andi %174, %175 : vector<128x128xi32>
    %c1_i32_70 = arith.constant 1 : i32
    %177 = vector.broadcast %c1_i32_70 : i32 to vector<128x128xi32>
    %178 = arith.cmpi eq, %176, %177 : vector<128x128xi32>
    %179 = arith.select %178, %172, %169 : vector<128x128xi1>, vector<128x128xf32>
    %180 = vector.extract_strided_slice %179 {offsets = [0, 64], sizes = [128, 64], strides = [1, 1]} : vector<128x128xf32> to vector<128x64xf32>
    %181 = vector.extract_strided_slice %179 {offsets = [0, 0], sizes = [128, 64], strides = [1, 1]} : vector<128x128xf32> to vector<128x64xf32>
    %182 = tpu.concatenate %180, %181 in 1 : vector<128x64xf32>, vector<128x64xf32> -> vector<128x128xf32>
    %c6_i32_71 = arith.constant 6 : i32
    %183 = vector.broadcast %c6_i32_71 : i32 to vector<128x128xi32>
    %184 = arith.shrsi %119, %183 : vector<128x128xi32>
    %c1_i32_72 = arith.constant 1 : i32
    %185 = vector.broadcast %c1_i32_72 : i32 to vector<128x128xi32>
    %186 = arith.andi %184, %185 : vector<128x128xi32>
    %c1_i32_73 = arith.constant 1 : i32
    %187 = vector.broadcast %c1_i32_73 : i32 to vector<128x128xi32>
    %188 = arith.cmpi eq, %186, %187 : vector<128x128xi32>
    %189 = arith.select %188, %182, %179 : vector<128x128xi1>, vector<128x128xf32>
    %cst_74 = arith.constant dense<0.000000e+00> : vector<128x128xf32>
    %190 = tpu.matmul %113, %114, %cst_74 {dimension_numbers = #tpu.dot_dimension_numbers<[1], [1], [0], [0], [0, 0, 1, 0], [], []>} : vector<128x32xbf16>, vector<128x32xbf16>, vector<128x128xf32> -> vector<128x128xf32>
    %191 = arith.addf %190, %189 : vector<128x128xf32>
    %192 = tpu.iota {dimensions = array<i32: 0>} : vector<128x128xi32>
    %193 = tpu.iota {dimensions = array<i32: 1>} : vector<128x128xi32>
    %194 = arith.cmpi sgt, %193, %192 : vector<128x128xi32>
    %cst_75 = arith.constant -1.000000e+09 : f32
    %195 = vector.broadcast %cst_75 : f32 to vector<128x128xf32>
    %196 = arith.select %194, %195, %191 : vector<128x128xi1>, vector<128x128xf32>
    %cst_76 = arith.constant dense<0xFF800000> : vector<128xf32>
    %197 = vector.multi_reduction <maximumf>, %196, %cst_76 [1] : vector<128x128xf32> to vector<128xf32>
    %198 = vector.shape_cast %197 : vector<128xf32> to vector<128x1xf32>
    %199 = vector.broadcast %198 : vector<128x1xf32> to vector<128x128xf32>
    %200 = arith.subf %196, %199 : vector<128x128xf32>
    %201 = math.exp %200 : vector<128x128xf32>
    %cst_77 = arith.constant dense<0.000000e+00> : vector<128xf32>
    %202 = vector.multi_reduction <add>, %201, %cst_77 [1] : vector<128x128xf32> to vector<128xf32>
    %203 = vector.shape_cast %202 : vector<128xf32> to vector<128x1xf32>
    %204 = tpu.reciprocal %203 {approx = true} : vector<128x1xf32> -> vector<128x1xf32>
    %205 = arith.truncf %201 : vector<128x128xf32> to vector<128x128xbf16>
    %c0_78 = arith.constant 0 : index
    %c32_79 = arith.constant 32 : index
    %206 = vector.load %arg11[%c0_78, %c32_79] : memref<128x128xbf16, #tpu.memory_space<vmem>>, vector<128x32xbf16>
    %cst_80 = arith.constant dense<0.000000e+00> : vector<128x32xf32>
    %207 = tpu.matmul %205, %206, %cst_80 {dimension_numbers = #tpu.dot_dimension_numbers<[1], [0], [0], [1], [0, 0, 1, 1], [], []>} : vector<128x128xbf16>, vector<128x32xbf16>, vector<128x32xf32> -> vector<128x32xf32>
    %208 = vector.broadcast %204 : vector<128x1xf32> to vector<128x32xf32>
    %209 = arith.mulf %207, %208 : vector<128x32xf32>
    %210 = arith.truncf %209 : vector<128x32xf32> to vector<128x32xbf16>
    %c0_81 = arith.constant 0 : index
    %c32_82 = arith.constant 32 : index
    %211 = vector.load %arg12[%c0_81, %c32_82] : memref<128x128xbf16, #tpu.memory_space<vmem>>, vector<128x32xbf16>
    tpu.vector_store %arg12[%c0_81, %c32_82], %210 {strides = array<i32>} : memref<128x128xbf16, #tpu.memory_space<vmem>>, vector<128x32xbf16>,
    %c0_83 = arith.constant 0 : index
    %c64 = arith.constant 64 : index
    %212 = vector.load %arg9[%c0_83, %c64] : memref<128x128xbf16, #tpu.memory_space<vmem>>, vector<128x32xbf16>
    %c0_84 = arith.constant 0 : index
    %c64_85 = arith.constant 64 : index
    %213 = vector.load %arg10[%c0_84, %c64_85] : memref<128x128xbf16, #tpu.memory_space<vmem>>, vector<128x32xbf16>
    %c0_86 = arith.constant 0 : index
    %c64_87 = arith.constant 64 : index
    %214 = vector.load %arg5[%c0_86, %c64_87] : memref<128x128xbf16, #tpu.memory_space<vmem>>, vector<128x32xbf16>
    %cst_88 = arith.constant dense<0.000000e+00> : vector<128x128xf32>
    %215 = tpu.matmul %212, %214, %cst_88 {dimension_numbers = #tpu.dot_dimension_numbers<[1], [1], [0], [0], [0, 0, 1, 0], [], []>} : vector<128x32xbf16>, vector<128x32xbf16>, vector<128x128xf32> -> vector<128x128xf32>
    %216 = tpu.iota {dimensions = array<i32: 0>} : vector<128x128xi32>
    %c127_i32_89 = arith.constant 127 : i32
    %217 = vector.broadcast %c127_i32_89 : i32 to vector<128x128xi32>
    %218 = arith.subi %217, %216 : vector<128x128xi32>
    %219 = vector.extract_strided_slice %215 {offsets = [0, 1], sizes = [128, 127], strides = [1, 1]} : vector<128x128xf32> to vector<128x127xf32>
    %220 = vector.extract_strided_slice %215 {offsets = [0, 0], sizes = [128, 1], strides = [1, 1]} : vector<128x128xf32> to vector<128x1xf32>
    %221 = tpu.concatenate %219, %220 in 1 : vector<128x127xf32>, vector<128x1xf32> -> vector<128x128xf32>
    %c0_i32_90 = arith.constant 0 : i32
    %222 = vector.broadcast %c0_i32_90 : i32 to vector<128x128xi32>
    %223 = arith.shrsi %218, %222 : vector<128x128xi32>
    %c1_i32_91 = arith.constant 1 : i32
    %224 = vector.broadcast %c1_i32_91 : i32 to vector<128x128xi32>
    %225 = arith.andi %223, %224 : vector<128x128xi32>
    %c1_i32_92 = arith.constant 1 : i32
    %226 = vector.broadcast %c1_i32_92 : i32 to vector<128x128xi32>
    %227 = arith.cmpi eq, %225, %226 : vector<128x128xi32>
    %228 = arith.select %227, %221, %215 : vector<128x128xi1>, vector<128x128xf32>
    %229 = vector.extract_strided_slice %228 {offsets = [0, 2], sizes = [128, 126], strides = [1, 1]} : vector<128x128xf32> to vector<128x126xf32>
    %230 = vector.extract_strided_slice %228 {offsets = [0, 0], sizes = [128, 2], strides = [1, 1]} : vector<128x128xf32> to vector<128x2xf32>
    %231 = tpu.concatenate %229, %230 in 1 : vector<128x126xf32>, vector<128x2xf32> -> vector<128x128xf32>
    %c1_i32_93 = arith.constant 1 : i32
    %232 = vector.broadcast %c1_i32_93 : i32 to vector<128x128xi32>
    %233 = arith.shrsi %218, %232 : vector<128x128xi32>
    %c1_i32_94 = arith.constant 1 : i32
    %234 = vector.broadcast %c1_i32_94 : i32 to vector<128x128xi32>
    %235 = arith.andi %233, %234 : vector<128x128xi32>
    %c1_i32_95 = arith.constant 1 : i32
    %236 = vector.broadcast %c1_i32_95 : i32 to vector<128x128xi32>
    %237 = arith.cmpi eq, %235, %236 : vector<128x128xi32>
    %238 = arith.select %237, %231, %228 : vector<128x128xi1>, vector<128x128xf32>
    %239 = vector.extract_strided_slice %238 {offsets = [0, 4], sizes = [128, 124], strides = [1, 1]} : vector<128x128xf32> to vector<128x124xf32>
    %240 = vector.extract_strided_slice %238 {offsets = [0, 0], sizes = [128, 4], strides = [1, 1]} : vector<128x128xf32> to vector<128x4xf32>
    %241 = tpu.concatenate %239, %240 in 1 : vector<128x124xf32>, vector<128x4xf32> -> vector<128x128xf32>
    %c2_i32_96 = arith.constant 2 : i32
    %242 = vector.broadcast %c2_i32_96 : i32 to vector<128x128xi32>
    %243 = arith.shrsi %218, %242 : vector<128x128xi32>
    %c1_i32_97 = arith.constant 1 : i32
    %244 = vector.broadcast %c1_i32_97 : i32 to vector<128x128xi32>
    %245 = arith.andi %243, %244 : vector<128x128xi32>
    %c1_i32_98 = arith.constant 1 : i32
    %246 = vector.broadcast %c1_i32_98 : i32 to vector<128x128xi32>
    %247 = arith.cmpi eq, %245, %246 : vector<128x128xi32>
    %248 = arith.select %247, %241, %238 : vector<128x128xi1>, vector<128x128xf32>
    %249 = vector.extract_strided_slice %248 {offsets = [0, 8], sizes = [128, 120], strides = [1, 1]} : vector<128x128xf32> to vector<128x120xf32>
    %250 = vector.extract_strided_slice %248 {offsets = [0, 0], sizes = [128, 8], strides = [1, 1]} : vector<128x128xf32> to vector<128x8xf32>
    %251 = tpu.concatenate %249, %250 in 1 : vector<128x120xf32>, vector<128x8xf32> -> vector<128x128xf32>
    %c3_i32_99 = arith.constant 3 : i32
    %252 = vector.broadcast %c3_i32_99 : i32 to vector<128x128xi32>
    %253 = arith.shrsi %218, %252 : vector<128x128xi32>
    %c1_i32_100 = arith.constant 1 : i32
    %254 = vector.broadcast %c1_i32_100 : i32 to vector<128x128xi32>
    %255 = arith.andi %253, %254 : vector<128x128xi32>
    %c1_i32_101 = arith.constant 1 : i32
    %256 = vector.broadcast %c1_i32_101 : i32 to vector<128x128xi32>
    %257 = arith.cmpi eq, %255, %256 : vector<128x128xi32>
    %258 = arith.select %257, %251, %248 : vector<128x128xi1>, vector<128x128xf32>
    %259 = vector.extract_strided_slice %258 {offsets = [0, 16], sizes = [128, 112], strides = [1, 1]} : vector<128x128xf32> to vector<128x112xf32>
    %260 = vector.extract_strided_slice %258 {offsets = [0, 0], sizes = [128, 16], strides = [1, 1]} : vector<128x128xf32> to vector<128x16xf32>
    %261 = tpu.concatenate %259, %260 in 1 : vector<128x112xf32>, vector<128x16xf32> -> vector<128x128xf32>
    %c4_i32_102 = arith.constant 4 : i32
    %262 = vector.broadcast %c4_i32_102 : i32 to vector<128x128xi32>
    %263 = arith.shrsi %218, %262 : vector<128x128xi32>
    %c1_i32_103 = arith.constant 1 : i32
    %264 = vector.broadcast %c1_i32_103 : i32 to vector<128x128xi32>
    %265 = arith.andi %263, %264 : vector<128x128xi32>
    %c1_i32_104 = arith.constant 1 : i32
    %266 = vector.broadcast %c1_i32_104 : i32 to vector<128x128xi32>
    %267 = arith.cmpi eq, %265, %266 : vector<128x128xi32>
    %268 = arith.select %267, %261, %258 : vector<128x128xi1>, vector<128x128xf32>
    %269 = vector.extract_strided_slice %268 {offsets = [0, 32], sizes = [128, 96], strides = [1, 1]} : vector<128x128xf32> to vector<128x96xf32>
    %270 = vector.extract_strided_slice %268 {offsets = [0, 0], sizes = [128, 32], strides = [1, 1]} : vector<128x128xf32> to vector<128x32xf32>
    %271 = tpu.concatenate %269, %270 in 1 : vector<128x96xf32>, vector<128x32xf32> -> vector<128x128xf32>
    %c5_i32_105 = arith.constant 5 : i32
    %272 = vector.broadcast %c5_i32_105 : i32 to vector<128x128xi32>
    %273 = arith.shrsi %218, %272 : vector<128x128xi32>
    %c1_i32_106 = arith.constant 1 : i32
    %274 = vector.broadcast %c1_i32_106 : i32 to vector<128x128xi32>
    %275 = arith.andi %273, %274 : vector<128x128xi32>
    %c1_i32_107 = arith.constant 1 : i32
    %276 = vector.broadcast %c1_i32_107 : i32 to vector<128x128xi32>
    %277 = arith.cmpi eq, %275, %276 : vector<128x128xi32>
    %278 = arith.select %277, %271, %268 : vector<128x128xi1>, vector<128x128xf32>
    %279 = vector.extract_strided_slice %278 {offsets = [0, 64], sizes = [128, 64], strides = [1, 1]} : vector<128x128xf32> to vector<128x64xf32>
    %280 = vector.extract_strided_slice %278 {offsets = [0, 0], sizes = [128, 64], strides = [1, 1]} : vector<128x128xf32> to vector<128x64xf32>
    %281 = tpu.concatenate %279, %280 in 1 : vector<128x64xf32>, vector<128x64xf32> -> vector<128x128xf32>
    %c6_i32_108 = arith.constant 6 : i32
    %282 = vector.broadcast %c6_i32_108 : i32 to vector<128x128xi32>
    %283 = arith.shrsi %218, %282 : vector<128x128xi32>
    %c1_i32_109 = arith.constant 1 : i32
    %284 = vector.broadcast %c1_i32_109 : i32 to vector<128x128xi32>
    %285 = arith.andi %283, %284 : vector<128x128xi32>
    %c1_i32_110 = arith.constant 1 : i32
    %286 = vector.broadcast %c1_i32_110 : i32 to vector<128x128xi32>
    %287 = arith.cmpi eq, %285, %286 : vector<128x128xi32>
    %288 = arith.select %287, %281, %278 : vector<128x128xi1>, vector<128x128xf32>
    %cst_111 = arith.constant dense<0.000000e+00> : vector<128x128xf32>
    %289 = tpu.matmul %212, %213, %cst_111 {dimension_numbers = #tpu.dot_dimension_numbers<[1], [1], [0], [0], [0, 0, 1, 0], [], []>} : vector<128x32xbf16>, vector<128x32xbf16>, vector<128x128xf32> -> vector<128x128xf32>
    %290 = arith.addf %289, %288 : vector<128x128xf32>
    %291 = tpu.iota {dimensions = array<i32: 0>} : vector<128x128xi32>
    %292 = tpu.iota {dimensions = array<i32: 1>} : vector<128x128xi32>
    %293 = arith.cmpi sgt, %292, %291 : vector<128x128xi32>
    %cst_112 = arith.constant -1.000000e+09 : f32
    %294 = vector.broadcast %cst_112 : f32 to vector<128x128xf32>
    %295 = arith.select %293, %294, %290 : vector<128x128xi1>, vector<128x128xf32>
    %cst_113 = arith.constant dense<0xFF800000> : vector<128xf32>
    %296 = vector.multi_reduction <maximumf>, %295, %cst_113 [1] : vector<128x128xf32> to vector<128xf32>
    %297 = vector.shape_cast %296 : vector<128xf32> to vector<128x1xf32>
    %298 = vector.broadcast %297 : vector<128x1xf32> to vector<128x128xf32>
    %299 = arith.subf %295, %298 : vector<128x128xf32>
    %300 = math.exp %299 : vector<128x128xf32>
    %cst_114 = arith.constant dense<0.000000e+00> : vector<128xf32>
    %301 = vector.multi_reduction <add>, %300, %cst_114 [1] : vector<128x128xf32> to vector<128xf32>
    %302 = vector.shape_cast %301 : vector<128xf32> to vector<128x1xf32>
    %303 = tpu.reciprocal %302 {approx = true} : vector<128x1xf32> -> vector<128x1xf32>
    %304 = arith.truncf %300 : vector<128x128xf32> to vector<128x128xbf16>
    %c0_115 = arith.constant 0 : index
    %c64_116 = arith.constant 64 : index
    %305 = vector.load %arg11[%c0_115, %c64_116] : memref<128x128xbf16, #tpu.memory_space<vmem>>, vector<128x32xbf16>
    %cst_117 = arith.constant dense<0.000000e+00> : vector<128x32xf32>
    %306 = tpu.matmul %304, %305, %cst_117 {dimension_numbers = #tpu.dot_dimension_numbers<[1], [0], [0], [1], [0, 0, 1, 1], [], []>} : vector<128x128xbf16>, vector<128x32xbf16>, vector<128x32xf32> -> vector<128x32xf32>
    %307 = vector.broadcast %303 : vector<128x1xf32> to vector<128x32xf32>
    %308 = arith.mulf %306, %307 : vector<128x32xf32>
    %309 = arith.truncf %308 : vector<128x32xf32> to vector<128x32xbf16>
    %c0_118 = arith.constant 0 : index
    %c64_119 = arith.constant 64 : index
    %310 = vector.load %arg12[%c0_118, %c64_119] : memref<128x128xbf16, #tpu.memory_space<vmem>>, vector<128x32xbf16>
    tpu.vector_store %arg12[%c0_118, %c64_119], %309 {strides = array<i32>} : memref<128x128xbf16, #tpu.memory_space<vmem>>, vector<128x32xbf16>,
    %c0_120 = arith.constant 0 : index
    %c96 = arith.constant 96 : index
    %311 = vector.load %arg9[%c0_120, %c96] : memref<128x128xbf16, #tpu.memory_space<vmem>>, vector<128x32xbf16>
    %c0_121 = arith.constant 0 : index
    %c96_122 = arith.constant 96 : index
    %312 = vector.load %arg10[%c0_121, %c96_122] : memref<128x128xbf16, #tpu.memory_space<vmem>>, vector<128x32xbf16>
    %c0_123 = arith.constant 0 : index
    %c96_124 = arith.constant 96 : index
    %313 = vector.load %arg5[%c0_123, %c96_124] : memref<128x128xbf16, #tpu.memory_space<vmem>>, vector<128x32xbf16>
    %cst_125 = arith.constant dense<0.000000e+00> : vector<128x128xf32>
    %314 = tpu.matmul %311, %313, %cst_125 {dimension_numbers = #tpu.dot_dimension_numbers<[1], [1], [0], [0], [0, 0, 1, 0], [], []>} : vector<128x32xbf16>, vector<128x32xbf16>, vector<128x128xf32> -> vector<128x128xf32>
    %315 = tpu.iota {dimensions = array<i32: 0>} : vector<128x128xi32>
    %c127_i32_126 = arith.constant 127 : i32
    %316 = vector.broadcast %c127_i32_126 : i32 to vector<128x128xi32>
    %317 = arith.subi %316, %315 : vector<128x128xi32>
    %318 = vector.extract_strided_slice %314 {offsets = [0, 1], sizes = [128, 127], strides = [1, 1]} : vector<128x128xf32> to vector<128x127xf32>
    %319 = vector.extract_strided_slice %314 {offsets = [0, 0], sizes = [128, 1], strides = [1, 1]} : vector<128x128xf32> to vector<128x1xf32>
    %320 = tpu.concatenate %318, %319 in 1 : vector<128x127xf32>, vector<128x1xf32> -> vector<128x128xf32>
    %c0_i32_127 = arith.constant 0 : i32
    %321 = vector.broadcast %c0_i32_127 : i32 to vector<128x128xi32>
    %322 = arith.shrsi %317, %321 : vector<128x128xi32>
    %c1_i32_128 = arith.constant 1 : i32
    %323 = vector.broadcast %c1_i32_128 : i32 to vector<128x128xi32>
    %324 = arith.andi %322, %323 : vector<128x128xi32>
    %c1_i32_129 = arith.constant 1 : i32
    %325 = vector.broadcast %c1_i32_129 : i32 to vector<128x128xi32>
    %326 = arith.cmpi eq, %324, %325 : vector<128x128xi32>
    %327 = arith.select %326, %320, %314 : vector<128x128xi1>, vector<128x128xf32>
    %328 = vector.extract_strided_slice %327 {offsets = [0, 2], sizes = [128, 126], strides = [1, 1]} : vector<128x128xf32> to vector<128x126xf32>
    %329 = vector.extract_strided_slice %327 {offsets = [0, 0], sizes = [128, 2], strides = [1, 1]} : vector<128x128xf32> to vector<128x2xf32>
    %330 = tpu.concatenate %328, %329 in 1 : vector<128x126xf32>, vector<128x2xf32> -> vector<128x128xf32>
    %c1_i32_130 = arith.constant 1 : i32
    %331 = vector.broadcast %c1_i32_130 : i32 to vector<128x128xi32>
    %332 = arith.shrsi %317, %331 : vector<128x128xi32>
    %c1_i32_131 = arith.constant 1 : i32
    %333 = vector.broadcast %c1_i32_131 : i32 to vector<128x128xi32>
    %334 = arith.andi %332, %333 : vector<128x128xi32>
    %c1_i32_132 = arith.constant 1 : i32
    %335 = vector.broadcast %c1_i32_132 : i32 to vector<128x128xi32>
    %336 = arith.cmpi eq, %334, %335 : vector<128x128xi32>
    %337 = arith.select %336, %330, %327 : vector<128x128xi1>, vector<128x128xf32>
    %338 = vector.extract_strided_slice %337 {offsets = [0, 4], sizes = [128, 124], strides = [1, 1]} : vector<128x128xf32> to vector<128x124xf32>
    %339 = vector.extract_strided_slice %337 {offsets = [0, 0], sizes = [128, 4], strides = [1, 1]} : vector<128x128xf32> to vector<128x4xf32>
    %340 = tpu.concatenate %338, %339 in 1 : vector<128x124xf32>, vector<128x4xf32> -> vector<128x128xf32>
    %c2_i32_133 = arith.constant 2 : i32
    %341 = vector.broadcast %c2_i32_133 : i32 to vector<128x128xi32>
    %342 = arith.shrsi %317, %341 : vector<128x128xi32>
    %c1_i32_134 = arith.constant 1 : i32
    %343 = vector.broadcast %c1_i32_134 : i32 to vector<128x128xi32>
    %344 = arith.andi %342, %343 : vector<128x128xi32>
    %c1_i32_135 = arith.constant 1 : i32
    %345 = vector.broadcast %c1_i32_135 : i32 to vector<128x128xi32>
    %346 = arith.cmpi eq, %344, %345 : vector<128x128xi32>
    %347 = arith.select %346, %340, %337 : vector<128x128xi1>, vector<128x128xf32>
    %348 = vector.extract_strided_slice %347 {offsets = [0, 8], sizes = [128, 120], strides = [1, 1]} : vector<128x128xf32> to vector<128x120xf32>
    %349 = vector.extract_strided_slice %347 {offsets = [0, 0], sizes = [128, 8], strides = [1, 1]} : vector<128x128xf32> to vector<128x8xf32>
    %350 = tpu.concatenate %348, %349 in 1 : vector<128x120xf32>, vector<128x8xf32> -> vector<128x128xf32>
    %c3_i32_136 = arith.constant 3 : i32
    %351 = vector.broadcast %c3_i32_136 : i32 to vector<128x128xi32>
    %352 = arith.shrsi %317, %351 : vector<128x128xi32>
    %c1_i32_137 = arith.constant 1 : i32
    %353 = vector.broadcast %c1_i32_137 : i32 to vector<128x128xi32>
    %354 = arith.andi %352, %353 : vector<128x128xi32>
    %c1_i32_138 = arith.constant 1 : i32
    %355 = vector.broadcast %c1_i32_138 : i32 to vector<128x128xi32>
    %356 = arith.cmpi eq, %354, %355 : vector<128x128xi32>
    %357 = arith.select %356, %350, %347 : vector<128x128xi1>, vector<128x128xf32>
    %358 = vector.extract_strided_slice %357 {offsets = [0, 16], sizes = [128, 112], strides = [1, 1]} : vector<128x128xf32> to vector<128x112xf32>
    %359 = vector.extract_strided_slice %357 {offsets = [0, 0], sizes = [128, 16], strides = [1, 1]} : vector<128x128xf32> to vector<128x16xf32>
    %360 = tpu.concatenate %358, %359 in 1 : vector<128x112xf32>, vector<128x16xf32> -> vector<128x128xf32>
    %c4_i32_139 = arith.constant 4 : i32
    %361 = vector.broadcast %c4_i32_139 : i32 to vector<128x128xi32>
    %362 = arith.shrsi %317, %361 : vector<128x128xi32>
    %c1_i32_140 = arith.constant 1 : i32
    %363 = vector.broadcast %c1_i32_140 : i32 to vector<128x128xi32>
    %364 = arith.andi %362, %363 : vector<128x128xi32>
    %c1_i32_141 = arith.constant 1 : i32
    %365 = vector.broadcast %c1_i32_141 : i32 to vector<128x128xi32>
    %366 = arith.cmpi eq, %364, %365 : vector<128x128xi32>
    %367 = arith.select %366, %360, %357 : vector<128x128xi1>, vector<128x128xf32>
    %368 = vector.extract_strided_slice %367 {offsets = [0, 32], sizes = [128, 96], strides = [1, 1]} : vector<128x128xf32> to vector<128x96xf32>
    %369 = vector.extract_strided_slice %367 {offsets = [0, 0], sizes = [128, 32], strides = [1, 1]} : vector<128x128xf32> to vector<128x32xf32>
    %370 = tpu.concatenate %368, %369 in 1 : vector<128x96xf32>, vector<128x32xf32> -> vector<128x128xf32>
    %c5_i32_142 = arith.constant 5 : i32
    %371 = vector.broadcast %c5_i32_142 : i32 to vector<128x128xi32>
    %372 = arith.shrsi %317, %371 : vector<128x128xi32>
    %c1_i32_143 = arith.constant 1 : i32
    %373 = vector.broadcast %c1_i32_143 : i32 to vector<128x128xi32>
    %374 = arith.andi %372, %373 : vector<128x128xi32>
    %c1_i32_144 = arith.constant 1 : i32
    %375 = vector.broadcast %c1_i32_144 : i32 to vector<128x128xi32>
    %376 = arith.cmpi eq, %374, %375 : vector<128x128xi32>
    %377 = arith.select %376, %370, %367 : vector<128x128xi1>, vector<128x128xf32>
    %378 = vector.extract_strided_slice %377 {offsets = [0, 64], sizes = [128, 64], strides = [1, 1]} : vector<128x128xf32> to vector<128x64xf32>
    %379 = vector.extract_strided_slice %377 {offsets = [0, 0], sizes = [128, 64], strides = [1, 1]} : vector<128x128xf32> to vector<128x64xf32>
    %380 = tpu.concatenate %378, %379 in 1 : vector<128x64xf32>, vector<128x64xf32> -> vector<128x128xf32>
    %c6_i32_145 = arith.constant 6 : i32
    %381 = vector.broadcast %c6_i32_145 : i32 to vector<128x128xi32>
    %382 = arith.shrsi %317, %381 : vector<128x128xi32>
    %c1_i32_146 = arith.constant 1 : i32
    %383 = vector.broadcast %c1_i32_146 : i32 to vector<128x128xi32>
    %384 = arith.andi %382, %383 : vector<128x128xi32>
    %c1_i32_147 = arith.constant 1 : i32
    %385 = vector.broadcast %c1_i32_147 : i32 to vector<128x128xi32>
    %386 = arith.cmpi eq, %384, %385 : vector<128x128xi32>
    %387 = arith.select %386, %380, %377 : vector<128x128xi1>, vector<128x128xf32>
    %cst_148 = arith.constant dense<0.000000e+00> : vector<128x128xf32>
    %388 = tpu.matmul %311, %312, %cst_148 {dimension_numbers = #tpu.dot_dimension_numbers<[1], [1], [0], [0], [0, 0, 1, 0], [], []>} : vector<128x32xbf16>, vector<128x32xbf16>, vector<128x128xf32> -> vector<128x128xf32>
    %389 = arith.addf %388, %387 : vector<128x128xf32>
    %390 = tpu.iota {dimensions = array<i32: 0>} : vector<128x128xi32>
    %391 = tpu.iota {dimensions = array<i32: 1>} : vector<128x128xi32>
    %392 = arith.cmpi sgt, %391, %390 : vector<128x128xi32>
    %cst_149 = arith.constant -1.000000e+09 : f32
    %393 = vector.broadcast %cst_149 : f32 to vector<128x128xf32>
    %394 = arith.select %392, %393, %389 : vector<128x128xi1>, vector<128x128xf32>
    %cst_150 = arith.constant dense<0xFF800000> : vector<128xf32>
    %395 = vector.multi_reduction <maximumf>, %394, %cst_150 [1] : vector<128x128xf32> to vector<128xf32>
    %396 = vector.shape_cast %395 : vector<128xf32> to vector<128x1xf32>
    %397 = vector.broadcast %396 : vector<128x1xf32> to vector<128x128xf32>
    %398 = arith.subf %394, %397 : vector<128x128xf32>
    %399 = math.exp %398 : vector<128x128xf32>
    %cst_151 = arith.constant dense<0.000000e+00> : vector<128xf32>
    %400 = vector.multi_reduction <add>, %399, %cst_151 [1] : vector<128x128xf32> to vector<128xf32>
    %401 = vector.shape_cast %400 : vector<128xf32> to vector<128x1xf32>
    %402 = tpu.reciprocal %401 {approx = true} : vector<128x1xf32> -> vector<128x1xf32>
    %403 = arith.truncf %399 : vector<128x128xf32> to vector<128x128xbf16>
    %c0_152 = arith.constant 0 : index
    %c96_153 = arith.constant 96 : index
    %404 = vector.load %arg11[%c0_152, %c96_153] : memref<128x128xbf16, #tpu.memory_space<vmem>>, vector<128x32xbf16>
    %cst_154 = arith.constant dense<0.000000e+00> : vector<128x32xf32>
    %405 = tpu.matmul %403, %404, %cst_154 {dimension_numbers = #tpu.dot_dimension_numbers<[1], [0], [0], [1], [0, 0, 1, 1], [], []>} : vector<128x128xbf16>, vector<128x32xbf16>, vector<128x32xf32> -> vector<128x32xf32>
    %406 = vector.broadcast %402 : vector<128x1xf32> to vector<128x32xf32>
    %407 = arith.mulf %405, %406 : vector<128x32xf32>
    %408 = arith.truncf %407 : vector<128x32xf32> to vector<128x32xbf16>
    %c0_155 = arith.constant 0 : index
    %c96_156 = arith.constant 96 : index
    %409 = vector.load %arg12[%c0_155, %c96_156] : memref<128x128xbf16, #tpu.memory_space<vmem>>, vector<128x32xbf16>
    tpu.vector_store %arg12[%c0_155, %c96_156], %408 {strides = array<i32>} : memref<128x128xbf16, #tpu.memory_space<vmem>>, vector<128x32xbf16>,
    %c0_157 = arith.constant 0 : index
    %c0_158 = arith.constant 0 : index
    %410 = vector.load %arg12[%c0_157, %c0_158] : memref<128x128xbf16, #tpu.memory_space<vmem>>, vector<128x128xbf16>
    %c0_159 = arith.constant 0 : index
    %c0_160 = arith.constant 0 : index
    %411 = vector.load %arg6[%c0_159, %c0_160] : memref<128x128xbf16, #tpu.memory_space<vmem>>, vector<128x128xbf16>
    %cst_161 = arith.constant dense<0.000000e+00> : vector<128x128xf32>
    %412 = tpu.matmul %410, %411, %cst_161 {dimension_numbers = #tpu.dot_dimension_numbers<[1], [0], [0], [1], [0, 0, 1, 1], [], []>} : vector<128x128xbf16>, vector<128x128xbf16>, vector<128x128xf32> -> vector<128x128xf32>
    %c0_162 = arith.constant 0 : index
    %c0_163 = arith.constant 0 : index
    %413 = vector.load %arg7[%c0_162, %c0_163] : memref<1x128xf32, #tpu.memory_space<vmem>>, vector<1x128xf32>
    %414 = vector.broadcast %413 : vector<1x128xf32> to vector<128x128xf32>
    %415 = arith.addf %412, %414 : vector<128x128xf32>
    %c0_164 = arith.constant 0 : index
    %c0_165 = arith.constant 0 : index
    %c0_166 = arith.constant 0 : index
    %416 = vector.load %arg8[%c0_164, %c0_165, %c0_166] : memref<1x128x128xf32, #tpu.memory_space<vmem>>, vector<1x128x128xf32>
    %417 = vector.shape_cast %416 : vector<1x128x128xf32> to vector<128x128xf32>
    %418 = vector.shape_cast %415 : vector<128x128xf32> to vector<1x128x128xf32>
    tpu.vector_store %arg8[%c0_164, %c0_165, %c0_166], %418 {strides = array<i32>} : memref<1x128x128xf32, #tpu.memory_space<vmem>>, vector<1x128x128xf32>,
    return
  }
  func.func @transform_0(%arg0: i32) -> (i32, i32, i32) {
    %c0_i32 = arith.constant 0 : i32
    %c0_i32_0 = arith.constant 0 : i32
    %c0_i32_1 = arith.constant 0 : i32
    return %arg0, %c0_i32, %c0_i32_0 : i32, i32, i32
  }
  func.func @transform_1(%arg0: i32) -> (i32, i32) {
    %c0_i32 = arith.constant 0 : i32
    %c0_i32_0 = arith.constant 0 : i32
    %c0_i32_1 = arith.constant 0 : i32
    return %c0_i32, %c0_i32_0 : i32, i32
  }
  func.func @transform_2(%arg0: i32) -> (i32, i32) {
    %c0_i32 = arith.constant 0 : i32
    %c0_i32_0 = arith.constant 0 : i32
    %c0_i32_1 = arith.constant 0 : i32
    return %c0_i32, %c0_i32_0 : i32, i32
  }
  func.func @transform_3(%arg0: i32) -> (i32, i32) {
    %c0_i32 = arith.constant 0 : i32
    %c0_i32_0 = arith.constant 0 : i32
    %c0_i32_1 = arith.constant 0 : i32
    return %c0_i32, %c0_i32_0 : i32, i32
  }
  func.func @transform_4(%arg0: i32) -> (i32, i32) {
    %c0_i32 = arith.constant 0 : i32
    %c0_i32_0 = arith.constant 0 : i32
    %c0_i32_1 = arith.constant 0 : i32
    return %c0_i32, %c0_i32_0 : i32, i32
  }
  func.func @transform_5(%arg0: i32) -> (i32, i32) {
    %c0_i32 = arith.constant 0 : i32
    %c0_i32_0 = arith.constant 0 : i32
    %c0_i32_1 = arith.constant 0 : i32
    return %c0_i32, %c0_i32_0 : i32, i32
  }
  func.func @transform_6(%arg0: i32) -> (i32, i32) {
    %c0_i32 = arith.constant 0 : i32
    %c0_i32_0 = arith.constant 0 : i32
    %c0_i32_1 = arith.constant 0 : i32
    return %c0_i32, %c0_i32_0 : i32, i32
  }
  func.func @transform_7(%arg0: i32) -> (i32, i32, i32) {
    %c0_i32 = arith.constant 0 : i32
    %c0_i32_0 = arith.constant 0 : i32
    %c0_i32_1 = arith.constant 0 : i32
    return %arg0, %c0_i32, %c0_i32_0 : i32, i32, i32
  }
}

</mosaic_0001>

<bundles_post_ra>
// kernel: tpu_custom_call.1
= control target key start
LH: loop header
LB: loop body
LE: loop exit
PB: predicated region body
PF: predicated region fallthrough
CT: control target
= control target key end

     0   :  { %6 = vsyncpa [#allocation3], 0  ;;  %s241_s0 = inlined_call_operand.hbm [shape: f32[128,128], index: 0, kind: input, shape index: {}]   ;;  %s242_s1 = inlined_call_operand.hbm [shape: f32[128,128], index: 1, kind: output, shape index: {}]  }
   0x1   :  { %7 = vsyncpa [#allocation4], 0  ;;  %s199_s6 = smov [#allocation2]  }
   0x2   :  { %s13_s7 = sshll.u32 %s199_s6, 4  ;;  %s14_s7 = int_to_ptr.vmem [resolvable:$true] %s13_s7 }
   0x3   :  { %s163_s8 = scalar_lea.vmem %s14_s7, 2048  ;;  %p168_p1 = scmp.lt.s32.totalorder %s14_s7, %s14_s7 }
   0x4   :  { %p164_p0 = scmp.ne.s32.totalorder %s14_s7, %s163_s8  ;;  %p169_p2 = scmp.lt.s32.totalorder %s163_s8, %s163_s8 }
   0x6   :  { %p170_p3 = por %p169_p2, %p168_p1 }
   0x8   :  { %p171_p4 = pnand %p170_p3, %p164_p0 }
   0xa   :  { %174 = shalt.err (!%p171_p4)
}
   0xb   :  { %s200_s9 = smov 128   ;;  %s201_s10 = smov 8  }
   0xc   :  { %19 = dma.hbm_to_vmem [thread:$0]  %s241_s0, 2048, %s14_s7, [#allocation3], %s200_s9, %s200_s9, %s201_s10  }
   0xd   :  { %195 = dma.done.wait [#allocation3], 2048  }
   0xe   :  { %196 = vsyncadd [#allocation3], 4294965248  ;;  %v25_v0 = vld [vmem:[#allocation2 + $0x10] sm:$0xff]  ;;  %v23_v1 = vld [vmem:[#allocation2] sm:$0xff]  ;;  %s202_s13 = smov 272   ;;  %s203_s14 = smov 256  }
   0xf   :  { %48 = vrot.lane.b32.xlu1 %v25_v0, %s202_s13  ;;  %40 = vrot.lane.b32.xlu0 %v23_v1, %s203_s14  ;;  %v26_v2 = vld [vmem:[#allocation2 + $0x18] sm:$0xff]  ;;  %v24_v3 = vld [vmem:[#allocation2 + $0x8] sm:$0xff]  ;;  %s204_s15 = smov 280   ;;  %s205_s16 = smov 264   ;;  %v27_v5 = vld [vmem:[#allocation2 + $0x20] sm:$0xff] }
  0x10   :  { %v28_v4 = vld [vmem:[#allocation2 + $0x28] sm:$0xff]  ;;  %s206_s17 = smov 296   ;;  %s207_s18 = smov 288   ;;  %v30_v6 = vld [vmem:[#allocation2 + $0x38] sm:$0xff]  ;;  %v29_v7 = vld [vmem:[#allocation2 + $0x30] sm:$0xff] }
  0x11   :  { %s208_s0 = smov 312   ;;  %s209_s19 = smov 304   ;;  %v32_v8 = vld [vmem:[#allocation2 + $0x48] sm:$0xff]  ;;  %v31_v9 = vld [vmem:[#allocation2 + $0x40] sm:$0xff]  ;;  %v34_v10 = vld [vmem:[#allocation2 + $0x58] sm:$0xff] }
  0x12   :  { %s210_s20 = smov 328   ;;  %s211_s21 = smov 320   ;;  %v33_v11 = vld [vmem:[#allocation2 + $0x50] sm:$0xff]  ;;  %v36_v12 = vld [vmem:[#allocation2 + $0x68] sm:$0xff]  ;;  %v35_v13 = vld [vmem:[#allocation2 + $0x60] sm:$0xff] }
  0x13   :  { %52 = vrot.lane.b32.xlu1 %v26_v2, %s204_s15  ;;  %44 = vrot.lane.b32.xlu0 %v24_v3, %s205_s16  ;;  %s212_s22 = smov 344   ;;  %s213_s23 = smov 336   ;;  %v38_v14 = vld [vmem:[#allocation2 + $0x78] sm:$0xff]  ;;  %v37_v15 = vld [vmem:[#allocation2 + $0x70] sm:$0xff] }
  0x14   :  { %s214_s24 = smov 360   ;;  %s215_s25 = smov 352  }
  0x15   :  { %s216_s26 = smov 376   ;;  %s217_s27 = smov 368  }
  0x16   :  { %s218_s28 = smov [#allocation5]  }
  0x17   :  { %60 = vrot.lane.b32.xlu1 %v28_v4, %s206_s17  ;;  %56 = vrot.lane.b32.xlu0 %v27_v5, %s207_s18  ;;  %s123_s29 = sshll.u32 %s218_s28, 4  ;;  %s124_s29 = int_to_ptr.vmem [resolvable:$true] %s123_s29 }
  0x18   :  { %s175_s30 = scalar_lea.vmem %s124_s29, 2048  ;;  %p180_p6 = scmp.lt.s32.totalorder %s124_s29, %s124_s29 }
  0x19   :  { %p176_p5 = scmp.ne.s32.totalorder %s124_s29, %s175_s30  ;;  %p181_p7 = scmp.lt.s32.totalorder %s175_s30, %s175_s30 }
  0x1b   :  { %68 = vrot.lane.b32.xlu1 %v30_v6, %s208_s0  ;;  %64 = vrot.lane.b32.xlu0 %v29_v7, %s209_s19  ;;  %p182_p8 = por %p181_p7, %p180_p6 }
  0x1d   :  { %p183_p9 = pnand %p182_p8, %p176_p5 }
  0x1f   :  { %76 = vrot.lane.b32.xlu1 %v32_v8, %s210_s20  ;;  %72 = vrot.lane.b32.xlu0 %v31_v9, %s211_s21 }
  0x23   :  { %84 = vrot.lane.b32.xlu1 %v34_v10, %s212_s22  ;;  %80 = vrot.lane.b32.xlu0 %v33_v11, %s213_s23 }
  0x27   :  { %92 = vrot.lane.b32.xlu1 %v36_v12, %s214_s24  ;;  %88 = vrot.lane.b32.xlu0 %v35_v13, %s215_s25 }
  0x2b   :  { %100 = vrot.lane.b32.xlu1 %v38_v14, %s216_s26  ;;  %96 = vrot.lane.b32.xlu0 %v37_v15, %s217_s27 }
  0x81   :  { %v49_v16 = vpop.permute.xlu1 %48  ;;  %v41_v17 = vpop.permute.xlu0 %40 }
  0x82   :  { %104 = vst [vmem:[#allocation5 + $0x10] sm:$0xff] %v49_v16  ;;  %102 = vst [vmem:[#allocation5] sm:$0xff] %v41_v17 }
  0x85   :  { %v53_v18 = vpop.permute.xlu1 %52  ;;  %v45_v19 = vpop.permute.xlu0 %44 }
  0x86   :  { %105 = vst [vmem:[#allocation5 + $0x18] sm:$0xff] %v53_v18  ;;  %103 = vst [vmem:[#allocation5 + $0x8] sm:$0xff] %v45_v19 }
  0x89   :  { %v61_v20 = vpop.permute.xlu1 %60  ;;  %v57_v21 = vpop.permute.xlu0 %56 }
  0x8a   :  { %107 = vst [vmem:[#allocation5 + $0x28] sm:$0xff] %v61_v20  ;;  %106 = vst [vmem:[#allocation5 + $0x20] sm:$0xff] %v57_v21 }
  0x8d   :  { %v69_v22 = vpop.permute.xlu1 %68  ;;  %v65_v23 = vpop.permute.xlu0 %64 }
  0x8e   :  { %109 = vst [vmem:[#allocation5 + $0x38] sm:$0xff] %v69_v22  ;;  %108 = vst [vmem:[#allocation5 + $0x30] sm:$0xff] %v65_v23 }
  0x91   :  { %v77_v24 = vpop.permute.xlu1 %76  ;;  %v73_v25 = vpop.permute.xlu0 %72 }
  0x92   :  { %111 = vst [vmem:[#allocation5 + $0x48] sm:$0xff] %v77_v24  ;;  %110 = vst [vmem:[#allocation5 + $0x40] sm:$0xff] %v73_v25 }
  0x95   :  { %v85_v26 = vpop.permute.xlu1 %84  ;;  %v81_v27 = vpop.permute.xlu0 %80 }
  0x96   :  { %113 = vst [vmem:[#allocation5 + $0x58] sm:$0xff] %v85_v26  ;;  %112 = vst [vmem:[#allocation5 + $0x50] sm:$0xff] %v81_v27 }
  0x99   :  { %v93_v28 = vpop.permute.xlu1 %92  ;;  %v89_v29 = vpop.permute.xlu0 %88 }
  0x9a   :  { %115 = vst [vmem:[#allocation5 + $0x68] sm:$0xff] %v93_v28  ;;  %114 = vst [vmem:[#allocation5 + $0x60] sm:$0xff] %v89_v29 }
  0x9d   :  { %v101_v30 = vpop.permute.xlu1 %100  ;;  %v97_v31 = vpop.permute.xlu0 %96 }
  0x9e   :  { %117 = vst [vmem:[#allocation5 + $0x78] sm:$0xff] %v101_v30  ;;  %116 = vst [vmem:[#allocation5 + $0x70] sm:$0xff] %v97_v31 }
  0x9f   :  { %186 = shalt.err (!%p183_p9)
}
  0xa0   :  { %129 = dma.vmem_to_hbm [thread:$0]  %s124_s29, 2048, %s242_s1, [#allocation4], %s200_s9, %s200_s9, %s201_s10  }
  0xa1   :  { %197 = dma.done.wait [#allocation4], 2048  }
  0xa2   :  { %198 = vsyncadd [#allocation4], 4294965248 }
  0xa3   :  { %133 = vsyncpa [#allocation3], 1 }
  0xa4   :  { %134 = vsyncpa [#allocation4], 1 }

// kernel: _rel_pos_mha_impl.1
= control target key start
LH: loop header
LB: loop body
LE: loop exit
PB: predicated region body
PF: predicated region fallthrough
CT: control target
= control target key end

     0   :  { %12 = vsyncpa [#allocation7], 0  ;;  %s15465_s0 = inlined_call_operand.vmem [shape: bf16[2,128,128], index: 0, kind: input, shape index: {}]   ;;  %s15466_s1 = inlined_call_operand.vmem [shape: bf16[128,128], index: 1, kind: input, shape index: {}]   ;;  %s15467_s2 = inlined_call_operand.vmem [shape: bf16[128,128], index: 2, kind: input, shape index: {}]   ;;  %s15468_s3 = inlined_call_operand.vmem [shape: bf16[128,128], index: 3, kind: input, shape index: {}]   ;;  %s15469_s4 = inlined_call_operand.vmem [shape: bf16[128,128], index: 4, kind: input, shape index: {}]   ;;  %s15470_s5 = inlined_call_operand.vmem [shape: bf16[128,128], index: 5, kind: input, shape index: {}]   ;;  %s15471_s6 = inlined_call_operand.vmem [shape: f32[1,128], index: 6, kind: input, shape index: {}]   ;;  %s15472_s7 = inlined_call_operand.hbm [shape: f32[2,128,128], index: 7, kind: output, shape index: {}]  }
   0x1   :  { %14 = vsyncpa [#allocation7 + $0x1], 0  ;;  %s9711_s24 = smov 0   ;;  %s9713_s25 = smov 0  }
   0x2   :  { %s9715_s26 = smov 0   ;;  %s9717_s27 = smov 0  }
   0x3 LB: > { %s9732_s28 = sadd.s32 4294967295, %s9658_s27   ;;  %s7665_s29 = sadd.s32 4294967294, %s9658_s27   ;;  %s9658_s27 = sphi %s9717_s27, %s17243_s27   ;;  %s9654_s26 = sphi %s9715_s26, %s17242_s26   ;;  %s9650_s25 = sphi %s9713_s25, %s17241_s25   ;;  %s9646_s24 = sphi %s9711_s24, %s17240_s24  }
   0x4   : > { %s9736_s30 = sadd.s32 1, %s9658_s27   ;;  %s179_s8 = sadd.s32 1, %s9654_s26 }
   0x5   : > { %s176_s9 = ssub.s32 %s9658_s27, %s9736_s30  ;;  %p189_p0 = scmp.ne.s32.totalorder %s9654_s26, %s9650_s25 }
   0x6   : > { %p177_p1 = scmp.eq.s32.totalorder %s176_s9, 0  ;;  %p190_p2 = scmp.eq.s32.totalorder %s9732_s28, 1 }
   0x7   : > { %p195_p3 = scmp.ne.s32.totalorder %s9650_s25, %s9646_s24  ;;  %p196_p4 = scmp.eq.s32.totalorder %s7665_s29, 1 }
   0x8   : > { %s9747_s10 = scalar_select %p177_p1, %s9654_s26, %s179_s8  }
   0x9   : > { %p9749_p5 = por %p190_p2, %p189_p0  ;;  %p9753_p6 = por %p196_p4, %p195_p3 }
   0xa   : > { %p7668_p7 = scmp.ge.s32.totalorder %s9658_s27, 1  ;;  %p240_p8 = scmp.lt.s32.totalorder %s9658_s27, 3 }
   0xc   : > { %p241_p9 = pnand %p7668_p7, %p240_p8 }
   0xe   : > { %244 = sbr.rel (%p241_p9) target bundleno = 4635 (0x121b), region = 48 }
  0x13   : > { %v9166_v0 = vld [vmem:[%s15466_s1 + $0x38] sm:$0xff]   ;;  %v9168_v2 = vld [vmem:[%s15466_s1 + $0x30] sm:$0xff]   ;;  %p272_p10 = scmp.lt.s32.totalorder %s9732_s28, 1  ;;  %v9170_v4 = vld [vmem:[%s15466_s1 + $0x28] sm:$0xff]   ;;  %vm15488_vm0 = vcmask 261120   ;;  %s9660_s14 = smov 127  }
  0x14   : > { %v9167_v1 = vld [vmem:[%s15467_s2 + $0x38] sm:$0xff]   ;;  %8541 = vmatprep.subr.bf16.mxu0 %v9166_v0  ;;  %v9169_v3 = vld [vmem:[%s15467_s2 + $0x30] sm:$0xff]   ;;  %v9171_v5 = vld [vmem:[%s15467_s2 + $0x28] sm:$0xff]   ;;  %s15888_s19 = smov 96   ;;  %s9662_s29 = smov 126  }
  0x15   : > { %8573 = vmatprep.subr.bf16.mxu1 %v9167_v1  ;;  %8542 = vmatpush3.bf16.msra.mxu0 %v9166_v0  ;;  %s273_s8 = scalar_select %p272_p10, %s9732_s28, 1  ;;  %v9172_v6 = vld [vmem:[%s15466_s1 + $0x20] sm:$0xff]   ;;  %v9174_v8 = vld [vmem:[%s15466_s1 + $0x18] sm:$0xff]   ;;  %v9176_v10 = vld [vmem:[%s15466_s1 + $0x10] sm:$0xff]  }
  0x16   : > { %8574 = vmatpush3.bf16.msra.mxu1 %v9167_v1  ;;  %8543 = vmatprep.subr.bf16.mxu0 %v9168_v2  ;;  %v9173_v7 = vld [vmem:[%s15467_s2 + $0x20] sm:$0xff]   ;;  %v9175_v9 = vld [vmem:[%s15467_s2 + $0x18] sm:$0xff]   ;;  %v9177_v12 = vld [vmem:[%s15467_s2 + $0x10] sm:$0xff]   ;;  %s9663_s21 = smov 124   ;;  %s15890_s22 = smov 112  }
  0x17   : > { %8575 = vmatprep.subr.bf16.mxu1 %v9169_v3  ;;  %s8030_s16 = sshll.u32 %s273_s8, 6  ;;  %v9178_v13 = vld [vmem:[%s15466_s1 + $0x8] sm:$0xff]   ;;  %v9180_v15 = vld [vmem:[%s15466_s1] sm:$0xff]   ;;  %v9191_v17 = vld [vmem:[%s15468_s3 + $0x38] sm:$0xff]   ;;  %s9666_s13 = smov 64  }
  0x18   : > { %s9794_s23 = scalar_lea.vmem %s15465_s0, %s8030_s16  ;;  %v9179_v14 = vld [vmem:[%s15467_s2 + $0x8] sm:$0xff]   ;;  %v9181_v16 = vld [vmem:[%s15467_s2] sm:$0xff]   ;;  %v9190_v18 = vld [vmem:[%s15469_s4 + $0x38] sm:$0xff]   ;;  %s9667_s17 = smov 32  }
  0x19   : > { %8544 = vmatpush3.bf16.msra.mxu0 %v9168_v2  ;;  %v9800_v11 = vld [vmem:[%s9794_s23] sm:$0xff]   ;;  %v9826_v19 = vld [vmem:[%s9794_s23 + $0x8] sm:$0xff]   ;;  %v9829_v20 = vld [vmem:[%s9794_s23 + $0x10] sm:$0xff]   ;;  %v1240_v22 = vsel %vm15488_vm0, %v9190_v18, 0  ;;  %s16720_s15 = smov 112   ;;  %s8143_s8 = sshll.u32 %s9732_s28, 11 }
  0x1a   : > { %8576 = vmatpush3.bf16.msra.mxu1 %v9169_v3  ;;  %8545 = vmatprep.subr.bf16.mxu0 %v9170_v4  ;;  %v9192_v21 = vld [vmem:[%s15469_s4 + $0x30] sm:$0xff]   ;;  %v9195_v24 = vld [vmem:[%s15469_s4 + $0x28] sm:$0xff]   ;;  %v9198_v25 = vld [vmem:[%s15469_s4 + $0x20] sm:$0xff]  }
  0x1b   : > { %8577 = vmatprep.subr.bf16.mxu1 %v9171_v5  ;;  %8557 = vmatprep.mubr.bf16.mxu0 %v9800_v11  ;;  %v9193_v23 = vld [vmem:[%s15468_s3 + $0x30] sm:$0xff]   ;;  %v9185_v26 = vld [vmem:[%s9794_s23 + $0x18] sm:$0xff]   ;;  %v1237_v27 = vsel %vm15488_vm0, %v9192_v21, 0  ;;  %v9194_v28 = vld [vmem:[%s15468_s3 + $0x28] sm:$0xff]   ;;  %v1234_v30 = vsel %vm15488_vm0, %v9195_v24, 0  ;;  %v1231_v31 = vsel %vm15488_vm0, %v9198_v25, 0 }
  0x1c   : > { %8589 = vmatprep.mubr.bf16.mxu1 %v9800_v11  ;;  %v9186_v29 = vld [vmem:[%s9794_s23 + $0x20] sm:$0xff]   ;;  %v9197_v33 = vld [vmem:[%s15468_s3 + $0x18] sm:$0xff]   ;;  %v9187_v34 = vld [vmem:[%s9794_s23 + $0x28] sm:$0xff]  }
  0x1d   : > { %8546 = vmatpush3.bf16.msra.mxu0 %v9170_v4  ;;  %v9196_v32 = vld [vmem:[%s15468_s3 + $0x20] sm:$0xff]   ;;  %v9188_v35 = vld [vmem:[%s9794_s23 + $0x30] sm:$0xff]   ;;  %v9200_v37 = vld [vmem:[%s15468_s3 + $0x8] sm:$0xff]  }
  0x1e   : > { %8578 = vmatpush3.bf16.msra.mxu1 %v9171_v5  ;;  %8547 = vmatprep.subr.bf16.mxu0 %v9172_v6  ;;  %v9199_v36 = vld [vmem:[%s15468_s3 + $0x10] sm:$0xff]   ;;  %v9189_v38 = vld [vmem:[%s9794_s23 + $0x38] sm:$0xff]   ;;  %v9202_v40 = vld [vmem:[%s15468_s3] sm:$0xff]   ;;  %s9664_s23 = smov 120  }
  0x1f   : > { %8579 = vmatprep.subr.bf16.mxu1 %v9173_v7  ;;  %v9201_v39 = vld [vmem:[%s15469_s4 + $0x18] sm:$0xff]   ;;  %v9203_v42 = vld [vmem:[%s15469_s4 + $0x10] sm:$0xff]   ;;  %v9204_v44 = vld [vmem:[%s15469_s4 + $0x8] sm:$0xff]  }
  0x20   : > { %v1228_v41 = vsel %vm15488_vm0, %v9201_v39, 0  ;;  %v1225_v43 = vsel %vm15488_vm0, %v9203_v42, 0  ;;  %v1222_v45 = vsel %vm15488_vm0, %v9204_v44, 0  ;;  %v9205_v46 = vld [vmem:[%s15469_s4] sm:$0xff]  }
  0x21   : > { %8548 = vmatpush3.bf16.msra.mxu0 %v9172_v6  ;;  %v1219_v47 = vsel %vm15488_vm0, %v9205_v46, 0 }
  0x22   : > { %8580 = vmatpush3.bf16.msra.mxu1 %v9173_v7  ;;  %8549 = vmatprep.subr.bf16.mxu0 %v9174_v8 }
  0x23   : > { %8581 = vmatprep.subr.bf16.mxu1 %v9175_v9 }
  0x25   : > { %8550 = vmatpush3.bf16.msra.mxu0 %v9174_v8 }
  0x26   : > { %8582 = vmatpush3.bf16.msra.mxu1 %v9175_v9  ;;  %8551 = vmatprep.subr.bf16.mxu0 %v9176_v10 }
  0x27   : > { %8583 = vmatprep.subr.bf16.mxu1 %v9177_v12 }
  0x29   : > { %8552 = vmatpush3.bf16.msra.mxu0 %v9176_v10 }
  0x2a   : > { %8584 = vmatpush3.bf16.msra.mxu1 %v9177_v12  ;;  %8553 = vmatprep.subr.bf16.mxu0 %v9178_v13 }
  0x2b   : > { %8585 = vmatprep.subr.bf16.mxu1 %v9179_v14 }
  0x2d   : > { %8554 = vmatpush3.bf16.msra.mxu0 %v9178_v13 }
  0x2e   : > { %8586 = vmatpush3.bf16.msra.mxu1 %v9179_v14  ;;  %8555 = vmatprep.subr.bf16.mxu0 %v9180_v15 }
  0x2f   : > { %8587 = vmatprep.subr.bf16.mxu1 %v9181_v16 }
  0x31   : > { %8556 = vmatpush3.bf16.msra.mxu0 %v9180_v15 }
  0x32   : > { %8588 = vmatpush3.bf16.msra.mxu1 %v9181_v16  ;;  %8605 = vmatprep.subr.bf16.mxu0 %v9191_v17 }
  0x33   : > { %9053 = vmatprep.subr.msk.bf16.mxu1 %vm15488_vm0, %v9190_v18 }
  0x34   : > { %8558 = vmatmul.mubr.bf16.vlgmr.msra.gmra.mxu0 %v9826_v19 }
  0x35   : > { %8590 = vmatmul.mubr.bf16.vlgmr.msra.gmra.mxu1 %v9826_v19  ;;  %8561 = vmatprep.mubr.bf16.mxu0 %v9829_v20 }
  0x36   : > { %8593 = vmatprep.mubr.bf16.mxu1 %v9829_v20  ;;  %8638 = vmatpush3.bf16.xpose.msra.mxu1 %v1240_v22 }
  0x37   : > { %8606 = vmatpush3.bf16.msra.mxu0 %v9191_v17  ;;  %9054 = vmatprep.subr.msk.bf16.mxu1 %vm15488_vm0, %v9192_v21 }
  0x38   : > { %8607 = vmatprep.subr.bf16.mxu0 %v9193_v23 }
  0x3b   : > { %8608 = vmatpush3.bf16.msra.mxu0 %v9193_v23 }
  0x3c   : > { %8562 = vmatmul.mubr.bf16.gmra.mxu0 %v9185_v26  ;;  %8609 = vmatprep.subr.bf16.mxu0 %v9194_v28 }
  0x3d   : > { %8594 = vmatmul.mubr.bf16.gmra.mxu1 %v9185_v26  ;;  %8565 = vmatprep.mubr.bf16.mxu0 %v9186_v29 }
  0x3e   : > { %8597 = vmatprep.mubr.bf16.mxu1 %v9186_v29  ;;  %8640 = vmatpush3.bf16.xpose.msra.mxu1 %v1237_v27 }
  0x3f   : > { %8610 = vmatpush3.bf16.msra.mxu0 %v9194_v28  ;;  %9055 = vmatprep.subr.msk.bf16.mxu1 %vm15488_vm0, %v9195_v24 }
  0x40   : > { %8611 = vmatprep.subr.bf16.mxu0 %v9196_v32 }
  0x43   : > { %8612 = vmatpush3.bf16.msra.mxu0 %v9196_v32 }
  0x44   : > { %8566 = vmatmul.mubr.bf16.gmra.mxu0 %v9187_v34  ;;  %8613 = vmatprep.subr.bf16.mxu0 %v9197_v33 }
  0x45   : > { %8598 = vmatmul.mubr.bf16.gmra.mxu1 %v9187_v34  ;;  %8569 = vmatprep.mubr.bf16.mxu0 %v9188_v35 }
  0x46   : > { %8601 = vmatprep.mubr.bf16.mxu1 %v9188_v35  ;;  %8642 = vmatpush3.bf16.xpose.msra.mxu1 %v1234_v30 }
  0x47   : > { %8614 = vmatpush3.bf16.msra.mxu0 %v9197_v33  ;;  %9056 = vmatprep.subr.msk.bf16.mxu1 %vm15488_vm0, %v9198_v25 }
  0x48   : > { %8615 = vmatprep.subr.bf16.mxu0 %v9199_v36 }
  0x4b   : > { %8616 = vmatpush3.bf16.msra.mxu0 %v9199_v36 }
  0x4c   : > { %8570 = vmatmul.mubr.bf16.gmra.mxu0 %v9189_v38  ;;  %8617 = vmatprep.subr.bf16.mxu0 %v9200_v37 }
  0x4d   : > { %8602 = vmatmul.mubr.bf16.gmra.mxu1 %v9189_v38  ;;  %8621 = vmatprep.mubr.bf16.mxu0 %v9800_v11 }
  0x4e   : > { %8644 = vmatpush3.bf16.xpose.msra.mxu1 %v1231_v31 }
  0x4f   : > { %8618 = vmatpush3.bf16.msra.mxu0 %v9200_v37  ;;  %9057 = vmatprep.subr.msk.bf16.mxu1 %vm15488_vm0, %v9201_v39 }
  0x50   : > { %8619 = vmatprep.subr.bf16.mxu0 %v9202_v40 }
  0x53   : > { %8620 = vmatpush3.bf16.msra.mxu0 %v9202_v40 }
  0x56   : > { %8646 = vmatpush3.bf16.xpose.msra.mxu1 %v1228_v41  ;;  %8622 = vmatmul.mubr.bf16.vlgmr.msra.gmra.mxu0 %v9826_v19 }
  0x57   : > { %9058 = vmatprep.subr.msk.bf16.mxu1 %vm15488_vm0, %v9203_v42  ;;  %8625 = vmatprep.mubr.bf16.mxu0 %v9829_v20 }
  0x5e   : > { %8648 = vmatpush3.bf16.xpose.msra.mxu1 %v1225_v43  ;;  %8626 = vmatmul.mubr.bf16.gmra.mxu0 %v9185_v26 }
  0x5f   : > { %8629 = vmatprep.mubr.bf16.mxu0 %v9186_v29  ;;  %9059 = vmatprep.subr.msk.bf16.mxu1 %vm15488_vm0, %v9204_v44 }
  0x66   : > { %8630 = vmatmul.mubr.bf16.gmra.mxu0 %v9187_v34  ;;  %8650 = vmatpush3.bf16.xpose.msra.mxu1 %v1222_v45 }
  0x67   : > { %8633 = vmatprep.mubr.bf16.mxu0 %v9188_v35  ;;  %9060 = vmatprep.subr.msk.bf16.mxu1 %vm15488_vm0, %v9205_v46 }
  0x6e   : > { %8634 = vmatmul.mubr.bf16.gmra.mxu0 %v9189_v38  ;;  %8652 = vmatpush3.bf16.xpose.msra.mxu1 %v1219_v47 }
  0xf4   : > { %v8559_v48 = vpop.f32.mrf.mxu0 }
  0xf5   : > { %v8591_v49 = vpop.f32.mrf.mxu1 }
  0xf6   : > { %v440_v50 = vpop.f32.mrf.mxu0 }
  0xf7   : > { %v681_v51 = vpop.f32.mrf.mxu1 }
  0xf8   : > { %v8560_v52 = vpop.f32.mrf.mxu0 }
  0xf9   : > { %v8152_v53 = vpack.c.bf16 %v8560_v52, %v8559_v48  ;;  %v8592_v54 = vpop.f32.mrf.mxu1 }
  0xfa   : > { %v8192_v55 = vpack.c.bf16 %v8592_v54, %v8591_v49  ;;  %v443_v56 = vpop.f32.mrf.mxu0 }
  0xfb   : > { %8264 = vst [vmem:[#allocation2 + $0x8] sm:$0xff] %v8152_v53   ;;  %v8147_v57 = vpack.c.bf16 %v443_v56, %v440_v50  ;;  %v684_v58 = vpop.f32.mrf.mxu1 }
  0xfc   : > { %8271 = vst [vmem:[#allocation3 + $0x8] sm:$0xff] %v8192_v55   ;;  %v8187_v59 = vpack.c.bf16 %v684_v58, %v681_v51  ;;  %v8563_v60 = vpop.f32.mrf.mxu0 }
  0xfd   : > { %8148 = vst [vmem:[#allocation2] sm:$0xff] %v8147_v57   ;;  %v8595_v61 = vpop.f32.mrf.mxu1 }
  0xfe   : > { %8188 = vst [vmem:[#allocation3] sm:$0xff] %v8187_v59   ;;  %v456_v62 = vpop.f32.mrf.mxu0 }
  0xff   : > { %v697_v63 = vpop.f32.mrf.mxu1 }
 0x100   : > { %v8564_v0 = vpop.f32.mrf.mxu0 }
 0x101   : > { %v8596_v1 = vpop.f32.mrf.mxu1  ;;  %v8162_v2 = vpack.c.bf16 %v8564_v0, %v8563_v60 }
 0x102   : > { %v8202_v3 = vpack.c.bf16 %v8596_v1, %v8595_v61  ;;  %v459_v4 = vpop.f32.mrf.mxu0  ;;  %v9901_v11 = vld [vmem:[#allocation2 + $0x8] sm:$0xff]  }
 0x103   : > { %v700_v5 = vpop.f32.mrf.mxu1  ;;  %8266 = vst [vmem:[#allocation2 + $0x18] sm:$0xff] %v8162_v2   ;;  %v8157_v6 = vpack.c.bf16 %v459_v4, %v456_v62  ;;  %v9220_v52 = vld [vmem:[#allocation3 + $0x8] sm:$0xff]  }
 0x104   : > { %8273 = vst [vmem:[#allocation3 + $0x18] sm:$0xff] %v8202_v3   ;;  %v8197_v7 = vpack.c.bf16 %v700_v5, %v697_v63  ;;  %v9206_v8 = vld [vmem:[#allocation2] sm:$0xff]   ;;  %v8567_v9 = vpop.f32.mrf.mxu0  ;;  %v2296_v53 = vsel %vm15488_vm0, %v9220_v52, 0 }
 0x105   : > { %v8599_v10 = vpop.f32.mrf.mxu1  ;;  %8265 = vst [vmem:[#allocation2 + $0x10] sm:$0xff] %v8157_v6   ;;  %8653 = vmatprep.mubr.msk.bf16.mxu1 %vm15488_vm0, %v9206_v8  ;;  %8685 = vmatprep.mubr.msk.bf16.mxu0 %vm15488_vm0, %v9206_v8  ;;  %v9221_v54 = vld [vmem:[#allocation3] sm:$0xff]  }
 0x106   : > { %8272 = vst [vmem:[#allocation3 + $0x10] sm:$0xff] %v8197_v7   ;;  %v472_v12 = vpop.f32.mrf.mxu0  ;;  %8654 = vmatmul.mubr.msk.bf16.vlgmr.msra.gmra.mxu1 %vm15488_vm0, %v9901_v11  ;;  %v2293_v55 = vsel %vm15488_vm0, %v9221_v54, 0 }
 0x107   : > { %v713_v13 = vpop.f32.mrf.mxu1 }
 0x108   : > { %v8568_v14 = vpop.f32.mrf.mxu0 }
 0x109   : > { %v8600_v15 = vpop.f32.mrf.mxu1  ;;  %v8172_v16 = vpack.c.bf16 %v8568_v14, %v8567_v9 }
 0x10a   : > { %v8212_v17 = vpack.c.bf16 %v8600_v15, %v8599_v10  ;;  %v475_v18 = vpop.f32.mrf.mxu0  ;;  %v9907_v21 = vld [vmem:[#allocation2 + $0x18] sm:$0xff]  }
 0x10b   : > { %v716_v19 = vpop.f32.mrf.mxu1  ;;  %8268 = vst [vmem:[#allocation2 + $0x28] sm:$0xff] %v8172_v16   ;;  %v8167_v20 = vpack.c.bf16 %v475_v18, %v472_v12  ;;  %v9218_v48 = vld [vmem:[#allocation3 + $0x18] sm:$0xff]  }
 0x10c   : > { %8275 = vst [vmem:[#allocation3 + $0x28] sm:$0xff] %v8212_v17   ;;  %v8207_v22 = vpack.c.bf16 %v716_v19, %v713_v13  ;;  %v8571_v23 = vpop.f32.mrf.mxu0  ;;  %v9208_v24 = vld [vmem:[#allocation2 + $0x10] sm:$0xff]   ;;  %v2302_v49 = vsel %vm15488_vm0, %v9218_v48, 0 }
 0x10d   : > { %v8603_v25 = vpop.f32.mrf.mxu1  ;;  %8267 = vst [vmem:[#allocation2 + $0x20] sm:$0xff] %v8167_v20   ;;  %8657 = vmatprep.mubr.msk.bf16.mxu1 %vm15488_vm0, %v9208_v24  ;;  %v9219_v50 = vld [vmem:[#allocation3 + $0x10] sm:$0xff]  }
 0x10e   : > { %8274 = vst [vmem:[#allocation3 + $0x20] sm:$0xff] %v8207_v22   ;;  %v488_v26 = vpop.f32.mrf.mxu0  ;;  %8658 = vmatmul.mubr.msk.bf16.gmra.mxu1 %vm15488_vm0, %v9907_v21  ;;  %v2299_v51 = vsel %vm15488_vm0, %v9219_v50, 0  ;;  %v9222_v19 = vld [vmem:[%s15469_s4 + $0x30] sm:$0xff]  }
 0x10f   : > { %v729_v27 = vpop.f32.mrf.mxu1 }
 0x110   : > { %v8572_v28 = vpop.f32.mrf.mxu0 }
 0x111   : > { %v8604_v29 = vpop.f32.mrf.mxu1  ;;  %v8182_v30 = vpack.c.bf16 %v8572_v28, %v8571_v23  ;;  %v9224_v23 = vld [vmem:[%s15469_s4 + $0x20] sm:$0xff]  }
 0x112   : > { %v8222_v31 = vpack.c.bf16 %v8604_v29, %v8603_v25  ;;  %v491_v32 = vpop.f32.mrf.mxu0  ;;  %v9211_v35 = vld [vmem:[#allocation2 + $0x28] sm:$0xff]  }
 0x113   : > { %8270 = vst [vmem:[#allocation2 + $0x38] sm:$0xff] %v8182_v30   ;;  %v8177_v33 = vpack.c.bf16 %v491_v32, %v488_v26  ;;  %v732_v34 = vpop.f32.mrf.mxu1  ;;  %v9216_v44 = vld [vmem:[#allocation3 + $0x28] sm:$0xff]  }
 0x114   : > { %8277 = vst [vmem:[#allocation3 + $0x38] sm:$0xff] %v8222_v31   ;;  %v8217_v36 = vpack.c.bf16 %v732_v34, %v729_v27  ;;  %v9210_v37 = vld [vmem:[#allocation2 + $0x20] sm:$0xff]   ;;  %v2308_v45 = vsel %vm15488_vm0, %v9216_v44, 0  ;;  %v9225_v25 = vld [vmem:[%s15469_s4 + $0x28] sm:$0xff]  }
 0x115   : > { %8269 = vst [vmem:[#allocation2 + $0x30] sm:$0xff] %v8177_v33   ;;  %8661 = vmatprep.mubr.msk.bf16.mxu1 %vm15488_vm0, %v9210_v37  ;;  %v9217_v46 = vld [vmem:[#allocation3 + $0x20] sm:$0xff]  }
 0x116   : > { %8276 = vst [vmem:[#allocation3 + $0x30] sm:$0xff] %v8217_v36   ;;  %8662 = vmatmul.mubr.msk.bf16.gmra.mxu1 %vm15488_vm0, %v9211_v35  ;;  %v2305_v47 = vsel %vm15488_vm0, %v9217_v46, 0  ;;  %v8623_v56 = vpop.f32.mrf.mxu0  ;;  %v15473_v36 = vlaneseq }
 0x118   : > { %v922_v57 = vpop.f32.mrf.mxu0 }
 0x11a   : > { %v9215_v38 = vld [vmem:[#allocation2 + $0x38] sm:$0xff]   ;;  %v8624_v58 = vpop.f32.mrf.mxu0 }
 0x11b   : > { %v9212_v39 = vld [vmem:[#allocation3 + $0x38] sm:$0xff]   ;;  %v8232_v59 = vpack.c.bf16 %v8624_v58, %v8623_v56 }
 0x11c   : > { %v9213_v40 = vld [vmem:[#allocation2 + $0x30] sm:$0xff]   ;;  %9061 = vmatprep.subr.msk.bf16.mxu0 %vm15488_vm0, %v9212_v39  ;;  %v2314_v41 = vsel %vm15488_vm0, %v9212_v39, 0  ;;  %v925_v60 = vpop.f32.mrf.mxu0 }
 0x11d   : > { %v9214_v42 = vld [vmem:[#allocation3 + $0x30] sm:$0xff]   ;;  %8670 = vmatpush3.bf16.xpose.msra.mxu0 %v2314_v41  ;;  %8665 = vmatprep.mubr.msk.bf16.mxu1 %vm15488_vm0, %v9213_v40  ;;  %8278 = vst [vmem:[#allocation4 + $0x8] sm:$0xff] %v8232_v59   ;;  %v8227_v61 = vpack.c.bf16 %v925_v60, %v922_v57 }
 0x11e   : > { %9062 = vmatprep.subr.msk.bf16.mxu0 %vm15488_vm0, %v9214_v42  ;;  %8666 = vmatmul.mubr.msk.bf16.gmra.mxu1 %vm15488_vm0, %v9215_v38  ;;  %v2311_v43 = vsel %vm15488_vm0, %v9214_v42, 0  ;;  %v8627_v62 = vpop.f32.mrf.mxu0  ;;  %v9226_v60 = vld [vmem:[%s15469_s4 + $0x10] sm:$0xff]  }
 0x11f   : > { %8228 = vst [vmem:[#allocation4] sm:$0xff] %v8227_v61   ;;  %v15959_v61 = vmov 0 }
 0x120   : > { %v938_v63 = vpop.f32.mrf.mxu0 }
 0x122   : > { %v8628_v0 = vpop.f32.mrf.mxu0 }
 0x123   : > { %v8242_v1 = vpack.c.bf16 %v8628_v0, %v8627_v62 }
 0x124   : > { %v941_v2 = vpop.f32.mrf.mxu0 }
 0x125   : > { %8672 = vmatpush3.bf16.xpose.msra.mxu0 %v2311_v43  ;;  %8280 = vst [vmem:[#allocation4 + $0x18] sm:$0xff] %v8242_v1   ;;  %v8237_v3 = vpack.c.bf16 %v941_v2, %v938_v63 }
 0x126   : > { %9063 = vmatprep.subr.msk.bf16.mxu0 %vm15488_vm0, %v9216_v44  ;;  %v8631_v4 = vpop.f32.mrf.mxu0 }
 0x127   : > { %8279 = vst [vmem:[#allocation4 + $0x10] sm:$0xff] %v8237_v3   ;;  %v9227_v3 = vld [vmem:[%s15469_s4] sm:$0xff]  }
 0x128   : > { %v954_v5 = vpop.f32.mrf.mxu0 }
 0x12a   : > { %v8632_v6 = vpop.f32.mrf.mxu0 }
 0x12b   : > { %v8252_v7 = vpack.c.bf16 %v8632_v6, %v8631_v4  ;;  %v9228_v4 = vld [vmem:[%s15469_s4 + $0x18] sm:$0xff]  }
 0x12c   : > { %v957_v8 = vpop.f32.mrf.mxu0 }
 0x12d   : > { %8674 = vmatpush3.bf16.xpose.msra.mxu0 %v2308_v45  ;;  %8282 = vst [vmem:[#allocation4 + $0x28] sm:$0xff] %v8252_v7   ;;  %v8247_v9 = vpack.c.bf16 %v957_v8, %v954_v5 }
 0x12e   : > { %9064 = vmatprep.subr.msk.bf16.mxu0 %vm15488_vm0, %v9217_v46  ;;  %v8635_v10 = vpop.f32.mrf.mxu0  ;;  %v15950_v46 = vmov 0 }
 0x12f   : > { %8281 = vst [vmem:[#allocation4 + $0x20] sm:$0xff] %v8247_v9  }
 0x135   : > { %8676 = vmatpush3.bf16.xpose.msra.mxu0 %v2305_v47 }
 0x136   : > { %9065 = vmatprep.subr.msk.bf16.mxu0 %vm15488_vm0, %v9218_v48 }
 0x13d   : > { %8678 = vmatpush3.bf16.xpose.msra.mxu0 %v2302_v49 }
 0x13e   : > { %9066 = vmatprep.subr.msk.bf16.mxu0 %vm15488_vm0, %v9219_v50 }
 0x145   : > { %8680 = vmatpush3.bf16.xpose.msra.mxu0 %v2299_v51 }
 0x146   : > { %9067 = vmatprep.subr.msk.bf16.mxu0 %vm15488_vm0, %v9220_v52 }
 0x14d   : > { %8682 = vmatpush3.bf16.xpose.msra.mxu0 %v2296_v53  ;;  %v15953_v53 = vmov 0 }
 0x14e   : > { %9068 = vmatprep.subr.msk.bf16.mxu0 %vm15488_vm0, %v9221_v54  ;;  %v15956_v54 = vmov 0 }
 0x155   : > { %8684 = vmatpush3.bf16.xpose.msra.mxu0 %v2293_v55 }
 0x15c   : > { %8686 = vmatmul.mubr.msk.bf16.vlgmr.msra.gmra.mxu0 %vm15488_vm0, %v9901_v11  ;;  %v970_v11 = vpop.f32.mrf.mxu0 }
 0x15d   : > { %8689 = vmatprep.mubr.msk.bf16.mxu0 %vm15488_vm0, %v9208_v24 }
 0x15e   : > { %v8636_v12 = vpop.f32.mrf.mxu0 }
 0x15f   : > { %v8262_v13 = vpack.c.bf16 %v8636_v12, %v8635_v10 }
 0x160   : > { %v973_v14 = vpop.f32.mrf.mxu0 }
 0x161   : > { %8284 = vst [vmem:[#allocation4 + $0x38] sm:$0xff] %v8262_v13   ;;  %v8257_v15 = vpack.c.bf16 %v973_v14, %v970_v11  ;;  %v9230_v11 = vld [vmem:[%s15469_s4 + $0x8] sm:$0xff]  }
 0x163   : > { %8283 = vst [vmem:[#allocation4 + $0x30] sm:$0xff] %v8257_v15  }
 0x164   : > { %8690 = vmatmul.mubr.msk.bf16.gmra.mxu0 %vm15488_vm0, %v9907_v21  ;;  %v9223_v21 = vld [vmem:[%s15469_s4 + $0x38] sm:$0xff]  }
 0x165   : > { %8693 = vmatprep.mubr.msk.bf16.mxu0 %vm15488_vm0, %v9210_v37  ;;  %v10013_v37 = vshrl.u32 %v15473_v36, 7 }
 0x167   : > { %15946 = vst [vmem:[#allocation9_spill] sm:$0xff] %v10013_v37  ;;  %v10019_v39 = vadd.s32 24, %v10013_v37  ;;  %v10032_v44 = vadd.s32 16, %v10013_v37  ;;  %v10078_v62 = vadd.s32 48, %v10013_v37  ;;  %v10102_v6 = vadd.s32 40, %v10013_v37 }
 0x168   : > { %v10105_v7 = vadd.s32 32, %v10013_v37  ;;  %v10108_v9 = vadd.s32 56, %v10013_v37  ;;  %v10124_v15 = vadd.s32 88, %v10013_v37 }
 0x169   : > { %15947 = vst [vmem:[#allocation10_spill] sm:$0xff] %v10019_v39  ;;  %v10026_v42 = vsub.s32 127, %v10019_v39  ;;  %15949 = vst [vmem:[#allocation12_spill] sm:$0xff] %v10032_v44  ;;  %v10041_v49 = vsub.s32 127, %v10032_v44  ;;  %v10099_v5 = vsub.s32 127, %v10078_v62  ;;  %v10118_v13 = vsub.s32 127, %v10102_v6 }
 0x16a   : > { %15962 = vst [vmem:[#allocation17_spill] sm:$0xff] %v10078_v62  ;;  %15963 = vst [vmem:[#allocation18_spill] sm:$0xff] %v10102_v6  ;;  %v10121_v14 = vsub.s32 127, %v10105_v7  ;;  %v9233_v62 = vld [vmem:[#allocation2 + $0x28] sm:$0xff]   ;;  %v9239_v44 = vld [vmem:[#allocation4 + $0x30] sm:$0xff]  }
 0x16b   : > { %v1439_v47 = vand.u32 1, %v10026_v42  ;;  %v1438_v55 = vand.u32 1, %v10041_v49  ;;  %15964 = vst [vmem:[#allocation19_spill] sm:$0xff] %v10105_v7  ;;  %15965 = vst [vmem:[#allocation20_spill] sm:$0xff] %v10108_v9  ;;  %v1442_v12 = vand.u32 1, %v10099_v5 }
 0x16c   : > { %8694 = vmatmul.mubr.msk.bf16.gmra.mxu0 %vm15488_vm0, %v9211_v35  ;;  %15966 = vst [vmem:[#allocation21_spill] sm:$0xff] %v10124_v15 }
 0x16d   : > { %8697 = vmatprep.mubr.msk.bf16.mxu0 %vm15488_vm0, %v9213_v40  ;;  %v10022_v40 = vadd.s32 8, %v10013_v37  ;;  %vm10049_vm2 = vcmp.eq.s32.totalorder %v1439_v47, 1  ;;  %vm10073_vm4 = vcmp.eq.s32.totalorder %v1438_v55, 1  ;;  %vm10138_vm5 = vcmp.eq.s32.totalorder %v1442_v12, 1 }
 0x16e   : > { %v15954_v53 = vsel %vm10049_vm2, 4294967295, %v15953_v53  ;;  %v15960_v61 = vsel %vm10073_vm4, 4294967295, %v15959_v61  ;;  %v10145_v47 = vsub.s32 127, %v10124_v15 }
 0x16f   : > { %15948 = vst [vmem:[#allocation11_spill] sm:$0xff] %v10022_v40  ;;  %v10029_v43 = vsub.s32 127, %v10022_v40  ;;  %15955 = vst [vmem:[#allocation14_spill] sm:$0xff] %v15954_v53  ;;  %v9237_v40 = vld [vmem:[#allocation2 + $0x30] sm:$0xff]  }
 0x170   : > { %15961 = vst [vmem:[#allocation16_spill] sm:$0xff] %v15960_v61 }
 0x171   : > { %v1437_v48 = vand.u32 1, %v10029_v43 }
 0x173   : > { %vm10053_vm3 = vcmp.eq.s32.totalorder %v1437_v48, 1 }
 0x174   : > { %8698 = vmatmul.mubr.msk.bf16.gmra.mxu0 %vm15488_vm0, %v9215_v38  ;;  %v10016_v38 = vsub.s32 127, %v10013_v37  ;;  %v15957_v54 = vsel %vm10053_vm3, 4294967295, %v15956_v54 }
 0x175   : > { %15958 = vst [vmem:[#allocation15_spill] sm:$0xff] %v15957_v54 }
 0x176   : > { %v1436_v41 = vand.u32 1, %v10016_v38 }
 0x178   : > { %vm10034_vm1 = vcmp.eq.s32.totalorder %v1436_v41, 1  ;;  %v1441_v41 = vand.u32 1, %v10118_v13 }
 0x179   : > { %v15951_v46 = vsel %vm10034_vm1, 4294967295, %v15950_v46 }
 0x17a   : > { %15952 = vst [vmem:[#allocation13_spill] sm:$0xff] %v15951_v46  ;;  %vm10166_vm6 = vcmp.eq.s32.totalorder %v1441_v41, 1 }
 0x1c6   : > { %v9941_v16 = vpop.f32.mrf.mxu1 }
 0x1c7   : > { %1392 = vrot.lane.b32.xlu1 %v9941_v16, %s9660_s14 }
 0x1c8   : > { %v1276_v17 = vpop.f32.mrf.mxu1 }
 0x1c9   : > { %1388 = vrot.lane.b32.xlu0 %v1276_v17, %s9660_s14 }
 0x1ca   : > { %v8656_v18 = vpop.f32.mrf.mxu1 }
 0x1cb   : > { %1394 = vrot.lane.b32.xlu1 %v8656_v18, %s9660_s14 }
 0x1cc   : > { %v1279_v20 = vpop.f32.mrf.mxu1 }
 0x1cd   : > { %1390 = vrot.lane.b32.xlu0 %v1279_v20, %s9660_s14 }
 0x1ce   : > { %v9954_v22 = vpop.f32.mrf.mxu1 }
 0x1cf   : > { %2997 = vrot.lane.b32.xlu1 %v9222_v19, %s15888_s19  ;;  %v10130_v19 = vadd.s32 80, %v10013_v37 }
 0x1d0   : > { %v9960_v24 = vpop.f32.mrf.mxu1 }
 0x1d1   : > { %2999 = vrot.lane.b32.xlu0 %v9223_v21, %s15888_s19  ;;  %15967 = vst [vmem:[#allocation22_spill] sm:$0xff] %v10130_v19  ;;  %v10134_v21 = vadd.s32 72, %v10013_v37  ;;  %v10149_v55 = vsub.s32 127, %v10130_v19 }
 0x1d2   : > { %v9966_v26 = vpop.f32.mrf.mxu1 }
 0x1d3   : > { %2993 = vrot.lane.b32.xlu1 %v9224_v23, %s15888_s19  ;;  %15968 = vst [vmem:[#allocation23_spill] sm:$0xff] %v10134_v21  ;;  %v1446_v12 = vand.u32 1, %v10149_v55 }
 0x1d4   : > { %v9969_v27 = vpop.f32.mrf.mxu1 }
 0x1d5   : > { %2995 = vrot.lane.b32.xlu0 %v9225_v25, %s15888_s19  ;;  %v15969_v25 = vmov 0  ;;  %vm10215_vm10 = vcmp.eq.s32.totalorder %v1446_v12, 1 }
 0x1d6   : > { %v9972_v28 = vpop.f32.mrf.mxu1  ;;  %v15970_v25 = vsel %vm10138_vm5, 4294967295, %v15969_v25 }
 0x1d7   : > { %1400 = vrot.lane.b32.xlu1 %v9954_v22, %s9660_s14  ;;  %15971 = vst [vmem:[#allocation24_spill] sm:$0xff] %v15970_v25 }
 0x1d8   : > { %v9976_v29 = vpop.f32.mrf.mxu1 }
 0x1d9   : > { %1402 = vrot.lane.b32.xlu0 %v9966_v26, %s9660_s14 }
 0x1da   : > { %v9980_v30 = vpop.f32.mrf.mxu1 }
 0x1db   : > { %1396 = vrot.lane.b32.xlu1 %v9960_v24, %s9660_s14 }
 0x1dc   : > { %v9984_v31 = vpop.f32.mrf.mxu1 }
 0x1dd   : > { %1398 = vrot.lane.b32.xlu0 %v9969_v27, %s9660_s14 }
 0x1de   : > { %v9988_v32 = vpop.f32.mrf.mxu1 }
 0x1df   : > { %1410 = vrot.lane.b32.xlu1 %v9980_v30, %s9660_s14 }
 0x1e0   : > { %v9994_v33 = vpop.f32.mrf.mxu1 }
 0x1e1   : > { %1408 = vrot.lane.b32.xlu0 %v9972_v28, %s9660_s14 }
 0x1e2   : > { %v10000_v34 = vpop.f32.mrf.mxu1 }
 0x1e3   : > { %1406 = vrot.lane.b32.xlu1 %v9984_v31, %s9660_s14 }
 0x1e4   : > { %v10006_v35 = vpop.f32.mrf.mxu1 }
 0x1e5   : > { %1404 = vrot.lane.b32.xlu0 %v9976_v29, %s9660_s14 }
 0x1e7   : > { %1416 = vrot.lane.b32.xlu1 %v9988_v32, %s9660_s14 }
 0x1e9   : > { %1418 = vrot.lane.b32.xlu0 %v10000_v34, %s9660_s14 }
 0x1eb   : > { %1412 = vrot.lane.b32.xlu1 %v9994_v33, %s9660_s14 }
 0x1ed   : > { %1414 = vrot.lane.b32.xlu0 %v10006_v35, %s9660_s14 }
 0x239   : > { %v1393_v45 = vpop.permute.xlu1 %1392 }
 0x23a   : > { %v10083_v0 = vsel %vm10073_vm4, %v1393_v45, %v9941_v16  ;;  %v1440_v45 = vand.u32 1, %v10121_v14 }
 0x23b   : > { %v1389_v50 = vpop.permute.xlu0 %1388 }
 0x23c   : > { %v10045_v51 = vsel %vm10034_vm1, %v1389_v50, %v1276_v17  ;;  %v9229_v17 = vld [vmem:[#allocation2 + $0x8] sm:$0xff]   ;;  %v9231_v50 = vld [vmem:[#allocation2] sm:$0xff]   ;;  %vm10170_vm7 = vcmp.eq.s32.totalorder %v1440_v45, 1 }
 0x23d   : > { %v1395_v52 = vpop.permute.xlu1 %1394  ;;  %1500 = vrot.lane.b32.xlu1 %v10045_v51, %s9662_s29 }
 0x23e   : > { %v10060_v57 = vsel %vm10049_vm2, %v1395_v52, %v8656_v18  ;;  %v10127_v18 = vsub.s32 127, %v10108_v9 }
 0x23f   : > { %v1391_v56 = vpop.permute.xlu0 %1390 }
 0x240   : > { %v10064_v58 = vsel %vm10053_vm3, %v1391_v56, %v1279_v20  ;;  %v1443_v52 = vand.u32 1, %v10127_v18 }
 0x241   : > { %v2998_v59 = vpop.permute.xlu1 %2997  ;;  %1506 = vrot.lane.b32.xlu1 %v10060_v57, %s9662_s29  ;;  %1502 = vrot.lane.b32.xlu0 %v10064_v58, %s9662_s29 }
 0x242   : > { %v3044_v20 = vsel %vm15488_vm0, %v2998_v59, 0  ;;  %vm10178_vm8 = vcmp.eq.s32.totalorder %v1443_v52, 1  ;;  %v15988_v52 = vmov 0 }
 0x243   : > { %v3000_v63 = vpop.permute.xlu0 %2999  ;;  %v15989_v52 = vsel %vm10215_vm10, 4294967295, %v15988_v52 }
 0x244   : > { %9069 = vmatprep.subr.msk.bf16.mxu0 %vm15488_vm0, %v3000_v63  ;;  %v3047_v1 = vsel %vm15488_vm0, %v3000_v63, 0  ;;  %v15973_v63 = vmov 0  ;;  %15990 = vst [vmem:[#allocation33_spill] sm:$0xff] %v15989_v52 }
 0x245   : > { %v10087_v2 = vpop.permute.xlu1 %2993  ;;  %2989 = vrot.lane.b32.xlu1 %v9226_v60, %s15888_s19  ;;  %1504 = vrot.lane.b32.xlu0 %v10083_v0, %s9662_s29  ;;  %v10161_v60 = vadd.s32 64, %v10013_v37  ;;  %v15974_v63 = vsel %vm10166_vm6, 4294967295, %v15973_v63 }
 0x246   : > { %8734 = vmatpush3.bf16.xpose.msra.mxu0 %v3047_v1  ;;  %15975 = vst [vmem:[#allocation26_spill] sm:$0xff] %v15974_v63  ;;  %v15976_v1 = vmov 0 }
 0x247   : > { %v2996_v8 = vpop.permute.xlu0 %2995  ;;  %9070 = vmatprep.subr.msk.bf16.mxu0 %vm15488_vm0, %v2998_v59  ;;  %v10158_v59 = vsub.s32 127, %v10134_v21  ;;  %15972 = vst [vmem:[#allocation25_spill] sm:$0xff] %v10161_v60  ;;  %v15977_v1 = vsel %vm10170_vm7, 4294967295, %v15976_v1 }
 0x248   : > { %15978 = vst [vmem:[#allocation27_spill] sm:$0xff] %v15977_v1 }
 0x249   : > { %v1401_v10 = vpop.permute.xlu1 %1400  ;;  %2985 = vrot.lane.b32.xlu1 %v9227_v3, %s15888_s19  ;;  %2991 = vrot.lane.b32.xlu0 %v9228_v4, %s15888_s19  ;;  %v10176_v3 = vadd.s32 120, %v10013_v37  ;;  %v1445_v45 = vand.u32 1, %v10158_v59 }
 0x24a   : > { %v10155_v56 = vsel %vm10138_vm5, %v1401_v10, %v9954_v22  ;;  %v1447_v22 = vand.u32 1, %v10145_v47 }
 0x24b   : > { %v1403_v16 = vpop.permute.xlu0 %1402  ;;  %15979 = vst [vmem:[#allocation28_spill] sm:$0xff] %v10176_v3  ;;  %vm10231_vm11 = vcmp.eq.s32.totalorder %v1445_v45, 1 }
 0x24c   : > { %vm10202_vm9 = vcmp.eq.s32.totalorder %v1447_v22, 1  ;;  %v10229_v36 = vsel %vm10178_vm8, %v1403_v16, %v9966_v26  ;;  %v10248_v16 = vadd.s32 96, %v10013_v37 }
 0x24d   : > { %v1397_v23 = vpop.permute.xlu1 %1396  ;;  %2931 = vrot.lane.b32.xlu1 %v9229_v17, %s15888_s19  ;;  %2987 = vrot.lane.b32.xlu0 %v9230_v11, %s15888_s19  ;;  %v15980_v11 = vmov 0  ;;  %v3041_v17 = vsel %vm15488_vm0, %v2996_v8, 0 }
 0x24e   : > { %8736 = vmatpush3.bf16.xpose.msra.mxu0 %v3044_v20  ;;  %v15981_v11 = vsel %vm10178_vm8, 4294967295, %v15980_v11  ;;  %v10192_v41 = vsel %vm10170_vm7, %v1397_v23, %v9960_v24  ;;  %v10210_v24 = vadd.s32 112, %v10013_v37  ;;  %v10213_v23 = vadd.s32 104, %v10013_v37  ;;  %15994 = vst [vmem:[#allocation35_spill] sm:$0xff] %v10248_v16  ;;  %v9234_v37 = vld [vmem:[#allocation2 + $0x10] sm:$0xff]  }
 0x24f   : > { %v1399_v48 = vpop.permute.xlu0 %1398  ;;  %9071 = vmatprep.subr.msk.bf16.mxu0 %vm15488_vm0, %v2996_v8  ;;  %15982 = vst [vmem:[#allocation29_spill] sm:$0xff] %v15981_v11  ;;  %v15983_v8 = vmov 0 }
 0x250   : > { %v10187_v20 = vsel %vm10166_vm6, %v1399_v48, %v9969_v27  ;;  %v15984_v8 = vsel %vm10202_vm9, 4294967295, %v15983_v8  ;;  %v10207_v27 = vsub.s32 127, %v10176_v3  ;;  %15986 = vst [vmem:[#allocation31_spill] sm:$0xff] %v10210_v24  ;;  %15987 = vst [vmem:[#allocation32_spill] sm:$0xff] %v10213_v23  ;;  %v10245_v26 = vsub.s32 127, %v10213_v23 }
 0x251   : > { %1512 = vrot.lane.b32.xlu1 %v10155_v56, %s9662_s29  ;;  %2929 = vrot.lane.b32.xlu0 %v9231_v50, %s15888_s19  ;;  %v1411_v4 = vpop.permute.xlu1 %1410  ;;  %v10196_v50 = vsub.s32 127, %v10161_v60  ;;  %15985 = vst [vmem:[#allocation30_spill] sm:$0xff] %v15984_v8  ;;  %v3038_v3 = vsel %vm15488_vm0, %v10087_v2, 0  ;;  %v15995_v23 = vmov 0 }
 0x252   : > { %v10224_v22 = vsel %vm10202_vm9, %v1411_v4, %v9980_v30  ;;  %v1451_v30 = vand.u32 1, %v10207_v27  ;;  %v10242_v4 = vsub.s32 127, %v10210_v24 }
 0x253   : > { %v1409_v10 = vpop.permute.xlu0 %1408  ;;  %v1444_v12 = vand.u32 1, %v10196_v50 }
 0x254   : > { %v10260_v24 = vsel %vm10215_vm10, %v1409_v10, %v9972_v28  ;;  %vm10270_vm13 = vcmp.eq.s32.totalorder %v1451_v30, 1  ;;  %v10277_v28 = vsub.s32 127, %v10248_v16  ;;  %v16004_v16 = vmov 0 }
 0x255   : > { %1510 = vrot.lane.b32.xlu1 %v10187_v20, %s9662_s29  ;;  %1508 = vrot.lane.b32.xlu0 %v10192_v41, %s9662_s29  ;;  %v1407_v21 = vpop.permute.xlu1 %1406  ;;  %vm10262_vm12 = vcmp.eq.s32.totalorder %v1444_v12, 1  ;;  %vm16014_vm10 = vcmask 261120  }
 0x256   : > { %8738 = vmatpush3.bf16.xpose.msra.mxu0 %v3041_v17  ;;  %v15991_v17 = vmov 0  ;;  %v10255_v15 = vsel %vm10231_vm11, %v1407_v21, %v9984_v31  ;;  %v15996_v23 = vsel %vm10262_vm12, 4294967295, %v15995_v23  ;;  %v1450_v31 = vand.u32 1, %v10242_v4 }
 0x257   : > { %v1405_v48 = vpop.permute.xlu0 %1404  ;;  %9072 = vmatprep.subr.msk.bf16.mxu0 %vm15488_vm0, %v10087_v2  ;;  %v15992_v17 = vsel %vm10231_vm11, 4294967295, %v15991_v17  ;;  %15997 = vst [vmem:[#allocation36_spill] sm:$0xff] %v15996_v23  ;;  %v15998_v2 = vmov 0  ;;  %v1449_v21 = vand.u32 1, %v10245_v26 }
 0x258   : > { %15993 = vst [vmem:[#allocation34_spill] sm:$0xff] %v15992_v17  ;;  %v15999_v2 = vsel %vm10270_vm13, 4294967295, %v15998_v2  ;;  %v10287_v30 = vsel %vm10262_vm12, %v1405_v48, %v9976_v29  ;;  %vm10293_vm14 = vcmp.eq.s32.totalorder %v1450_v31, 1  ;;  %v16007_v31 = vmov 0 }
 0x259   : > { %1522 = vrot.lane.b32.xlu1 %v10224_v22, %s9662_s29  ;;  %1514 = vrot.lane.b32.xlu0 %v10229_v36, %s9662_s29  ;;  %16000 = vst [vmem:[#allocation37_spill] sm:$0xff] %v15999_v2  ;;  %v1417_v10 = vpop.permute.xlu1 %1416  ;;  %vm10297_vm15 = vcmp.eq.s32.totalorder %v1449_v21, 1  ;;  %v1551_v21 = vshra.s32 %v10026_v42, 1 }
 0x25a   : > { %v16005_v16 = vsel %vm10297_vm15, 4294967295, %v16004_v16  ;;  %v10305_v29 = vsel %vm10293_vm14, %v1417_v10, %v9988_v32  ;;  %v1550_v10 = vshra.s32 %v10041_v49, 1 }
 0x25b   : > { %v1419_v45 = vpop.permute.xlu0 %1418  ;;  %16006 = vst [vmem:[#allocation39_spill] sm:$0xff] %v16005_v16  ;;  %v10333_v6 = vand.u32 1, %v1551_v21 }
 0x25c   : > { %v10282_v12 = vsel %vm10270_vm13, %v1419_v45, %v10000_v34  ;;  %v1448_v34 = vand.u32 1, %v10277_v28  ;;  %v10335_v19 = vand.u32 1, %v1550_v10 }
 0x25d   : > { %1518 = vrot.lane.b32.xlu1 %v10255_v15, %s9662_s29  ;;  %1520 = vrot.lane.b32.xlu0 %v10260_v24, %s9662_s29  ;;  %v1413_v45 = vpop.permute.xlu1 %1412  ;;  %16011 = vst [vmem:[#allocation42_spill] sm:$0xff] %v10333_v6 }
 0x25e   : > { %8740 = vmatpush3.bf16.xpose.msra.mxu0 %v3038_v3  ;;  %v16001_v3 = vmov 0  ;;  %vm10316_vm0 = vcmp.eq.s32.totalorder %v1448_v34, 1  ;;  %16012 = vst [vmem:[#allocation43_spill] sm:$0xff] %v10335_v19  ;;  %vm15511_vm13 = vcmp.eq.s32.totalorder %v10335_v19, 1 }
 0x25f   : > { %v1415_v60 = vpop.permute.xlu0 %1414  ;;  %v16002_v3 = vsel %vm10293_vm14, 4294967295, %v16001_v3  ;;  %v16008_v31 = vsel %vm10316_vm0, 4294967295, %v16007_v31  ;;  %v10323_v32 = vsel %vm10316_vm0, %v1413_v45, %v9994_v33  ;;  %v1548_v33 = vshra.s32 %v10016_v38, 1 }
 0x260   : > { %16003 = vst [vmem:[#allocation38_spill] sm:$0xff] %v16002_v3  ;;  %v10310_v48 = vsel %vm10297_vm15, %v1415_v60, %v10006_v35  ;;  %16009 = vst [vmem:[#allocation40_spill] sm:$0xff] %v16008_v31  ;;  %v1549_v35 = vshra.s32 %v10029_v43, 1  ;;  %vm15506_vm0 = vcmp.eq.s32.totalorder %v10333_v6, 1 }
 0x261   : > { %1530 = vrot.lane.b32.xlu1 %v10282_v12, %s9662_s29  ;;  %1516 = vrot.lane.b32.xlu0 %v10287_v30, %s9662_s29  ;;  %v10347_v21 = vand.u32 1, %v1548_v33 }
 0x262   : > { %v10328_v60 = vand.u32 1, %v1549_v35 }
 0x263   : > { %16013 = vst [vmem:[#allocation44_spill] sm:$0xff] %v10347_v21 }
 0x264   : > { %16010 = vst [vmem:[#allocation41_spill] sm:$0xff] %v10328_v60  ;;  %vm15503_vm14 = vcmp.eq.s32.totalorder %v10328_v60, 1 }
 0x265   : > { %1528 = vrot.lane.b32.xlu0 %v10305_v29, %s9662_s29  ;;  %1526 = vrot.lane.b32.xlu1 %v10310_v48, %s9662_s29 }
 0x269   : > { %1524 = vrot.lane.b32.xlu0 %v10323_v32, %s9662_s29 }
 0x2af   : > { %v1501_v34 = vpop.permute.xlu1 %1500 }
 0x2b3   : > { %v1503_v45 = vpop.permute.xlu0 %1502  ;;  %v1507_v35 = vpop.permute.xlu1 %1506 }
 0x2b4   : > { %v10341_v9 = vsel %vm15503_vm14, %v1503_v45, %v10064_v58  ;;  %v10352_v7 = vsel %vm15506_vm0, %v1507_v35, %v10060_v57  ;;  %vm15516_vm14 = vcmp.eq.s32.totalorder %v10347_v21, 1  ;;  %v9232_v45 = vld [vmem:[#allocation2 + $0x18] sm:$0xff]   ;;  %vm16015_vm0 = vmmov %vm16014_vm10 }
 0x2b5   : > { %1630 = vrot.lane.b32.xlu1 %v10341_v9, %s9663_s21  ;;  %v10368_v57 = vsel %vm15516_vm14, %v1501_v34, %v10045_v51  ;;  %v9235_v34 = vld [vmem:[#allocation2 + $0x38] sm:$0xff]   ;;  %vm16021_vm14 = vmmov %vm16015_vm0 }
 0x2b6   : > { %vm16032_vm12 = vmmov %vm16015_vm0 }
 0x2b7   : > { %v1505_v10 = vpop.permute.xlu0 %1504  ;;  %v2990_v35 = vpop.permute.xlu1 %2989 }
 0x2b8   : > { %v10357_v58 = vsel %vm15511_vm13, %v1505_v10, %v10083_v0  ;;  %vm16016_vm13 = vmmov %vm16015_vm0 }
 0x2b9   : > { %1634 = vrot.lane.b32.xlu1 %v10352_v7, %s9663_s21  ;;  %1632 = vrot.lane.b32.xlu0 %v10357_v58, %s9663_s21 }
 0x2bb   : > { %v2992_v33 = vpop.permute.xlu0 %2991 }
 0x2bc   : > { %9073 = vmatprep.subr.msk.bf16.mxu0 %vm16014_vm10, %v2992_v33  ;;  %v3035_v0 = vsel %vm16015_vm0, %v2992_v33, 0  ;;  %v9236_v33 = vld [vmem:[#allocation2 + $0x20] sm:$0xff]   ;;  %vm16018_vm10 = vmmov %vm16015_vm0 }
 0x2bd   : > { %2935 = vrot.lane.b32.xlu1 %v9232_v45, %s15888_s19  ;;  %1628 = vrot.lane.b32.xlu0 %v10368_v57, %s9663_s21  ;;  %v3032_v45 = vsel %vm16015_vm0, %v2990_v35, 0 }
 0x2be   : > { %8742 = vmatpush3.bf16.xpose.msra.mxu0 %v3035_v0  ;;  %v9238_v0 = vld [vmem:[#allocation4 + $0x38] sm:$0xff]  }
 0x2bf   : > { %v2988_v10 = vpop.permute.xlu0 %2987  ;;  %9074 = vmatprep.subr.msk.bf16.mxu0 %vm16016_vm13, %v2990_v35  ;;  %vm16019_vm13 = vmmov %vm16015_vm0  ;;  %8701 = vmatprep.subr.bf16.mxu1 %v9238_v0  ;;  %v9241_v35 = vld [vmem:[#allocation4 + $0x20] sm:$0xff]  }
 0x2c0   : > { %8702 = vmatpush3.bf16.msra.mxu1 %v9238_v0  ;;  %v9243_v0 = vld [vmem:[#allocation4 + $0x10] sm:$0xff]  }
 0x2c1   : > { %2939 = vrot.lane.b32.xlu1 %v9233_v62, %s15888_s19  ;;  %2933 = vrot.lane.b32.xlu0 %v9234_v37, %s15888_s19  ;;  %v9240_v37 = vld [vmem:[#allocation4 + $0x28] sm:$0xff]   ;;  %v3029_v62 = vsel %vm16015_vm0, %v2988_v10, 0 }
 0x2c2   : > { %8703 = vmatprep.subr.bf16.mxu1 %v9239_v44 }
 0x2c3   : > { %v10377_v51 = vpop.permute.xlu0 %2929 }
 0x2c4   : > { %16017 = vst [vmem:[#allocation45_spill] sm:$0xff] %v10377_v51  ;;  %8749 = vmatprep.mubr.msk.bf16.mxu0 %vm16018_vm10, %v10377_v51  ;;  %8704 = vmatpush3.bf16.msra.mxu1 %v9239_v44  ;;  %vm16020_vm10 = vmmov %vm16015_vm0  ;;  %v9245_v44 = vld [vmem:[#allocation4] sm:$0xff]  }
 0x2c5   : > { %2943 = vrot.lane.b32.xlu1 %v9235_v34, %s15888_s19  ;;  %2937 = vrot.lane.b32.xlu0 %v9236_v33, %s15888_s19  ;;  %v2986_v34 = vpop.permute.xlu1 %2985  ;;  %v9242_v33 = vld [vmem:[#allocation4 + $0x18] sm:$0xff]  }
 0x2c6   : > { %8744 = vmatpush3.bf16.xpose.msra.mxu0 %v3032_v45  ;;  %8705 = vmatprep.subr.bf16.mxu1 %v9240_v37  ;;  %v3026_v45 = vsel %vm16021_vm14, %v2986_v34, 0  ;;  %vm16026_vm14 = vmmov %vm16015_vm0 }
 0x2c7   : > { %9075 = vmatprep.subr.msk.bf16.mxu0 %vm16019_vm13, %v2988_v10  ;;  %vm16023_vm13 = vmmov %vm16015_vm0 }
 0x2c8   : > { %8706 = vmatpush3.bf16.msra.mxu1 %v9240_v37 }
 0x2c9   : > { %2941 = vrot.lane.b32.xlu0 %v9237_v40, %s15888_s19  ;;  %8707 = vmatprep.subr.bf16.mxu1 %v9241_v35  ;;  %v9244_v40 = vld [vmem:[#allocation4 + $0x8] sm:$0xff]   ;;  %v10389_v10 = vpop.permute.xlu1 %2931 }
 0x2ca   : > { %16022 = vst [vmem:[#allocation46_spill] sm:$0xff] %v10389_v10 }
 0x2cc   : > { %8708 = vmatpush3.bf16.msra.mxu1 %v9241_v35 }
 0x2cd   : > { %8709 = vmatprep.subr.bf16.mxu1 %v9242_v33  ;;  %v10393_v37 = vpop.permute.xlu1 %1512 }
 0x2ce   : > { %8746 = vmatpush3.bf16.xpose.msra.mxu0 %v3029_v62  ;;  %v10395_v62 = vpop.permute.xlu0 %1508 }
 0x2cf   : > { %9076 = vmatprep.subr.msk.bf16.mxu0 %vm16020_vm10, %v2986_v34  ;;  %vm16028_vm10 = vmmov %vm16015_vm0 }
 0x2d0   : > { %8710 = vmatpush3.bf16.msra.mxu1 %v9242_v33 }
 0x2d1   : > { %8711 = vmatprep.subr.bf16.mxu1 %v9243_v0  ;;  %v1511_v35 = vpop.permute.xlu1 %1510 }
 0x2d2   : > { %v1515_v34 = vpop.permute.xlu0 %1514 }
 0x2d4   : > { %8712 = vmatpush3.bf16.msra.mxu1 %v9243_v0 }
 0x2d5   : > { %8713 = vmatprep.subr.bf16.mxu1 %v9244_v40  ;;  %v10397_v33 = vpop.permute.xlu1 %1522 }
 0x2d6   : > { %8748 = vmatpush3.bf16.xpose.msra.mxu0 %v3026_v45  ;;  %v10399_v45 = vpop.permute.xlu0 %1520 }
 0x2d8   : > { %8714 = vmatpush3.bf16.msra.mxu1 %v9244_v40 }
 0x2d9   : > { %8715 = vmatprep.subr.bf16.mxu1 %v9245_v44  ;;  %v10401_v51 = vpop.permute.xlu1 %1518 }
 0x2da   : > { %v10403_v0 = vpop.permute.xlu0 %1516 }
 0x2dc   : > { %8716 = vmatpush3.bf16.msra.mxu1 %v9245_v44 }
 0x2dd   : > { %8750 = vmatmul.mubr.msk.bf16.vlgmr.msra.gmra.mxu0 %vm16023_vm13, %v10389_v10  ;;  %v10405_v10 = vpop.permute.xlu1 %1530  ;;  %vm16031_vm13 = vmmov %vm16015_vm0 }
 0x2de   : > { %v10407_v39 = vpop.permute.xlu0 %1528 }
 0x2e1   : > { %v10409_v40 = vpop.permute.xlu1 %1526 }
 0x2e2   : > { %v10411_v44 = vpop.permute.xlu0 %1524 }
 0x327   : > { %v10413_v19 = vpop.permute.xlu1 %1630 }
 0x32b   : > { %v10415_v21 = vpop.permute.xlu0 %1632  ;;  %v10417_v3 = vpop.permute.xlu1 %1634 }
 0x32f   : > { %v10419_v6 = vpop.permute.xlu0 %1628  ;;  %v10423_v31 = vpop.permute.xlu1 %2935 }
 0x330   : > { %16025 = vst [vmem:[#allocation48_spill] sm:$0xff] %v10423_v31 }
 0x333   : > { %v10421_v60 = vpop.permute.xlu0 %2933  ;;  %v10433_v52 = vpop.permute.xlu1 %2939 }
 0x334   : > { %16024 = vst [vmem:[#allocation47_spill] sm:$0xff] %v10421_v60  ;;  %8753 = vmatprep.mubr.msk.bf16.mxu0 %vm16026_vm14, %v10421_v60  ;;  %16029 = vst [vmem:[#allocation50_spill] sm:$0xff] %v10433_v52 }
 0x335   : > { %8754 = vmatmul.mubr.msk.bf16.gmra.mxu0 %vm16015_vm0, %v10423_v31  ;;  %vm16034_vm14 = vmmov %vm16015_vm0  ;;  %v10445_v31 = vpop.f32.mrf.mxu0 }
 0x336   : > { %16035 = vst [vmem:[#allocation53_spill] sm:$0xff] %v10445_v31 }
 0x337   : > { %v10429_v2 = vpop.permute.xlu0 %2937  ;;  %v10441_v25 = vpop.permute.xlu1 %2943 }
 0x338   : > { %16027 = vst [vmem:[#allocation49_spill] sm:$0xff] %v10429_v2  ;;  %8757 = vmatprep.mubr.msk.bf16.mxu0 %vm16028_vm10, %v10429_v2  ;;  %16033 = vst [vmem:[#allocation52_spill] sm:$0xff] %v10441_v25  ;;  %v10447_v60 = vpop.f32.mrf.mxu0 }
 0x339   : > { %16036 = vst [vmem:[#allocation54_spill] sm:$0xff] %v10447_v60 }
 0x33a   : > { %v10449_v2 = vpop.f32.mrf.mxu0 }
 0x33b   : > { %v10435_v23 = vpop.permute.xlu0 %2941  ;;  %16037 = vst [vmem:[#allocation55_spill] sm:$0xff] %v10449_v2 }
 0x33c   : > { %16030 = vst [vmem:[#allocation51_spill] sm:$0xff] %v10435_v23  ;;  %v10451_v63 = vpop.f32.mrf.mxu0 }
 0x33d   : > { %8758 = vmatmul.mubr.msk.bf16.gmra.mxu0 %vm16031_vm13, %v10433_v52  ;;  %16038 = vst [vmem:[#allocation56_spill] sm:$0xff] %v10451_v63 }
 0x33e   : > { %8761 = vmatprep.mubr.msk.bf16.mxu0 %vm16032_vm12, %v10435_v23  ;;  %v10453_v16 = vpop.f32.mrf.mxu0 }
 0x33f   : > { %16039 = vst [vmem:[#allocation57_spill] sm:$0xff] %v10453_v16 }
 0x340   : > { %v10455_v8 = vpop.f32.mrf.mxu0 }
 0x341   : > { %16040 = vst [vmem:[#allocation58_spill] sm:$0xff] %v10455_v8 }
 0x342   : > { %v10457_v52 = vpop.f32.mrf.mxu0 }
 0x343   : > { %16041 = vst [vmem:[#allocation59_spill] sm:$0xff] %v10457_v52 }
 0x344   : > { %v10459_v23 = vpop.f32.mrf.mxu0 }
 0x345   : > { %8762 = vmatmul.mubr.msk.bf16.gmra.mxu0 %vm16034_vm14, %v10441_v25  ;;  %16042 = vst [vmem:[#allocation60_spill] sm:$0xff] %v10459_v23 }
 0x346   : > { %v10461_v17 = vpop.f32.mrf.mxu0 }
 0x347   : > { %16043 = vst [vmem:[#allocation61_spill] sm:$0xff] %v10461_v17  ;;  %v1557_v17 = vshra.s32 %v10158_v59, 1 }
 0x348   : > { %v10463_v11 = vpop.f32.mrf.mxu0 }
 0x349   : > { %16044 = vst [vmem:[#allocation62_spill] sm:$0xff] %v10463_v11  ;;  %v1555_v11 = vshra.s32 %v10127_v18, 1 }
 0x34a   : > { %v10465_v25 = vpop.f32.mrf.mxu0 }
 0x34b   : > { %16045 = vst [vmem:[#allocation63_spill] sm:$0xff] %v10465_v25 }
 0x34c   : > { %v10467_v31 = vpop.f32.mrf.mxu0 }
 0x34d   : > { %16046 = vst [vmem:[#allocation64_spill] sm:$0xff] %v10467_v31 }
 0x34e   : > { %v10469_v60 = vpop.f32.mrf.mxu0 }
 0x34f   : > { %16047 = vst [vmem:[#allocation65_spill] sm:$0xff] %v10469_v60  ;;  %v1553_v60 = vshra.s32 %v10118_v13, 1 }
 0x350   : > { %v10471_v2 = vpop.f32.mrf.mxu0 }
 0x351   : > { %16048 = vst [vmem:[#allocation66_spill] sm:$0xff] %v10471_v2  ;;  %v10492_v2 = vand.u32 1, %v1555_v11 }
 0x352   : > { %v10473_v63 = vpop.f32.mrf.mxu0 }
 0x353   : > { %16049 = vst [vmem:[#allocation67_spill] sm:$0xff] %v10473_v63  ;;  %16051 = vst [vmem:[#allocation69_spill] sm:$0xff] %v10492_v2  ;;  %vm15641_vm12 = vcmp.eq.s32.totalorder %v10492_v2, 1  ;;  %v1559_v63 = vshra.s32 %v10145_v47, 1 }
 0x354   : > { %v10475_v16 = vpop.f32.mrf.mxu0  ;;  %v10504_v23 = vsel %vm15641_vm12, %v1515_v34, %v10229_v36  ;;  %v10520_v36 = vand.u32 1, %v1557_v17  ;;  %v1563_v34 = vshra.s32 %v10207_v27, 1 }
 0x355   : > { %16050 = vst [vmem:[#allocation68_spill] sm:$0xff] %v10475_v16  ;;  %v10498_v16 = vand.u32 1, %v1553_v60  ;;  %v10509_v11 = vand.u32 1, %v1559_v63 }
 0x356   : > { %16054 = vst [vmem:[#allocation72_spill] sm:$0xff] %v10520_v36  ;;  %vm15574_vm13 = vcmp.eq.s32.totalorder %v10520_v36, 1 }
 0x357   : > { %16052 = vst [vmem:[#allocation70_spill] sm:$0xff] %v10498_v16  ;;  %vm15666_vm0 = vcmp.eq.s32.totalorder %v10498_v16, 1  ;;  %16053 = vst [vmem:[#allocation71_spill] sm:$0xff] %v10509_v11  ;;  %vm15559_vm10 = vcmp.eq.s32.totalorder %v10509_v11, 1  ;;  %v10539_v17 = vsel %vm15574_vm13, %v10401_v51, %v10255_v15  ;;  %v1677_v51 = vshra.s32 %v10029_v43, 2 }
 0x358   : > { %v10515_v60 = vsel %vm15666_vm0, %v1511_v35, %v10187_v20  ;;  %v10527_v63 = vsel %vm15559_vm10, %v10397_v33, %v10224_v22  ;;  %v10532_v20 = vand.u32 1, %v1563_v34  ;;  %v1561_v35 = vshra.s32 %v10245_v26, 1 }
 0x359   : > { %v1679_v33 = vshra.s32 %v10026_v42, 2 }
 0x35a   : > { %16055 = vst [vmem:[#allocation73_spill] sm:$0xff] %v10532_v20  ;;  %vm15560_vm14 = vcmp.eq.s32.totalorder %v10532_v20, 1  ;;  %v10544_v22 = vand.u32 1, %v1561_v35  ;;  %v1556_v20 = vshra.s32 %v10196_v50, 1 }
 0x35b   : > { %v10551_v34 = vsel %vm15560_vm14, %v10405_v10, %v10282_v12  ;;  %v10556_v15 = vand.u32 1, %v1679_v33  ;;  %v10568_v12 = vand.u32 1, %v1677_v51 }
 0x35c   : > { %16056 = vst [vmem:[#allocation74_spill] sm:$0xff] %v10544_v22  ;;  %vm15561_vm10 = vcmp.eq.s32.totalorder %v10544_v22, 1 }
 0x35d   : > { %16057 = vst [vmem:[#allocation75_spill] sm:$0xff] %v10556_v15  ;;  %v10563_v35 = vsel %vm15561_vm10, %v10409_v40, %v10310_v48  ;;  %vm15562_vm14 = vcmp.eq.s32.totalorder %v10556_v15, 1  ;;  %16058 = vst [vmem:[#allocation76_spill] sm:$0xff] %v10568_v12  ;;  %vm15567_vm10 = vcmp.eq.s32.totalorder %v10568_v12, 1  ;;  %v1554_v40 = vshra.s32 %v10099_v5, 1 }
 0x35e   : > { %v10574_v10 = vsel %vm15562_vm14, %v10417_v3, %v10352_v7  ;;  %v10583_v48 = vsel %vm15567_vm10, %v10413_v19, %v10341_v9  ;;  %v1552_v7 = vshra.s32 %v10121_v14, 1  ;;  %v1558_v19 = vshra.s32 %v10149_v55, 1 }
 0x35f   : > { %v10588_v33 = vand.u32 1, %v1554_v40 }
 0x360   : > { %v10598_v9 = vand.u32 1, %v1552_v7  ;;  %v10616_v7 = vand.u32 1, %v1558_v19  ;;  %v1562_v19 = vshra.s32 %v10242_v4, 1 }
 0x361   : > { %16059 = vst [vmem:[#allocation77_spill] sm:$0xff] %v10588_v33  ;;  %vm15579_vm14 = vcmp.eq.s32.totalorder %v10588_v33, 1 }
 0x362   : > { %16060 = vst [vmem:[#allocation78_spill] sm:$0xff] %v10598_v9  ;;  %v10609_v40 = vsel %vm15579_vm14, %v10393_v37, %v10155_v56  ;;  %vm15674_vm10 = vcmp.eq.s32.totalorder %v10598_v9, 1  ;;  %16061 = vst [vmem:[#allocation79_spill] sm:$0xff] %v10616_v7  ;;  %vm15584_vm13 = vcmp.eq.s32.totalorder %v10616_v7, 1  ;;  %v10634_v37 = vand.u32 1, %v1556_v20 }
 0x363   : > { %v10627_v56 = vsel %vm15674_vm10, %v10395_v62, %v10192_v41  ;;  %v10645_v41 = vsel %vm15584_vm13, %v10399_v45, %v10260_v24  ;;  %v10652_v62 = vand.u32 1, %v1562_v19  ;;  %v1560_v20 = vshra.s32 %v10277_v28, 1 }
 0x364   : > { %16062 = vst [vmem:[#allocation80_spill] sm:$0xff] %v10634_v37  ;;  %vm15589_vm14 = vcmp.eq.s32.totalorder %v10634_v37, 1  ;;  %v1678_v19 = vshra.s32 %v10041_v49, 2 }
 0x365   : > { %16063 = vst [vmem:[#allocation81_spill] sm:$0xff] %v10652_v62  ;;  %v10663_v24 = vsel %vm15589_vm14, %v10403_v0, %v10287_v30  ;;  %vm15592_vm13 = vcmp.eq.s32.totalorder %v10652_v62, 1  ;;  %v10670_v45 = vand.u32 1, %v1560_v20  ;;  %v1676_v20 = vshra.s32 %v10016_v38, 2 }
 0x366   : > { %v10681_v30 = vsel %vm15592_vm13, %v10407_v39, %v10305_v29  ;;  %v10688_v0 = vand.u32 1, %v1678_v19 }
 0x367   : > { %16064 = vst [vmem:[#allocation82_spill] sm:$0xff] %v10670_v45  ;;  %vm15593_vm14 = vcmp.eq.s32.totalorder %v10670_v45, 1  ;;  %v10702_v39 = vand.u32 1, %v1676_v20 }
 0x368   : > { %16065 = vst [vmem:[#allocation83_spill] sm:$0xff] %v10688_v0  ;;  %v10695_v37 = vsel %vm15593_vm14, %v10411_v44, %v10323_v32  ;;  %vm15596_vm13 = vcmp.eq.s32.totalorder %v10688_v0, 1  ;;  %v1683_v32 = vshra.s32 %v10127_v18, 2 }
 0x369   : > { %16066 = vst [vmem:[#allocation84_spill] sm:$0xff] %v10702_v39  ;;  %v10708_v29 = vsel %vm15596_vm13, %v10415_v21, %v10357_v58  ;;  %vm15597_vm14 = vcmp.eq.s32.totalorder %v10702_v39, 1  ;;  %v1681_v58 = vshra.s32 %v10118_v13, 2 }
 0x36a   : > { %v10723_v20 = vsel %vm15597_vm14, %v10419_v6, %v10368_v57  ;;  %v10729_v21 = vand.u32 1, %v1683_v32  ;;  %v1687_v6 = vshra.s32 %v10145_v47, 2 }
 0x36c   : > { %16067 = vst [vmem:[#allocation85_spill] sm:$0xff] %v10729_v21  ;;  %vm15602_vm13 = vcmp.eq.s32.totalorder %v10729_v21, 1  ;;  %v10748_v32 = vand.u32 1, %v1687_v6  ;;  %v1691_v6 = vshra.s32 %v10207_v27, 2 }
 0x36e   : > { %16069 = vst [vmem:[#allocation87_spill] sm:$0xff] %v10748_v32 }
 0x39d   : > { %v10477_v8 = vpop.f32.mrf.mxu0 }
 0x39f   : > { %v10479_v52 = vpop.f32.mrf.mxu0 }
 0x3a0   : > { %3162 = vrot.lane.b32.xlu0 %v10479_v52, %s9660_s14 }
 0x3a1   : > { %v10484_v25 = vpop.f32.mrf.mxu0 }
 0x3a3   : > { %v10486_v31 = vpop.f32.mrf.mxu0 }
 0x3a4   : > { %3166 = vrot.lane.b32.xlu0 %v10477_v8, %s9660_s14  ;;  %3164 = vrot.lane.b32.xlu1 %v10486_v31, %s9660_s14 }
 0x3a8   : > { %3168 = vrot.lane.b32.xlu1 %v10484_v25, %s9660_s14 }
 0x3ac   : > { %1642 = vrot.lane.b32.xlu1 %v10504_v23, %s9663_s21 }
 0x3b0   : > { %1638 = vrot.lane.b32.xlu1 %v10515_v60, %s9663_s21 }
 0x3b4   : > { %1650 = vrot.lane.b32.xlu1 %v10527_v63, %s9663_s21 }
 0x3b8   : > { %1646 = vrot.lane.b32.xlu1 %v10539_v17, %s9663_s21 }
 0x3bc   : > { %1658 = vrot.lane.b32.xlu1 %v10551_v34, %s9663_s21 }
 0x3c0   : > { %1654 = vrot.lane.b32.xlu1 %v10563_v35, %s9663_s21 }
 0x3c4   : > { %1762 = vrot.lane.b32.xlu1 %v10574_v10, %s9664_s23 }
 0x3c8   : > { %1758 = vrot.lane.b32.xlu1 %v10583_v48, %s9664_s23 }
 0x3f5   : > { %v10591_v3 = vpop.f32.mrf.mxu0 }
 0x3f7   : > { %v10593_v51 = vpop.f32.mrf.mxu0 }
 0x3f8   : > { %3170 = vrot.lane.b32.xlu0 %v10593_v51, %s9660_s14 }
 0x3f9   : > { %v10601_v15 = vpop.f32.mrf.mxu0 }
 0x3fb   : > { %v10603_v12 = vpop.f32.mrf.mxu0 }
 0x3fc   : > { %1640 = vrot.lane.b32.xlu0 %v10609_v40, %s9663_s21  ;;  %3172 = vrot.lane.b32.xlu1 %v10603_v12, %s9660_s14 }
 0x3fd   : > { %v10619_v22 = vpop.f32.mrf.mxu0 }
 0x3ff   : > { %v10621_v11 = vpop.f32.mrf.mxu0 }
 0x400   : > { %1636 = vrot.lane.b32.xlu0 %v10627_v56, %s9663_s21  ;;  %3176 = vrot.lane.b32.xlu1 %v10601_v15, %s9660_s14 }
 0x401   : > { %v10637_v36 = vpop.f32.mrf.mxu0 }
 0x403   : > { %v10639_v33 = vpop.f32.mrf.mxu0 }
 0x404   : > { %1648 = vrot.lane.b32.xlu0 %v10645_v41, %s9663_s21  ;;  %3180 = vrot.lane.b32.xlu1 %v10639_v33, %s9660_s14 }
 0x405   : > { %v10655_v2 = vpop.f32.mrf.mxu0 }
 0x407   : > { %v10657_v16 = vpop.f32.mrf.mxu0 }
 0x408   : > { %1644 = vrot.lane.b32.xlu0 %v10663_v24, %s9663_s21  ;;  %3184 = vrot.lane.b32.xlu1 %v10637_v36, %s9660_s14 }
 0x409   : > { %v10673_v7 = vpop.f32.mrf.mxu0 }
 0x40b   : > { %v10675_v9 = vpop.f32.mrf.mxu0 }
 0x40c   : > { %1656 = vrot.lane.b32.xlu0 %v10681_v30, %s9663_s21  ;;  %3188 = vrot.lane.b32.xlu1 %v10675_v9, %s9660_s14 }
 0x410   : > { %1652 = vrot.lane.b32.xlu0 %v10695_v37, %s9663_s21  ;;  %3192 = vrot.lane.b32.xlu1 %v10673_v7, %s9660_s14 }
 0x414   : > { %1760 = vrot.lane.b32.xlu0 %v10708_v29, %s9664_s23 }
 0x416   : > { %v3165_v44 = vpop.permute.xlu1 %3164 }
 0x417   : > { %v10717_v19 = vsel %vm10053_vm3, %v3165_v44, %v10486_v31  ;;  %v10735_v31 = vand.u32 1, %v1681_v58  ;;  %v1685_v58 = vshra.s32 %v10158_v59, 2 }
 0x418   : > { %3244 = vrot.lane.b32.xlu1 %v10717_v19, %s9662_s29  ;;  %1756 = vrot.lane.b32.xlu0 %v10723_v20, %s9664_s23 }
 0x419   : > { %16068 = vst [vmem:[#allocation86_spill] sm:$0xff] %v10735_v31  ;;  %vm15605_vm14 = vcmp.eq.s32.totalorder %v10735_v31, 1 }
 0x41a   : > { %v3169_v0 = vpop.permute.xlu1 %3168 }
 0x41c   : > { %3174 = vrot.lane.b32.xlu0 %v10591_v3, %s9660_s14 }
 0x41e   : > { %v1643_v57 = vpop.permute.xlu1 %1642 }
 0x41f   : > { %v10741_v44 = vsel %vm15602_vm13, %v1643_v57, %v10504_v23  ;;  %vm15610_vm13 = vcmp.eq.s32.totalorder %v10748_v32, 1  ;;  %v10761_v23 = vand.u32 1, %v1685_v58  ;;  %v3163_v58 = vpop.permute.xlu0 %3162 }
 0x420   : > { %1770 = vrot.lane.b32.xlu1 %v10741_v44, %s9664_s23  ;;  %3178 = vrot.lane.b32.xlu0 %v10621_v11, %s9660_s14 }
 0x421   : > { %16070 = vst [vmem:[#allocation88_spill] sm:$0xff] %v10761_v23 }
 0x422   : > { %v1639_v54 = vpop.permute.xlu1 %1638 }
 0x423   : > { %v10754_v39 = vsel %vm15605_vm14, %v1639_v54, %v10515_v60  ;;  %vm15613_vm14 = vcmp.eq.s32.totalorder %v10761_v23, 1  ;;  %v10774_v54 = vand.u32 1, %v1691_v6  ;;  %v1689_v60 = vshra.s32 %v10245_v26, 2 }
 0x424   : > { %1766 = vrot.lane.b32.xlu1 %v10754_v39, %s9664_s23  ;;  %3182 = vrot.lane.b32.xlu0 %v10619_v22, %s9660_s14  ;;  %v1807_v6 = vshra.s32 %v10026_v42, 3 }
 0x425   : > { %16071 = vst [vmem:[#allocation89_spill] sm:$0xff] %v10774_v54 }
 0x426   : > { %v1651_v57 = vpop.permute.xlu1 %1650 }
 0x427   : > { %v10767_v21 = vsel %vm15610_vm13, %v1651_v57, %v10527_v63  ;;  %vm15616_vm13 = vcmp.eq.s32.totalorder %v10774_v54, 1  ;;  %v10787_v63 = vand.u32 1, %v1689_v60  ;;  %v10805_v60 = vand.u32 1, %v1807_v6 }
 0x428   : > { %1778 = vrot.lane.b32.xlu1 %v10767_v21, %s9664_s23  ;;  %3186 = vrot.lane.b32.xlu0 %v10657_v16, %s9660_s14  ;;  %v1805_v54 = vshra.s32 %v10029_v43, 3 }
 0x429   : > { %16072 = vst [vmem:[#allocation90_spill] sm:$0xff] %v10787_v63  ;;  %16073 = vst [vmem:[#allocation91_spill] sm:$0xff] %v10805_v60 }
 0x42a   : > { %v1647_v31 = vpop.permute.xlu1 %1646 }
 0x42b   : > { %v10780_v32 = vsel %vm15613_vm14, %v1647_v31, %v10539_v17  ;;  %v10798_v17 = vsel %vm10034_vm1, %v3163_v58, %v10479_v52  ;;  %v3167_v31 = vpop.permute.xlu0 %3166  ;;  %vm15617_vm14 = vcmp.eq.s32.totalorder %v10787_v63, 1  ;;  %v10823_v58 = vand.u32 1, %v1805_v54 }
 0x42c   : > { %1774 = vrot.lane.b32.xlu1 %v10780_v32, %s9664_s23  ;;  %3190 = vrot.lane.b32.xlu0 %v10655_v2, %s9660_s14  ;;  %v10816_v52 = vsel %vm10073_vm4, %v3167_v31, %v10477_v8  ;;  %v1682_v54 = vshra.s32 %v10099_v5, 2 }
 0x42d   : > { %16074 = vst [vmem:[#allocation92_spill] sm:$0xff] %v10823_v58 }
 0x42e   : > { %v1659_v57 = vpop.permute.xlu1 %1658 }
 0x42f   : > { %v10793_v62 = vsel %vm15616_vm13, %v1659_v57, %v10551_v34  ;;  %vm15620_vm13 = vcmp.eq.s32.totalorder %v10805_v60, 1 }
 0x430   : > { %1786 = vrot.lane.b32.xlu1 %v10793_v62, %s9664_s23  ;;  %3242 = vrot.lane.b32.xlu0 %v10798_v17, %s9662_s29 }
 0x432   : > { %v1655_v34 = vpop.permute.xlu1 %1654 }
 0x433   : > { %v10811_v57 = vsel %vm15617_vm14, %v1655_v34, %v10563_v35  ;;  %vm15623_vm14 = vcmp.eq.s32.totalorder %v10823_v58, 1  ;;  %v10848_v34 = vand.u32 1, %v1682_v54 }
 0x434   : > { %1782 = vrot.lane.b32.xlu1 %v10811_v57, %s9664_s23  ;;  %3246 = vrot.lane.b32.xlu0 %v10816_v52, %s9662_s29 }
 0x435   : > { %16075 = vst [vmem:[#allocation93_spill] sm:$0xff] %v10848_v34 }
 0x436   : > { %v1763_v6 = vpop.permute.xlu1 %1762 }
 0x437   : > { %v10828_v35 = vsel %vm15620_vm13, %v1763_v6, %v10574_v10  ;;  %v10843_v10 = vsel %vm10049_vm2, %v3169_v0, %v10484_v25  ;;  %v1680_v6 = vshra.s32 %v10121_v14, 2  ;;  %vm15630_vm13 = vcmp.eq.s32.totalorder %v10848_v34, 1 }
 0x438   : > { %1890 = vrot.lane.b32.xlu1 %v10828_v35, %s15890_s22  ;;  %v1686_v0 = vshra.s32 %v10149_v55, 2 }
 0x439   : > { %v10859_v25 = vand.u32 1, %v1680_v6 }
 0x43a   : > { %v1759_v8 = vpop.permute.xlu1 %1758 }
 0x43b   : > { %v10836_v31 = vsel %vm15623_vm14, %v1759_v8, %v10583_v48  ;;  %16076 = vst [vmem:[#allocation94_spill] sm:$0xff] %v10859_v25  ;;  %vm15633_vm14 = vcmp.eq.s32.totalorder %v10859_v25, 1 }
 0x43c   : > { %1886 = vrot.lane.b32.xlu1 %v10836_v31, %s15890_s22 }
 0x440   : > { %3248 = vrot.lane.b32.xlu1 %v10843_v10, %s9662_s29 }
 0x46a   : > { %v3171_v46 = vpop.permute.xlu0 %3170 }
 0x46b   : > { %v10854_v48 = vsel %vm10170_vm7, %v3171_v46, %v10593_v51  ;;  %v10872_v46 = vand.u32 1, %v1686_v0  ;;  %v1684_v51 = vshra.s32 %v10196_v50, 2 }
 0x46c   : > { %3250 = vrot.lane.b32.xlu1 %v10854_v48, %s9662_s29 }
 0x46d   : > { %16077 = vst [vmem:[#allocation95_spill] sm:$0xff] %v10872_v46  ;;  %v10890_v0 = vand.u32 1, %v1684_v51  ;;  %v1688_v51 = vshra.s32 %v10277_v28, 2 }
 0x46e   : > { %v10862_v8 = vpop.permute.xlu1 %3172  ;;  %v1641_v54 = vpop.permute.xlu0 %1640 }
 0x46f   : > { %v10867_v53 = vsel %vm15630_vm13, %v1641_v54, %v10609_v40  ;;  %vm15636_vm13 = vcmp.eq.s32.totalorder %v10872_v46, 1  ;;  %16079 = vst [vmem:[#allocation96_spill] sm:$0xff] %v10890_v0  ;;  %v1690_v54 = vshra.s32 %v10242_v4, 2 }
 0x470   : > { %1768 = vrot.lane.b32.xlu0 %v10867_v53, %s9664_s23 }
 0x472   : > { %v3177_v6 = vpop.permute.xlu1 %3176  ;;  %v1637_v1 = vpop.permute.xlu0 %1636 }
 0x473   : > { %v10878_v60 = vsel %vm10178_vm8, %v3177_v6, %v10601_v15  ;;  %v10883_v40 = vsel %vm15633_vm14, %v1637_v1, %v10627_v56  ;;  %vm15639_vm14 = vcmp.eq.s32.totalorder %v10890_v0, 1  ;;  %v10908_v56 = vand.u32 1, %v1690_v54 }
 0x474   : > { %3256 = vrot.lane.b32.xlu1 %v10878_v60, %s9662_s29  ;;  %1764 = vrot.lane.b32.xlu0 %v10883_v40, %s9664_s23  ;;  %v10926_v54 = vand.u32 1, %v1688_v51 }
 0x475   : > { %16081 = vst [vmem:[#allocation97_spill] sm:$0xff] %v10908_v56 }
 0x476   : > { %v3181_v61 = vpop.permute.xlu1 %3180  ;;  %v1649_v15 = vpop.permute.xlu0 %1648  ;;  %16083 = vst [vmem:[#allocation98_spill] sm:$0xff] %v10926_v54 }
 0x477   : > { %v10896_v58 = vsel %vm10231_vm11, %v3181_v61, %v10639_v33  ;;  %v10901_v1 = vsel %vm15636_vm13, %v1649_v15, %v10645_v41  ;;  %vm15640_vm13 = vcmp.eq.s32.totalorder %v10908_v56, 1  ;;  %v1806_v15 = vshra.s32 %v10041_v49, 3  ;;  %v9246_v56 = vld [vmem:[#allocation3 + $0x38] sm:$0xff]  }
 0x478   : > { %3260 = vrot.lane.b32.xlu1 %v10896_v58, %s9662_s29  ;;  %1776 = vrot.lane.b32.xlu0 %v10901_v1, %s9664_s23 }
 0x479   : > { %v10944_v51 = vand.u32 1, %v1806_v15 }
 0x47a   : > { %v3185_v6 = vpop.permute.xlu1 %3184  ;;  %v1645_v61 = vpop.permute.xlu0 %1644 }
 0x47b   : > { %v10914_v63 = vsel %vm10202_vm9, %v3185_v6, %v10637_v36  ;;  %v10919_v41 = vsel %vm15639_vm14, %v1645_v61, %v10663_v24  ;;  %vm15662_vm14 = vcmp.eq.s32.totalorder %v10926_v54, 1  ;;  %16085 = vst [vmem:[#allocation99_spill] sm:$0xff] %v10944_v51  ;;  %v1804_v61 = vshra.s32 %v10016_v38, 3 }
 0x47c   : > { %3264 = vrot.lane.b32.xlu1 %v10914_v63, %s9662_s29  ;;  %1772 = vrot.lane.b32.xlu0 %v10919_v41, %s9664_s23 }
 0x47e   : > { %v3189_v33 = vpop.permute.xlu1 %3188  ;;  %v1657_v36 = vpop.permute.xlu0 %1656 }
 0x47f   : > { %v10932_v46 = vsel %vm10297_vm15, %v3189_v33, %v10675_v9  ;;  %v10937_v24 = vsel %vm15640_vm13, %v1657_v36, %v10681_v30  ;;  %vm15646_vm13 = vcmp.eq.s32.totalorder %v10944_v51, 1  ;;  %v10955_v30 = vand.u32 1, %v1804_v61 }
 0x480   : > { %3268 = vrot.lane.b32.xlu1 %v10932_v46, %s9662_s29  ;;  %1784 = vrot.lane.b32.xlu0 %v10937_v24, %s9664_s23 }
 0x481   : > { %16086 = vst [vmem:[#allocation100_spill] sm:$0xff] %v10955_v30  ;;  %vm15655_vm12 = vcmp.eq.s32.totalorder %v10955_v30, 1  ;;  %v1815_v30 = vshra.s32 %v10145_v47, 3 }
 0x482   : > { %v1653_v6 = vpop.permute.xlu0 %1652  ;;  %v10966_v36 = vpop.permute.xlu1 %3192 }
 0x483   : > { %v10950_v9 = vsel %vm15662_vm14, %v1653_v6, %v10695_v37  ;;  %v1811_v37 = vshra.s32 %v10127_v18, 3 }
 0x484   : > { %1780 = vrot.lane.b32.xlu0 %v10950_v9, %s9664_s23 }
 0x486   : > { %v1761_v33 = vpop.permute.xlu0 %1760 }
 0x487   : > { %v10960_v15 = vsel %vm15646_vm13, %v1761_v33, %v10708_v29  ;;  %v10975_v29 = vand.u32 1, %v1811_v37  ;;  %v1809_v33 = vshra.s32 %v10118_v13, 3  ;;  %v10989_v37 = vsel %vm10166_vm6, %v10862_v8, %v10603_v12 }
 0x488   : > { %1888 = vrot.lane.b32.xlu0 %v10960_v15, %s15890_s22 }
 0x489   : > { %16087 = vst [vmem:[#allocation101_spill] sm:$0xff] %v10975_v29  ;;  %vm15656_vm13 = vcmp.eq.s32.totalorder %v10975_v29, 1  ;;  %v10982_v54 = vand.u32 1, %v1809_v33  ;;  %v1813_v33 = vshra.s32 %v10158_v59, 3 }
 0x48a   : > { %v1757_v6 = vpop.permute.xlu0 %1756  ;;  %v10978_v51 = vpop.permute.xlu1 %3244 }
 0x48b   : > { %v10971_v61 = vsel %vm15655_vm12, %v1757_v6, %v10723_v20  ;;  %16088 = vst [vmem:[#allocation102_spill] sm:$0xff] %v10982_v54  ;;  %vm15657_vm12 = vcmp.eq.s32.totalorder %v10982_v54, 1  ;;  %v16094_v54 = vld [vmem:[#allocation36_spill] sm:$0xff] }
 0x48c   : > { %1884 = vrot.lane.b32.xlu0 %v10971_v61, %s15890_s22  ;;  %vm16095_vm14 = vnez %v16094_v54  ;;  %v9248_v54 = vld [vmem:[#allocation3 + $0x28] sm:$0xff]  }
 0x48e   : > { %v3175_v23 = vpop.permute.xlu0 %3174 }
 0x48f   : > { %v11007_v6 = vsel %vm10138_vm5, %v3175_v23, %v10591_v3  ;;  %v9247_v23 = vld [vmem:[#allocation3 + $0x30] sm:$0xff]  }
 0x490   : > { %3760 = vrot.lane.b32.xlu0 %v9246_v56, %s15888_s19  ;;  %v11001_v56 = vand.u32 1, %v1815_v30  ;;  %v11019_v30 = vand.u32 1, %v1813_v33  ;;  %v1817_v33 = vshra.s32 %v10245_v26, 3 }
 0x492   : > { %v1771_v20 = vpop.permute.xlu1 %1770  ;;  %16090 = vst [vmem:[#allocation103_spill] sm:$0xff] %v11001_v56  ;;  %16092 = vst [vmem:[#allocation104_spill] sm:$0xff] %v11019_v30  ;;  %v3179_v8 = vpop.permute.xlu0 %3178 }
 0x493   : > { %v10994_v0 = vsel %vm15656_vm13, %v1771_v20, %v10741_v44  ;;  %vm15665_vm13 = vcmp.eq.s32.totalorder %v11001_v56, 1  ;;  %v1819_v20 = vshra.s32 %v10207_v27, 3  ;;  %v11037_v34 = vsel %vm16095_vm14, %v3179_v8, %v10621_v11  ;;  %v16097_v11 = vld [vmem:[#allocation33_spill] sm:$0xff] }
 0x494   : > { %1898 = vrot.lane.b32.xlu1 %v10994_v0, %s15890_s22  ;;  %3252 = vrot.lane.b32.xlu0 %v10989_v37, %s9662_s29  ;;  %vm16098_vm0 = vnez %v16097_v11 }
 0x496   : > { %v1767_v12 = vpop.permute.xlu1 %1766 }
 0x497   : > { %v11012_v44 = vsel %vm15657_vm12, %v1767_v12, %v10754_v39  ;;  %vm15667_vm12 = vcmp.eq.s32.totalorder %v11019_v30, 1  ;;  %v11031_v12 = vand.u32 1, %v1819_v20  ;;  %v11049_v20 = vand.u32 1, %v1817_v33 }
 0x498   : > { %1894 = vrot.lane.b32.xlu1 %v11012_v44, %s15890_s22  ;;  %3254 = vrot.lane.b32.xlu0 %v11007_v6, %s9662_s29 }
 0x499   : > { %16093 = vst [vmem:[#allocation105_spill] sm:$0xff] %v11031_v12  ;;  %16096 = vst [vmem:[#allocation106_spill] sm:$0xff] %v11049_v20 }
 0x49a   : > { %v1779_v3 = vpop.permute.xlu1 %1778 }
 0x49b   : > { %v11025_v39 = vsel %vm15665_vm13, %v1779_v3, %v10767_v21  ;;  %v3183_v3 = vpop.permute.xlu0 %3182  ;;  %vm15670_vm13 = vcmp.eq.s32.totalorder %v11031_v12, 1  ;;  %v16100_v12 = vld [vmem:[#allocation37_spill] sm:$0xff] }
 0x49c   : > { %1906 = vrot.lane.b32.xlu1 %v11025_v39, %s15890_s22  ;;  %3758 = vrot.lane.b32.xlu0 %v9247_v23, %s15888_s19  ;;  %v11054_v8 = vsel %vm16098_vm0, %v3183_v3, %v10619_v22 }
 0x49e   : > { %v1775_v29 = vpop.permute.xlu1 %1774 }
 0x49f   : > { %v11042_v21 = vsel %vm15667_vm12, %v1775_v29, %v10780_v32  ;;  %vm15673_vm12 = vcmp.eq.s32.totalorder %v11049_v20, 1  ;;  %v1935_v29 = vshra.s32 %v10026_v42, 4  ;;  %v3187_v3 = vpop.permute.xlu0 %3186 }
 0x4a0   : > { %1902 = vrot.lane.b32.xlu1 %v11042_v21, %s15890_s22  ;;  %3258 = vrot.lane.b32.xlu0 %v11037_v34, %s9662_s29 }
 0x4a2   : > { %v1787_v23 = vpop.permute.xlu1 %1786 }
 0x4a3   : > { %v11059_v32 = vsel %vm15670_vm13, %v1787_v23, %v10793_v62  ;;  %v11075_v62 = vand.u32 1, %v1935_v29  ;;  %v1933_v23 = vshra.s32 %v10029_v43, 4  ;;  %vm16101_vm13 = vnez %v16100_v12  ;;  %v9249_v29 = vld [vmem:[#allocation3 + $0x20] sm:$0xff]  }
 0x4a4   : > { %1914 = vrot.lane.b32.xlu1 %v11059_v32, %s15890_s22  ;;  %3262 = vrot.lane.b32.xlu0 %v11054_v8, %s9662_s29  ;;  %v11082_v56 = vsel %vm16101_vm13, %v10966_v36, %v10673_v7 }
 0x4a5   : > { %16099 = vst [vmem:[#allocation107_spill] sm:$0xff] %v11075_v62  ;;  %16102 = vst [vmem:[#allocation108_spill] sm:$0xff] %v11082_v56  ;;  %vm15675_vm10 = vcmp.eq.s32.totalorder %v11075_v62, 1  ;;  %v1812_v62 = vshra.s32 %v10196_v50, 3 }
 0x4a6   : > { %v1783_v33 = vpop.permute.xlu1 %1782 }
 0x4a7   : > { %v11070_v22 = vsel %vm15673_vm12, %v1783_v33, %v10811_v57  ;;  %v16103_v57 = vld [vmem:[#allocation40_spill] sm:$0xff] }
 0x4a8   : > { %1910 = vrot.lane.b32.xlu1 %v11070_v22, %s15890_s22  ;;  %3756 = vrot.lane.b32.xlu0 %v9248_v54, %s15888_s19  ;;  %vm16104_vm12 = vnez %v16103_v57  ;;  %v11094_v54 = vand.u32 1, %v1933_v23  ;;  %v16109_v23 = vld [vmem:[#allocation42_spill] sm:$0xff] }
 0x4a9   : > { %v11087_v33 = vsel %vm16104_vm12, %v3187_v3, %v10657_v16  ;;  %vm16125_vm12 = vcmask 261120  }
 0x4aa   : > { %v1891_v11 = vpop.permute.xlu1 %1890  ;;  %16105 = vst [vmem:[#allocation109_spill] sm:$0xff] %v11094_v54  ;;  %vm15676_vm13 = vcmp.eq.s32.totalorder %v11094_v54, 1 }
 0x4ab   : > { %v11099_v7 = vsel %vm15675_vm10, %v1891_v11, %v10828_v35  ;;  %v16106_v35 = vld [vmem:[#allocation41_spill] sm:$0xff] }
 0x4ac   : > { %3272 = vrot.lane.b32.xlu1 %v11082_v56, %s9662_s29  ;;  %3266 = vrot.lane.b32.xlu0 %v11087_v33, %s9662_s29  ;;  %vm16107_vm10 = vcmp.eq.s32.totalorder %v16106_v35, 1  ;;  %v1810_v35 = vshra.s32 %v10099_v5, 3  ;;  %v16168_v56 = vld [vmem:[#allocation56_spill] sm:$0xff] }
 0x4ad   : > { %v11116_v11 = vsel %vm16107_vm10, %v10978_v51, %v10717_v19  ;;  %v3191_v19 = vpop.permute.xlu0 %3190 }
 0x4ae   : > { %v1887_v36 = vpop.permute.xlu1 %1886  ;;  %16108 = vst [vmem:[#allocation110_spill] sm:$0xff] %v11116_v11  ;;  %v11132_v12 = vand.u32 1, %v1810_v35 }
 0x4af   : > { %v11107_v16 = vsel %vm15676_vm13, %v1887_v36, %v10836_v31  ;;  %vm16110_vm13 = vcmp.eq.s32.totalorder %v16109_v23, 1  ;;  %v9250_v36 = vld [vmem:[#allocation3 + $0x10] sm:$0xff]   ;;  %v1808_v23 = vshra.s32 %v10121_v14, 3 }
 0x4b0   : > { %2018 = vrot.lane.b32.xlu1 %v11099_v7, %s15888_s19  ;;  %16112 = vst [vmem:[#allocation112_spill] sm:$0xff] %v11132_v12  ;;  %vm15681_vm10 = vcmp.eq.s32.totalorder %v11132_v12, 1 }
 0x4b1   : > { %v11129_v51 = vpop.permute.xlu0 %3242 }
 0x4b2   : > { %v3249_v3 = vpop.permute.xlu1 %3248 }
 0x4b3   : > { %v11123_v31 = vsel %vm16110_vm13, %v3249_v3, %v10843_v10  ;;  %v11138_v3 = vand.u32 1, %v1808_v23 }
 0x4b4   : > { %2014 = vrot.lane.b32.xlu1 %v11107_v16, %s15888_s19  ;;  %16111 = vst [vmem:[#allocation111_spill] sm:$0xff] %v11123_v31 }
 0x4b5   : > { %v11135_v10 = vpop.permute.xlu0 %3246  ;;  %16113 = vst [vmem:[#allocation113_spill] sm:$0xff] %v11138_v3  ;;  %vm15686_vm13 = vcmp.eq.s32.totalorder %v11138_v3, 1 }
 0x4b8   : > { %3754 = vrot.lane.b32.xlu1 %v9249_v29, %s15888_s19  ;;  %v9251_v29 = vld [vmem:[#allocation3] sm:$0xff]  }
 0x4bc   : > { %3324 = vrot.lane.b32.xlu1 %v11116_v11, %s9663_s21 }
 0x4c0   : > { %3328 = vrot.lane.b32.xlu1 %v11123_v31, %s9663_s21  ;;  %v16122_v31 = vld [vmem:[#allocation38_spill] sm:$0xff] }
 0x4c4   : > { %3750 = vrot.lane.b32.xlu1 %v9250_v36, %s15888_s19  ;;  %v1814_v36 = vshra.s32 %v10149_v55, 3 }
 0x4c6   : > { %v11149_v35 = vand.u32 1, %v1814_v36 }
 0x4c8   : > { %3746 = vrot.lane.b32.xlu1 %v9251_v29, %s15888_s19  ;;  %16114 = vst [vmem:[#allocation114_spill] sm:$0xff] %v11149_v35 }
 0x4de   : > { %v11168_v30 = vpop.permute.xlu1 %3250 }
 0x4e2   : > { %v1769_v57 = vpop.permute.xlu0 %1768 }
 0x4e3   : > { %v11144_v29 = vsel %vm15681_vm10, %v1769_v57, %v10867_v53  ;;  %vm15691_vm10 = vcmp.eq.s32.totalorder %v11149_v35, 1  ;;  %v11160_v53 = vand.u32 1, %v1812_v62  ;;  %v1818_v57 = vshra.s32 %v10242_v4, 3 }
 0x4e4   : > { %1896 = vrot.lane.b32.xlu0 %v11144_v29, %s15890_s22  ;;  %v1816_v62 = vshra.s32 %v10277_v28, 3 }
 0x4e5   : > { %16115 = vst [vmem:[#allocation115_spill] sm:$0xff] %v11160_v53 }
 0x4e6   : > { %v1765_v54 = vpop.permute.xlu0 %1764  ;;  %v11181_v35 = vpop.permute.xlu1 %3256 }
 0x4e7   : > { %v11155_v23 = vsel %vm15686_vm13, %v1765_v54, %v10883_v40  ;;  %vm15694_vm13 = vcmp.eq.s32.totalorder %v11160_v53, 1  ;;  %v11173_v40 = vand.u32 1, %v1818_v57 }
 0x4e8   : > { %1892 = vrot.lane.b32.xlu0 %v11155_v23, %s15890_s22 }
 0x4e9   : > { %16116 = vst [vmem:[#allocation116_spill] sm:$0xff] %v11173_v40 }
 0x4ea   : > { %v1777_v20 = vpop.permute.xlu0 %1776  ;;  %v11200_v53 = vpop.permute.xlu1 %3260 }
 0x4eb   : > { %v11166_v36 = vsel %vm15691_vm10, %v1777_v20, %v10901_v1  ;;  %vm15699_vm10 = vcmp.eq.s32.totalorder %v11173_v40, 1  ;;  %v11186_v1 = vand.u32 1, %v1816_v62  ;;  %v1934_v20 = vshra.s32 %v10041_v49, 4 }
 0x4ec   : > { %1904 = vrot.lane.b32.xlu0 %v11166_v36, %s15890_s22 }
 0x4ed   : > { %16117 = vst [vmem:[#allocation117_spill] sm:$0xff] %v11186_v1 }
 0x4ee   : > { %v1773_v54 = vpop.permute.xlu0 %1772  ;;  %v11217_v40 = vpop.permute.xlu1 %3264 }
 0x4ef   : > { %v11179_v12 = vsel %vm15694_vm13, %v1773_v54, %v10919_v41  ;;  %vm15702_vm13 = vcmp.eq.s32.totalorder %v11186_v1, 1  ;;  %v11197_v41 = vand.u32 1, %v1934_v20  ;;  %v1932_v54 = vshra.s32 %v10016_v38, 4 }
 0x4f0   : > { %1900 = vrot.lane.b32.xlu0 %v11179_v12, %s15890_s22 }
 0x4f1   : > { %16118 = vst [vmem:[#allocation118_spill] sm:$0xff] %v11197_v41 }
 0x4f2   : > { %v1785_v57 = vpop.permute.xlu0 %1784 }
 0x4f3   : > { %v11192_v3 = vsel %vm15699_vm10, %v1785_v57, %v10937_v24  ;;  %vm15708_vm10 = vcmp.eq.s32.totalorder %v11197_v41, 1  ;;  %v11210_v24 = vand.u32 1, %v1932_v54  ;;  %v11233_v41 = vpop.permute.xlu1 %3268 }
 0x4f4   : > { %1912 = vrot.lane.b32.xlu0 %v11192_v3, %s15890_s22 }
 0x4f5   : > { %16119 = vst [vmem:[#allocation119_spill] sm:$0xff] %v11210_v24 }
 0x4f6   : > { %v1781_v62 = vpop.permute.xlu0 %1780 }
 0x4f7   : > { %v11205_v25 = vsel %vm15702_vm13, %v1781_v62, %v10950_v9  ;;  %vm15710_vm13 = vcmp.eq.s32.totalorder %v11210_v24, 1  ;;  %v1939_v9 = vshra.s32 %v10127_v18, 4  ;;  %v16127_v24 = vld [vmem:[#allocation44_spill] sm:$0xff] }
 0x4f8   : > { %1908 = vrot.lane.b32.xlu0 %v11205_v25, %s15890_s22  ;;  %vm16128_vm15 = vcmp.eq.s32.totalorder %v16127_v24, 1 }
 0x4fa   : > { %v1889_v57 = vpop.permute.xlu0 %1888 }
 0x4fb   : > { %v11215_v20 = vsel %vm15708_vm10, %v1889_v57, %v10960_v15  ;;  %v11230_v15 = vand.u32 1, %v1939_v9  ;;  %v1937_v57 = vshra.s32 %v10118_v13, 4  ;;  %vm16123_vm10 = vnez %v16122_v31 }
 0x4fc   : > { %2016 = vrot.lane.b32.xlu0 %v11215_v20, %s15888_s19  ;;  %v11240_v11 = vsel %vm16123_vm10, %v3191_v19, %v10655_v2  ;;  %v1943_v9 = vshra.s32 %v10145_v47, 4  ;;  %v11254_v31 = vsel %vm16128_vm15, %v11129_v51, %v10798_v17  ;;  %v16131_v17 = vld [vmem:[#allocation43_spill] sm:$0xff] }
 0x4fd   : > { %16120 = vst [vmem:[#allocation120_spill] sm:$0xff] %v11230_v15  ;;  %16124 = vst [vmem:[#allocation122_spill] sm:$0xff] %v11240_v11  ;;  %vm16132_vm15 = vcmp.eq.s32.totalorder %v16131_v17, 1 }
 0x4fe   : > { %v1885_v62 = vpop.permute.xlu0 %1884  ;;  %16129 = vst [vmem:[#allocation124_spill] sm:$0xff] %v11254_v31  ;;  %v11266_v19 = vand.u32 1, %v1943_v9  ;;  %v11273_v51 = vsel %vm16132_vm15, %v11135_v10, %v10816_v52  ;;  %v9252_v52 = vld [vmem:[#allocation3 + $0x18] sm:$0xff]  }
 0x4ff   : > { %v11226_v54 = vsel %vm15710_vm13, %v1885_v62, %v10971_v61  ;;  %vm15715_vm13 = vcmp.eq.s32.totalorder %v11230_v15, 1  ;;  %v11247_v61 = vand.u32 1, %v1937_v57  ;;  %v1941_v57 = vshra.s32 %v10158_v59, 4  ;;  %16133 = vst [vmem:[#allocation126_spill] sm:$0xff] %v11273_v51  ;;  %v9253_v15 = vld [vmem:[#allocation3 + $0x8] sm:$0xff]  }
 0x500   : > { %2012 = vrot.lane.b32.xlu0 %v11226_v54, %s15888_s19  ;;  %16130 = vst [vmem:[#allocation125_spill] sm:$0xff] %v11266_v19 }
 0x501   : > { %16126 = vst [vmem:[#allocation123_spill] sm:$0xff] %v11247_v61  ;;  %v11285_v9 = vand.u32 1, %v1941_v57 }
 0x502   : > { %v11235_v1 = vpop.permute.xlu0 %3760 }
 0x503   : > { %16121 = vst [vmem:[#allocation121_spill] sm:$0xff] %v11235_v1  ;;  %9077 = vmatprep.subr.msk.bf16.mxu1 %vm16125_vm12, %v11235_v1  ;;  %vm15777_vm12 = vcmp.eq.s32.totalorder %v11247_v61, 1  ;;  %16134 = vst [vmem:[#allocation127_spill] sm:$0xff] %v11285_v9  ;;  %vm15721_vm15 = vcmp.eq.s32.totalorder %v11285_v9, 1  ;;  %v1938_v9 = vshra.s32 %v10099_v5, 4 }
 0x504   : > { %3270 = vrot.lane.b32.xlu0 %v11240_v11, %s9662_s29 }
 0x506   : > { %v1899_v62 = vpop.permute.xlu1 %1898 }
 0x507   : > { %v11259_v2 = vsel %vm15715_vm13, %v1899_v62, %v10994_v0  ;;  %vm15720_vm13 = vcmp.eq.s32.totalorder %v11266_v19, 1  ;;  %v1947_v62 = vshra.s32 %v10207_v27, 4 }
 0x508   : > { %2026 = vrot.lane.b32.xlu1 %v11259_v2, %s15888_s19  ;;  %3322 = vrot.lane.b32.xlu0 %v11254_v31, %s9663_s21 }
 0x50a   : > { %v1895_v24 = vpop.permute.xlu1 %1894 }
 0x50b   : > { %v11278_v0 = vsel %vm15777_vm12, %v1895_v24, %v11012_v44  ;;  %v11297_v44 = vand.u32 1, %v1947_v62  ;;  %v1945_v24 = vshra.s32 %v10245_v26, 4 }
 0x50c   : > { %2022 = vrot.lane.b32.xlu1 %v11278_v0, %s15888_s19  ;;  %3326 = vrot.lane.b32.xlu0 %v11273_v51, %s9663_s21 }
 0x50d   : > { %16135 = vst [vmem:[#allocation128_spill] sm:$0xff] %v11297_v44 }
 0x50e   : > { %v1907_v17 = vpop.permute.xlu1 %1906 }
 0x50f   : > { %v11291_v10 = vsel %vm15720_vm13, %v1907_v17, %v11025_v39  ;;  %vm15722_vm13 = vcmp.eq.s32.totalorder %v11297_v44, 1  ;;  %v11309_v39 = vand.u32 1, %v1945_v24  ;;  %v9254_v17 = vld [vmem:[%s15469_s4 + $0x38] sm:$0xff]  }
 0x510   : > { %2034 = vrot.lane.b32.xlu1 %v11291_v10, %s15888_s19  ;;  %3752 = vrot.lane.b32.xlu0 %v9252_v52, %s15888_s19 }
 0x511   : > { %16136 = vst [vmem:[#allocation129_spill] sm:$0xff] %v11309_v39 }
 0x512   : > { %v1903_v57 = vpop.permute.xlu1 %1902 }
 0x513   : > { %v11303_v61 = vsel %vm15721_vm15, %v1903_v57, %v11042_v21  ;;  %vm15727_vm15 = vcmp.eq.s32.totalorder %v11309_v39, 1  ;;  %v2063_v21 = vshra.s32 %v10026_v42, 5  ;;  %v2061_v57 = vshra.s32 %v10029_v43, 5 }
 0x514   : > { %2030 = vrot.lane.b32.xlu1 %v11303_v61, %s15888_s19  ;;  %3748 = vrot.lane.b32.xlu0 %v9253_v15, %s15888_s19 }
 0x515   : > { %v11337_v44 = vand.u32 1, %v2061_v57 }
 0x516   : > { %v1915_v62 = vpop.permute.xlu1 %1914 }
 0x517   : > { %v11317_v52 = vsel %vm15722_vm13, %v1915_v62, %v11059_v32  ;;  %v11331_v32 = vand.u32 1, %v2063_v21  ;;  %16139 = vst [vmem:[#allocation132_spill] sm:$0xff] %v11337_v44 }
 0x518   : > { %2042 = vrot.lane.b32.xlu1 %v11317_v52, %s15888_s19  ;;  %4499 = vrot.lane.b32.xlu0 %v9254_v17, %s9666_s13 }
 0x519   : > { %16137 = vst [vmem:[#allocation130_spill] sm:$0xff] %v11331_v32  ;;  %vm15741_vm13 = vcmp.eq.s32.totalorder %v11331_v32, 1 }
 0x51a   : > { %v1911_v15 = vpop.permute.xlu1 %1910 }
 0x51b   : > { %v11327_v24 = vsel %vm15727_vm15, %v1911_v15, %v11070_v22  ;;  %vm15736_vm15 = vcmp.eq.s32.totalorder %v11337_v44, 1  ;;  %v11354_v15 = vpop.permute.xlu0 %3252  ;;  %v11367_v44 = vand.u32 1, %v1938_v9 }
 0x51c   : > { %2038 = vrot.lane.b32.xlu1 %v11327_v24, %s15888_s19 }
 0x51d   : > { %16142 = vst [vmem:[#allocation135_spill] sm:$0xff] %v11367_v44 }
 0x51e   : > { %v11334_v62 = vpop.permute.xlu1 %3272 }
 0x51f   : > { %16138 = vst [vmem:[#allocation131_spill] sm:$0xff] %v11334_v62  ;;  %v11356_v57 = vpop.permute.xlu0 %3254 }
 0x522   : > { %v2019_v17 = vpop.permute.xlu1 %2018 }
 0x523   : > { %v11342_v39 = vsel %vm15741_vm13, %v2019_v17, %v11099_v7  ;;  %v11358_v7 = vpop.permute.xlu0 %3758 }
 0x524   : > { %2146 = vrot.lane.b32.xlu1 %v11342_v39, %s9666_s13  ;;  %16140 = vst [vmem:[#allocation133_spill] sm:$0xff] %v11358_v7  ;;  %v1942_v7 = vshra.s32 %v10149_v55, 4 }
 0x526   : > { %v2015_v22 = vpop.permute.xlu1 %2014  ;;  %v11384_v9 = vand.u32 1, %v1942_v7 }
 0x527   : > { %v11350_v21 = vsel %vm15736_vm15, %v2015_v22, %v11107_v16  ;;  %v11360_v17 = vpop.permute.xlu0 %3258  ;;  %v1936_v16 = vshra.s32 %v10121_v14, 4  ;;  %vm15744_vm15 = vcmp.eq.s32.totalorder %v11367_v44, 1 }
 0x528   : > { %2142 = vrot.lane.b32.xlu1 %v11350_v21, %s9666_s13  ;;  %16144 = vst [vmem:[#allocation137_spill] sm:$0xff] %v11384_v9 }
 0x529   : > { %v11373_v1 = vand.u32 1, %v1936_v16 }
 0x52a   : > { %v11398_v44 = vpop.permute.xlu1 %3754 }
 0x52b   : > { %v11362_v32 = vpop.permute.xlu0 %3262  ;;  %16143 = vst [vmem:[#allocation136_spill] sm:$0xff] %v11373_v1  ;;  %vm15747_vm13 = vcmp.eq.s32.totalorder %v11373_v1, 1  ;;  %16146 = vst [vmem:[#allocation139_spill] sm:$0xff] %v11398_v44 }
 0x52e   : > { %v11416_v44 = vpop.permute.xlu1 %3324 }
 0x52f   : > { %v11364_v19 = vpop.permute.xlu0 %3756  ;;  %16148 = vst [vmem:[#allocation141_spill] sm:$0xff] %v11416_v44 }
 0x530   : > { %16141 = vst [vmem:[#allocation134_spill] sm:$0xff] %v11364_v19  ;;  %v1940_v19 = vshra.s32 %v10196_v50, 4 }
 0x533   : > { %v11370_v22 = vpop.permute.xlu0 %3266 }
 0x556   : > { %v1897_v51 = vpop.permute.xlu0 %1896 }
 0x557   : > { %v11379_v31 = vsel %vm15744_vm15, %v1897_v51, %v11144_v29  ;;  %vm15751_vm15 = vcmp.eq.s32.totalorder %v11384_v9, 1  ;;  %v11395_v29 = vand.u32 1, %v1940_v19  ;;  %v1946_v51 = vshra.s32 %v10242_v4, 4 }
 0x558   : > { %2024 = vrot.lane.b32.xlu0 %v11379_v31, %s15888_s19 }
 0x559   : > { %16145 = vst [vmem:[#allocation138_spill] sm:$0xff] %v11395_v29 }
 0x55a   : > { %v1893_v11 = vpop.permute.xlu0 %1892 }
 0x55b   : > { %v11390_v16 = vsel %vm15747_vm13, %v1893_v11, %v11155_v23  ;;  %vm15754_vm13 = vcmp.eq.s32.totalorder %v11395_v29, 1  ;;  %v11408_v11 = vand.u32 1, %v1946_v51  ;;  %v1944_v23 = vshra.s32 %v10277_v28, 4  ;;  %v11435_v29 = vpop.permute.xlu1 %3328 }
 0x55c   : > { %2020 = vrot.lane.b32.xlu0 %v11390_v16, %s15888_s19  ;;  %v2062_v51 = vshra.s32 %v10041_v49, 5  ;;  %16151 = vst [vmem:[#allocation144_spill] sm:$0xff] %v11435_v29 }
 0x55d   : > { %16147 = vst [vmem:[#allocation140_spill] sm:$0xff] %v11408_v11 }
 0x55e   : > { %v1905_v7 = vpop.permute.xlu0 %1904 }
 0x55f   : > { %v11403_v62 = vsel %vm15751_vm15, %v1905_v7, %v11166_v36  ;;  %vm15757_vm15 = vcmp.eq.s32.totalorder %v11408_v11, 1  ;;  %v11421_v36 = vand.u32 1, %v1944_v23  ;;  %v11452_v11 = vpop.permute.xlu1 %3750 }
 0x560   : > { %2032 = vrot.lane.b32.xlu0 %v11403_v62, %s15888_s19  ;;  %16153 = vst [vmem:[#allocation146_spill] sm:$0xff] %v11452_v11  ;;  %v2071_v11 = vshra.s32 %v10145_v47, 5 }
 0x561   : > { %16149 = vst [vmem:[#allocation142_spill] sm:$0xff] %v11421_v36 }
 0x562   : > { %v1901_v19 = vpop.permute.xlu0 %1900 }
 0x563   : > { %v11414_v1 = vsel %vm15754_vm13, %v1901_v19, %v11179_v12  ;;  %vm15760_vm13 = vcmp.eq.s32.totalorder %v11421_v36, 1  ;;  %v11432_v12 = vand.u32 1, %v2062_v51  ;;  %v2060_v19 = vshra.s32 %v10016_v38, 5 }
 0x564   : > { %2028 = vrot.lane.b32.xlu0 %v11414_v1, %s15888_s19 }
 0x565   : > { %16150 = vst [vmem:[#allocation143_spill] sm:$0xff] %v11432_v12 }
 0x566   : > { %v1913_v7 = vpop.permute.xlu0 %1912 }
 0x567   : > { %v11427_v9 = vsel %vm15757_vm15, %v1913_v7, %v11192_v3  ;;  %vm15763_vm15 = vcmp.eq.s32.totalorder %v11432_v12, 1  ;;  %v11445_v3 = vand.u32 1, %v2060_v19  ;;  %v11468_v12 = vpop.permute.xlu1 %3746 }
 0x568   : > { %2040 = vrot.lane.b32.xlu0 %v11427_v9, %s15888_s19  ;;  %16155 = vst [vmem:[#allocation148_spill] sm:$0xff] %v11468_v12 }
 0x569   : > { %16152 = vst [vmem:[#allocation145_spill] sm:$0xff] %v11445_v3 }
 0x56a   : > { %v1909_v23 = vpop.permute.xlu0 %1908 }
 0x56b   : > { %v11440_v44 = vsel %vm15760_vm13, %v1909_v23, %v11205_v25  ;;  %vm15767_vm13 = vcmp.eq.s32.totalorder %v11445_v3, 1  ;;  %v2067_v25 = vshra.s32 %v10127_v18, 5 }
 0x56c   : > { %2036 = vrot.lane.b32.xlu0 %v11440_v44, %s15888_s19 }
 0x56e   : > { %v2017_v7 = vpop.permute.xlu0 %2016 }
 0x56f   : > { %v11450_v51 = vsel %vm15763_vm15, %v2017_v7, %v11215_v20  ;;  %v11465_v20 = vand.u32 1, %v2067_v25  ;;  %v2065_v7 = vshra.s32 %v10118_v13, 5  ;;  %v11482_v25 = vand.u32 1, %v2071_v11 }
 0x570   : > { %2144 = vrot.lane.b32.xlu0 %v11450_v51, %s9666_s13 }
 0x571   : > { %16154 = vst [vmem:[#allocation147_spill] sm:$0xff] %v11465_v20  ;;  %vm15770_vm15 = vcmp.eq.s32.totalorder %v11465_v20, 1  ;;  %v11471_v36 = vand.u32 1, %v2065_v7  ;;  %16157 = vst [vmem:[#allocation150_spill] sm:$0xff] %v11482_v25 }
 0x572   : > { %v2013_v23 = vpop.permute.xlu0 %2012 }
 0x573   : > { %v11461_v19 = vsel %vm15767_vm13, %v2013_v23, %v11226_v54  ;;  %16156 = vst [vmem:[#allocation149_spill] sm:$0xff] %v11471_v36  ;;  %vm15773_vm13 = vcmp.eq.s32.totalorder %v11471_v36, 1  ;;  %v2069_v23 = vshra.s32 %v10158_v59, 5 }
 0x574   : > { %2140 = vrot.lane.b32.xlu0 %v11461_v19, %s9666_s13 }
 0x57a   : > { %v2027_v29 = vpop.permute.xlu1 %2026 }
 0x57b   : > { %v11477_v54 = vsel %vm15770_vm15, %v2027_v29, %v11259_v2  ;;  %vm15776_vm15 = vcmp.eq.s32.totalorder %v11482_v25, 1  ;;  %v11493_v2 = vand.u32 1, %v2069_v23  ;;  %v2075_v29 = vshra.s32 %v10207_v27, 5 }
 0x57c   : > { %2154 = vrot.lane.b32.xlu1 %v11477_v54, %s9666_s13 }
 0x57d   : > { %16158 = vst [vmem:[#allocation151_spill] sm:$0xff] %v11493_v2 }
 0x57e   : > { %v2023_v3 = vpop.permute.xlu1 %2022 }
 0x57f   : > { %v11488_v7 = vsel %vm15773_vm13, %v2023_v3, %v11278_v0  ;;  %vm15789_vm13 = vcmp.eq.s32.totalorder %v11493_v2, 1  ;;  %v11504_v0 = vand.u32 1, %v2075_v29  ;;  %v2073_v3 = vshra.s32 %v10245_v26, 5 }
 0x580   : > { %2150 = vrot.lane.b32.xlu1 %v11488_v7, %s9666_s13 }
 0x581   : > { %16159 = vst [vmem:[#allocation152_spill] sm:$0xff] %v11504_v0 }
 0x582   : > { %v2035_v20 = vpop.permute.xlu1 %2034 }
 0x583   : > { %v11499_v11 = vsel %vm15776_vm15, %v2035_v20, %v11291_v10  ;;  %vm15782_vm15 = vcmp.eq.s32.totalorder %v11504_v0, 1  ;;  %v11515_v10 = vand.u32 1, %v2073_v3  ;;  %v2191_v3 = vshra.s32 %v10026_v42, 6  ;;  %v11536_v0 = vpop.permute.xlu0 %3270 }
 0x584   : > { %2162 = vrot.lane.b32.xlu1 %v11499_v11, %s9666_s13  ;;  %16162 = vst [vmem:[#allocation155_spill] sm:$0xff] %v11536_v0 }
 0x585   : > { %16160 = vst [vmem:[#allocation153_spill] sm:$0xff] %v11515_v10  ;;  %vm15787_vm12 = vcmp.eq.s32.totalorder %v11515_v10, 1  ;;  %v11533_v2 = vand.u32 1, %v2191_v3 }
 0x586   : > { %v2031_v36 = vpop.permute.xlu1 %2030 }
 0x587   : > { %v11510_v23 = vsel %vm15789_vm13, %v2031_v36, %v11303_v61  ;;  %16161 = vst [vmem:[#allocation154_spill] sm:$0xff] %v11533_v2  ;;  %v11548_v3 = vpop.permute.xlu0 %3322 }
 0x588   : > { %2158 = vrot.lane.b32.xlu1 %v11510_v23, %s9666_s13 }
 0x58a   : > { %v2043_v20 = vpop.permute.xlu1 %2042 }
 0x58b   : > { %v11520_v29 = vsel %vm15782_vm15, %v2043_v20, %v11317_v52  ;;  %v2189_v52 = vshra.s32 %v10029_v43, 6  ;;  %vm15793_vm15 = vcmp.eq.s32.totalorder %v11533_v2, 1  ;;  %v16166_v43 = vld [vmem:[#allocation55_spill] sm:$0xff] }
 0x58c   : > { %2170 = vrot.lane.b32.xlu1 %v11520_v29, %s9666_s13 }
 0x58d   : > { %v11539_v25 = vand.u32 1, %v2189_v52  ;;  %v16167_v52 = vld [vmem:[#allocation10_spill] sm:$0xff] }
 0x58e   : > { %v2039_v61 = vpop.permute.xlu1 %2038 }
 0x58f   : > { %v11528_v36 = vsel %vm15787_vm12, %v2039_v61, %v11327_v24  ;;  %16163 = vst [vmem:[#allocation156_spill] sm:$0xff] %v11539_v25  ;;  %v16164_v61 = vlaneseq  ;;  %vm15801_vm12 = vcmp.eq.s32.totalorder %v11539_v25, 1  ;;  %v2070_v25 = vshra.s32 %v10149_v55, 5 }
 0x590   : > { %2166 = vrot.lane.b32.xlu1 %v11528_v36, %s9666_s13 }
 0x591   : > { %v11545_v10 = vand.u32 127, %v16164_v61  ;;  %v16169_v61 = vld [vmem:[#allocation11_spill] sm:$0xff] }
 0x593   : > { %16165 = vst [vmem:[#allocation157_spill] sm:$0xff] %v11545_v10  ;;  %vm15795_vm13 = vcmp.gt.s32.totalorder %v11545_v10, %v16167_v52  ;;  %v16173_v52 = vld [vmem:[#allocation78_spill] sm:$0xff] }
 0x596   : > { %v2147_v20 = vpop.permute.xlu1 %2146 }
 0x597   : > { %v2239_v24 = vsel %vm15793_vm15, %v2147_v20, %v11342_v39  ;;  %v11562_v20 = vpop.permute.xlu0 %3326  ;;  %vm15796_vm15 = vcmp.gt.s32.totalorder %v11545_v10, %v16169_v61 }
 0x598   : > { %v2362_v12 = vadd.f32 %v16166_v43, %v2239_v24  ;;  %v2064_v43 = vshra.s32 %v10121_v14, 5 }
 0x59a   : > { %v2143_v42 = vpop.permute.xlu1 %2142  ;;  %v11560_v39 = vsel %vm15795_vm13, -1e+09, %v2362_v12  ;;  %v2066_v12 = vshra.s32 %v10099_v5, 5  ;;  %vm16174_vm13 = vcmp.eq.s32.totalorder %v16173_v52, 1  ;;  %v11590_v61 = vand.u32 1, %v2064_v43 }
 0x59b   : > { %v2237_v0 = vsel %vm15801_vm12, %v2143_v42, %v11350_v21 }
 0x59c   : > { %v2354_v2 = vadd.f32 %v16168_v56, %v2237_v0  ;;  %v11573_v56 = vpop.permute.xlu0 %3752  ;;  %v11580_v42 = vand.u32 1, %v2066_v12  ;;  %16175 = vst [vmem:[#allocation159_spill] sm:$0xff] %v11590_v61 }
 0x59e   : > { %v11570_v21 = vsel %vm15796_vm15, -1e+09, %v2354_v2  ;;  %16172 = vst [vmem:[#allocation158_spill] sm:$0xff] %v11580_v42  ;;  %v11587_v2 = vsel %vm16174_vm13, %v11168_v30, %v10854_v48  ;;  %vm15808_vm15 = vcmp.eq.s32.totalorder %v11580_v42, 1  ;;  %vm15804_vm13 = vcmp.eq.s32.totalorder %v11590_v61, 1 }
 0x59f   : > { %v11603_v48 = vand.u32 1, %v2070_v25  ;;  %v2068_v30 = vshra.s32 %v10196_v50, 5 }
 0x5a0   : > { %v11575_v0 = vpop.permute.xlu0 %3748 }
 0x5a1   : > { %16170 = vst [vmem:[#allocation55_spill] sm:$0xff] %v11575_v0  ;;  %16176 = vst [vmem:[#allocation160_spill] sm:$0xff] %v11603_v48  ;;  %vm15807_vm12 = vcmp.eq.s32.totalorder %v11603_v48, 1 }
 0x5a4   : > { %v11578_v24 = vpop.permute.xlu0 %4499 }
 0x5a5   : > { %16171 = vst [vmem:[#allocation56_spill] sm:$0xff] %v11578_v24 }
 0x5b4   : > { %2453 = vmax.xlane.f32.xlu1 %v11560_v39 }
 0x5b8   : > { %2449 = vmax.xlane.f32.xlu1 %v11570_v21 }
 0x5c9   : > { %3330 = vrot.lane.b32.xlu1 %v11587_v2, %s9663_s21 }
 0x5ca   : > { %v2025_v24 = vpop.permute.xlu0 %2024 }
 0x5cb   : > { %v11598_v12 = vsel %vm15808_vm15, %v2025_v24, %v11379_v31  ;;  %v11614_v31 = vand.u32 1, %v2068_v30  ;;  %v2074_v24 = vshra.s32 %v10242_v4, 5 }
 0x5cc   : > { %2152 = vrot.lane.b32.xlu0 %v11598_v12, %s9666_s13 }
 0x5cd   : > { %16177 = vst [vmem:[#allocation161_spill] sm:$0xff] %v11614_v31 }
 0x5ce   : > { %v2021_v43 = vpop.permute.xlu0 %2020 }
 0x5cf   : > { %v11609_v52 = vsel %vm15804_vm13, %v2021_v43, %v11390_v16  ;;  %vm15819_vm13 = vcmp.eq.s32.totalorder %v11614_v31, 1  ;;  %v11625_v16 = vand.u32 1, %v2074_v24  ;;  %v2072_v43 = vshra.s32 %v10277_v28, 5 }
 0x5d0   : > { %2148 = vrot.lane.b32.xlu0 %v11609_v52, %s9666_s13 }
 0x5d1   : > { %16178 = vst [vmem:[#allocation162_spill] sm:$0xff] %v11625_v16 }
 0x5d2   : > { %v2033_v42 = vpop.permute.xlu0 %2032 }
 0x5d3   : > { %v11620_v25 = vsel %vm15807_vm12, %v2033_v42, %v11403_v62  ;;  %vm15811_vm12 = vcmp.eq.s32.totalorder %v11625_v16, 1  ;;  %v11636_v62 = vand.u32 1, %v2072_v43  ;;  %v2190_v43 = vshra.s32 %v10041_v49, 6 }
 0x5d4   : > { %2160 = vrot.lane.b32.xlu0 %v11620_v25, %s9666_s13 }
 0x5d5   : > { %16179 = vst [vmem:[#allocation163_spill] sm:$0xff] %v11636_v62  ;;  %vm15816_vm15 = vcmp.eq.s32.totalorder %v11636_v62, 1  ;;  %v11654_v31 = vand.u32 1, %v2190_v43  ;;  %v16183_v43 = vld [vmem:[#allocation12_spill] sm:$0xff] }
 0x5d6   : > { %v2029_v61 = vpop.permute.xlu0 %2028 }
 0x5d7   : > { %v11631_v30 = vsel %vm15819_vm13, %v2029_v61, %v11414_v1  ;;  %16180 = vst [vmem:[#allocation164_spill] sm:$0xff] %v11654_v31  ;;  %vm15827_vm13 = vcmp.gt.s32.totalorder %v11545_v10, %v16183_v43  ;;  %v2193_v43 = vshra.s32 %v10118_v13, 6 }
 0x5d8   : > { %2156 = vrot.lane.b32.xlu0 %v11631_v30, %s9666_s13 }
 0x5da   : > { %v2041_v42 = vpop.permute.xlu0 %2040 }
 0x5db   : > { %v11641_v24 = vsel %vm15811_vm12, %v2041_v42, %v11427_v9  ;;  %v2188_v9 = vshra.s32 %v10016_v38, 6  ;;  %vm15821_vm12 = vcmp.eq.s32.totalorder %v11654_v31, 1  ;;  %v16184_v38 = vld [vmem:[#allocation54_spill] sm:$0xff] }
 0x5dc   : > { %2168 = vrot.lane.b32.xlu0 %v11641_v24, %s9666_s13 }
 0x5dd   : > { %v11658_v16 = vand.u32 1, %v2188_v9 }
 0x5de   : > { %v2037_v1 = vpop.permute.xlu0 %2036 }
 0x5df   : > { %v11649_v61 = vsel %vm15816_vm15, %v2037_v1, %v11440_v44  ;;  %16181 = vst [vmem:[#allocation165_spill] sm:$0xff] %v11658_v16  ;;  %vm15822_vm15 = vcmp.eq.s32.totalorder %v11658_v16, 1  ;;  %v16182_v1 = vld [vmem:[#allocation53_spill] sm:$0xff] }
 0x5e0   : > { %2164 = vrot.lane.b32.xlu0 %v11649_v61, %s9666_s13 }
 0x5e2   : > { %v2145_v42 = vpop.permute.xlu0 %2144 }
 0x5e3   : > { %v2238_v62 = vsel %vm15821_vm12, %v2145_v42, %v11450_v51  ;;  %v16185_v51 = vld [vmem:[#allocation9_spill] sm:$0xff] }
 0x5e4   : > { %v2359_v48 = vadd.f32 %v16182_v1, %v2238_v62  ;;  %vm15828_vm12 = vcmp.gt.s32.totalorder %v11545_v10, %v16185_v51  ;;  %v2194_v1 = vshra.s32 %v10099_v5, 6  ;;  %v2199_v5 = vshra.s32 %v10145_v47, 6 }
 0x5e5   : > { %v2196_v47 = vshra.s32 %v10196_v50, 6 }
 0x5e6   : > { %v2141_v44 = vpop.permute.xlu0 %2140  ;;  %v11674_v9 = vsel %vm15827_vm13, -1e+09, %v2359_v48 }
 0x5e7   : > { %v2236_v49 = vsel %vm15822_vm15, %v2141_v44, %v11461_v19  ;;  %v16186_v19 = vld [vmem:[#allocation70_spill] sm:$0xff] }
 0x5e8   : > { %v2351_v0 = vadd.f32 %v16184_v38, %v2236_v49  ;;  %vm16187_vm15 = vcmp.eq.s32.totalorder %v16186_v19, 1  ;;  %v2195_v49 = vshra.s32 %v10127_v18, 6  ;;  %v11695_v38 = vand.u32 1, %v2194_v1  ;;  %v16192_v1 = vld [vmem:[#allocation17_spill] sm:$0xff] }
 0x5e9   : > { %v11689_v42 = vsel %vm16187_vm15, %v11354_v15, %v10989_v37  ;;  %v2198_v15 = vshra.s32 %v10149_v55, 6  ;;  %v11705_v19 = vand.u32 1, %v2193_v43  ;;  %v11721_v43 = vand.u32 1, %v2199_v5  ;;  %v16198_v5 = vld [vmem:[#allocation19_spill] sm:$0xff] }
 0x5ea   : > { %v11682_v62 = vsel %vm15828_vm12, -1e+09, %v2351_v0  ;;  %16188 = vst [vmem:[#allocation53_spill] sm:$0xff] %v11695_v38  ;;  %v2192_v0 = vshra.s32 %v10121_v14, 6  ;;  %v11699_v16 = vand.u32 1, %v2195_v49  ;;  %vm15835_vm15 = vcmp.eq.s32.totalorder %v11695_v38, 1 }
 0x5eb   : > { %16191 = vst [vmem:[#allocation167_spill] sm:$0xff] %v11705_v19  ;;  %v2203_v14 = vshra.s32 %v10207_v27, 6  ;;  %vm15836_vm12 = vcmp.gt.s32.totalorder %v11545_v10, %v16192_v1  ;;  %v11717_v55 = vand.u32 1, %v2198_v15  ;;  %16195 = vst [vmem:[#allocation168_spill] sm:$0xff] %v11721_v43  ;;  %v2197_v27 = vshra.s32 %v10158_v59, 6 }
 0x5ec   : > { %16189 = vst [vmem:[#allocation54_spill] sm:$0xff] %v11699_v16  ;;  %v11702_v37 = vand.u32 1, %v2192_v0  ;;  %v16193_v0 = vld [vmem:[#allocation57_spill] sm:$0xff]  ;;  %vm15840_vm13 = vcmp.gt.s32.totalorder %v11545_v10, %v16198_v5  ;;  %v2201_v59 = vshra.s32 %v10245_v26, 6  ;;  %vm16213_vm10 = vcmp.eq.s32.totalorder %v11721_v43, 1 }
 0x5ed   : > { %16194 = vst [vmem:[#allocation57_spill] sm:$0xff] %v11717_v55  ;;  %v11732_v15 = vand.u32 1, %v2203_v14 }
 0x5ee   : > { %v2155_v48 = vpop.permute.xlu1 %2154  ;;  %16190 = vst [vmem:[#allocation166_spill] sm:$0xff] %v11702_v37  ;;  %vm15837_vm9 = vcmp.eq.s32.totalorder %v11702_v37, 1 }
 0x5ef   : > { %16197 = vst [vmem:[#allocation169_spill] sm:$0xff] %v11732_v15  ;;  %vm16214_vm14 = vcmp.eq.s32.totalorder %v11732_v15, 1  ;;  %v16220_v15 = vld [vmem:[#allocation67_spill] sm:$0xff] }
 0x5f2   : > { %v2151_v44 = vpop.permute.xlu1 %2150 }
 0x5f6   : > { %v2163_v51 = vpop.permute.xlu1 %2162 }
 0x5fa   : > { %v2159_v49 = vpop.permute.xlu1 %2158 }
 0x5ff   : > { %2451 = vmax.xlane.f32.xlu0 %v11674_v9 }
 0x603   : > { %2447 = vmax.xlane.f32.xlu0 %v11682_v62 }
 0x619   : > { %3332 = vrot.lane.b32.xlu0 %v11689_v42, %s9663_s21 }
 0x63e   : > { %v2153_v18 = vpop.permute.xlu0 %2152 }
 0x63f   : > { %v2242_v13 = vsel %vm15835_vm15, %v2153_v18, %v11598_v12  ;;  %vm16196_vm15 = vcmp.eq.s32.totalorder %v11699_v16, 1 }
 0x640   : > { %v2375_v31 = vadd.f32 %v16193_v0, %v2242_v13  ;;  %v2243_v18 = vsel %vm16196_vm15, %v2155_v48, %v11477_v54  ;;  %v16199_v13 = vld [vmem:[#allocation58_spill] sm:$0xff]  ;;  %v11743_v0 = vand.u32 1, %v2196_v47  ;;  %v16201_v54 = vld [vmem:[#allocation20_spill] sm:$0xff]  ;;  %v16202_v48 = vld [vmem:[#allocation59_spill] sm:$0xff]  ;;  %vm16205_vm15 = vcmp.eq.s32.totalorder %v11717_v55, 1 }
 0x641   : > { %v2378_v14 = vadd.f32 %v16202_v48, %v2243_v18  ;;  %v2202_v48 = vshra.s32 %v10242_v4, 6  ;;  %v2247_v4 = vsel %vm16213_vm10, %v2163_v51, %v11499_v11  ;;  %v2200_v51 = vshra.s32 %v10277_v28, 6 }
 0x642   : > { %v2149_v38 = vpop.permute.xlu0 %2148  ;;  %v11727_v12 = vsel %vm15836_vm12, -1e+09, %v2375_v31  ;;  %16200 = vst [vmem:[#allocation58_spill] sm:$0xff] %v11743_v0  ;;  %vm16204_vm12 = vcmp.eq.s32.totalorder %v11705_v19, 1 }
 0x643   : > { %v2240_v50 = vsel %vm15837_vm9, %v2149_v38, %v11609_v52  ;;  %2459 = vmax.xlane.f32.xlu0 %v11727_v12  ;;  %v11749_v52 = vand.u32 1, %v2197_v27  ;;  %v2171_v38 = vpop.permute.xlu1 %2170  ;;  %v2241_v47 = vsel %vm16204_vm12, %v2151_v44, %v11488_v7  ;;  %v16206_v27 = vld [vmem:[#allocation22_spill] sm:$0xff]  ;;  %v16210_v44 = vld [vmem:[#allocation60_spill] sm:$0xff]  ;;  %v11800_v11 = vand.u32 1, %v2202_v48 }
 0x644   : > { %v2367_v31 = vadd.f32 %v16199_v13, %v2240_v50  ;;  %vm15844_vm9 = vcmp.gt.s32.totalorder %v11545_v10, %v16206_v27  ;;  %v11766_v50 = vand.u32 1, %v2201_v59  ;;  %v16208_v13 = vld [vmem:[#allocation61_spill] sm:$0xff]  ;;  %v16209_v7 = vld [vmem:[#allocation18_spill] sm:$0xff]  ;;  %v2370_v5 = vadd.f32 %v16210_v44, %v2241_v47 }
 0x645   : > { %16203 = vst [vmem:[#allocation59_spill] sm:$0xff] %v11749_v52  ;;  %v16212_v59 = vld [vmem:[#allocation25_spill] sm:$0xff]  ;;  %vm15851_vm12 = vcmp.eq.s32.totalorder %v11749_v52, 1  ;;  %v2251_v47 = vsel %vm16214_vm14, %v2171_v38, %v11520_v29  ;;  %16217 = vst [vmem:[#allocation61_spill] sm:$0xff] %v11800_v11  ;;  %v16219_v29 = vld [vmem:[#allocation63_spill] sm:$0xff]  ;;  %vm16221_vm10 = vcmp.gt.s32.totalorder %v11545_v10, %v16209_v7 }
 0x646   : > { %v2161_v37 = vpop.permute.xlu0 %2160  ;;  %v11754_v26 = vsel %vm15840_vm13, -1e+09, %v2367_v31  ;;  %16207 = vst [vmem:[#allocation170_spill] sm:$0xff] %v11766_v50  ;;  %vm15861_vm13 = vcmp.gt.s32.totalorder %v11545_v10, %v16212_v59  ;;  %v16218_v44 = vld [vmem:[#allocation21_spill] sm:$0xff]  ;;  %v2394_v38 = vadd.f32 %v16219_v29, %v2247_v4  ;;  %v2245_v28 = vsel %vm15851_vm12, %v2159_v49, %v11510_v23 }
 0x647   : > { %v2246_v18 = vsel %vm16205_vm15, %v2161_v37, %v11620_v25  ;;  %2455 = vmax.xlane.f32.xlu1 %v11754_v26  ;;  %vm16211_vm15 = vcmp.gt.s32.totalorder %v11545_v10, %v16201_v54  ;;  %vm15850_vm14 = vcmp.gt.s32.totalorder %v11545_v10, %v16218_v44 }
 0x648   : > { %v2391_v31 = vadd.f32 %v16208_v13, %v2246_v18  ;;  %v11777_v25 = vsel %vm16211_vm15, -1e+09, %v2378_v14  ;;  %vm16215_vm15 = vcmp.eq.s32.totalorder %v11743_v0, 1  ;;  %v2167_v18 = vpop.permute.xlu1 %2166  ;;  %v16216_v13 = vld [vmem:[#allocation62_spill] sm:$0xff]  ;;  %v11810_v0 = vsel %vm16221_vm10, -1e+09, %v2370_v5 }
 0x649   : > { %vm15860_vm10 = vcmp.eq.s32.totalorder %v11800_v11, 1  ;;  %v11828_v5 = vand.u32 1, %v2200_v51  ;;  %v11835_v23 = vsel %vm15850_vm14, -1e+09, %v2394_v38  ;;  %v16227_v51 = vld [vmem:[#allocation32_spill] sm:$0xff]  ;;  %v16228_v38 = vld [vmem:[#allocation65_spill] sm:$0xff] }
 0x64a   : > { %v2157_v55 = vpop.permute.xlu0 %2156  ;;  %v11782_v37 = vsel %vm15844_vm9, -1e+09, %v2391_v31  ;;  %vm15849_vm9 = vcmp.eq.s32.totalorder %v11766_v50, 1  ;;  %vm15853_vm14 = vcmp.gt.s32.totalorder %v11545_v10, %v16227_v51 }
 0x64b   : > { %v2244_v14 = vsel %vm16215_vm15, %v2157_v55, %v11631_v30  ;;  %2461 = vmax.xlane.f32.xlu1 %v11777_v25  ;;  %2467 = vmax.xlane.f32.xlu0 %v11782_v37  ;;  %v2410_v30 = vadd.f32 %v16220_v15, %v2251_v47  ;;  %v2249_v4 = vsel %vm15849_vm9, %v2167_v18, %v11528_v36  ;;  %v16222_v15 = vld [vmem:[#allocation28_spill] sm:$0xff]  ;;  %v16226_v18 = vld [vmem:[#allocation23_spill] sm:$0xff]  ;;  %vm15859_vm12 = vcmp.eq.s32.totalorder %v11828_v5, 1 }
 0x64c   : > { %v2383_v31 = vadd.f32 %v16216_v13, %v2244_v14  ;;  %vm15852_vm15 = vcmp.gt.s32.totalorder %v11545_v10, %v16222_v15  ;;  %16223 = vst [vmem:[#allocation60_spill] sm:$0xff] %v11828_v5  ;;  %v16224_v47 = vld [vmem:[#allocation64_spill] sm:$0xff]  ;;  %vm15854_vm9 = vcmp.gt.s32.totalorder %v11545_v10, %v16226_v18 }
 0x64d   : > { %v2386_v14 = vadd.f32 %v16224_v47, %v2245_v28  ;;  %v16225_v13 = vld [vmem:[#allocation68_spill] sm:$0xff]  ;;  %v11840_v36 = vsel %vm15852_vm15, -1e+09, %v2410_v30  ;;  %v16230_v47 = vld [vmem:[#allocation66_spill] sm:$0xff] }
 0x64e   : > { %v2169_v55 = vpop.permute.xlu0 %2168  ;;  %v11815_v48 = vsel %vm15861_vm13, -1e+09, %v2383_v31  ;;  %v2402_v31 = vadd.f32 %v16225_v13, %v2249_v4  ;;  %v16229_v4 = vld [vmem:[#allocation31_spill] sm:$0xff] }
 0x64f   : > { %2457 = vmax.xlane.f32.xlu1 %v11810_v0  ;;  %2463 = vmax.xlane.f32.xlu0 %v11815_v48  ;;  %v2250_v49 = vsel %vm15860_vm10, %v2169_v55, %v11641_v24  ;;  %v11856_v28 = vsel %vm15854_vm9, -1e+09, %v2386_v14  ;;  %vm15855_vm15 = vcmp.gt.s32.totalorder %v11545_v10, %v16229_v4 }
 0x650   : > { %v2407_v30 = vadd.f32 %v16228_v38, %v2250_v49  ;;  %v11861_v24 = vsel %vm15853_vm14, -1e+09, %v2402_v31  ;;  %v16231_v31 = vld [vmem:[#allocation35_spill] sm:$0xff]  ;;  %v16232_v49 = vld [vmem:[#allocation69_spill] sm:$0xff] }
 0x651   : > { %vm15856_vm14 = vcmp.gt.s32.totalorder %v11545_v10, %v16231_v31  ;;  %vm16233_vm9 = vcmp.eq.s32.totalorder %v16232_v49, 1  ;;  %v16234_v38 = vld [vmem:[#allocation77_spill] sm:$0xff] }
 0x652   : > { %v2165_v29 = vpop.permute.xlu0 %2164  ;;  %v11874_v14 = vsel %vm15855_vm15, -1e+09, %v2407_v30  ;;  %vm16235_vm15 = vcmp.eq.s32.totalorder %v16234_v38, 1 }
 0x653   : > { %2469 = vmax.xlane.f32.xlu1 %v11835_v23  ;;  %2477 = vmax.xlane.f32.xlu0 %v11840_v36  ;;  %v2248_v55 = vsel %vm15859_vm12, %v2165_v29, %v11649_v61  ;;  %v11889_v29 = vsel %vm16233_vm9, %v11181_v35, %v10878_v60  ;;  %v11897_v30 = vsel %vm16235_vm15, %v11356_v57, %v11007_v6  ;;  %v9255_v60 = vld [vmem:[%s15469_s4 + $0x30] sm:$0xff]   ;;  %v16240_v57 = vld [vmem:[#allocation72_spill] sm:$0xff] }
 0x654   : > { %v2399_v13 = vadd.f32 %v16230_v47, %v2248_v55  ;;  %v16236_v55 = vld [vmem:[#allocation80_spill] sm:$0xff]  ;;  %v16238_v6 = vld [vmem:[#allocation79_spill] sm:$0xff] }
 0x655   : > { %vm16239_vm9 = vcmp.eq.s32.totalorder %v16238_v6, 1  ;;  %v16263_v6 = vld [vmem:[#allocation144_spill] sm:$0xff] }
 0x656   : > { %v11882_v61 = vsel %vm15856_vm14, -1e+09, %v2399_v13  ;;  %vm16237_vm14 = vcmp.eq.s32.totalorder %v16236_v55, 1  ;;  %v11916_v35 = vsel %vm16239_vm9, %v11362_v32, %v11054_v8  ;;  %v16242_v8 = vld [vmem:[#allocation71_spill] sm:$0xff]  ;;  %v16244_v13 = vld [vmem:[#allocation74_spill] sm:$0xff] }
 0x657   : > { %2465 = vmax.xlane.f32.xlu1 %v11856_v28  ;;  %2473 = vmax.xlane.f32.xlu0 %v11861_v24  ;;  %v11903_v47 = vsel %vm16237_vm14, %v11360_v17, %v11037_v34  ;;  %v9256_v34 = vld [vmem:[%s15469_s4 + $0x28] sm:$0xff]   ;;  %vm16241_vm14 = vcmp.eq.s32.totalorder %v16240_v57, 1  ;;  %vm16243_vm15 = vcmp.eq.s32.totalorder %v16242_v8, 1  ;;  %vm16245_vm9 = vcmp.eq.s32.totalorder %v16244_v13, 1  ;;  %v16253_v57 = vld [vmem:[#allocation81_spill] sm:$0xff] }
 0x658   : > { %v11928_v17 = vsel %vm16241_vm14, %v11200_v53, %v10896_v58  ;;  %v11937_v32 = vsel %vm16243_vm15, %v11217_v40, %v10914_v63  ;;  %v2454_v58 = vpop.xlane.xlu1 %2453  ;;  %vm16246_vm14 = vcmp.eq.s32.totalorder %v10670_v45, 1  ;;  %v16247_v63 = vld [vmem:[#allocation108_spill] sm:$0xff]  ;;  %v16248_v40 = vld [vmem:[#allocation131_spill] sm:$0xff] }
 0x659   : > { %v11953_v53 = vsel %vm16246_vm14, %v11370_v22, %v11087_v33  ;;  %v16255_v33 = vld [vmem:[#allocation110_spill] sm:$0xff]  ;;  %v16256_v22 = vld [vmem:[#allocation141_spill] sm:$0xff]  ;;  %v16257_v45 = vld [vmem:[#allocation76_spill] sm:$0xff] }
 0x65a   : > { %vm16258_vm14 = vcmp.eq.s32.totalorder %v16257_v45, 1  ;;  %v16264_v45 = vld [vmem:[#allocation75_spill] sm:$0xff] }
 0x65b   : > { %2475 = vmax.xlane.f32.xlu1 %v11874_v14  ;;  %v11975_v55 = vsel %vm16258_vm14, %v16256_v22, %v16255_v33 }
 0x65f   : > { %2471 = vmax.xlane.f32.xlu1 %v11882_v61 }
 0x66d   : > { %3336 = vrot.lane.b32.xlu0 %v11889_v29, %s9663_s21 }
 0x670   : > { %3334 = vrot.lane.b32.xlu1 %v11897_v30, %s9663_s21 }
 0x671   : > { %3338 = vrot.lane.b32.xlu0 %v11903_v47, %s9663_s21 }
 0x674   : > { %4497 = vrot.lane.b32.xlu1 %v9255_v60, %s9666_s13  ;;  %v11943_v60 = vsel %vm16245_vm9, %v11233_v41, %v10932_v46  ;;  %v16251_v46 = vld [vmem:[#allocation122_spill] sm:$0xff]  ;;  %v16252_v41 = vld [vmem:[#allocation155_spill] sm:$0xff]  ;;  %vm16254_vm9 = vcmp.eq.s32.totalorder %v16253_v57, 1 }
 0x675   : > { %3342 = vrot.lane.b32.xlu0 %v11916_v35, %s9663_s21  ;;  %v11969_v8 = vsel %vm16254_vm9, %v16252_v41, %v16251_v46  ;;  %v16262_v41 = vld [vmem:[#allocation111_spill] sm:$0xff]  ;;  %vm16265_vm9 = vcmp.eq.s32.totalorder %v16264_v45, 1 }
 0x676   : > { %v11992_v33 = vsel %vm16265_vm9, %v16263_v6, %v16262_v41 }
 0x678   : > { %3340 = vrot.lane.b32.xlu1 %v11928_v17, %s9663_s21 }
 0x679   : > { %4495 = vrot.lane.b32.xlu0 %v9256_v34, %s9666_s13  ;;  %v16249_v34 = vld [vmem:[#allocation73_spill] sm:$0xff] }
 0x67a   : > { %vm16250_vm15 = vcmp.eq.s32.totalorder %v16249_v34, 1  ;;  %v16260_v34 = vld [vmem:[#allocation84_spill] sm:$0xff] }
 0x67b   : > { %v11959_v13 = vsel %vm16250_vm15, %v16248_v40, %v16247_v63  ;;  %v2450_v63 = vpop.xlane.xlu1 %2449  ;;  %v16259_v40 = vld [vmem:[#allocation124_spill] sm:$0xff]  ;;  %vm16261_vm15 = vcmp.eq.s32.totalorder %v16260_v34, 1 }
 0x67c   : > { %3344 = vrot.lane.b32.xlu1 %v11937_v32, %s9663_s21  ;;  %v11985_v57 = vsel %vm16261_vm15, %v11548_v3, %v16259_v40  ;;  %v2480_v46 = vsub.f32 %v11570_v21, %v2450_v63  ;;  %v9257_v3 = vld [vmem:[%s15469_s4 + $0x18] sm:$0xff]   ;;  %v2482_v21 = vsub.f32 %v11560_v39, %v2454_v58  ;;  %v16266_v63 = vld [vmem:[#allocation126_spill] sm:$0xff]  ;;  %v16267_v40 = vld [vmem:[#allocation83_spill] sm:$0xff] }
 0x67d   : > { %3348 = vrot.lane.b32.xlu0 %v11943_v60, %s9663_s21  ;;  %vm16268_vm14 = vcmp.eq.s32.totalorder %v16267_v40, 1  ;;  %v9259_v39 = vld [vmem:[%s15469_s4 + $0x8] sm:$0xff]  }
 0x67e   : > { %v12007_v6 = vsel %vm16268_vm14, %v11562_v20, %v16266_v63  ;;  %v2497_v41 = vmul.f32 1.442695, %v2480_v46  ;;  %v2501_v20 = vmul.f32 1.442695, %v2482_v21  ;;  %v16271_v21 = vld [vmem:[#allocation86_spill] sm:$0xff]  ;;  %vm16278_vm14 = vcmask 261120  }
 0x67f   : > { %v3331_v46 = vpop.permute.xlu1 %3330  ;;  %vm16272_vm9 = vcmp.eq.s32.totalorder %v16271_v21, 1 }
 0x680   : > { %3346 = vrot.lane.b32.xlu1 %v11953_v53, %s9663_s21  ;;  %9342 = vpow2.f32 %v2497_v41 }
 0x681   : > { %3352 = vrot.lane.b32.xlu0 %v11959_v13, %s9663_s21 }
 0x684   : > { %3350 = vrot.lane.b32.xlu1 %v11969_v8, %s9663_s21 }
 0x685   : > { %3404 = vrot.lane.b32.xlu0 %v11975_v55, %s9664_s23 }
 0x688   : > { %3402 = vrot.lane.b32.xlu1 %v11985_v57, %s9664_s23  ;;  %v2452_v22 = vpop.xlane.xlu0 %2451 }
 0x689   : > { %v2481_v49 = vsub.f32 %v11674_v9, %v2452_v22  ;;  %3408 = vrot.lane.b32.xlu0 %v11992_v33, %s9664_s23  ;;  %v9258_v22 = vld [vmem:[%s15469_s4 + $0x20] sm:$0xff]  }
 0x68b   : > { %v2499_v45 = vmul.f32 1.442695, %v2481_v49  ;;  %v9260_v49 = vld [vmem:[%s15469_s4 + $0x10] sm:$0xff]  }
 0x68c   : > { %3406 = vrot.lane.b32.xlu1 %v12007_v6, %s9664_s23  ;;  %v2448_v9 = vpop.xlane.xlu0 %2447 }
 0x68d   : > { %v2479_v34 = vsub.f32 %v11682_v62, %v2448_v9  ;;  %4491 = vrot.lane.b32.xlu0 %v9257_v3, %s9666_s13  ;;  %9344 = vpow2.f32 %v2499_v45  ;;  %v16269_v62 = vld [vmem:[#allocation94_spill] sm:$0xff]  ;;  %v9261_v45 = vld [vmem:[%s15469_s4] sm:$0xff]   ;;  %v12041_v41 = vpop.eup %9342 }
 0x68e   : > { %vm16270_vm15 = vcmp.eq.s32.totalorder %v16269_v62, 1  ;;  %16273 = vst [vmem:[#allocation62_spill] sm:$0xff] %v12041_v41 }
 0x68f   : > { %v2495_v58 = vmul.f32 1.442695, %v2479_v34  ;;  %v12027_v3 = vsel %vm16270_vm15, %v3331_v46, %v11587_v2  ;;  %vm16280_vm15 = vmmov %vm16278_vm14 }
 0x690   : > { %4493 = vrot.lane.b32.xlu1 %v9258_v22, %s9666_s13  ;;  %v3333_v34 = vpop.permute.xlu0 %3332 }
 0x691   : > { %9346 = vpow2.f32 %v2495_v58  ;;  %4487 = vrot.lane.b32.xlu0 %v9259_v39, %s9666_s13  ;;  %v12039_v63 = vsel %vm16272_vm9, %v3333_v34, %v11689_v42  ;;  %v16277_v42 = vld [vmem:[#allocation121_spill] sm:$0xff]  ;;  %vm16281_vm9 = vmmov %vm16278_vm14 }
 0x692   : > { %9348 = vpow2.f32 %v2501_v20  ;;  %v3784_v58 = vsel %vm16278_vm14, %v16277_v42, 0  ;;  %vm16283_vm12 = vmmov %vm16281_vm9  ;;  %v3772_v42 = vsel %vm16281_vm9, %v11573_v56, 0 }
 0x693   : > { %vm16284_vm10 = vmmov %vm16281_vm9 }
 0x694   : > { %4489 = vrot.lane.b32.xlu1 %v9260_v49, %s9666_s13  ;;  %v16279_v49 = vld [vmem:[#allocation133_spill] sm:$0xff]  ;;  %vm16286_vm13 = vmmov %vm16281_vm9 }
 0x695   : > { %3410 = vrot.lane.b32.xlu0 %v12027_v3, %s9664_s23  ;;  %v3781_v46 = vsel %vm16281_vm9, %v16279_v49, 0  ;;  %vm16287_vm14 = vmmov %vm16281_vm9 }
 0x698   : > { %4485 = vrot.lane.b32.xlu1 %v9261_v45, %s9666_s13  ;;  %v16282_v45 = vld [vmem:[#allocation134_spill] sm:$0xff] }
 0x699   : > { %v3778_v34 = vsel %vm16284_vm10, %v16282_v45, 0  ;;  %vm16291_vm10 = vmmov %vm16281_vm9 }
 0x69a   : > { %v12045_v2 = vpop.eup %9344 }
 0x69b   : > { %16274 = vst [vmem:[#allocation63_spill] sm:$0xff] %v12045_v2 }
 0x69c   : > { %3412 = vrot.lane.b32.xlu1 %v12039_v63, %s9664_s23 }
 0x69e   : > { %v12047_v9 = vpop.eup %9346 }
 0x69f   : > { %16275 = vst [vmem:[#allocation67_spill] sm:$0xff] %v12047_v9  ;;  %v12049_v22 = vpop.eup %9348  ;;  %v2575_v39 = vpack.c.bf16 %v12041_v41, %v12047_v9 }
 0x6a0   : > { %16276 = vst [vmem:[#allocation64_spill] sm:$0xff] %v12049_v22  ;;  %v2576_v20 = vpack.c.bf16 %v12049_v22, %v12045_v2 }
 0x6a1   : > { %8717 = vmatprep.mubr.bf16.mxu1 %v2575_v39  ;;  %v16285_v39 = vld [vmem:[#allocation139_spill] sm:$0xff] }
 0x6a2   : > { %8718 = vmatmul.mubr.bf16.vlgmr.msra.gmra.mxu1 %v2576_v20  ;;  %v3775_v20 = vsel %vm16287_vm14, %v16285_v39, 0  ;;  %vm16294_vm14 = vmmov %vm16281_vm9 }
 0x6a3   : > { %8766 = vmatpush3.bf16.xpose.msra.mxu1 %v3784_v58  ;;  %v16289_v58 = vld [vmem:[#allocation146_spill] sm:$0xff] }
 0x6a4   : > { %9078 = vmatprep.subr.msk.bf16.mxu1 %vm16280_vm15, %v16279_v49  ;;  %vm16288_vm15 = vmmov %vm16281_vm9  ;;  %v3769_v49 = vsel %vm16291_vm10, %v16289_v58, 0 }
 0x6ab   : > { %8768 = vmatpush3.bf16.xpose.msra.mxu1 %v3781_v46  ;;  %v16292_v46 = vld [vmem:[#allocation55_spill] sm:$0xff] }
 0x6ac   : > { %9079 = vmatprep.subr.msk.bf16.mxu1 %vm16283_vm12, %v16282_v45  ;;  %vm16290_vm12 = vmmov %vm16281_vm9 }
 0x6b3   : > { %8770 = vmatpush3.bf16.xpose.msra.mxu1 %v3778_v34 }
 0x6b4   : > { %9080 = vmatprep.subr.msk.bf16.mxu1 %vm16286_vm13, %v16285_v39  ;;  %vm16293_vm13 = vmmov %vm16281_vm9  ;;  %v3766_v39 = vsel %vm16294_vm14, %v16292_v46, 0 }
 0x6bb   : > { %8772 = vmatpush3.bf16.xpose.msra.mxu1 %v3775_v20 }
 0x6bc   : > { %9081 = vmatprep.subr.msk.bf16.mxu1 %vm16288_vm15, %v11573_v56  ;;  %v16295_v56 = vld [vmem:[#allocation148_spill] sm:$0xff]  ;;  %vm16296_vm15 = vmmov %vm16281_vm9 }
 0x6c3   : > { %8774 = vmatpush3.bf16.xpose.msra.mxu1 %v3772_v42 }
 0x6c4   : > { %9082 = vmatprep.subr.msk.bf16.mxu1 %vm16290_vm12, %v16289_v58  ;;  %vm16298_vm12 = vmmov %vm16281_vm9 }
 0x6cb   : > { %8776 = vmatpush3.bf16.xpose.msra.mxu1 %v3769_v49 }
 0x6cc   : > { %9083 = vmatprep.subr.msk.bf16.mxu1 %vm16293_vm13, %v16292_v46  ;;  %v2460_v45 = vpop.xlane.xlu0 %2459 }
 0x6cd   : > { %v2485_v58 = vsub.f32 %v11727_v12, %v2460_v45 }
 0x6cf   : > { %v2507_v40 = vmul.f32 1.442695, %v2485_v58 }
 0x6d0   : > { %v2456_v34 = vpop.xlane.xlu1 %2455 }
 0x6d1   : > { %v2483_v20 = vsub.f32 %v11754_v26, %v2456_v34  ;;  %v3763_v26 = vsel %vm16281_vm9, %v16295_v56, 0 }
 0x6d3   : > { %8778 = vmatpush3.bf16.xpose.msra.mxu1 %v3766_v39  ;;  %v2503_v49 = vmul.f32 1.442695, %v2483_v20  ;;  %v16297_v39 = vld [vmem:[#allocation56_spill] sm:$0xff] }
 0x6d4   : > { %9084 = vmatprep.subr.msk.bf16.mxu1 %vm16296_vm15, %v16295_v56  ;;  %v2462_v42 = vpop.xlane.xlu1 %2461  ;;  %v2468_v22 = vpop.xlane.xlu0 %2467 }
 0x6d5   : > { %v2486_v41 = vsub.f32 %v11777_v25, %v2462_v42  ;;  %9350 = vpow2.f32 %v2503_v49 }
 0x6d7   : > { %v2509_v2 = vmul.f32 1.442695, %v2486_v41 }
 0x6d8   : > { %v2458_v9 = vpop.xlane.xlu1 %2457  ;;  %v2464_v21 = vpop.xlane.xlu0 %2463 }
 0x6d9   : > { %v2484_v62 = vsub.f32 %v11810_v0, %v2458_v9  ;;  %v2487_v34 = vsub.f32 %v11815_v48, %v2464_v21  ;;  %9352 = vpow2.f32 %v2509_v2  ;;  %v2489_v0 = vsub.f32 %v11782_v37, %v2468_v22 }
 0x6db   : > { %v2505_v46 = vmul.f32 1.442695, %v2484_v62  ;;  %8780 = vmatpush3.bf16.xpose.msra.mxu1 %v3763_v26  ;;  %v2511_v9 = vmul.f32 1.442695, %v2487_v34  ;;  %v2515_v48 = vmul.f32 1.442695, %v2489_v0 }
 0x6dc   : > { %9085 = vmatprep.subr.msk.bf16.mxu1 %vm16298_vm12, %v16297_v39  ;;  %v2470_v12 = vpop.xlane.xlu1 %2469  ;;  %v2478_v25 = vpop.xlane.xlu0 %2477  ;;  %v9262_v34 = vld [vmem:[#allocation2 + $0x8] sm:$0xff]  }
 0x6dd   : > { %9354 = vpow2.f32 %v2505_v46  ;;  %v2490_v41 = vsub.f32 %v11835_v23, %v2470_v12  ;;  %v2494_v22 = vsub.f32 %v11840_v36, %v2478_v25 }
 0x6de   : > { %9356 = vpow2.f32 %v2507_v40  ;;  %v16299_v40 = vld [vmem:[#allocation85_spill] sm:$0xff] }
 0x6df   : > { %v2517_v45 = vmul.f32 1.442695, %v2490_v41  ;;  %9358 = vpow2.f32 %v2511_v9  ;;  %vm16300_vm10 = vcmp.eq.s32.totalorder %v16299_v40, 1 }
 0x6e0   : > { %v2466_v20 = vpop.xlane.xlu1 %2465  ;;  %v2474_v56 = vpop.xlane.xlu0 %2473 }
 0x6e1   : > { %v2488_v62 = vsub.f32 %v11856_v28, %v2466_v20  ;;  %v2492_v2 = vsub.f32 %v11861_v24, %v2474_v56  ;;  %9360 = vpow2.f32 %v2517_v45 }
 0x6e2   : > { %v12105_v49 = vpop.eup %9350 }
 0x6e3   : > { %v2513_v21 = vmul.f32 1.442695, %v2488_v62  ;;  %v2521_v28 = vmul.f32 1.442695, %v2492_v2  ;;  %16301 = vst [vmem:[#allocation68_spill] sm:$0xff] %v12105_v49  ;;  %v9263_v2 = vld [vmem:[#allocation2] sm:$0xff]  }
 0x6e4   : > { %v2476_v42 = vpop.xlane.xlu1 %2475  ;;  %v3337_v58 = vpop.permute.xlu0 %3336 }
 0x6e5   : > { %9362 = vpow2.f32 %v2513_v21  ;;  %v2493_v23 = vsub.f32 %v11874_v14, %v2476_v42  ;;  %v12100_v37 = vsel %vm16300_vm10, %v3337_v58, %v11889_v29  ;;  %v2525_v29 = vmul.f32 1.442695, %v2494_v22 }
 0x6e6   : > { %9364 = vpow2.f32 %v2515_v48  ;;  %3416 = vrot.lane.b32.xlu1 %v12100_v37, %s9664_s23  ;;  %v12107_v12 = vpop.eup %9352 }
 0x6e7   : > { %v2523_v24 = vmul.f32 1.442695, %v2493_v23  ;;  %16302 = vst [vmem:[#allocation65_spill] sm:$0xff] %v12107_v12  ;;  %9366 = vpow2.f32 %v2521_v28 }
 0x6e8   : > { %v2472_v26 = vpop.xlane.xlu1 %2471  ;;  %v3339_v46 = vpop.permute.xlu0 %3338 }
 0x6e9   : > { %v2491_v14 = vsub.f32 %v11882_v61, %v2472_v26  ;;  %9368 = vpow2.f32 %v2523_v24  ;;  %v16305_v61 = vld [vmem:[#allocation93_spill] sm:$0xff]  ;;  %v16311_v26 = vld [vmem:[#allocation88_spill] sm:$0xff] }
 0x6ea   : > { %v12110_v41 = vpop.eup %9354  ;;  %4431 = vrot.lane.b32.xlu1 %v9262_v34, %s9666_s13  ;;  %vm16306_vm13 = vcmp.eq.s32.totalorder %v16305_v61, 1  ;;  %vm16312_vm14 = vcmp.eq.s32.totalorder %v16311_v26, 1 }
 0x6eb   : > { %16303 = vst [vmem:[#allocation66_spill] sm:$0xff] %v12110_v41  ;;  %v12113_v36 = vpop.eup %9356  ;;  %v2519_v25 = vmul.f32 1.442695, %v2491_v14  ;;  %v2577_v0 = vpack.c.bf16 %v12110_v41, %v12105_v49  ;;  %v16313_v14 = vld [vmem:[#allocation96_spill] sm:$0xff]  ;;  %v16355_v49 = vld [vmem:[#allocation51_spill] sm:$0xff] }
 0x6ec   : > { %16304 = vst [vmem:[#allocation77_spill] sm:$0xff] %v12113_v36  ;;  %v3335_v9 = vpop.permute.xlu1 %3334  ;;  %v3343_v45 = vpop.permute.xlu0 %3342  ;;  %v2578_v20 = vpack.c.bf16 %v12107_v12, %v12113_v36  ;;  %vm16314_vm15 = vcmp.eq.s32.totalorder %v16313_v14, 1  ;;  %v9266_v36 = vld [vmem:[#allocation2 + $0x20] sm:$0xff]  }
 0x6ed   : > { %9370 = vpow2.f32 %v2519_v25  ;;  %v12122_v56 = vsel %vm16306_vm13, %v3335_v9, %v11897_v30  ;;  %8721 = vmatprep.mubr.bf16.mxu1 %v2577_v0  ;;  %v12126_v62 = vpop.eup %9358 }
 0x6ee   : > { %9372 = vpow2.f32 %v2525_v29  ;;  %3414 = vrot.lane.b32.xlu0 %v12122_v56, %s9664_s23  ;;  %8722 = vmatmul.mubr.bf16.gmra.mxu1 %v2578_v20  ;;  %16307 = vst [vmem:[#allocation108_spill] sm:$0xff] %v12126_v62  ;;  %v12132_v42 = vpop.eup %9360  ;;  %v12151_v29 = vsel %vm16314_vm15, %v3339_v46, %v11903_v47  ;;  %v16320_v46 = vld [vmem:[#allocation95_spill] sm:$0xff] }
 0x6ef   : > { %16308 = vst [vmem:[#allocation131_spill] sm:$0xff] %v12132_v42  ;;  %vm16321_vm12 = vcmp.eq.s32.totalorder %v16320_v46, 1 }
 0x6f0   : > { %v12128_v48 = vpop.permute.xlu1 %4497  ;;  %v12130_v21 = vpop.permute.xlu0 %4495 }
 0x6f2   : > { %v12134_v58 = vpop.eup %9362  ;;  %4429 = vrot.lane.b32.xlu0 %v9263_v2, %s9666_s13 }
 0x6f3   : > { %16309 = vst [vmem:[#allocation122_spill] sm:$0xff] %v12134_v58  ;;  %v12137_v30 = vpop.eup %9364  ;;  %v2579_v23 = vpack.c.bf16 %v12134_v58, %v12126_v62 }
 0x6f4   : > { %16310 = vst [vmem:[#allocation155_spill] sm:$0xff] %v12137_v30  ;;  %v3341_v22 = vpop.permute.xlu1 %3340  ;;  %v3349_v28 = vpop.permute.xlu0 %3348  ;;  %v2580_v24 = vpack.c.bf16 %v12132_v42, %v12137_v30  ;;  %v16323_v42 = vld [vmem:[#allocation90_spill] sm:$0xff]  ;;  %v16347_v30 = vld [vmem:[#allocation48_spill] sm:$0xff] }
 0x6f5   : > { %v12146_v34 = vsel %vm16312_vm14, %v3341_v22, %v11928_v17  ;;  %8725 = vmatprep.mubr.bf16.mxu1 %v2579_v23  ;;  %v12157_v25 = vpop.eup %9366  ;;  %v16317_v17 = vld [vmem:[#allocation87_spill] sm:$0xff]  ;;  %v12171_v23 = vsel %vm16321_vm12, %v3343_v45, %v11916_v35  ;;  %vm16324_vm10 = vcmp.eq.s32.totalorder %v16323_v42, 1  ;;  %v16325_v45 = vld [vmem:[#allocation98_spill] sm:$0xff]  ;;  %vm16328_vm14 = vcmask 261120  }
 0x6f6   : > { %8726 = vmatmul.mubr.bf16.gmra.mxu1 %v2580_v24  ;;  %3420 = vrot.lane.b32.xlu1 %v12146_v34, %s9664_s23  ;;  %16315 = vst [vmem:[#allocation110_spill] sm:$0xff] %v12157_v25  ;;  %v12159_v9 = vpop.eup %9368  ;;  %vm16318_vm9 = vcmp.eq.s32.totalorder %v16317_v17, 1  ;;  %v12186_v35 = vsel %vm16324_vm10, %v3349_v28, %v11943_v60  ;;  %vm16326_vm13 = vcmp.eq.s32.totalorder %v16325_v45, 1  ;;  %v16329_v60 = vld [vmem:[#allocation89_spill] sm:$0xff] }
 0x6f7   : > { %3418 = vrot.lane.b32.xlu0 %v12151_v29, %s9664_s23  ;;  %16316 = vst [vmem:[#allocation141_spill] sm:$0xff] %v12159_v9  ;;  %vm16330_vm15 = vcmp.eq.s32.totalorder %v16329_v60, 1  ;;  %v16479_v60 = vld [vmem:[#allocation164_spill] sm:$0xff] }
 0x6f8   : > { %v3345_v0 = vpop.permute.xlu1 %3344  ;;  %v3353_v2 = vpop.permute.xlu0 %3352 }
 0x6f9   : > { %v12164_v20 = vsel %vm16318_vm9, %v3345_v0, %v11937_v32  ;;  %v12202_v28 = vsel %vm16330_vm15, %v3353_v2, %v11959_v13  ;;  %v16335_v13 = vld [vmem:[#allocation100_spill] sm:$0xff] }
 0x6fa   : > { %v12166_v47 = vpop.eup %9370  ;;  %3424 = vrot.lane.b32.xlu1 %v12164_v20, %s9664_s23  ;;  %vm16336_vm10 = vcmp.eq.s32.totalorder %v16335_v13, 1 }
 0x6fb   : > { %16319 = vst [vmem:[#allocation124_spill] sm:$0xff] %v12166_v47  ;;  %v12175_v22 = vpop.eup %9372  ;;  %3422 = vrot.lane.b32.xlu0 %v12171_v23, %s9664_s23  ;;  %v2581_v32 = vpack.c.bf16 %v12157_v25, %v12166_v47  ;;  %v9264_v47 = vld [vmem:[#allocation2 + $0x10] sm:$0xff]  }
 0x6fc   : > { %16322 = vst [vmem:[#allocation111_spill] sm:$0xff] %v12175_v22  ;;  %v3347_v24 = vpop.permute.xlu1 %3346  ;;  %v2582_v0 = vpack.c.bf16 %v12175_v22, %v12159_v9  ;;  %v3405_v25 = vpop.permute.xlu0 %3404  ;;  %v16327_v22 = vld [vmem:[#allocation45_spill] sm:$0xff]  ;;  %v9265_v9 = vld [vmem:[#allocation2 + $0x18] sm:$0xff]  }
 0x6fd   : > { %v12191_v58 = vsel %vm16326_vm13, %v3347_v24, %v11953_v53  ;;  %8729 = vmatprep.mubr.bf16.mxu1 %v2581_v32  ;;  %v16331_v53 = vld [vmem:[#allocation97_spill] sm:$0xff]  ;;  %vm16338_vm13 = vmmov %vm16328_vm14 }
 0x6fe   : > { %8730 = vmatmul.mubr.bf16.gmra.mxu1 %v2582_v0  ;;  %3428 = vrot.lane.b32.xlu1 %v12186_v35, %s9664_s23  ;;  %vm16332_vm9 = vcmp.eq.s32.totalorder %v16331_v53, 1  ;;  %vm16341_vm15 = vmmov %vm16338_vm13 }
 0x6ff   : > { %3426 = vrot.lane.b32.xlu0 %v12191_v58, %s9664_s23  ;;  %8781 = vmatprep.mubr.msk.bf16.mxu1 %vm16328_vm14, %v16327_v22  ;;  %v16333_v22 = vld [vmem:[#allocation92_spill] sm:$0xff]  ;;  %vm16339_vm14 = vmmov %vm16338_vm13 }
 0x700   : > { %v3351_v12 = vpop.permute.xlu1 %3350  ;;  %vm16334_vm12 = vcmp.eq.s32.totalorder %v16333_v22, 1  ;;  %v3409_v41 = vpop.permute.xlu0 %3408 }
 0x701   : > { %v12207_v32 = vsel %vm16332_vm9, %v3351_v12, %v11969_v8  ;;  %v12216_v0 = vsel %vm16334_vm12, %v3405_v25, %v11975_v55  ;;  %v16337_v8 = vld [vmem:[#allocation46_spill] sm:$0xff]  ;;  %v4547_v12 = vsel %vm16339_vm14, %v16297_v39, 0  ;;  %v16340_v55 = vld [vmem:[#allocation47_spill] sm:$0xff]  ;;  %vm16342_vm9 = vmmov %vm16338_vm13 }
 0x702   : > { %3432 = vrot.lane.b32.xlu1 %v12202_v28, %s9664_s23  ;;  %v16343_v25 = vld [vmem:[#allocation91_spill] sm:$0xff]  ;;  %vm16349_vm14 = vmmov %vm16342_vm9 }
 0x703   : > { %3430 = vrot.lane.b32.xlu0 %v12207_v32, %s9664_s23  ;;  %vm16344_vm12 = vcmp.eq.s32.totalorder %v16343_v25, 1  ;;  %v16345_v39 = vld [vmem:[#allocation99_spill] sm:$0xff] }
 0x704   : > { %v3403_v24 = vpop.permute.xlu1 %3402  ;;  %v16415_v25 = vld [vmem:[#allocation127_spill] sm:$0xff] }
 0x705   : > { %v12221_v2 = vsel %vm16336_vm10, %v3403_v24, %v11985_v57  ;;  %v12238_v24 = vsel %vm16344_vm12, %v3409_v41, %v11992_v33  ;;  %vm16346_vm10 = vcmp.eq.s32.totalorder %v16345_v39, 1  ;;  %v4544_v33 = vsel %vm16349_vm14, %v12128_v48, 0  ;;  %vm16353_vm12 = vmmov %vm16342_vm9 }
 0x706   : > { %8782 = vmatmul.mubr.msk.bf16.vlgmr.msra.gmra.mxu1 %vm16338_vm13, %v16337_v8  ;;  %3484 = vrot.lane.b32.xlu1 %v12216_v0, %s15890_s22  ;;  %vm16348_vm13 = vmmov %vm16342_vm9 }
 0x707   : > { %8830 = vmatpush3.bf16.xpose.msra.mxu1 %v4547_v12  ;;  %3482 = vrot.lane.b32.xlu0 %v12221_v2, %s15890_s22  ;;  %v4492_v12 = vpop.permute.xlu0 %4491  ;;  %vm16357_vm14 = vmmov %vm16342_vm9 }
 0x708   : > { %8785 = vmatprep.mubr.msk.bf16.mxu1 %vm16341_vm15, %v16340_v55  ;;  %9086 = vmatprep.subr.msk.bf16.mxu1 %vm16342_vm9, %v12128_v48  ;;  %v3407_v57 = vpop.permute.xlu1 %3406  ;;  %vm16351_vm15 = vmmov %vm16342_vm9 }
 0x709   : > { %v12243_v8 = vsel %vm16346_vm10, %v3407_v57, %v12007_v6  ;;  %v16350_v6 = vld [vmem:[#allocation49_spill] sm:$0xff]  ;;  %v9267_v57 = vld [vmem:[#allocation2 + $0x28] sm:$0xff]   ;;  %vm16354_vm10 = vmmov %vm16342_vm9 }
 0x70a   : > { %3488 = vrot.lane.b32.xlu1 %v12238_v24, %s15890_s22 }
 0x70b   : > { %3486 = vrot.lane.b32.xlu0 %v12243_v8, %s15890_s22  ;;  %v4488_v62 = vpop.permute.xlu0 %4487 }
 0x70c   : > { %v4494_v55 = vpop.permute.xlu1 %4493 }
 0x70e   : > { %8786 = vmatmul.mubr.msk.bf16.gmra.mxu1 %vm16348_vm13, %v16347_v30  ;;  %4435 = vrot.lane.b32.xlu1 %v9265_v9, %s9666_s13  ;;  %v9269_v30 = vld [vmem:[#allocation2 + $0x38] sm:$0xff]   ;;  %v9268_v9 = vld [vmem:[#allocation2 + $0x30] sm:$0xff]   ;;  %vm16356_vm13 = vmmov %vm16342_vm9 }
 0x70f   : > { %8832 = vmatpush3.bf16.xpose.msra.mxu1 %v4544_v33  ;;  %4433 = vrot.lane.b32.xlu0 %v9264_v47, %s9666_s13  ;;  %v16352_v33 = vld [vmem:[#allocation50_spill] sm:$0xff]  ;;  %v4541_v47 = vsel %vm16354_vm10, %v12130_v21, 0 }
 0x710   : > { %8789 = vmatprep.mubr.msk.bf16.mxu1 %vm16351_vm15, %v16350_v6  ;;  %9087 = vmatprep.subr.msk.bf16.mxu1 %vm16342_vm9, %v12130_v21  ;;  %v4490_v41 = vpop.permute.xlu1 %4489  ;;  %v3411_v6 = vpop.permute.xlu0 %3410 }
 0x712   : > { %4439 = vrot.lane.b32.xlu1 %v9267_v57, %s9666_s13 }
 0x713   : > { %4437 = vrot.lane.b32.xlu0 %v9266_v36, %s9666_s13  ;;  %v16358_v36 = vld [vmem:[#allocation102_spill] sm:$0xff] }
 0x714   : > { %v4486_v48 = vpop.permute.xlu1 %4485  ;;  %vm16359_vm15 = vcmp.eq.s32.totalorder %v16358_v36, 1 }
 0x716   : > { %8790 = vmatmul.mubr.msk.bf16.gmra.mxu1 %vm16353_vm12, %v16352_v33  ;;  %4443 = vrot.lane.b32.xlu1 %v9269_v30, %s9666_s13  ;;  %v16360_v33 = vld [vmem:[#allocation113_spill] sm:$0xff]  ;;  %vm16362_vm12 = vmmov %vm16354_vm10  ;;  %v16363_v30 = vld [vmem:[#allocation52_spill] sm:$0xff] }
 0x717   : > { %4441 = vrot.lane.b32.xlu0 %v9268_v9, %s9666_s13  ;;  %8834 = vmatpush3.bf16.xpose.msra.mxu1 %v4541_v47  ;;  %vm16361_vm9 = vcmp.eq.s32.totalorder %v16360_v33, 1 }
 0x718   : > { %8793 = vmatprep.mubr.msk.bf16.mxu1 %vm16356_vm13, %v16355_v49  ;;  %v3413_v57 = vpop.permute.xlu1 %3412  ;;  %9088 = vmatprep.subr.msk.bf16.mxu1 %vm16357_vm14, %v4494_v55  ;;  %v12278_v21 = vsel %vm16361_vm9, %v3411_v6, %v12027_v3  ;;  %v4538_v49 = vsel %vm16362_vm12, %v4494_v55, 0  ;;  %vm16364_vm13 = vmmov %vm16354_vm10  ;;  %v16372_v6 = vld [vmem:[#allocation101_spill] sm:$0xff] }
 0x719   : > { %v12273_v22 = vsel %vm16359_vm15, %v3413_v57, %v12039_v63  ;;  %vm16365_vm14 = vmmov %vm16354_vm10  ;;  %v16374_v57 = vld [vmem:[#allocation112_spill] sm:$0xff] }
 0x71a   : > { %3492 = vrot.lane.b32.xlu1 %v12273_v22, %s15890_s22  ;;  %v4535_v63 = vsel %vm16365_vm14, %v4492_v12, 0  ;;  %vm16366_vm15 = vmmov %vm16354_vm10 }
 0x71b   : > { %3490 = vrot.lane.b32.xlu0 %v12278_v21, %s15890_s22  ;;  %vm16367_vm9 = vmmov %vm16354_vm10 }
 0x71c   : > { %v4532_v3 = vsel %vm16367_vm9, %v4490_v41, 0  ;;  %vm16368_vm11 = vmmov %vm16367_vm9 }
 0x71d   : > { %vm16369_vm0 = vmmov %vm16367_vm9 }
 0x71e   : > { %8794 = vmatmul.mubr.msk.bf16.gmra.mxu1 %vm16354_vm10, %v16363_v30  ;;  %v4529_v9 = vsel %vm16369_vm0, %v4488_v62, 0  ;;  %vm16370_vm12 = vmmov %vm16369_vm0  ;;  %vm16373_vm10 = vcmp.eq.s32.totalorder %v16372_v6, 1  ;;  %v16377_v30 = vld [vmem:[#allocation104_spill] sm:$0xff]  ;;  %v16383_v6 = vld [vmem:[#allocation114_spill] sm:$0xff] }
 0x71f   : > { %8836 = vmatpush3.bf16.xpose.msra.mxu1 %v4538_v49  ;;  %vm16371_vm8 = vmmov %vm16369_vm0  ;;  %vm16384_vm9 = vcmp.eq.s32.totalorder %v16383_v6, 1  ;;  %v16391_v6 = vld [vmem:[#allocation116_spill] sm:$0xff] }
 0x720   : > { %9089 = vmatprep.subr.msk.bf16.mxu1 %vm16364_vm13, %v4492_v12  ;;  %v4526_v55 = vsel %vm16371_vm8, %v4486_v48, 0  ;;  %vm16376_vm8 = vmmov %vm16369_vm0  ;;  %vm16378_vm13 = vcmp.eq.s32.totalorder %v16377_v30, 1 }
 0x727   : > { %8838 = vmatpush3.bf16.xpose.msra.mxu1 %v4535_v63 }
 0x728   : > { %9090 = vmatprep.subr.msk.bf16.mxu1 %vm16366_vm15, %v4490_v41 }
 0x72f   : > { %8840 = vmatpush3.bf16.xpose.msra.mxu1 %v4532_v3  ;;  %v16379_v3 = vld [vmem:[#allocation115_spill] sm:$0xff] }
 0x730   : > { %9091 = vmatprep.subr.msk.bf16.mxu1 %vm16368_vm11, %v4488_v62  ;;  %vm16375_vm11 = vcmp.eq.s32.totalorder %v16374_v57, 1  ;;  %vm16380_vm14 = vcmp.eq.s32.totalorder %v16379_v3, 1  ;;  %v16387_v3 = vld [vmem:[#allocation117_spill] sm:$0xff] }
 0x737   : > { %8842 = vmatpush3.bf16.xpose.msra.mxu1 %v4529_v9 }
 0x738   : > { %9092 = vmatprep.subr.msk.bf16.mxu1 %vm16370_vm12, %v4486_v48 }
 0x73f   : > { %8844 = vmatpush3.bf16.xpose.msra.mxu1 %v4526_v55 }
 0x758   : > { %v3417_v47 = vpop.permute.xlu1 %3416 }
 0x759   : > { %v12298_v12 = vsel %vm16373_vm10, %v3417_v47, %v12100_v37  ;;  %v16381_v47 = vld [vmem:[#allocation103_spill] sm:$0xff]  ;;  %vm16388_vm10 = vcmp.eq.s32.totalorder %v16387_v3, 1 }
 0x75a   : > { %3496 = vrot.lane.b32.xlu1 %v12298_v12, %s15890_s22  ;;  %vm16382_vm15 = vcmp.eq.s32.totalorder %v16381_v47, 1  ;;  %v16395_v3 = vld [vmem:[#allocation119_spill] sm:$0xff] }
 0x75c   : > { %v12309_v48 = vpop.permute.xlu1 %4431 }
 0x760   : > { %v3415_v41 = vpop.permute.xlu0 %3414 }
 0x761   : > { %v12305_v62 = vsel %vm16375_vm11, %v3415_v41, %v12122_v56 }
 0x762   : > { %3494 = vrot.lane.b32.xlu0 %v12305_v62, %s15890_s22 }
 0x764   : > { %v12311_v49 = vpop.permute.xlu0 %4429 }
 0x765   : > { %8845 = vmatprep.mubr.msk.bf16.mxu1 %vm16376_vm8, %v12311_v49  ;;  %vm16392_vm8 = vcmp.eq.s32.totalorder %v16391_v6, 1  ;;  %v16408_v6 = vld [vmem:[#allocation136_spill] sm:$0xff] }
 0x766   : > { %8846 = vmatmul.mubr.msk.bf16.vlgmr.msra.gmra.mxu1 %vm16369_vm0, %v12309_v48 }
 0x768   : > { %v3421_v37 = vpop.permute.xlu1 %3420 }
 0x769   : > { %v3459_v63 = vsel %vm16378_vm13, %v3421_v37, %v12146_v34  ;;  %v3419_v56 = vpop.permute.xlu0 %3418  ;;  %vm16396_vm13 = vcmp.eq.s32.totalorder %v16395_v3, 1  ;;  %v16406_v3 = vld [vmem:[#allocation123_spill] sm:$0xff] }
 0x76a   : > { %v3458_v9 = vsel %vm16380_vm14, %v3419_v56, %v12151_v29  ;;  %3500 = vrot.lane.b32.xlu1 %v3459_v63, %s15890_s22  ;;  %v16385_v29 = vld [vmem:[#allocation106_spill] sm:$0xff] }
 0x76b   : > { %3498 = vrot.lane.b32.xlu0 %v3458_v9, %s15890_s22  ;;  %vm16386_vm12 = vcmp.eq.s32.totalorder %v16385_v29, 1 }
 0x76c   : > { %v3425_v55 = vpop.permute.xlu1 %3424 }
 0x76d   : > { %v3461_v41 = vsel %vm16382_vm15, %v3425_v55, %v12164_v20  ;;  %v3423_v36 = vpop.permute.xlu0 %3422 }
 0x76e   : > { %v3460_v30 = vsel %vm16384_vm9, %v3423_v36, %v12171_v23  ;;  %3504 = vrot.lane.b32.xlu1 %v3461_v41, %s15890_s22  ;;  %v16389_v23 = vld [vmem:[#allocation105_spill] sm:$0xff]  ;;  %vm16401_vm9 = vcmask 261120  }
 0x76f   : > { %3502 = vrot.lane.b32.xlu0 %v3460_v30, %s15890_s22  ;;  %vm16390_vm11 = vcmp.eq.s32.totalorder %v16389_v23, 1 }
 0x770   : > { %v3429_v34 = vpop.permute.xlu1 %3428 }
 0x771   : > { %v3463_v37 = vsel %vm16386_vm12, %v3429_v34, %v12186_v35  ;;  %v3427_v56 = vpop.permute.xlu0 %3426  ;;  %vm16402_vm12 = vmmov %vm16401_vm9 }
 0x772   : > { %v3462_v47 = vsel %vm16388_vm10, %v3427_v56, %v12191_v58  ;;  %3508 = vrot.lane.b32.xlu1 %v3463_v37, %s15890_s22  ;;  %v16393_v58 = vld [vmem:[#allocation109_spill] sm:$0xff]  ;;  %vm16403_vm10 = vmmov %vm16401_vm9 }
 0x773   : > { %3506 = vrot.lane.b32.xlu0 %v3462_v47, %s15890_s22  ;;  %vm16394_vm0 = vcmp.eq.s32.totalorder %v16393_v58, 1 }
 0x774   : > { %v3433_v20 = vpop.permute.xlu1 %3432 }
 0x775   : > { %v3465_v36 = vsel %vm16390_vm11, %v3433_v20, %v12202_v28  ;;  %v3431_v55 = vpop.permute.xlu0 %3430  ;;  %v16397_v20 = vld [vmem:[#allocation107_spill] sm:$0xff]  ;;  %vm16404_vm11 = vmmov %vm16401_vm9 }
 0x776   : > { %v3464_v29 = vsel %vm16392_vm8, %v3431_v55, %v12207_v32  ;;  %3512 = vrot.lane.b32.xlu1 %v3465_v36, %s15890_s22  ;;  %vm16398_vm14 = vcmp.eq.s32.totalorder %v16397_v20, 1  ;;  %vm16405_vm8 = vmmov %vm16401_vm9 }
 0x777   : > { %3510 = vrot.lane.b32.xlu0 %v3464_v29, %s15890_s22 }
 0x778   : > { %v3485_v35 = vpop.permute.xlu1 %3484 }
 0x779   : > { %v12352_v34 = vsel %vm16394_vm0, %v3485_v35, %v12216_v0  ;;  %v3483_v56 = vpop.permute.xlu0 %3482  ;;  %v16399_v35 = vld [vmem:[#allocation118_spill] sm:$0xff]  ;;  %vm16407_vm0 = vcmp.eq.s32.totalorder %v16406_v3, 1  ;;  %v16411_v3 = vld [vmem:[#allocation120_spill] sm:$0xff] }
 0x77a   : > { %v12357_v28 = vsel %vm16396_vm13, %v3483_v56, %v12221_v2  ;;  %3564 = vrot.lane.b32.xlu1 %v12352_v34, %s15888_s19  ;;  %vm16400_vm15 = vcmp.eq.s32.totalorder %v16399_v35, 1  ;;  %vm16409_vm13 = vcmp.eq.s32.totalorder %v16408_v6, 1 }
 0x77b   : > { %3562 = vrot.lane.b32.xlu0 %v12357_v28, %s15888_s19 }
 0x77c   : > { %v3489_v32 = vpop.permute.xlu1 %3488 }
 0x77d   : > { %v12366_v55 = vsel %vm16398_vm14, %v3489_v32, %v12238_v24  ;;  %v3487_v0 = vpop.permute.xlu0 %3486  ;;  %vm16410_vm14 = vmmov %vm16405_vm8 }
 0x77e   : > { %v12371_v58 = vsel %vm16400_vm15, %v3487_v0, %v12243_v8  ;;  %3568 = vrot.lane.b32.xlu1 %v12366_v55, %s15888_s19  ;;  %vm16412_vm15 = vcmp.eq.s32.totalorder %v16411_v3, 1 }
 0x77f   : > { %3566 = vrot.lane.b32.xlu0 %v12371_v58, %s15888_s19 }
 0x780   : > { %v12377_v2 = vpop.permute.xlu1 %4435 }
 0x781   : > { %v12379_v56 = vpop.permute.xlu0 %4433 }
 0x782   : > { %8849 = vmatprep.mubr.msk.bf16.mxu1 %vm16401_vm9, %v12379_v56 }
 0x783   : > { %8850 = vmatmul.mubr.msk.bf16.gmra.mxu1 %vm16402_vm12, %v12377_v2  ;;  %vm16416_vm12 = vcmp.eq.s32.totalorder %v16415_v25, 1  ;;  %v16421_v25 = vld [vmem:[#allocation137_spill] sm:$0xff] }
 0x784   : > { %v12385_v24 = vpop.permute.xlu1 %4439 }
 0x785   : > { %v12387_v8 = vpop.permute.xlu0 %4437 }
 0x786   : > { %8853 = vmatprep.mubr.msk.bf16.mxu1 %vm16403_vm10, %v12387_v8 }
 0x788   : > { %v12391_v32 = vpop.permute.xlu1 %4443 }
 0x789   : > { %v12393_v0 = vpop.permute.xlu0 %4441 }
 0x78b   : > { %8854 = vmatmul.mubr.msk.bf16.gmra.mxu1 %vm16404_vm11, %v12385_v24 }
 0x78c   : > { %8857 = vmatprep.mubr.msk.bf16.mxu1 %vm16405_vm8, %v12393_v0  ;;  %v3493_v20 = vpop.permute.xlu1 %3492  ;;  %vm16422_vm8 = vcmp.eq.s32.totalorder %v16421_v25, 1 }
 0x78d   : > { %v12402_v35 = vsel %vm16407_vm0, %v3493_v20, %v12273_v22  ;;  %v3491_v23 = vpop.permute.xlu0 %3490 }
 0x78e   : > { %v12407_v33 = vsel %vm16409_vm13, %v3491_v23, %v12278_v21  ;;  %3572 = vrot.lane.b32.xlu1 %v12402_v35, %s15888_s19  ;;  %v16413_v23 = vld [vmem:[#allocation135_spill] sm:$0xff] }
 0x78f   : > { %3570 = vrot.lane.b32.xlu0 %v12407_v33, %s15888_s19  ;;  %vm16414_vm9 = vcmp.eq.s32.totalorder %v16413_v23, 1 }
 0x793   : > { %8858 = vmatmul.mubr.msk.bf16.gmra.mxu1 %vm16410_vm14, %v12391_v32 }
 0x7cc   : > { %v3497_v57 = vpop.permute.xlu1 %3496 }
 0x7cd   : > { %v12418_v22 = vsel %vm16412_vm15, %v3497_v57, %v12298_v12  ;;  %v16417_v12 = vld [vmem:[#allocation138_spill] sm:$0xff] }
 0x7ce   : > { %3576 = vrot.lane.b32.xlu1 %v12418_v22, %s15888_s19  ;;  %vm16418_vm10 = vcmp.eq.s32.totalorder %v16417_v12, 1 }
 0x7d4   : > { %v3495_v21 = vpop.permute.xlu0 %3494 }
 0x7d5   : > { %v12425_v20 = vsel %vm16414_vm9, %v3495_v21, %v12305_v62  ;;  %v16419_v21 = vld [vmem:[#allocation125_spill] sm:$0xff] }
 0x7d6   : > { %3574 = vrot.lane.b32.xlu0 %v12425_v20, %s15888_s19  ;;  %vm16420_vm11 = vcmp.eq.s32.totalorder %v16419_v21, 1  ;;  %v16425_v21 = vld [vmem:[#allocation142_spill] sm:$0xff] }
 0x7d7   : > { %vm16426_vm13 = vcmp.eq.s32.totalorder %v16425_v21, 1  ;;  %v16431_v21 = vld [vmem:[#allocation130_spill] sm:$0xff] }
 0x7d8   : > { %vm16432_vm9 = vcmp.eq.s32.totalorder %v16431_v21, 1 }
 0x7dc   : > { %v3501_v6 = vpop.permute.xlu1 %3500 }
 0x7dd   : > { %v12431_v13 = vsel %vm16416_vm12, %v3501_v6, %v3459_v63  ;;  %v3499_v3 = vpop.permute.xlu0 %3498 }
 0x7de   : > { %v12435_v57 = vsel %vm16418_vm10, %v3499_v3, %v3458_v9  ;;  %3580 = vrot.lane.b32.xlu1 %v12431_v13, %s15888_s19  ;;  %v16423_v3 = vld [vmem:[#allocation129_spill] sm:$0xff] }
 0x7df   : > { %3578 = vrot.lane.b32.xlu0 %v12435_v57, %s15888_s19  ;;  %vm16424_vm0 = vcmp.eq.s32.totalorder %v16423_v3, 1  ;;  %v16429_v3 = vld [vmem:[#allocation140_spill] sm:$0xff] }
 0x7e0   : > { %v3505_v62 = vpop.permute.xlu1 %3504  ;;  %vm16430_vm15 = vcmp.eq.s32.totalorder %v16429_v3, 1  ;;  %v9277_v3 = vld [vmem:[#allocation4 + $0x8] sm:$0xff]  }
 0x7e1   : > { %v12443_v23 = vsel %vm16420_vm11, %v3505_v62, %v3461_v41  ;;  %v3503_v39 = vpop.permute.xlu0 %3502 }
 0x7e2   : > { %v12447_v6 = vsel %vm16422_vm8, %v3503_v39, %v3460_v30  ;;  %3584 = vrot.lane.b32.xlu1 %v12443_v23, %s15888_s19  ;;  %v16427_v30 = vld [vmem:[#allocation128_spill] sm:$0xff] }
 0x7e3   : > { %3582 = vrot.lane.b32.xlu0 %v12447_v6, %s15888_s19  ;;  %vm16428_vm14 = vcmp.eq.s32.totalorder %v16427_v30, 1 }
 0x7e4   : > { %v3509_v63 = vpop.permute.xlu1 %3508 }
 0x7e5   : > { %v12455_v9 = vsel %vm16424_vm0, %v3509_v63, %v3463_v37  ;;  %v3507_v12 = vpop.permute.xlu0 %3506 }
 0x7e6   : > { %v12459_v41 = vsel %vm16426_vm13, %v3507_v12, %v3462_v47  ;;  %3588 = vrot.lane.b32.xlu1 %v12455_v9, %s15888_s19  ;;  %v9270_v47 = vld [vmem:[#allocation4 + $0x30] sm:$0xff]   ;;  %v9271_v12 = vld [vmem:[#allocation4 + $0x38] sm:$0xff]  }
 0x7e7   : > { %3586 = vrot.lane.b32.xlu0 %v12459_v41, %s15888_s19 }
 0x7e8   : > { %v3513_v39 = vpop.permute.xlu1 %3512 }
 0x7e9   : > { %v12467_v62 = vsel %vm16428_vm14, %v3513_v39, %v3465_v36  ;;  %v3511_v25 = vpop.permute.xlu0 %3510  ;;  %v9272_v36 = vld [vmem:[#allocation4 + $0x10] sm:$0xff]   ;;  %v9273_v39 = vld [vmem:[#allocation4 + $0x28] sm:$0xff]  }
 0x7ea   : > { %v12471_v37 = vsel %vm16430_vm15, %v3511_v25, %v3464_v29  ;;  %3592 = vrot.lane.b32.xlu1 %v12467_v62, %s15888_s19  ;;  %v9274_v25 = vld [vmem:[#allocation4] sm:$0xff]  }
 0x7eb   : > { %3590 = vrot.lane.b32.xlu0 %v12471_v37, %s15888_s19  ;;  %v9275_v29 = vld [vmem:[#allocation4 + $0x20] sm:$0xff]  }
 0x7ec   : > { %v3565_v63 = vpop.permute.xlu1 %3564 }
 0x7ee   : > { %4103 = vrot.lane.b32.xlu1 %v9270_v47, %s15888_s19 }
 0x7ef   : > { %4105 = vrot.lane.b32.xlu0 %v9271_v12, %s15888_s19  ;;  %v9276_v12 = vld [vmem:[#allocation4 + $0x18] sm:$0xff]  }
 0x7f0   : > { %v3569_v30 = vpop.permute.xlu1 %3568 }
 0x7f1   : > { %v12486_v47 = vsel %vm16432_vm9, %v3569_v30, %v12366_v55  ;;  %v3563_v55 = vpop.permute.xlu0 %3562  ;;  %v9279_v30 = vld [vmem:[#allocation3 + $0x38] sm:$0xff]  }
 0x7f2   : > { %4095 = vrot.lane.b32.xlu1 %v9272_v36, %s15888_s19  ;;  %v16433_v36 = vld [vmem:[#allocation132_spill] sm:$0xff] }
 0x7f3   : > { %4101 = vrot.lane.b32.xlu0 %v9273_v39, %s15888_s19  ;;  %vm16434_vm12 = vcmp.eq.s32.totalorder %v16433_v36, 1 }
 0x7f4   : > { %v12494_v39 = vsel %vm16434_vm12, %v3565_v63, %v12352_v34  ;;  %v16435_v34 = vld [vmem:[#allocation143_spill] sm:$0xff] }
 0x7f5   : > { %vm16436_vm10 = vcmp.eq.s32.totalorder %v16435_v34, 1 }
 0x7f6   : > { %4091 = vrot.lane.b32.xlu1 %v9274_v25, %s15888_s19  ;;  %v9278_v25 = vld [vmem:[#allocation3 + $0x28] sm:$0xff]  }
 0x7f7   : > { %4099 = vrot.lane.b32.xlu0 %v9275_v29, %s15888_s19  ;;  %v9280_v29 = vld [vmem:[#allocation3 + $0x30] sm:$0xff]  }
 0x7fa   : > { %3648 = vrot.lane.b32.xlu1 %v12486_v47, %s9666_s13 }
 0x7fb   : > { %4097 = vrot.lane.b32.xlu0 %v9276_v12, %s15888_s19  ;;  %v3567_v12 = vpop.permute.xlu0 %3566 }
 0x7fc   : > { %v12505_v63 = vsel %vm16436_vm10, %v3567_v12, %v12371_v58  ;;  %v16440_v58 = vld [vmem:[#allocation147_spill] sm:$0xff] }
 0x7fd   : > { %vm16441_vm8 = vcmp.eq.s32.totalorder %v16440_v58, 1 }
 0x7fe   : > { %3644 = vrot.lane.b32.xlu1 %v12494_v39, %s9666_s13 }
 0x7ff   : > { %4093 = vrot.lane.b32.xlu0 %v9277_v3, %s15888_s19  ;;  %v16437_v3 = vld [vmem:[#allocation145_spill] sm:$0xff] }
 0x800   : > { %vm16438_vm11 = vcmp.eq.s32.totalorder %v16437_v3, 1 }
 0x801   : > { %v12512_v36 = vsel %vm16438_vm11, %v3563_v55, %v12357_v28  ;;  %v3571_v28 = vpop.permute.xlu0 %3570  ;;  %v16443_v55 = vld [vmem:[#allocation149_spill] sm:$0xff] }
 0x802   : > { %5256 = vrot.lane.b32.xlu1 %v9278_v25, %s9666_s13  ;;  %v9281_v25 = vld [vmem:[#allocation3 + $0x20] sm:$0xff]   ;;  %vm16444_vm0 = vcmp.eq.s32.totalorder %v16443_v55, 1 }
 0x803   : > { %5260 = vrot.lane.b32.xlu0 %v9279_v30, %s9666_s13  ;;  %v3573_v30 = vpop.permute.xlu1 %3572 }
 0x804   : > { %v12531_v3 = vsel %vm16444_vm0, %v3573_v30, %v12402_v35  ;;  %v16450_v35 = vld [vmem:[#allocation159_spill] sm:$0xff] }
 0x805   : > { %vm16451_vm14 = vcmp.eq.s32.totalorder %v16450_v35, 1  ;;  %v16456_v35 = vld [vmem:[#allocation160_spill] sm:$0xff] }
 0x806   : > { %v12551_v30 = vsel %vm16451_vm14, %v3571_v28, %v12407_v33  ;;  %vm16457_vm9 = vcmp.eq.s32.totalorder %v16456_v35, 1  ;;  %v16464_v35 = vld [vmem:[#allocation152_spill] sm:$0xff]  ;;  %vm16480_vm14 = vcmp.eq.s32.totalorder %v16479_v60, 1 }
 0x807   : > { %5258 = vrot.lane.b32.xlu0 %v9280_v29, %s9666_s13  ;;  %v12517_v29 = vpop.f32.mrf.mxu1  ;;  %vm16465_vm11 = vcmp.eq.s32.totalorder %v16464_v35, 1 }
 0x808   : > { %16439 = vst [vmem:[#allocation144_spill] sm:$0xff] %v12517_v29 }
 0x809   : > { %v12524_v34 = vpop.f32.mrf.mxu1 }
 0x80a   : > { %16442 = vst [vmem:[#allocation126_spill] sm:$0xff] %v12524_v34 }
 0x80b   : > { %3646 = vrot.lane.b32.xlu0 %v12505_v63, %s9666_s13 }
 0x80f   : > { %3642 = vrot.lane.b32.xlu0 %v12512_v36, %s9666_s13 }
 0x813   : > { %5254 = vrot.lane.b32.xlu0 %v9281_v25, %s9666_s13  ;;  %v12533_v25 = vpop.f32.mrf.mxu1 }
 0x814   : > { %16445 = vst [vmem:[#allocation121_spill] sm:$0xff] %v12533_v25 }
 0x815   : > { %v12542_v34 = vpop.f32.mrf.mxu1 }
 0x816   : > { %16448 = vst [vmem:[#allocation133_spill] sm:$0xff] %v12542_v34 }
 0x817   : > { %v12546_v58 = vpop.f32.mrf.mxu1 }
 0x818   : > { %16449 = vst [vmem:[#allocation134_spill] sm:$0xff] %v12546_v58 }
 0x819   : > { %v12555_v25 = vpop.f32.mrf.mxu1 }
 0x81a   : > { %16452 = vst [vmem:[#allocation139_spill] sm:$0xff] %v12555_v25  ;;  %v16459_v25 = vld [vmem:[#allocation151_spill] sm:$0xff] }
 0x81b   : > { %vm16460_vm12 = vcmp.eq.s32.totalorder %v16459_v25, 1  ;;  %v16466_v25 = vld [vmem:[#allocation162_spill] sm:$0xff] }
 0x840   : > { %v3577_v21 = vpop.permute.xlu1 %3576 }
 0x841   : > { %v12522_v12 = vsel %vm16441_vm8, %v3577_v21, %v12418_v22  ;;  %v16446_v22 = vld [vmem:[#allocation158_spill] sm:$0xff]  ;;  %vm16467_vm8 = vcmp.eq.s32.totalorder %v16466_v25, 1 }
 0x842   : > { %3656 = vrot.lane.b32.xlu1 %v12522_v12, %s9666_s13  ;;  %vm16447_vm13 = vcmp.eq.s32.totalorder %v16446_v22, 1  ;;  %v16454_v22 = vld [vmem:[#allocation150_spill] sm:$0xff] }
 0x843   : > { %vm16455_vm15 = vcmp.eq.s32.totalorder %v16454_v22, 1  ;;  %v16461_v22 = vld [vmem:[#allocation161_spill] sm:$0xff] }
 0x844   : > { %vm16462_vm10 = vcmp.eq.s32.totalorder %v16461_v22, 1 }
 0x846   : > { %3652 = vrot.lane.b32.xlu1 %v12531_v3, %s9666_s13 }
 0x848   : > { %v3575_v29 = vpop.permute.xlu0 %3574 }
 0x849   : > { %v12540_v21 = vsel %vm16447_vm13, %v3575_v29, %v12425_v20  ;;  %v12557_v29 = vpop.f32.mrf.mxu1 }
 0x84a   : > { %3654 = vrot.lane.b32.xlu0 %v12540_v21, %s9666_s13  ;;  %16453 = vst [vmem:[#allocation146_spill] sm:$0xff] %v12557_v29 }
 0x84b   : > { %v12573_v28 = vpop.f32.mrf.mxu1 }
 0x84c   : > { %16458 = vst [vmem:[#allocation55_spill] sm:$0xff] %v12573_v28 }
 0x84e   : > { %3650 = vrot.lane.b32.xlu0 %v12551_v30, %s9666_s13 }
 0x850   : > { %v3581_v55 = vpop.permute.xlu1 %3580 }
 0x851   : > { %v3579_v20 = vpop.permute.xlu0 %3578 }
 0x854   : > { %v3585_v34 = vpop.permute.xlu1 %3584 }
 0x855   : > { %v12562_v42 = vsel %vm16455_vm15, %v3585_v34, %v12443_v23  ;;  %v3583_v58 = vpop.permute.xlu0 %3582  ;;  %v12578_v23 = vsel %vm16460_vm12, %v3581_v55, %v12431_v13  ;;  %vm16481_vm15 = vcmask 261120  }
 0x856   : > { %v12567_v33 = vsel %vm16457_vm9, %v3583_v58, %v12447_v6  ;;  %3664 = vrot.lane.b32.xlu1 %v12562_v42, %s9666_s13  ;;  %v12583_v6 = vsel %vm16462_vm10, %v3579_v20, %v12435_v57  ;;  %v12589_v58 = vpop.f32.mrf.mxu1 }
 0x857   : > { %3662 = vrot.lane.b32.xlu0 %v12567_v33, %s9666_s13  ;;  %16463 = vst [vmem:[#allocation148_spill] sm:$0xff] %v12589_v58  ;;  %v16469_v58 = vld [vmem:[#allocation153_spill] sm:$0xff] }
 0x858   : > { %v3589_v29 = vpop.permute.xlu1 %3588  ;;  %v12605_v20 = vpop.f32.mrf.mxu1  ;;  %vm16470_vm0 = vcmp.eq.s32.totalorder %v16469_v58, 1 }
 0x859   : > { %v3587_v34 = vpop.permute.xlu0 %3586  ;;  %16468 = vst [vmem:[#allocation56_spill] sm:$0xff] %v12605_v20  ;;  %v12610_v35 = vsel %vm16470_vm0, %v3589_v29, %v12455_v9 }
 0x85a   : > { %3660 = vrot.lane.b32.xlu1 %v12578_v23, %s9666_s13 }
 0x85b   : > { %3658 = vrot.lane.b32.xlu0 %v12583_v6, %s9666_s13 }
 0x85c   : > { %v3593_v28 = vpop.permute.xlu1 %3592 }
 0x85d   : > { %v12594_v13 = vsel %vm16465_vm11, %v3593_v28, %v12467_v62  ;;  %v3591_v55 = vpop.permute.xlu0 %3590  ;;  %v16471_v28 = vld [vmem:[#allocation163_spill] sm:$0xff] }
 0x85e   : > { %v12599_v57 = vsel %vm16467_vm8, %v3591_v55, %v12471_v37  ;;  %3672 = vrot.lane.b32.xlu1 %v12594_v13, %s9666_s13  ;;  %vm16472_vm13 = vcmp.eq.s32.totalorder %v16471_v28, 1  ;;  %v12621_v55 = vpop.f32.mrf.mxu1 }
 0x85f   : > { %3670 = vrot.lane.b32.xlu0 %v12599_v57, %s9666_s13  ;;  %v12615_v25 = vsel %vm16472_vm13, %v3587_v34, %v12459_v41  ;;  %16473 = vst [vmem:[#allocation45_spill] sm:$0xff] %v12621_v55 }
 0x860   : > { %v4104_v37 = vpop.permute.xlu1 %4103  ;;  %v12623_v29 = vpop.f32.mrf.mxu1 }
 0x861   : > { %v4106_v62 = vpop.permute.xlu0 %4105  ;;  %16474 = vst [vmem:[#allocation46_spill] sm:$0xff] %v12623_v29 }
 0x862   : > { %8797 = vmatprep.subr.bf16.mxu0 %v4106_v62  ;;  %3668 = vrot.lane.b32.xlu1 %v12610_v35, %s9666_s13  ;;  %v12625_v41 = vpop.f32.mrf.mxu1 }
 0x863   : > { %3666 = vrot.lane.b32.xlu0 %v12615_v25, %s9666_s13  ;;  %8798 = vmatpush3.bf16.msra.mxu0 %v4106_v62  ;;  %16475 = vst [vmem:[#allocation47_spill] sm:$0xff] %v12625_v41 }
 0x864   : > { %8799 = vmatprep.subr.bf16.mxu0 %v4104_v37  ;;  %v12627_v58 = vpop.f32.mrf.mxu1  ;;  %v4096_v28 = vpop.permute.xlu1 %4095 }
 0x865   : > { %v4102_v9 = vpop.permute.xlu0 %4101  ;;  %16476 = vst [vmem:[#allocation48_spill] sm:$0xff] %v12627_v58 }
 0x866   : > { %v12629_v55 = vpop.f32.mrf.mxu1 }
 0x867   : > { %8800 = vmatpush3.bf16.msra.mxu0 %v4104_v37  ;;  %16477 = vst [vmem:[#allocation49_spill] sm:$0xff] %v12629_v55 }
 0x868   : > { %8801 = vmatprep.subr.bf16.mxu0 %v4102_v9  ;;  %v4092_v29 = vpop.permute.xlu1 %4091  ;;  %v12633_v22 = vpop.f32.mrf.mxu1 }
 0x869   : > { %v4100_v20 = vpop.permute.xlu0 %4099  ;;  %16478 = vst [vmem:[#allocation50_spill] sm:$0xff] %v12633_v22  ;;  %v16482_v22 = vld [vmem:[#allocation154_spill] sm:$0xff] }
 0x86a   : > { %vm16483_vm9 = vcmp.eq.s32.totalorder %v16482_v22, 1 }
 0x86b   : > { %8802 = vmatpush3.bf16.msra.mxu0 %v4102_v9 }
 0x86c   : > { %8803 = vmatprep.subr.bf16.mxu0 %v4100_v20  ;;  %v3649_v41 = vpop.permute.xlu1 %3648 }
 0x86d   : > { %v4098_v34 = vpop.permute.xlu0 %4097  ;;  %v3693_v26 = vsel %vm16483_vm9, %v3649_v41, %v12486_v47  ;;  %v16490_v47 = vld [vmem:[#allocation156_spill] sm:$0xff] }
 0x86e   : > { %vm16491_vm8 = vcmp.eq.s32.totalorder %v16490_v47, 1 }
 0x86f   : > { %8804 = vmatpush3.bf16.msra.mxu0 %v4100_v20  ;;  %v8783_v20 = vpop.f32.mrf.mxu1 }
 0x870   : > { %8805 = vmatprep.subr.bf16.mxu0 %v4098_v34  ;;  %v3645_v53 = vpop.permute.xlu1 %3644 }
 0x871   : > { %v4094_v62 = vpop.permute.xlu0 %4093  ;;  %v3820_v55 = vpop.f32.mrf.mxu1  ;;  %v3691_v41 = vsel %vm16491_vm8, %v3645_v53, %v12494_v39  ;;  %v9282_v53 = vld [vmem:[#allocation3 + $0x18] sm:$0xff]  }
 0x873   : > { %8806 = vmatpush3.bf16.msra.mxu0 %v4098_v34  ;;  %v8784_v46 = vpop.f32.mrf.mxu1 }
 0x874   : > { %8807 = vmatprep.subr.bf16.mxu0 %v4096_v28  ;;  %v3832_v60 = vadd.f32 %v8784_v46, %v3693_v26  ;;  %v16492_v46 = vld [vmem:[#allocation10_spill] sm:$0xff] }
 0x875   : > { %v12631_v37 = vpop.permute.xlu0 %5260  ;;  %vm16493_vm0 = vcmp.gt.s32.totalorder %v11545_v10, %v16492_v46 }
 0x877   : > { %8808 = vmatpush3.bf16.msra.mxu0 %v4096_v28 }
 0x878   : > { %8809 = vmatprep.subr.bf16.mxu0 %v4094_v62 }
 0x879   : > { %v12635_v9 = vpop.permute.xlu0 %5258 }
 0x87b   : > { %8810 = vmatpush3.bf16.msra.mxu0 %v4094_v62  ;;  %v16484_v62 = vld [vmem:[#allocation165_spill] sm:$0xff] }
 0x87c   : > { %8811 = vmatprep.subr.bf16.mxu0 %v4092_v29  ;;  %vm16485_vm12 = vcmp.eq.s32.totalorder %v16484_v62, 1 }
 0x87d   : > { %v3647_v58 = vpop.permute.xlu0 %3646 }
 0x87e   : > { %v3692_v34 = vsel %vm16480_vm14, %v3647_v58, %v12505_v63  ;;  %v16486_v63 = vld [vmem:[#allocation9_spill] sm:$0xff]  ;;  %vm16496_vm14 = vcmp.eq.s32.totalorder %v11705_v19, 1  ;;  %v16511_v19 = vld [vmem:[#allocation58_spill] sm:$0xff] }
 0x87f   : > { %8812 = vmatpush3.bf16.msra.mxu0 %v4092_v29  ;;  %v3829_v28 = vadd.f32 %v8783_v20, %v3692_v34  ;;  %vm16487_vm10 = vcmp.gt.s32.totalorder %v11545_v10, %v16486_v63  ;;  %v16488_v29 = vld [vmem:[#allocation12_spill] sm:$0xff]  ;;  %v12676_v34 = vpop.permute.xlu1 %5256  ;;  %v16498_v63 = vld [vmem:[#allocation53_spill] sm:$0xff] }
 0x880   : > { %9093 = vmatprep.subr.msk.bf16.mxu0 %vm16481_vm15, %v12631_v37  ;;  %vm16489_vm11 = vcmp.gt.s32.totalorder %v11545_v10, %v16488_v29  ;;  %vm16497_vm15 = vcmp.gt.s32.totalorder %v11545_v10, %v16209_v7  ;;  %vm16499_vm9 = vcmp.eq.s32.totalorder %v16498_v63, 1 }
 0x881   : > { %v3643_v45 = vpop.permute.xlu0 %3642  ;;  %v12656_v20 = vsel %vm16489_vm11, -1e+09, %v3829_v28 }
 0x882   : > { %v3690_v17 = vsel %vm16485_vm12, %v3643_v45, %v12512_v36  ;;  %v16494_v45 = vld [vmem:[#allocation11_spill] sm:$0xff]  ;;  %vm16500_vm12 = vcmp.gt.s32.totalorder %v11545_v10, %v16192_v1 }
 0x883   : > { %v3821_v14 = vadd.f32 %v3820_v55, %v3690_v17  ;;  %v3823_v17 = vpop.f32.mrf.mxu1  ;;  %vm16495_vm13 = vcmp.gt.s32.totalorder %v11545_v10, %v16494_v45 }
 0x884   : > { %v3824_v26 = vadd.f32 %v3823_v17, %v3691_v41 }
 0x885   : > { %v12651_v58 = vsel %vm16487_vm10, -1e+09, %v3821_v14  ;;  %v12666_v14 = vsel %vm16493_vm0, -1e+09, %v3832_v60  ;;  %v8787_v39 = vpop.f32.mrf.mxu1  ;;  %v12678_v17 = vpop.permute.xlu0 %5254  ;;  %vm16501_vm10 = vcmp.eq.s32.totalorder %v11699_v16, 1  ;;  %vm16506_vm0 = vcmp.gt.s32.totalorder %v11545_v10, %v16201_v54  ;;  %v16686_v16 = vld [vmem:[#allocation93_spill] sm:$0xff] }
 0x886   : > { %3899 = vmax.xlane.f32.xlu0 %v12651_v58  ;;  %3903 = vmax.xlane.f32.xlu1 %v12656_v20  ;;  %v12672_v36 = vsel %vm16495_vm13, -1e+09, %v3824_v26 }
 0x887   : > { %v3836_v55 = vpop.f32.mrf.mxu1 }
 0x889   : > { %v8788_v28 = vpop.f32.mrf.mxu1 }
 0x88a   : > { %3905 = vmax.xlane.f32.xlu1 %v12666_v14 }
 0x88b   : > { %v3839_v60 = vpop.f32.mrf.mxu1 }
 0x88d   : > { %v8791_v46 = vpop.f32.mrf.mxu1 }
 0x88e   : > { %3901 = vmax.xlane.f32.xlu1 %v12672_v36 }
 0x88f   : > { %v3852_v40 = vpop.f32.mrf.mxu1 }
 0x89c   : > { %5252 = vrot.lane.b32.xlu0 %v9282_v53, %s9666_s13 }
 0x8b4   : > { %v3657_v41 = vpop.permute.xlu1 %3656 }
 0x8b8   : > { %v3653_v47 = vpop.permute.xlu1 %3652 }
 0x8b9   : > { %v3695_v26 = vsel %vm16496_vm14, %v3653_v47, %v12531_v3  ;;  %v3697_v47 = vsel %vm16501_vm10, %v3657_v41, %v12522_v12  ;;  %vm16509_vm14 = vcmp.gt.s32.totalorder %v11545_v10, %v16206_v27  ;;  %vm16514_vm10 = vcmp.eq.s32.totalorder %v11749_v52, 1 }
 0x8ba   : > { %v3840_v45 = vadd.f32 %v3839_v60, %v3695_v26 }
 0x8bc   : > { %v3655_v22 = vpop.permute.xlu0 %3654  ;;  %v12686_v53 = vsel %vm16497_vm15, -1e+09, %v3840_v45  ;;  %v16502_v45 = vld [vmem:[#allocation166_spill] sm:$0xff]  ;;  %vm16510_vm15 = vcmp.eq.s32.totalorder %v11721_v43, 1 }
 0x8bd   : > { %v3696_v62 = vsel %vm16499_vm9, %v3655_v22, %v12540_v21  ;;  %3909 = vmax.xlane.f32.xlu0 %v12686_v53  ;;  %vm16503_vm11 = vcmp.eq.s32.totalorder %v16502_v45, 1  ;;  %v8792_v21 = vpop.f32.mrf.mxu1  ;;  %vm16512_vm9 = vcmp.eq.s32.totalorder %v16511_v19, 1 }
 0x8be   : > { %v3845_v29 = vadd.f32 %v8787_v39, %v3696_v62  ;;  %v3848_v62 = vadd.f32 %v8788_v28, %v3697_v47  ;;  %v16504_v39 = vld [vmem:[#allocation19_spill] sm:$0xff] }
 0x8bf   : > { %vm16505_vm8 = vcmp.gt.s32.totalorder %v11545_v10, %v16504_v39 }
 0x8c0   : > { %v3651_v61 = vpop.permute.xlu0 %3650  ;;  %v12695_v3 = vsel %vm16500_vm12, -1e+09, %v3845_v29  ;;  %v3855_v29 = vpop.f32.mrf.mxu1  ;;  %v12713_v12 = vsel %vm16506_vm0, -1e+09, %v3848_v62  ;;  %vm16513_vm12 = vcmp.gt.s32.totalorder %v11545_v10, %v16212_v59  ;;  %vm16517_vm0 = vcmp.eq.s32.totalorder %v11766_v50, 1 }
 0x8c1   : > { %v3694_v60 = vsel %vm16503_vm11, %v3651_v61, %v12551_v30  ;;  %3911 = vmax.xlane.f32.xlu1 %v12695_v3  ;;  %v16507_v30 = vld [vmem:[#allocation57_spill] sm:$0xff]  ;;  %vm16515_vm11 = vcmp.gt.s32.totalorder %v11545_v10, %v16218_v44 }
 0x8c2   : > { %v3837_v22 = vadd.f32 %v3836_v55, %v3694_v60  ;;  %vm16508_vm13 = vcmp.eq.s32.totalorder %v16507_v30, 1  ;;  %v8795_v41 = vpop.f32.mrf.mxu1 }
 0x8c4   : > { %v12707_v26 = vsel %vm16505_vm8, -1e+09, %v3837_v22  ;;  %vm16516_vm8 = vcmp.eq.s32.totalorder %v11800_v11, 1  ;;  %v16639_v11 = vld [vmem:[#allocation72_spill] sm:$0xff] }
 0x8c5   : > { %3907 = vmax.xlane.f32.xlu1 %v12707_v26 }
 0x8c8   : > { %v3665_v7 = vpop.permute.xlu1 %3664 }
 0x8c9   : > { %v3663_v61 = vpop.permute.xlu0 %3662  ;;  %3913 = vmax.xlane.f32.xlu1 %v12713_v12  ;;  %v3701_v62 = vsel %vm16510_vm15, %v3665_v7, %v12562_v42  ;;  %vm16520_vm15 = vcmp.gt.s32.totalorder %v11545_v10, %v16231_v31 }
 0x8ca   : > { %v3700_v55 = vsel %vm16508_vm13, %v3663_v61, %v12567_v33  ;;  %vm16518_vm13 = vcmp.eq.s32.totalorder %v11828_v5, 1 }
 0x8cb   : > { %v3861_v28 = vadd.f32 %v8791_v46, %v3700_v55  ;;  %v3868_v46 = vpop.f32.mrf.mxu1  ;;  %v3864_v55 = vadd.f32 %v8792_v21, %v3701_v62 }
 0x8cc   : > { %v3661_v47 = vpop.permute.xlu1 %3660 }
 0x8cd   : > { %v3659_v60 = vpop.permute.xlu0 %3658  ;;  %v12722_v22 = vsel %vm16509_vm14, -1e+09, %v3861_v28  ;;  %v3699_v7 = vsel %vm16514_vm10, %v3661_v47, %v12578_v23  ;;  %v8796_v42 = vpop.f32.mrf.mxu1  ;;  %vm16519_vm14 = vcmp.gt.s32.totalorder %v11545_v10, %v16226_v18  ;;  %vm16524_vm10 = vcmp.gt.s32.totalorder %v11545_v10, %v16227_v51 }
 0x8ce   : > { %v3698_v54 = vsel %vm16512_vm9, %v3659_v60, %v12583_v6  ;;  %3919 = vmax.xlane.f32.xlu0 %v12722_v22  ;;  %v3856_v60 = vadd.f32 %v3855_v29, %v3699_v7  ;;  %v9283_v7 = vld [vmem:[#allocation3 + $0x10] sm:$0xff]  }
 0x8cf   : > { %v3853_v33 = vadd.f32 %v3852_v40, %v3698_v54  ;;  %v12743_v54 = vsel %vm16515_vm11, -1e+09, %v3864_v55  ;;  %v3871_v47 = vpop.f32.mrf.mxu1  ;;  %vm16525_vm11 = vcmp.gt.s32.totalorder %v11545_v10, %v16222_v15 }
 0x8d0   : > { %v3673_v61 = vpop.permute.xlu1 %3672  ;;  %v12758_v55 = vsel %vm16519_vm14, -1e+09, %v3856_v60 }
 0x8d1   : > { %v3671_v30 = vpop.permute.xlu0 %3670  ;;  %v12734_v28 = vsel %vm16513_vm12, -1e+09, %v3853_v33  ;;  %vm16523_vm12 = vcmp.gt.s32.totalorder %v11545_v10, %v16229_v4  ;;  %v16718_v10 = vld [vmem:[#allocation99_spill] sm:$0xff] }
 0x8d2   : > { %3915 = vmax.xlane.f32.xlu1 %v12734_v28  ;;  %v3704_v40 = vsel %vm16516_vm8, %v3671_v30, %v12599_v57  ;;  %vm16530_vm8 = vcmask 261120  }
 0x8d3   : > { %v3877_v62 = vadd.f32 %v8795_v41, %v3704_v40  ;;  %v9285_v40 = vld [vmem:[%s15469_s4 + $0x30] sm:$0xff]  }
 0x8d4   : > { %v3669_v6 = vpop.permute.xlu1 %3668 }
 0x8d5   : > { %v3667_v43 = vpop.permute.xlu0 %3666  ;;  %v3703_v21 = vsel %vm16517_vm0, %v3669_v6, %v12610_v35  ;;  %v16521_v35 = vld [vmem:[#allocation169_spill] sm:$0xff]  ;;  %v12773_v30 = vsel %vm16523_vm12, -1e+09, %v3877_v62  ;;  %v9289_v62 = vld [vmem:[%s15469_s4 + $0x10] sm:$0xff]   ;;  %vm16531_vm0 = vmmov %vm16530_vm8 }
 0x8d6   : > { %v3702_v23 = vsel %vm16518_vm13, %v3667_v43, %v12615_v25  ;;  %3921 = vmax.xlane.f32.xlu1 %v12743_v54  ;;  %v3872_v33 = vadd.f32 %v3871_v47, %v3703_v21  ;;  %vm16522_vm9 = vcmp.eq.s32.totalorder %v16521_v35, 1  ;;  %v9284_v6 = vld [vmem:[#allocation3] sm:$0xff]   ;;  %v9286_v21 = vld [vmem:[#allocation3 + $0x8] sm:$0xff]   ;;  %v9296_v35 = vld [vmem:[#allocation2 + $0x10] sm:$0xff]  }
 0x8d7   : > { %v3869_v29 = vadd.f32 %v3868_v46, %v3702_v23  ;;  %v3705_v43 = vsel %vm16522_vm9, %v3673_v61, %v12594_v13  ;;  %v12788_v46 = vpop.f32.mrf.mxu1  ;;  %v9287_v23 = vld [vmem:[%s15469_s4 + $0x20] sm:$0xff]   ;;  %vm16532_vm13 = vmmov %vm16531_vm0 }
 0x8d8   : > { %v3880_v25 = vadd.f32 %v8796_v42, %v3705_v43  ;;  %v12778_v41 = vsel %vm16524_vm10, -1e+09, %v3872_v33  ;;  %v9290_v33 = vld [vmem:[%s15469_s4 + $0x28] sm:$0xff]   ;;  %vm16533_vm14 = vmmov %vm16531_vm0 }
 0x8d9   : > { %v12763_v57 = vsel %vm16520_vm15, -1e+09, %v3869_v29  ;;  %v12790_v61 = vpop.f32.mrf.mxu1  ;;  %v9288_v29 = vld [vmem:[%s15469_s4 + $0x38] sm:$0xff]   ;;  %vm16534_vm15 = vmmov %vm16531_vm0 }
 0x8da   : > { %3917 = vmax.xlane.f32.xlu1 %v12758_v55  ;;  %3923 = vmax.xlane.f32.xlu0 %v12763_v57  ;;  %v12785_v13 = vsel %vm16525_vm11, -1e+09, %v3880_v25  ;;  %v9291_v25 = vld [vmem:[%s15469_s4] sm:$0xff]   ;;  %vm16535_vm9 = vmmov %vm16531_vm0 }
 0x8db   : > { %v12796_v42 = vpop.f32.mrf.mxu1  ;;  %vm16536_vm12 = vmmov %vm16531_vm0 }
 0x8dc   : > { %vm16537_vm10 = vmmov %vm16531_vm0 }
 0x8dd   : > { %v12801_v60 = vpop.f32.mrf.mxu1  ;;  %vm16538_vm11 = vmmov %vm16531_vm0 }
 0x8de   : > { %3927 = vmax.xlane.f32.xlu1 %v12773_v30  ;;  %3925 = vmax.xlane.f32.xlu0 %v12778_v41 }
 0x8df   : > { %v12817_v47 = vpop.f32.mrf.mxu1 }
 0x8e1   : > { %v12827_v43 = vpop.f32.mrf.mxu1 }
 0x8e2   : > { %3929 = vmax.xlane.f32.xlu1 %v12785_v13 }
 0x8f3   : > { %4662 = vrot.lane.b32.xlu1 %v12790_v61, %s9660_s14 }
 0x8f4   : > { %4666 = vrot.lane.b32.xlu0 %v12788_v46, %s9660_s14 }
 0x8f7   : > { %5250 = vrot.lane.b32.xlu1 %v9283_v7, %s9666_s13  ;;  %v9292_v7 = vld [vmem:[%s15469_s4 + $0x18] sm:$0xff]  }
 0x8f8   : > { %4668 = vrot.lane.b32.xlu0 %v12796_v42, %s9660_s14 }
 0x8fb   : > { %5246 = vrot.lane.b32.xlu1 %v9284_v6, %s9666_s13  ;;  %v12837_v6 = vpop.f32.mrf.mxu1 }
 0x8fc   : > { %4664 = vrot.lane.b32.xlu0 %v12801_v60, %s9660_s14 }
 0x8ff   : > { %5997 = vrot.lane.b32.xlu1 %v9285_v40, %s9667_s17  ;;  %v9294_v40 = vld [vmem:[%s15469_s4 + $0x8] sm:$0xff]  }
 0x900   : > { %5248 = vrot.lane.b32.xlu0 %v9286_v21, %s9666_s13  ;;  %v9293_v21 = vld [vmem:[#allocation2 + $0x8] sm:$0xff]  }
 0x903   : > { %5993 = vrot.lane.b32.xlu1 %v9287_v23, %s9667_s17  ;;  %v12844_v23 = vpop.f32.mrf.mxu1 }
 0x904   : > { %5999 = vrot.lane.b32.xlu0 %v9288_v29, %s9667_s17 }
 0x907   : > { %5989 = vrot.lane.b32.xlu1 %v9289_v62, %s9667_s17 }
 0x908   : > { %5995 = vrot.lane.b32.xlu0 %v9290_v33, %s9667_s17  ;;  %v12848_v33 = vpop.f32.mrf.mxu1 }
 0x90b   : > { %5985 = vrot.lane.b32.xlu1 %v9291_v25, %s9667_s17  ;;  %v9295_v25 = vld [vmem:[#allocation2] sm:$0xff]  }
 0x90c   : > { %5991 = vrot.lane.b32.xlu0 %v9292_v7, %s9667_s17 }
 0x90f   : > { %5931 = vrot.lane.b32.xlu1 %v9293_v21, %s9667_s17  ;;  %v3900_v29 = vpop.xlane.xlu0 %3899  ;;  %v3904_v62 = vpop.xlane.xlu1 %3903 }
 0x910   : > { %5987 = vrot.lane.b32.xlu0 %v9294_v40, %s9667_s17  ;;  %v3931_v51 = vsub.f32 %v12651_v58, %v3900_v29  ;;  %v3933_v50 = vsub.f32 %v12656_v20, %v3904_v62  ;;  %v12856_v21 = vpop.f32.mrf.mxu1 }
 0x912   : > { %v3947_v31 = vmul.f32 1.442695, %v3931_v51  ;;  %v3951_v4 = vmul.f32 1.442695, %v3933_v50  ;;  %v12862_v5 = vpop.f32.mrf.mxu1 }
 0x913   : > { %4674 = vrot.lane.b32.xlu1 %v12817_v47, %s9660_s14  ;;  %v3906_v7 = vpop.xlane.xlu1 %3905 }
 0x914   : > { %v3934_v15 = vsub.f32 %v12666_v14, %v3906_v7  ;;  %5929 = vrot.lane.b32.xlu0 %v9295_v25, %s9667_s17  ;;  %9374 = vpow2.f32 %v3947_v31  ;;  %v5284_v7 = vsel %vm16530_vm8, %v12631_v37, 0  ;;  %v5253_v37 = vpop.permute.xlu0 %5252  ;;  %vm16549_vm8 = vmmov %vm16531_vm0 }
 0x916   : > { %v3953_v40 = vmul.f32 1.442695, %v3934_v15  ;;  %v12868_v15 = vpop.f32.mrf.mxu1 }
 0x917   : > { %4670 = vrot.lane.b32.xlu1 %v12827_v43, %s9660_s14  ;;  %v3902_v58 = vpop.xlane.xlu1 %3901 }
 0x918   : > { %v3932_v29 = vsub.f32 %v12672_v36, %v3902_v58  ;;  %5933 = vrot.lane.b32.xlu0 %v9296_v35, %s9667_s17  ;;  %9376 = vpow2.f32 %v3953_v40  ;;  %v12874_v50 = vpop.f32.mrf.mxu1  ;;  %v5281_v58 = vsel %vm16532_vm13, %v12635_v9, 0  ;;  %vm16552_vm13 = vmmov %vm16531_vm0 }
 0x91a   : > { %v3949_v14 = vmul.f32 1.442695, %v3932_v29  ;;  %v12880_v51 = vpop.f32.mrf.mxu1  ;;  %v5278_v29 = vsel %vm16534_vm15, %v12676_v34, 0  ;;  %vm16558_vm15 = vmmov %vm16531_vm0 }
 0x91b   : > { %4684 = vrot.lane.b32.xlu1 %v12862_v5, %s9660_s14 }
 0x91c   : > { %9378 = vpow2.f32 %v3949_v14  ;;  %4676 = vrot.lane.b32.xlu0 %v12837_v6, %s9660_s14  ;;  %v12896_v62 = vpop.f32.mrf.mxu1  ;;  %v5275_v14 = vsel %vm16536_vm12, %v12678_v17, 0  ;;  %vm16560_vm12 = vmmov %vm16531_vm0 }
 0x91d   : > { %9380 = vpow2.f32 %v3951_v4 }
 0x91e   : > { %v12904_v40 = vpop.f32.mrf.mxu1 }
 0x91f   : > { %4680 = vrot.lane.b32.xlu1 %v12868_v15, %s9660_s14 }
 0x920   : > { %4672 = vrot.lane.b32.xlu0 %v12844_v23, %s9660_s14 }
 0x921   : > { %v12882_v31 = vpop.eup %9374 }
 0x922   : > { %16526 = vst [vmem:[#allocation51_spill] sm:$0xff] %v12882_v31 }
 0x923   : > { %4690 = vrot.lane.b32.xlu1 %v12874_v50, %s9660_s14 }
 0x924   : > { %4682 = vrot.lane.b32.xlu0 %v12848_v33, %s9660_s14 }
 0x925   : > { %v12886_v4 = vpop.eup %9376 }
 0x926   : > { %16527 = vst [vmem:[#allocation52_spill] sm:$0xff] %v12886_v4 }
 0x927   : > { %4686 = vrot.lane.b32.xlu1 %v12880_v51, %s9660_s14 }
 0x928   : > { %4678 = vrot.lane.b32.xlu0 %v12856_v21, %s9660_s14 }
 0x929   : > { %v12890_v20 = vpop.eup %9378 }
 0x92a   : > { %16528 = vst [vmem:[#allocation171_spill] sm:$0xff] %v12890_v20  ;;  %v12892_v36 = vpop.eup %9380  ;;  %v4027_v35 = vpack.c.bf16 %v12890_v20, %v12882_v31 }
 0x92b   : > { %16529 = vst [vmem:[#allocation172_spill] sm:$0xff] %v12892_v36  ;;  %v4028_v25 = vpack.c.bf16 %v12886_v4, %v12892_v36 }
 0x92c   : > { %4692 = vrot.lane.b32.xlu0 %v12896_v62, %s9660_s14  ;;  %8813 = vmatprep.mubr.bf16.mxu0 %v4027_v35 }
 0x92d   : > { %8814 = vmatmul.mubr.bf16.vlgmr.msra.gmra.mxu0 %v4028_v25 }
 0x92e   : > { %8862 = vmatpush3.bf16.xpose.msra.mxu0 %v5284_v7  ;;  %v5272_v7 = vsel %vm16538_vm11, %v5253_v37, 0  ;;  %vm16564_vm11 = vmmov %vm16531_vm0 }
 0x92f   : > { %9094 = vmatprep.subr.msk.bf16.mxu0 %vm16531_vm0, %v12635_v9 }
 0x930   : > { %4688 = vrot.lane.b32.xlu0 %v12904_v40, %s9660_s14 }
 0x936   : > { %8864 = vmatpush3.bf16.xpose.msra.mxu0 %v5281_v58 }
 0x937   : > { %9095 = vmatprep.subr.msk.bf16.mxu0 %vm16533_vm14, %v12676_v34  ;;  %vm16557_vm14 = vmmov %vm16531_vm0 }
 0x93e   : > { %8866 = vmatpush3.bf16.xpose.msra.mxu0 %v5278_v29 }
 0x93f   : > { %9096 = vmatprep.subr.msk.bf16.mxu0 %vm16535_vm9, %v12678_v17  ;;  %vm16559_vm9 = vmmov %vm16531_vm0 }
 0x946   : > { %8868 = vmatpush3.bf16.xpose.msra.mxu0 %v5275_v14  ;;  %v3910_v35 = vpop.xlane.xlu0 %3909 }
 0x947   : > { %9097 = vmatprep.subr.msk.bf16.mxu0 %vm16537_vm10, %v5253_v37  ;;  %v3936_v9 = vsub.f32 %v12686_v53, %v3910_v35  ;;  %vm16561_vm10 = vmmov %vm16531_vm0 }
 0x949   : > { %v3957_v58 = vmul.f32 1.442695, %v3936_v9 }
 0x94a   : > { %v3912_v25 = vpop.xlane.xlu1 %3911 }
 0x94b   : > { %v3937_v34 = vsub.f32 %v12695_v3, %v3912_v25  ;;  %9382 = vpow2.f32 %v3957_v58 }
 0x94d   : > { %v3959_v36 = vmul.f32 1.442695, %v3937_v34 }
 0x94e   : > { %8870 = vmatpush3.bf16.xpose.msra.mxu0 %v5272_v7  ;;  %v3908_v29 = vpop.xlane.xlu1 %3907 }
 0x94f   : > { %v3935_v4 = vsub.f32 %v12707_v26, %v3908_v29 }
 0x951   : > { %v3955_v20 = vmul.f32 1.442695, %v3935_v4 }
 0x952   : > { %v3914_v17 = vpop.xlane.xlu1 %3913 }
 0x953   : > { %9384 = vpow2.f32 %v3955_v20  ;;  %v3938_v14 = vsub.f32 %v12713_v12, %v3914_v17 }
 0x954   : > { %9386 = vpow2.f32 %v3959_v36 }
 0x955   : > { %v3961_v31 = vmul.f32 1.442695, %v3938_v14 }
 0x957   : > { %9388 = vpow2.f32 %v3961_v31  ;;  %v3920_v35 = vpop.xlane.xlu0 %3919 }
 0x958   : > { %v12927_v9 = vpop.eup %9382  ;;  %v3941_v4 = vsub.f32 %v12722_v22, %v3920_v35 }
 0x959   : > { %16539 = vst [vmem:[#allocation173_spill] sm:$0xff] %v12927_v9 }
 0x95a   : > { %v3967_v17 = vmul.f32 1.442695, %v3941_v4 }
 0x95b   : > { %v3916_v53 = vpop.xlane.xlu1 %3915 }
 0x95c   : > { %v3939_v37 = vsub.f32 %v12734_v28, %v3916_v53 }
 0x95e   : > { %v3963_v12 = vmul.f32 1.442695, %v3939_v37 }
 0x95f   : > { %v3922_v3 = vpop.xlane.xlu1 %3921 }
 0x960   : > { %v12929_v25 = vpop.eup %9384  ;;  %v3942_v26 = vsub.f32 %v12743_v54, %v3922_v3  ;;  %9390 = vpow2.f32 %v3963_v12 }
 0x961   : > { %16540 = vst [vmem:[#allocation174_spill] sm:$0xff] %v12929_v25  ;;  %v4029_v20 = vpack.c.bf16 %v12927_v9, %v12929_v25  ;;  %v12935_v7 = vpop.eup %9386  ;;  %v9316_v25 = vld [vmem:[#allocation3 + $0x8] sm:$0xff]  }
 0x962   : > { %16541 = vst [vmem:[#allocation175_spill] sm:$0xff] %v12935_v7  ;;  %v3969_v31 = vmul.f32 1.442695, %v3942_v26 }
 0x963   : > { %v3918_v36 = vpop.xlane.xlu1 %3917  ;;  %v3924_v58 = vpop.xlane.xlu0 %3923  ;;  %8817 = vmatprep.mubr.bf16.mxu0 %v4029_v20 }
 0x964   : > { %v12937_v28 = vpop.eup %9388  ;;  %v3940_v34 = vsub.f32 %v12758_v55, %v3918_v36  ;;  %v3943_v29 = vsub.f32 %v12763_v57, %v3924_v58  ;;  %9392 = vpow2.f32 %v3969_v31 }
 0x965   : > { %16542 = vst [vmem:[#allocation176_spill] sm:$0xff] %v12937_v28  ;;  %v4030_v22 = vpack.c.bf16 %v12937_v28, %v12935_v7  ;;  %v9308_v28 = vld [vmem:[#allocation4 + $0x18] sm:$0xff]  }
 0x966   : > { %v3965_v54 = vmul.f32 1.442695, %v3940_v34  ;;  %v3971_v35 = vmul.f32 1.442695, %v3943_v29 }
 0x967   : > { %v3928_v14 = vpop.xlane.xlu1 %3927  ;;  %v3926_v53 = vpop.xlane.xlu0 %3925  ;;  %8818 = vmatmul.mubr.bf16.gmra.mxu0 %v4030_v22 }
 0x968   : > { %9394 = vpow2.f32 %v3965_v54  ;;  %v3945_v37 = vsub.f32 %v12773_v30, %v3928_v14  ;;  %v3944_v3 = vsub.f32 %v12778_v41, %v3926_v53 }
 0x969   : > { %9396 = vpow2.f32 %v3967_v17 }
 0x96a   : > { %v3973_v55 = vmul.f32 1.442695, %v3944_v3  ;;  %v3975_v26 = vmul.f32 1.442695, %v3945_v37  ;;  %9398 = vpow2.f32 %v3971_v35 }
 0x96b   : > { %v3930_v57 = vpop.xlane.xlu1 %3929  ;;  %v4667_v4 = vpop.permute.xlu0 %4666 }
 0x96c   : > { %v3946_v20 = vsub.f32 %v12785_v13, %v3930_v57  ;;  %v12949_v31 = vsel %vm10073_vm4, %v4667_v4, %v12788_v46  ;;  %9400 = vpow2.f32 %v3973_v55  ;;  %v9298_v57 = vld [vmem:[#allocation2 + $0x20] sm:$0xff]  }
 0x96d   : > { %4746 = vrot.lane.b32.xlu0 %v12949_v31, %s9662_s29  ;;  %9402 = vpow2.f32 %v3975_v26  ;;  %v12960_v13 = vpop.eup %9390  ;;  %v9297_v26 = vld [vmem:[#allocation2 + $0x18] sm:$0xff]  }
 0x96e   : > { %v3977_v30 = vmul.f32 1.442695, %v3946_v20  ;;  %16545 = vst [vmem:[#allocation16_spill] sm:$0xff] %v12960_v13 }
 0x96f   : > { %v4663_v41 = vpop.permute.xlu1 %4662  ;;  %v4669_v36 = vpop.permute.xlu0 %4668 }
 0x970   : > { %9404 = vpow2.f32 %v3977_v30  ;;  %v12956_v34 = vsel %vm10034_vm1, %v4663_v41, %v12790_v61  ;;  %v12967_v54 = vsel %vm10049_vm2, %v4669_v36, %v12796_v42 }
 0x971   : > { %4742 = vrot.lane.b32.xlu1 %v12956_v34, %s9662_s29  ;;  %v12962_v17 = vpop.eup %9392 }
 0x972   : > { %16546 = vst [vmem:[#allocation13_spill] sm:$0xff] %v12962_v17 }
 0x973   : > { %v5251_v46 = vpop.permute.xlu1 %5250  ;;  %v4665_v29 = vpop.permute.xlu0 %4664 }
 0x974   : > { %v12972_v53 = vsel %vm10053_vm3, %v4665_v29, %v12801_v60  ;;  %9098 = vmatprep.subr.msk.bf16.mxu0 %vm16549_vm8, %v5251_v46  ;;  %v5269_v61 = vsel %vm16531_vm0, %v5251_v46, 0  ;;  %v9299_v46 = vld [vmem:[#allocation2 + $0x28] sm:$0xff]   ;;  %vm16565_vm8 = vmmov %vm16531_vm0 }
 0x975   : > { %v12976_v35 = vpop.eup %9394  ;;  %8872 = vmatpush3.bf16.xpose.msra.mxu0 %v5269_v61  ;;  %4748 = vrot.lane.b32.xlu1 %v12967_v54, %s9662_s29  ;;  %v9300_v61 = vld [vmem:[#allocation2 + $0x30] sm:$0xff]  }
 0x976   : > { %16550 = vst [vmem:[#allocation14_spill] sm:$0xff] %v12976_v35  ;;  %v12980_v37 = vpop.eup %9396  ;;  %4744 = vrot.lane.b32.xlu0 %v12972_v53, %s9662_s29  ;;  %v4031_v42 = vpack.c.bf16 %v12976_v35, %v12960_v13  ;;  %v9302_v35 = vld [vmem:[#allocation4 + $0x38] sm:$0xff]  }
 0x977   : > { %16551 = vst [vmem:[#allocation15_spill] sm:$0xff] %v12980_v37  ;;  %v5247_v60 = vpop.permute.xlu1 %5246  ;;  %v5249_v3 = vpop.permute.xlu0 %5248  ;;  %v4032_v55 = vpack.c.bf16 %v12962_v17, %v12980_v37  ;;  %v9301_v17 = vld [vmem:[#allocation2 + $0x38] sm:$0xff]  }
 0x978   : > { %8821 = vmatprep.mubr.bf16.mxu0 %v4031_v42  ;;  %9099 = vmatprep.subr.msk.bf16.mxu0 %vm16552_vm13, %v5249_v3  ;;  %v12989_v4 = vpop.eup %9398  ;;  %vm16567_vm13 = vmmov %vm16531_vm0 }
 0x979   : > { %16553 = vst [vmem:[#allocation177_spill] sm:$0xff] %v12989_v4  ;;  %8822 = vmatmul.mubr.bf16.gmra.mxu0 %v4032_v55  ;;  %5935 = vrot.lane.b32.xlu1 %v9297_v26, %s9667_s17  ;;  %v12992_v20 = vpop.eup %9400  ;;  %v5266_v55 = vsel %vm16557_vm14, %v5249_v3, 0  ;;  %vm16570_vm14 = vmmov %vm16531_vm0 }
 0x97a   : > { %16554 = vst [vmem:[#allocation178_spill] sm:$0xff] %v12992_v20  ;;  %5937 = vrot.lane.b32.xlu0 %v9298_v57, %s9667_s17  ;;  %v4033_v36 = vpack.c.bf16 %v12992_v20, %v12989_v4  ;;  %v12997_v29 = vpop.eup %9402 }
 0x97b   : > { %v5998_v30 = vpop.permute.xlu1 %5997  ;;  %v6000_v41 = vpop.permute.xlu0 %5999  ;;  %16555 = vst [vmem:[#allocation179_spill] sm:$0xff] %v12997_v29 }
 0x97c   : > { %8825 = vmatprep.mubr.bf16.mxu0 %v4033_v36 }
 0x97d   : > { %v12999_v42 = vpop.eup %9404  ;;  %5939 = vrot.lane.b32.xlu1 %v9299_v46, %s9667_s17  ;;  %8874 = vmatpush3.bf16.xpose.msra.mxu0 %v5266_v55  ;;  %v9303_v46 = vld [vmem:[#allocation4 + $0x20] sm:$0xff]   ;;  %v5263_v55 = vsel %vm16560_vm12, %v5247_v60, 0  ;;  %vm16573_vm12 = vmmov %vm16531_vm0 }
 0x97e   : > { %16556 = vst [vmem:[#allocation180_spill] sm:$0xff] %v12999_v42  ;;  %5941 = vrot.lane.b32.xlu0 %v9300_v61, %s9667_s17  ;;  %v4034_v26 = vpack.c.bf16 %v12999_v42, %v12997_v29  ;;  %9100 = vmatprep.subr.msk.bf16.mxu0 %vm16558_vm15, %v5247_v60  ;;  %v9304_v61 = vld [vmem:[#allocation4 + $0x30] sm:$0xff]   ;;  %v9307_v60 = vld [vmem:[#allocation4] sm:$0xff]   ;;  %vm16571_vm15 = vmmov %vm16531_vm0 }
 0x97f   : > { %v13007_v57 = vpop.permute.xlu1 %5993  ;;  %v5996_v20 = vpop.permute.xlu0 %5995 }
 0x981   : > { %8826 = vmatmul.mubr.bf16.gmra.mxu0 %v4034_v26  ;;  %5943 = vrot.lane.b32.xlu1 %v9301_v17, %s9667_s17  ;;  %v9306_v26 = vld [vmem:[#allocation4 + $0x28] sm:$0xff]  }
 0x982   : > { %5605 = vrot.lane.b32.xlu0 %v9302_v35, %s9666_s13  ;;  %8877 = vmatprep.mubr.msk.bf16.mxu0 %vm16559_vm9, %v12311_v49  ;;  %v9305_v49 = vld [vmem:[#allocation4 + $0x10] sm:$0xff]   ;;  %vm16572_vm9 = vmmov %vm16531_vm0 }
 0x983   : > { %v13013_v3 = vpop.permute.xlu1 %5989  ;;  %v13015_v36 = vpop.permute.xlu0 %5991 }
 0x985   : > { %5599 = vrot.lane.b32.xlu1 %v9303_v46, %s9666_s13  ;;  %8876 = vmatpush3.bf16.xpose.msra.mxu0 %v5263_v55 }
 0x986   : > { %5603 = vrot.lane.b32.xlu0 %v9304_v61, %s9666_s13  ;;  %9101 = vmatprep.subr.msk.bf16.mxu0 %vm16561_vm10, %v6000_v41  ;;  %v6047_v61 = vsel %vm16531_vm0, %v6000_v41, 0 }
 0x987   : > { %v13021_v17 = vpop.permute.xlu1 %5985  ;;  %v13023_v35 = vpop.permute.xlu0 %5987 }
 0x989   : > { %5595 = vrot.lane.b32.xlu1 %v9305_v49, %s9666_s13 }
 0x98a   : > { %5601 = vrot.lane.b32.xlu0 %v9306_v26, %s9666_s13 }
 0x98b   : > { %v13027_v42 = vpop.permute.xlu1 %5931  ;;  %v13029_v46 = vpop.permute.xlu0 %5929 }
 0x98c   : > { %16562 = vst [vmem:[#allocation181_spill] sm:$0xff] %v13027_v42  ;;  %16563 = vst [vmem:[#allocation182_spill] sm:$0xff] %v13029_v46  ;;  %8878 = vmatmul.mubr.msk.bf16.vlgmr.msra.gmra.mxu0 %vm16564_vm11, %v12309_v48  ;;  %v9309_v48 = vld [vmem:[#allocation4 + $0x8] sm:$0xff]  }
 0x98d   : > { %5591 = vrot.lane.b32.xlu1 %v9307_v60, %s9666_s13  ;;  %8881 = vmatprep.mubr.msk.bf16.mxu0 %vm16565_vm8, %v12379_v56  ;;  %vm16579_vm8 = vmmov %vm16531_vm0 }
 0x98e   : > { %5597 = vrot.lane.b32.xlu0 %v9308_v28, %s9666_s13  ;;  %8926 = vmatpush3.bf16.xpose.msra.mxu0 %v6047_v61 }
 0x98f   : > { %v4675_v55 = vpop.permute.xlu1 %4674  ;;  %v13038_v49 = vpop.permute.xlu0 %5933  ;;  %9102 = vmatprep.subr.msk.bf16.mxu0 %vm16567_vm13, %v5998_v30  ;;  %vm16580_vm13 = vmmov %vm16531_vm0 }
 0x990   : > { %16566 = vst [vmem:[#allocation183_spill] sm:$0xff] %v13038_v49  ;;  %v13044_v9 = vsel %vm10138_vm5, %v4675_v55, %v12817_v47  ;;  %v6044_v47 = vsel %vm16572_vm9, %v5998_v30, 0 }
 0x991   : > { %4754 = vrot.lane.b32.xlu1 %v13044_v9, %s9662_s29 }
 0x992   : > { %5593 = vrot.lane.b32.xlu0 %v9309_v48, %s9666_s13 }
 0x993   : > { %v4671_v56 = vpop.permute.xlu1 %4670  ;;  %v4677_v28 = vpop.permute.xlu0 %4676 }
 0x994   : > { %v13052_v60 = vsel %vm10170_vm7, %v4671_v56, %v12827_v43  ;;  %8882 = vmatmul.mubr.msk.bf16.gmra.mxu0 %vm16570_vm14, %v12377_v2  ;;  %v16575_v2 = vld [vmem:[#allocation29_spill] sm:$0xff] }
 0x995   : > { %8885 = vmatprep.mubr.msk.bf16.mxu0 %vm16571_vm15, %v12387_v8  ;;  %vm16576_vm10 = vnez %v16575_v2  ;;  %vm16583_vm15 = vmmov %vm16531_vm0 }
 0x996   : > { %4750 = vrot.lane.b32.xlu0 %v13052_v60, %s9662_s29  ;;  %8928 = vmatpush3.bf16.xpose.msra.mxu0 %v6044_v47  ;;  %v13070_v56 = vsel %vm16576_vm10, %v4677_v28, %v12837_v6  ;;  %v16577_v47 = vld [vmem:[#allocation33_spill] sm:$0xff]  ;;  %v6041_v6 = vsel %vm16580_vm13, %v5996_v20, 0  ;;  %v16581_v28 = vld [vmem:[#allocation34_spill] sm:$0xff]  ;;  %vm16590_vm13 = vmmov %vm16531_vm0 }
 0x997   : > { %v4685_v61 = vpop.permute.xlu1 %4684  ;;  %v4673_v55 = vpop.permute.xlu0 %4672  ;;  %9103 = vmatprep.subr.msk.bf16.mxu0 %vm16573_vm12, %v5996_v20  ;;  %vm16578_vm11 = vnez %v16577_v47  ;;  %vm16582_vm14 = vnez %v16581_v28  ;;  %v16586_v20 = vld [vmem:[#allocation38_spill] sm:$0xff] }
 0x998   : > { %v13065_v43 = vsel %vm10166_vm6, %v4673_v55, %v12844_v23  ;;  %vm16587_vm12 = vnez %v16586_v20 }
 0x999   : > { %4752 = vrot.lane.b32.xlu1 %v13065_v43, %s9662_s29 }
 0x99a   : > { %4756 = vrot.lane.b32.xlu0 %v13070_v56, %s9662_s29 }
 0x99b   : > { %v4681_v8 = vpop.permute.xlu1 %4680  ;;  %v4683_v30 = vpop.permute.xlu0 %4682 }
 0x99c   : > { %v13079_v29 = vsel %vm16578_vm11, %v4683_v30, %v12848_v33  ;;  %8886 = vmatmul.mubr.msk.bf16.gmra.mxu0 %vm16579_vm8, %v12385_v24  ;;  %v13091_v55 = vsel %vm16582_vm14, %v4681_v8, %v12868_v15  ;;  %v16584_v24 = vld [vmem:[#allocation36_spill] sm:$0xff]  ;;  %v16588_v8 = vld [vmem:[#allocation30_spill] sm:$0xff] }
 0x99d   : > { %4762 = vrot.lane.b32.xlu1 %v13079_v29, %s9662_s29  ;;  %8889 = vmatprep.mubr.msk.bf16.mxu0 %vm16531_vm0, %v12393_v0  ;;  %vm16585_vm9 = vnez %v16584_v24  ;;  %vm16589_vm8 = vnez %v16588_v8 }
 0x99e   : > { %8930 = vmatpush3.bf16.xpose.msra.mxu0 %v6041_v6  ;;  %v13112_v6 = vsel %vm16589_vm8, %v4685_v61, %v12862_v5  ;;  %v16593_v5 = vld [vmem:[#allocation39_spill] sm:$0xff]  ;;  %v16595_v61 = vld [vmem:[#allocation40_spill] sm:$0xff] }
 0x99f   : > { %v4679_v23 = vpop.permute.xlu0 %4678  ;;  %9104 = vmatprep.subr.msk.bf16.mxu0 %vm16583_vm15, %v13007_v57  ;;  %v4691_v33 = vpop.permute.xlu1 %4690  ;;  %vm16591_vm15 = vmmov %vm16531_vm0  ;;  %vm16596_vm14 = vnez %v16595_v61 }
 0x9a0   : > { %v13098_v30 = vsel %vm16585_vm9, %v4679_v23, %v12856_v21  ;;  %v13107_v15 = vsel %vm16587_vm12, %v4691_v33, %v12874_v50  ;;  %v6038_v23 = vsel %vm16590_vm13, %v13007_v57, 0  ;;  %vm16592_vm12 = vmmov %vm16531_vm0  ;;  %v9310_v33 = vld [vmem:[#allocation3 + $0x28] sm:$0xff]  }
 0x9a1   : > { %4760 = vrot.lane.b32.xlu1 %v13091_v55, %s9662_s29  ;;  %4758 = vrot.lane.b32.xlu0 %v13098_v30, %s9662_s29 }
 0x9a3   : > { %v4693_v0 = vpop.permute.xlu0 %4692  ;;  %v4687_v21 = vpop.permute.xlu1 %4686 }
 0x9a4   : > { %8890 = vmatmul.mubr.msk.bf16.gmra.mxu0 %vm16531_vm0, %v12391_v32  ;;  %vm16594_vm0 = vnez %v16593_v5  ;;  %v13134_v57 = vsel %vm16596_vm14, %v4687_v21, %v12880_v51 }
 0x9a5   : > { %4770 = vrot.lane.b32.xlu1 %v13107_v15, %s9662_s29  ;;  %8941 = vmatprep.mubr.msk.bf16.mxu0 %vm16591_vm15, %v13029_v46  ;;  %vm16599_vm15 = vmmov %vm16590_vm13 }
 0x9a6   : > { %4764 = vrot.lane.b32.xlu0 %v13112_v6, %s9662_s29  ;;  %8932 = vmatpush3.bf16.xpose.msra.mxu0 %v6038_v23  ;;  %v16597_v23 = vld [vmem:[#allocation37_spill] sm:$0xff] }
 0x9a7   : > { %v4689_v50 = vpop.permute.xlu0 %4688  ;;  %9105 = vmatprep.subr.msk.bf16.mxu0 %vm16592_vm12, %v13015_v36  ;;  %vm16598_vm12 = vnez %v16597_v23 }
 0x9a8   : > { %v13129_v32 = vsel %vm16594_vm0, %v4689_v50, %v12904_v40  ;;  %v13143_v4 = vsel %vm16598_vm12, %v4693_v0, %v12896_v62  ;;  %v6035_v40 = vsel %vm16590_vm13, %v13015_v36, 0  ;;  %vm16600_vm0 = vmmov %vm16590_vm13  ;;  %v16606_v0 = vld [vmem:[#allocation43_spill] sm:$0xff]  ;;  %v16608_v50 = vld [vmem:[#allocation44_spill] sm:$0xff] }
 0x9a9   : > { %4768 = vrot.lane.b32.xlu1 %v13129_v32, %s9662_s29  ;;  %v6032_v51 = vsel %vm16600_vm0, %v13013_v3, 0  ;;  %vm16601_vm14 = vmmov %vm16600_vm0 }
 0x9aa   : > { %4766 = vrot.lane.b32.xlu0 %v13134_v57, %s9662_s29  ;;  %vm16602_vm12 = vmmov %vm16600_vm0 }
 0x9ab   : > { %v6029_v62 = vsel %vm16602_vm12, %v13023_v35, 0  ;;  %vm16603_vm13 = vmmov %vm16600_vm0 }
 0x9ac   : > { %vm16604_vm8 = vmmov %vm16600_vm0 }
 0x9ad   : > { %6756 = vrot.lane.b32.xlu1 %v9310_v33, %s9667_s17  ;;  %v6026_v36 = vsel %vm16604_vm8, %v13021_v17, 0  ;;  %vm16609_vm8 = vcmp.eq.s32.totalorder %v16608_v50, 1 }
 0x9ae   : > { %4772 = vrot.lane.b32.xlu0 %v13143_v4, %s9662_s29  ;;  %8934 = vmatpush3.bf16.xpose.msra.mxu0 %v6035_v40  ;;  %v9311_v40 = vld [vmem:[#allocation3 + $0x38] sm:$0xff]  }
 0x9af   : > { %9106 = vmatprep.subr.msk.bf16.mxu0 %vm16599_vm15, %v13013_v3  ;;  %vm16605_vm15 = vmmov %vm16600_vm0 }
 0x9b6   : > { %8936 = vmatpush3.bf16.xpose.msra.mxu0 %v6032_v51  ;;  %v16610_v51 = vld [vmem:[#allocation42_spill] sm:$0xff] }
 0x9b7   : > { %9107 = vmatprep.subr.msk.bf16.mxu0 %vm16601_vm14, %v13023_v35  ;;  %vm16607_vm14 = vcmp.eq.s32.totalorder %v16606_v0, 1  ;;  %vm16611_vm12 = vcmp.eq.s32.totalorder %v16610_v51, 1 }
 0x9be   : > { %8938 = vmatpush3.bf16.xpose.msra.mxu0 %v6029_v62 }
 0x9bf   : > { %9108 = vmatprep.subr.msk.bf16.mxu0 %vm16603_vm13, %v13021_v17 }
 0x9c6   : > { %8940 = vmatpush3.bf16.xpose.msra.mxu0 %v6026_v36 }
 0x9cd   : > { %8942 = vmatmul.mubr.msk.bf16.vlgmr.msra.gmra.mxu0 %vm16605_vm15, %v13027_v42  ;;  %vm16616_vm15 = vmmov %vm16600_vm0 }
 0x9ce   : > { %8945 = vmatprep.mubr.msk.bf16.mxu0 %vm16600_vm0, %v13038_v49 }
 0x9df   : > { %v4747_v3 = vpop.permute.xlu0 %4746 }
 0x9e0   : > { %v13169_v21 = vsel %vm16607_vm14, %v4747_v3, %v12949_v31  ;;  %v16613_v3 = vld [vmem:[#allocation41_spill] sm:$0xff]  ;;  %vm16620_vm14 = vmmov %vm16600_vm0 }
 0x9e1   : > { %4826 = vrot.lane.b32.xlu0 %v13169_v21, %s9663_s21  ;;  %vm16614_vm13 = vcmp.eq.s32.totalorder %v16613_v3, 1 }
 0x9e3   : > { %v4743_v35 = vpop.permute.xlu1 %4742 }
 0x9e4   : > { %v13176_v17 = vsel %vm16609_vm8, %v4743_v35, %v12956_v34  ;;  %v9312_v34 = vld [vmem:[#allocation3 + $0x30] sm:$0xff]   ;;  %vm16621_vm8 = vmmov %vm16600_vm0 }
 0x9e5   : > { %4822 = vrot.lane.b32.xlu0 %v13176_v17, %s9663_s21 }
 0x9e7   : > { %v4749_v33 = vpop.permute.xlu1 %4748 }
 0x9e8   : > { %v13183_v62 = vsel %vm16611_vm12, %v4749_v33, %v12967_v54  ;;  %v4745_v31 = vpop.permute.xlu0 %4744  ;;  %v9313_v33 = vld [vmem:[#allocation3 + $0x20] sm:$0xff]   ;;  %vm16622_vm12 = vmmov %vm16600_vm0 }
 0x9e9   : > { %4828 = vrot.lane.b32.xlu1 %v13183_v62, %s9663_s21  ;;  %6760 = vrot.lane.b32.xlu0 %v9311_v40, %s9667_s17  ;;  %v13193_v35 = vsel %vm16614_vm13, %v4745_v31, %v12972_v53  ;;  %v9314_v40 = vld [vmem:[#allocation3 + $0x10] sm:$0xff]   ;;  %v9315_v31 = vld [vmem:[#allocation3 + $0x18] sm:$0xff]   ;;  %vm16623_vm13 = vcmp.eq.s32.totalorder %v16234_v38, 1 }
 0x9eb   : > { %v13188_v36 = vpop.permute.xlu1 %5935 }
 0x9ec   : > { %16612 = vst [vmem:[#allocation24_spill] sm:$0xff] %v13188_v36  ;;  %v13195_v37 = vpop.permute.xlu0 %5937  ;;  %8946 = vmatmul.mubr.msk.bf16.gmra.mxu0 %vm16616_vm15, %v13188_v36 }
 0x9ed   : > { %16615 = vst [vmem:[#allocation27_spill] sm:$0xff] %v13195_v37  ;;  %6758 = vrot.lane.b32.xlu0 %v9312_v34, %s9667_s17  ;;  %4824 = vrot.lane.b32.xlu1 %v13193_v35, %s9663_s21 }
 0x9ee   : > { %8949 = vmatprep.mubr.msk.bf16.mxu0 %vm16600_vm0, %v13195_v37 }
 0x9ef   : > { %v13204_v54 = vpop.permute.xlu1 %5939 }
 0x9f0   : > { %16617 = vst [vmem:[#allocation26_spill] sm:$0xff] %v13204_v54  ;;  %v13206_v13 = vpop.permute.xlu0 %5941 }
 0x9f1   : > { %16618 = vst [vmem:[#allocation29_spill] sm:$0xff] %v13206_v13  ;;  %6754 = vrot.lane.b32.xlu0 %v9313_v33, %s9667_s17  ;;  %6750 = vrot.lane.b32.xlu1 %v9314_v40, %s9667_s17 }
 0x9f3   : > { %v13210_v53 = vpop.permute.xlu1 %5943 }
 0x9f4   : > { %16619 = vst [vmem:[#allocation33_spill] sm:$0xff] %v13210_v53  ;;  %v5606_v34 = vpop.permute.xlu0 %5605  ;;  %8950 = vmatmul.mubr.msk.bf16.gmra.mxu0 %vm16620_vm14, %v13204_v54 }
 0x9f5   : > { %8893 = vmatprep.subr.bf16.mxu1 %v5606_v34  ;;  %6752 = vrot.lane.b32.xlu0 %v9315_v31, %s9667_s17 }
 0x9f6   : > { %8894 = vmatpush3.bf16.msra.mxu1 %v5606_v34  ;;  %8953 = vmatprep.mubr.msk.bf16.mxu0 %vm16621_vm8, %v13206_v13 }
 0x9f7   : > { %v5600_v7 = vpop.permute.xlu1 %5599 }
 0x9f8   : > { %v5604_v37 = vpop.permute.xlu0 %5603 }
 0x9f9   : > { %8895 = vmatprep.subr.bf16.mxu1 %v5604_v37  ;;  %6748 = vrot.lane.b32.xlu0 %v9316_v25, %s9667_s17 }
 0x9fa   : > { %8896 = vmatpush3.bf16.msra.mxu1 %v5604_v37 }
 0x9fb   : > { %v5596_v33 = vpop.permute.xlu1 %5595 }
 0x9fc   : > { %v5602_v40 = vpop.permute.xlu0 %5601  ;;  %8954 = vmatmul.mubr.msk.bf16.gmra.mxu0 %vm16622_vm12, %v13210_v53 }
 0x9fd   : > { %8897 = vmatprep.subr.bf16.mxu1 %v5602_v40 }
 0x9fe   : > { %8898 = vmatpush3.bf16.msra.mxu1 %v5602_v40  ;;  %v16624_v40 = vld [vmem:[#allocation78_spill] sm:$0xff] }
 0x9ff   : > { %8899 = vmatprep.subr.bf16.mxu1 %v5600_v7  ;;  %v5592_v31 = vpop.permute.xlu1 %5591  ;;  %vm16625_vm15 = vcmp.eq.s32.totalorder %v16624_v40, 1 }
 0xa00   : > { %v5598_v34 = vpop.permute.xlu0 %5597 }
 0xa02   : > { %8900 = vmatpush3.bf16.msra.mxu1 %v5600_v7 }
 0xa03   : > { %8901 = vmatprep.subr.bf16.mxu1 %v5598_v34  ;;  %v4755_v13 = vpop.permute.xlu1 %4754 }
 0xa04   : > { %v13223_v54 = vsel %vm16623_vm13, %v4755_v13, %v13044_v9  ;;  %v5594_v25 = vpop.permute.xlu0 %5593  ;;  %v16626_v13 = vld [vmem:[#allocation69_spill] sm:$0xff] }
 0xa05   : > { %4834 = vrot.lane.b32.xlu0 %v13223_v54, %s9663_s21  ;;  %vm16627_vm0 = vcmp.eq.s32.totalorder %v16626_v13, 1 }
 0xa06   : > { %8902 = vmatpush3.bf16.msra.mxu1 %v5598_v34 }
 0xa07   : > { %8903 = vmatprep.subr.bf16.mxu1 %v5596_v33 }
 0xa08   : > { %v4751_v37 = vpop.permute.xlu0 %4750 }
 0xa09   : > { %v13230_v53 = vsel %vm16625_vm15, %v4751_v37, %v13052_v60  ;;  %v16628_v60 = vld [vmem:[#allocation79_spill] sm:$0xff]  ;;  %v16630_v37 = vld [vmem:[#allocation70_spill] sm:$0xff] }
 0xa0a   : > { %8904 = vmatpush3.bf16.msra.mxu1 %v5596_v33  ;;  %4830 = vrot.lane.b32.xlu0 %v13230_v53, %s9663_s21  ;;  %vm16629_vm14 = vcmp.eq.s32.totalorder %v16628_v60, 1  ;;  %vm16631_vm8 = vcmp.eq.s32.totalorder %v16630_v37, 1  ;;  %v16723_v60 = vld [vmem:[#allocation91_spill] sm:$0xff] }
 0xa0b   : > { %8905 = vmatprep.subr.bf16.mxu1 %v5594_v25  ;;  %v4753_v7 = vpop.permute.xlu1 %4752 }
 0xa0c   : > { %v4757_v9 = vpop.permute.xlu0 %4756  ;;  %v13249_v49 = vsel %vm16631_vm8, %v4753_v7, %v13065_v43  ;;  %v16634_v43 = vld [vmem:[#allocation81_spill] sm:$0xff] }
 0xa0d   : > { %v13237_v36 = vsel %vm16627_vm0, %v4757_v9, %v13070_v56  ;;  %v16632_v9 = vld [vmem:[#allocation80_spill] sm:$0xff]  ;;  %vm16635_vm13 = vcmp.eq.s32.totalorder %v16634_v43, 1  ;;  %vm16640_vm0 = vcmp.eq.s32.totalorder %v16639_v11, 1 }
 0xa0e   : > { %8906 = vmatpush3.bf16.msra.mxu1 %v5594_v25  ;;  %4836 = vrot.lane.b32.xlu1 %v13237_v36, %s9663_s21  ;;  %vm16633_vm12 = vcmp.eq.s32.totalorder %v16632_v9, 1  ;;  %v16721_v11 = vld [vmem:[#allocation100_spill] sm:$0xff] }
 0xa0f   : > { %8907 = vmatprep.subr.bf16.mxu1 %v5592_v31  ;;  %v4763_v34 = vpop.permute.xlu1 %4762 }
 0xa10   : > { %v13244_v33 = vsel %vm16629_vm14, %v4763_v34, %v13079_v29  ;;  %v16636_v34 = vld [vmem:[#allocation71_spill] sm:$0xff] }
 0xa11   : > { %4842 = vrot.lane.b32.xlu0 %v13244_v33, %s9663_s21  ;;  %vm16637_vm15 = vcmp.eq.s32.totalorder %v16636_v34, 1 }
 0xa12   : > { %8908 = vmatpush3.bf16.msra.mxu1 %v5592_v31  ;;  %4832 = vrot.lane.b32.xlu1 %v13249_v49, %s9663_s21 }
 0xa13   : > { %v4761_v56 = vpop.permute.xlu1 %4760  ;;  %v4759_v25 = vpop.permute.xlu0 %4758 }
 0xa14   : > { %v13258_v42 = vsel %vm16633_vm12, %v4759_v25, %v13098_v30  ;;  %v13276_v25 = vpop.f32.mrf.mxu0 }
 0xa15   : > { %4838 = vrot.lane.b32.xlu0 %v13258_v42, %s9663_s21  ;;  %16638 = vst [vmem:[#allocation34_spill] sm:$0xff] %v13276_v25  ;;  %v16644_v25 = vld [vmem:[#allocation73_spill] sm:$0xff] }
 0xa16   : > { %vm16645_vm8 = vcmp.eq.s32.totalorder %v16644_v25, 1 }
 0xa17   : > { %v4771_v29 = vpop.permute.xlu1 %4770 }
 0xa18   : > { %v13265_v7 = vsel %vm16635_vm13, %v4771_v29, %v13107_v15  ;;  %v4765_v31 = vpop.permute.xlu0 %4764  ;;  %v13281_v15 = vsel %vm16640_vm0, %v4761_v56, %v13091_v55  ;;  %v16641_v29 = vld [vmem:[#allocation82_spill] sm:$0xff] }
 0xa19   : > { %v13270_v46 = vsel %vm16637_vm15, %v4765_v31, %v13112_v6  ;;  %4850 = vrot.lane.b32.xlu0 %v13265_v7, %s9663_s21  ;;  %vm16642_vm14 = vcmp.eq.s32.totalorder %v16641_v29, 1  ;;  %v13292_v31 = vpop.f32.mrf.mxu0  ;;  %v16647_v56 = vld [vmem:[#allocation74_spill] sm:$0xff] }
 0xa1a   : > { %4844 = vrot.lane.b32.xlu1 %v13270_v46, %s9663_s21  ;;  %16643 = vst [vmem:[#allocation36_spill] sm:$0xff] %v13292_v31  ;;  %vm16648_vm12 = vcmp.eq.s32.totalorder %v16647_v56, 1 }
 0xa1b   : > { %v4769_v55 = vpop.permute.xlu1 %4768 }
 0xa1c   : > { %v4767_v30 = vpop.permute.xlu0 %4766 }
 0xa1d   : > { %v13286_v43 = vsel %vm16642_vm14, %v4767_v30, %v13134_v57  ;;  %v13301_v57 = vpop.f32.mrf.mxu0  ;;  %v13306_v30 = vsel %vm16648_vm12, %v4769_v55, %v13129_v32  ;;  %vm16672_vm14 = vcmask 261120   ;;  %vm16687_vm12 = vcmp.eq.s32.totalorder %v16686_v16, 1 }
 0xa1e   : > { %4840 = vrot.lane.b32.xlu1 %v13281_v15, %s9663_s21  ;;  %4846 = vrot.lane.b32.xlu0 %v13286_v43, %s9663_s21  ;;  %16646 = vst [vmem:[#allocation38_spill] sm:$0xff] %v13301_v57 }
 0xa1f   : > { %v13310_v31 = vpop.f32.mrf.mxu0 }
 0xa20   : > { %v4773_v6 = vpop.permute.xlu0 %4772  ;;  %16649 = vst [vmem:[#allocation30_spill] sm:$0xff] %v13310_v31 }
 0xa21   : > { %v13297_v18 = vsel %vm16645_vm8, %v4773_v6, %v13143_v4 }
 0xa22   : > { %4852 = vrot.lane.b32.xlu1 %v13297_v18, %s9663_s21 }
 0xa26   : > { %4848 = vrot.lane.b32.xlu1 %v13306_v30, %s9663_s21 }
 0xa27   : > { %v13312_v52 = vpop.f32.mrf.mxu0 }
 0xa28   : > { %16650 = vst [vmem:[#allocation39_spill] sm:$0xff] %v13312_v52 }
 0xa29   : > { %v13314_v4 = vpop.f32.mrf.mxu0 }
 0xa2a   : > { %16651 = vst [vmem:[#allocation40_spill] sm:$0xff] %v13314_v4  ;;  %v16661_v4 = vld [vmem:[#allocation83_spill] sm:$0xff] }
 0xa2b   : > { %v13316_v6 = vpop.f32.mrf.mxu0  ;;  %vm16662_vm13 = vcmp.eq.s32.totalorder %v16661_v4, 1 }
 0xa2c   : > { %16652 = vst [vmem:[#allocation37_spill] sm:$0xff] %v13316_v6 }
 0xa2d   : > { %v13318_v25 = vpop.f32.mrf.mxu0 }
 0xa2e   : > { %16653 = vst [vmem:[#allocation43_spill] sm:$0xff] %v13318_v25 }
 0xa39   : > { %v13320_v44 = vpop.f32.mrf.mxu0 }
 0xa3a   : > { %16654 = vst [vmem:[#allocation44_spill] sm:$0xff] %v13320_v44 }
 0xa3b   : > { %v13322_v57 = vpop.f32.mrf.mxu0 }
 0xa3c   : > { %16655 = vst [vmem:[#allocation42_spill] sm:$0xff] %v13322_v57 }
 0xa3d   : > { %v13324_v56 = vpop.f32.mrf.mxu0 }
 0xa3e   : > { %16656 = vst [vmem:[#allocation41_spill] sm:$0xff] %v13324_v56  ;;  %v13343_v56 = vpop.permute.xlu1 %6756 }
 0xa3f   : > { %v13326_v32 = vpop.f32.mrf.mxu0  ;;  %16664 = vst [vmem:[#allocation187_spill] sm:$0xff] %v13343_v56  ;;  %v16674_v56 = vld [vmem:[#allocation76_spill] sm:$0xff] }
 0xa40   : > { %16657 = vst [vmem:[#allocation78_spill] sm:$0xff] %v13326_v32  ;;  %vm16675_vm8 = vcmp.eq.s32.totalorder %v16674_v56, 1 }
 0xa41   : > { %v13328_v55 = vpop.f32.mrf.mxu0 }
 0xa42   : > { %16658 = vst [vmem:[#allocation69_spill] sm:$0xff] %v13328_v55 }
 0xa43   : > { %v13330_v59 = vpop.f32.mrf.mxu0 }
 0xa44   : > { %16659 = vst [vmem:[#allocation184_spill] sm:$0xff] %v13330_v59  ;;  %v16666_v59 = vld [vmem:[#allocation84_spill] sm:$0xff] }
 0xa45   : > { %v13332_v31 = vpop.f32.mrf.mxu0  ;;  %vm16667_vm15 = vcmp.eq.s32.totalorder %v16666_v59, 1 }
 0xa46   : > { %16660 = vst [vmem:[#allocation185_spill] sm:$0xff] %v13332_v31 }
 0xa47   : > { %v13339_v25 = vpop.f32.mrf.mxu0 }
 0xa48   : > { %16663 = vst [vmem:[#allocation186_spill] sm:$0xff] %v13339_v25  ;;  %v16669_v25 = vld [vmem:[#allocation75_spill] sm:$0xff] }
 0xa49   : > { %vm16670_vm0 = vcmp.eq.s32.totalorder %v16669_v25, 1 }
 0xa4c   : > { %v13345_v32 = vpop.f32.mrf.mxu0 }
 0xa4d   : > { %16665 = vst [vmem:[#allocation188_spill] sm:$0xff] %v13345_v32 }
 0xa53   : > { %v4827_v52 = vpop.permute.xlu0 %4826 }
 0xa54   : > { %v13337_v6 = vsel %vm16662_vm13, %v4827_v52, %v13169_v21  ;;  %v13354_v52 = vpop.f32.mrf.mxu0 }
 0xa55   : > { %4906 = vrot.lane.b32.xlu0 %v13337_v6, %s9664_s23  ;;  %16668 = vst [vmem:[#allocation189_spill] sm:$0xff] %v13354_v52 }
 0xa57   : > { %v4823_v55 = vpop.permute.xlu0 %4822 }
 0xa58   : > { %v13350_v31 = vsel %vm16667_vm15, %v4823_v55, %v13176_v17  ;;  %v13367_v17 = vpop.f32.mrf.mxu0 }
 0xa59   : > { %4902 = vrot.lane.b32.xlu0 %v13350_v31, %s9664_s23  ;;  %16673 = vst [vmem:[#allocation191_spill] sm:$0xff] %v13367_v17 }
 0xa5b   : > { %v4829_v21 = vpop.permute.xlu1 %4828  ;;  %v13361_v57 = vpop.permute.xlu0 %6760 }
 0xa5c   : > { %v13359_v44 = vsel %vm16670_vm0, %v4829_v21, %v13183_v62  ;;  %16671 = vst [vmem:[#allocation190_spill] sm:$0xff] %v13361_v57  ;;  %9109 = vmatprep.subr.msk.bf16.mxu1 %vm16672_vm14, %v13361_v57  ;;  %v13378_v62 = vpop.f32.mrf.mxu0 }
 0xa5d   : > { %4908 = vrot.lane.b32.xlu1 %v13359_v44, %s9664_s23  ;;  %16677 = vst [vmem:[#allocation193_spill] sm:$0xff] %v13378_v62 }
 0xa5e   : > { %v13380_v21 = vpop.f32.mrf.mxu0 }
 0xa5f   : > { %v4825_v55 = vpop.permute.xlu1 %4824  ;;  %v13374_v59 = vpop.permute.xlu0 %6758  ;;  %16678 = vst [vmem:[#allocation194_spill] sm:$0xff] %v13380_v21 }
 0xa60   : > { %v13372_v4 = vsel %vm16675_vm8, %v4825_v55, %v13193_v35  ;;  %16676 = vst [vmem:[#allocation192_spill] sm:$0xff] %v13374_v59  ;;  %v13384_v25 = vpop.f32.mrf.mxu0 }
 0xa61   : > { %4904 = vrot.lane.b32.xlu1 %v13372_v4, %s9664_s23  ;;  %16680 = vst [vmem:[#allocation196_spill] sm:$0xff] %v13384_v25 }
 0xa62   : > { %v13388_v27 = vpop.f32.mrf.mxu0 }
 0xa63   : > { %v13382_v57 = vpop.permute.xlu0 %6754  ;;  %16682 = vst [vmem:[#allocation198_spill] sm:$0xff] %v13388_v27 }
 0xa64   : > { %16679 = vst [vmem:[#allocation195_spill] sm:$0xff] %v13382_v57  ;;  %v13390_v56 = vpop.f32.mrf.mxu0 }
 0xa65   : > { %16683 = vst [vmem:[#allocation199_spill] sm:$0xff] %v13390_v56  ;;  %v16690_v56 = vld [vmem:[#allocation94_spill] sm:$0xff] }
 0xa66   : > { %v13394_v55 = vpop.f32.mrf.mxu0  ;;  %vm16691_vm13 = vcmp.eq.s32.totalorder %v16690_v56, 1 }
 0xa67   : > { %v13386_v19 = vpop.permute.xlu0 %6752  ;;  %16685 = vst [vmem:[#allocation201_spill] sm:$0xff] %v13394_v55 }
 0xa68   : > { %16681 = vst [vmem:[#allocation197_spill] sm:$0xff] %v13386_v19  ;;  %v13403_v57 = vpop.f32.mrf.mxu0  ;;  %v13405_v19 = vpop.permute.xlu1 %6750 }
 0xa69   : > { %16688 = vst [vmem:[#allocation202_spill] sm:$0xff] %v13403_v57  ;;  %16689 = vst [vmem:[#allocation203_spill] sm:$0xff] %v13405_v19 }
 0xa6a   : > { %v13414_v55 = vpop.f32.mrf.mxu0 }
 0xa6b   : > { %v13392_v35 = vpop.permute.xlu0 %6748  ;;  %16692 = vst [vmem:[#allocation204_spill] sm:$0xff] %v13414_v55  ;;  %v16698_v55 = vld [vmem:[#allocation86_spill] sm:$0xff] }
 0xa6c   : > { %16684 = vst [vmem:[#allocation200_spill] sm:$0xff] %v13392_v35  ;;  %v13423_v19 = vpop.f32.mrf.mxu0  ;;  %vm16699_vm14 = vcmp.eq.s32.totalorder %v16698_v55, 1 }
 0xa6d   : > { %16695 = vst [vmem:[#allocation205_spill] sm:$0xff] %v13423_v19 }
 0xa77   : > { %v4835_v59 = vpop.permute.xlu0 %4834 }
 0xa78   : > { %v13399_v39 = vsel %vm16687_vm12, %v4835_v59, %v13223_v54  ;;  %v16693_v54 = vld [vmem:[#allocation85_spill] sm:$0xff] }
 0xa79   : > { %4914 = vrot.lane.b32.xlu0 %v13399_v39, %s9664_s23  ;;  %vm16694_vm15 = vcmp.eq.s32.totalorder %v16693_v54, 1  ;;  %v16701_v54 = vld [vmem:[#allocation96_spill] sm:$0xff] }
 0xa7a   : > { %vm16702_vm8 = vcmp.eq.s32.totalorder %v16701_v54, 1  ;;  %v16709_v54 = vld [vmem:[#allocation88_spill] sm:$0xff] }
 0xa7c   : > { %v4831_v27 = vpop.permute.xlu0 %4830 }
 0xa7d   : > { %v13410_v35 = vsel %vm16691_vm13, %v4831_v27, %v13230_v53  ;;  %v16696_v27 = vld [vmem:[#allocation95_spill] sm:$0xff] }
 0xa7e   : > { %4910 = vrot.lane.b32.xlu0 %v13410_v35, %s9664_s23  ;;  %vm16697_vm0 = vcmp.eq.s32.totalorder %v16696_v27, 1 }
 0xa80   : > { %v4837_v59 = vpop.permute.xlu1 %4836 }
 0xa81   : > { %v13419_v16 = vsel %vm16694_vm15, %v4837_v59, %v13237_v36  ;;  %v13439_v36 = vpop.f32.mrf.mxu0  ;;  %vm16710_vm15 = vcmp.eq.s32.totalorder %v16709_v54, 1 }
 0xa82   : > { %4916 = vrot.lane.b32.xlu1 %v13419_v16, %s9664_s23  ;;  %16700 = vst [vmem:[#allocation206_spill] sm:$0xff] %v13439_v36  ;;  %v16706_v36 = vld [vmem:[#allocation87_spill] sm:$0xff] }
 0xa83   : > { %v4843_v57 = vpop.permute.xlu0 %4842  ;;  %vm16707_vm13 = vcmp.eq.s32.totalorder %v16706_v36, 1 }
 0xa84   : > { %v4833_v56 = vpop.permute.xlu1 %4832  ;;  %v13428_v53 = vsel %vm16697_vm0, %v4843_v57, %v13244_v33  ;;  %v13448_v33 = vpop.f32.mrf.mxu0 }
 0xa85   : > { %v13433_v25 = vsel %vm16699_vm14, %v4833_v56, %v13249_v49  ;;  %4922 = vrot.lane.b32.xlu0 %v13428_v53, %s9664_s23  ;;  %16703 = vst [vmem:[#allocation207_spill] sm:$0xff] %v13448_v33  ;;  %v16704_v56 = vld [vmem:[#allocation97_spill] sm:$0xff] }
 0xa86   : > { %4912 = vrot.lane.b32.xlu1 %v13433_v25, %s9664_s23  ;;  %vm16705_vm12 = vcmp.eq.s32.totalorder %v16704_v56, 1 }
 0xa87   : > { %v4839_v59 = vpop.permute.xlu0 %4838 }
 0xa88   : > { %v13444_v27 = vsel %vm16702_vm8, %v4839_v59, %v13258_v42  ;;  %v13464_v42 = vpop.f32.mrf.mxu0 }
 0xa89   : > { %4918 = vrot.lane.b32.xlu0 %v13444_v27, %s9664_s23  ;;  %16708 = vst [vmem:[#allocation208_spill] sm:$0xff] %v13464_v42 }
 0xa8b   : > { %v4851_v49 = vpop.permute.xlu0 %4850 }
 0xa8c   : > { %v4845_v57 = vpop.permute.xlu1 %4844  ;;  %v13453_v55 = vsel %vm16705_vm12, %v4851_v49, %v13265_v7  ;;  %v16711_v49 = vld [vmem:[#allocation98_spill] sm:$0xff]  ;;  %vm16719_vm12 = vcmp.eq.s32.totalorder %v16718_v10, 1 }
 0xa8d   : > { %v13458_v19 = vsel %vm16707_vm13, %v4845_v57, %v13270_v46  ;;  %4930 = vrot.lane.b32.xlu0 %v13453_v55, %s9664_s23  ;;  %vm16712_vm0 = vcmp.eq.s32.totalorder %v16711_v49, 1  ;;  %v13478_v57 = vpop.f32.mrf.mxu0  ;;  %v16716_v49 = vld [vmem:[#allocation90_spill] sm:$0xff]  ;;  %vm16722_vm13 = vcmp.eq.s32.totalorder %v16721_v11, 1 }
 0xa8e   : > { %4924 = vrot.lane.b32.xlu1 %v13458_v19, %s9664_s23  ;;  %16713 = vst [vmem:[#allocation209_spill] sm:$0xff] %v13478_v57  ;;  %vm16717_vm8 = vcmp.eq.s32.totalorder %v16716_v49, 1 }
 0xa8f   : > { %v13482_v42 = vpop.f32.mrf.mxu0 }
 0xa90   : > { %v4841_v59 = vpop.permute.xlu1 %4840  ;;  %v4847_v7 = vpop.permute.xlu0 %4846 }
 0xa91   : > { %v13469_v56 = vsel %vm16710_vm15, %v4841_v59, %v13281_v15  ;;  %v13474_v46 = vsel %vm16712_vm0, %v4847_v7, %v13286_v43  ;;  %v16714_v15 = vld [vmem:[#allocation89_spill] sm:$0xff]  ;;  %v13493_v7 = vpop.f32.mrf.mxu0  ;;  %vm16724_vm15 = vcmp.eq.s32.totalorder %v16723_v60, 1 }
 0xa92   : > { %4920 = vrot.lane.b32.xlu1 %v13469_v56, %s9664_s23  ;;  %4926 = vrot.lane.b32.xlu0 %v13474_v46, %s9664_s23  ;;  %vm16715_vm14 = vcmp.eq.s32.totalorder %v16714_v15, 1 }
 0xa94   : > { %v4853_v36 = vpop.permute.xlu1 %4852 }
 0xa95   : > { %v13487_v59 = vsel %vm16715_vm14, %v4853_v36, %v13297_v18  ;;  %v13504_v18 = vpop.f32.mrf.mxu0 }
 0xa96   : > { %4932 = vrot.lane.b32.xlu1 %v13487_v59, %s9664_s23  ;;  %6166 = vrot.lane.b32.xlu0 %v13482_v42, %s9660_s14 }
 0xa97   : > { %v13508_v36 = vpop.f32.mrf.mxu0 }
 0xa98   : > { %v4849_v43 = vpop.permute.xlu1 %4848 }
 0xa99   : > { %v13498_v54 = vsel %vm16717_vm8, %v4849_v43, %v13306_v30 }
 0xa9a   : > { %4928 = vrot.lane.b32.xlu1 %v13498_v54, %s9664_s23  ;;  %6162 = vrot.lane.b32.xlu0 %v13493_v7, %s9660_s14 }
 0xa9e   : > { %6168 = vrot.lane.b32.xlu1 %v13504_v18, %s9660_s14 }
 0xaa2   : > { %6164 = vrot.lane.b32.xlu1 %v13508_v36, %s9660_s14 }
 0xaac   : > { %v13512_v15 = vpop.f32.mrf.mxu0 }
 0xaad   : > { %6174 = vrot.lane.b32.xlu0 %v13512_v15, %s9660_s14 }
 0xaae   : > { %v13516_v30 = vpop.f32.mrf.mxu0 }
 0xab0   : > { %v13518_v43 = vpop.f32.mrf.mxu0 }
 0xab1   : > { %6176 = vrot.lane.b32.xlu1 %v13518_v43, %s9660_s14  ;;  %6170 = vrot.lane.b32.xlu0 %v13516_v30, %s9660_s14 }
 0xab2   : > { %v13524_v49 = vpop.f32.mrf.mxu0 }
 0xab4   : > { %v13526_v57 = vpop.f32.mrf.mxu0 }
 0xab5   : > { %6172 = vrot.lane.b32.xlu1 %v13524_v49, %s9660_s14  ;;  %6182 = vrot.lane.b32.xlu0 %v13526_v57, %s9660_s14 }
 0xab6   : > { %v13532_v33 = vpop.f32.mrf.mxu0 }
 0xab8   : > { %v13534_v45 = vpop.f32.mrf.mxu0 }
 0xab9   : > { %6184 = vrot.lane.b32.xlu1 %v13534_v45, %s9660_s14  ;;  %6178 = vrot.lane.b32.xlu0 %v13532_v33, %s9660_s14 }
 0xaba   : > { %v13540_v1 = vpop.f32.mrf.mxu0 }
 0xabc   : > { %v13542_v21 = vpop.f32.mrf.mxu0 }
 0xabd   : > { %6180 = vrot.lane.b32.xlu1 %v13540_v1, %s9660_s14  ;;  %6190 = vrot.lane.b32.xlu0 %v13542_v21, %s9660_s14 }
 0xabe   : > { %v13548_v63 = vpop.f32.mrf.mxu0 }
 0xac0   : > { %v13550_v62 = vpop.f32.mrf.mxu0 }
 0xac1   : > { %6192 = vrot.lane.b32.xlu1 %v13550_v62, %s9660_s14  ;;  %6186 = vrot.lane.b32.xlu0 %v13548_v63, %s9660_s14 }
 0xac2   : > { %v13556_v17 = vpop.f32.mrf.mxu0 }
 0xac5   : > { %6188 = vrot.lane.b32.xlu1 %v13556_v17, %s9660_s14  ;;  %s16759_s14 = smov 96  }
 0xac7   : > { %v4907_v52 = vpop.permute.xlu0 %4906 }
 0xac8   : > { %v13563_v32 = vsel %vm16719_vm12, %v4907_v52, %v13337_v6  ;;  %v16725_v52 = vld [vmem:[#allocation92_spill] sm:$0xff] }
 0xac9   : > { %4986 = vrot.lane.b32.xlu0 %v13563_v32, %s16720_s15  ;;  %vm16726_vm0 = vcmp.eq.s32.totalorder %v16725_v52, 1 }
 0xacb   : > { %v4903_v29 = vpop.permute.xlu0 %4902 }
 0xacc   : > { %v13570_v34 = vsel %vm16722_vm13, %v4903_v29, %v13350_v31  ;;  %v16727_v31 = vld [vmem:[#allocation112_spill] sm:$0xff] }
 0xacd   : > { %4982 = vrot.lane.b32.xlu0 %v13570_v34, %s16720_s15  ;;  %vm16728_vm14 = vcmp.eq.s32.totalorder %v16727_v31, 1  ;;  %v16733_v31 = vld [vmem:[#allocation114_spill] sm:$0xff] }
 0xace   : > { %vm16734_vm13 = vcmp.eq.s32.totalorder %v16733_v31, 1  ;;  %v16741_v31 = vld [vmem:[#allocation103_spill] sm:$0xff] }
 0xacf   : > { %v4909_v9 = vpop.permute.xlu1 %4908 }
 0xad0   : > { %v13577_v37 = vsel %vm16724_vm15, %v4909_v9, %v13359_v44  ;;  %v16729_v9 = vld [vmem:[#allocation113_spill] sm:$0xff] }
 0xad1   : > { %4988 = vrot.lane.b32.xlu1 %v13577_v37, %s16720_s15  ;;  %vm16730_vm8 = vcmp.eq.s32.totalorder %v16729_v9, 1 }
 0xad3   : > { %v4905_v6 = vpop.permute.xlu1 %4904 }
 0xad4   : > { %v13584_v10 = vsel %vm16726_vm0, %v4905_v6, %v13372_v4  ;;  %v16731_v6 = vld [vmem:[#allocation101_spill] sm:$0xff] }
 0xad5   : > { %4984 = vrot.lane.b32.xlu1 %v13584_v10, %s16720_s15  ;;  %vm16732_vm12 = vcmp.eq.s32.totalorder %v16731_v6, 1 }
 0xaeb   : > { %v4915_v29 = vpop.permute.xlu0 %4914 }
 0xaec   : > { %v13591_v11 = vsel %vm16728_vm14, %v4915_v29, %v13399_v39 }
 0xaed   : > { %4994 = vrot.lane.b32.xlu0 %v13591_v11, %s16720_s15 }
 0xaf0   : > { %v4911_v44 = vpop.permute.xlu0 %4910 }
 0xaf1   : > { %v13598_v60 = vsel %vm16730_vm8, %v4911_v44, %v13410_v35  ;;  %v16735_v35 = vld [vmem:[#allocation102_spill] sm:$0xff]  ;;  %vm16742_vm8 = vcmp.eq.s32.totalorder %v16741_v31, 1 }
 0xaf2   : > { %4990 = vrot.lane.b32.xlu0 %v13598_v60, %s16720_s15  ;;  %vm16736_vm15 = vcmp.eq.s32.totalorder %v16735_v35, 1 }
 0xaf4   : > { %v4917_v4 = vpop.permute.xlu1 %4916 }
 0xaf5   : > { %v13605_v52 = vsel %vm16732_vm12, %v4917_v4, %v13419_v16  ;;  %v16737_v4 = vld [vmem:[#allocation115_spill] sm:$0xff] }
 0xaf6   : > { %4996 = vrot.lane.b32.xlu1 %v13605_v52, %s16720_s15  ;;  %vm16738_vm0 = vcmp.eq.s32.totalorder %v16737_v4, 1 }
 0xaf7   : > { %v4923_v39 = vpop.permute.xlu0 %4922 }
 0xaf8   : > { %v4913_v29 = vpop.permute.xlu1 %4912  ;;  %v13612_v9 = vsel %vm16734_vm13, %v4923_v39, %v13428_v53 }
 0xaf9   : > { %v13617_v44 = vsel %vm16736_vm15, %v4913_v29, %v13433_v25  ;;  %5002 = vrot.lane.b32.xlu0 %v13612_v9, %s16720_s15  ;;  %v16739_v25 = vld [vmem:[#allocation116_spill] sm:$0xff] }
 0xafa   : > { %4992 = vrot.lane.b32.xlu1 %v13617_v44, %s16720_s15  ;;  %vm16740_vm14 = vcmp.eq.s32.totalorder %v16739_v25, 1 }
 0xafb   : > { %v4919_v16 = vpop.permute.xlu0 %4918 }
 0xafc   : > { %v13626_v6 = vsel %vm16738_vm0, %v4919_v16, %v13444_v27  ;;  %v16743_v16 = vld [vmem:[#allocation104_spill] sm:$0xff] }
 0xafd   : > { %4998 = vrot.lane.b32.xlu0 %v13626_v6, %s16720_s15  ;;  %vm16744_vm12 = vcmp.eq.s32.totalorder %v16743_v16, 1 }
 0xaff   : > { %v4931_v53 = vpop.permute.xlu0 %4930 }
 0xb00   : > { %v4925_v39 = vpop.permute.xlu1 %4924  ;;  %v13633_v29 = vsel %vm16740_vm14, %v4931_v53, %v13453_v55  ;;  %v16745_v55 = vld [vmem:[#allocation117_spill] sm:$0xff] }
 0xb01   : > { %v13638_v35 = vsel %vm16742_vm8, %v4925_v39, %v13458_v19  ;;  %5010 = vrot.lane.b32.xlu0 %v13633_v29, %s16720_s15  ;;  %vm16746_vm13 = vcmp.eq.s32.totalorder %v16745_v55, 1  ;;  %v16747_v39 = vld [vmem:[#allocation105_spill] sm:$0xff] }
 0xb02   : > { %5004 = vrot.lane.b32.xlu1 %v13638_v35, %s16720_s15  ;;  %vm16748_vm15 = vcmp.eq.s32.totalorder %v16747_v39, 1 }
 0xb04   : > { %v4921_v27 = vpop.permute.xlu1 %4920  ;;  %v4927_v25 = vpop.permute.xlu0 %4926 }
 0xb05   : > { %v13647_v4 = vsel %vm16744_vm12, %v4921_v27, %v13469_v56  ;;  %v13652_v53 = vsel %vm16746_vm13, %v4927_v25, %v13474_v46  ;;  %v16749_v46 = vld [vmem:[#allocation106_spill] sm:$0xff] }
 0xb06   : > { %5000 = vrot.lane.b32.xlu1 %v13647_v4, %s16720_s15  ;;  %5006 = vrot.lane.b32.xlu0 %v13652_v53, %s16720_s15  ;;  %vm16750_vm0 = vcmp.eq.s32.totalorder %v16749_v46, 1 }
 0xb08   : > { %v4933_v19 = vpop.permute.xlu1 %4932  ;;  %v6167_v56 = vpop.permute.xlu0 %6166 }
 0xb09   : > { %v13661_v31 = vsel %vm16748_vm15, %v4933_v19, %v13487_v59  ;;  %v13682_v19 = vsel %vm10073_vm4, %v6167_v56, %v13482_v42  ;;  %vm16754_vm4 = vnez %v16595_v61 }
 0xb0a   : > { %5012 = vrot.lane.b32.xlu1 %v13661_v31, %s16720_s15 }
 0xb0c   : > { %v4929_v27 = vpop.permute.xlu1 %4928  ;;  %v6163_v55 = vpop.permute.xlu0 %6162 }
 0xb0d   : > { %v13668_v25 = vsel %vm16750_vm0, %v4929_v27, %v13498_v54  ;;  %v13673_v16 = vsel %vm10034_vm1, %v6163_v55, %v13493_v7  ;;  %vm16751_vm1 = vnez %v16588_v8  ;;  %v16757_v8 = vld [vmem:[#allocation118_spill] sm:$0xff] }
 0xb0e   : > { %5008 = vrot.lane.b32.xlu1 %v13668_v25, %s16720_s15  ;;  %6242 = vrot.lane.b32.xlu0 %v13673_v16, %s9662_s29 }
 0xb10   : > { %v6169_v59 = vpop.permute.xlu1 %6168 }
 0xb11   : > { %v13687_v54 = vsel %vm10049_vm2, %v6169_v59, %v13504_v18  ;;  %vm16752_vm2 = vnez %v16581_v28  ;;  %v16764_v59 = vld [vmem:[#allocation109_spill] sm:$0xff] }
 0xb12   : > { %6246 = vrot.lane.b32.xlu1 %v13682_v19, %s9662_s29  ;;  %6248 = vrot.lane.b32.xlu0 %v13687_v54, %s9662_s29 }
 0xb14   : > { %v6165_v58 = vpop.permute.xlu1 %6164 }
 0xb15   : > { %v13696_v7 = vsel %vm10053_vm3, %v6165_v58, %v13508_v36  ;;  %vm16753_vm3 = vnez %v16586_v20 }
 0xb16   : > { %6244 = vrot.lane.b32.xlu1 %v13696_v7, %s9662_s29 }
 0xb1f   : > { %v6175_v12 = vpop.permute.xlu0 %6174 }
 0xb20   : > { %v13703_v22 = vsel %vm10138_vm5, %v6175_v12, %v13512_v15  ;;  %vm16755_vm5 = vnez %v16597_v23  ;;  %v16766_v12 = vld [vmem:[#allocation135_spill] sm:$0xff] }
 0xb21   : > { %6254 = vrot.lane.b32.xlu1 %v13703_v22, %s9662_s29  ;;  %vm16767_vm14 = vcmp.eq.s32.totalorder %v16766_v12, 1 }
 0xb23   : > { %v6177_v42 = vpop.permute.xlu1 %6176  ;;  %v6171_v18 = vpop.permute.xlu0 %6170 }
 0xb24   : > { %v13710_v14 = vsel %vm16576_vm10, %v6177_v42, %v13518_v43  ;;  %v13715_v36 = vsel %vm10170_vm7, %v6171_v18, %v13516_v30  ;;  %vm16758_vm7 = vcmp.eq.s32.totalorder %v16757_v8, 1  ;;  %v16768_v18 = vld [vmem:[#allocation136_spill] sm:$0xff] }
 0xb25   : > { %6256 = vrot.lane.b32.xlu0 %v13710_v14, %s9662_s29  ;;  %6250 = vrot.lane.b32.xlu1 %v13715_v36, %s9662_s29  ;;  %vm16769_vm8 = vcmp.eq.s32.totalorder %v16768_v18, 1  ;;  %v16845_v18 = vld [vmem:[#allocation12_spill] sm:$0xff] }
 0xb27   : > { %v6173_v26 = vpop.permute.xlu1 %6172  ;;  %v6183_v15 = vpop.permute.xlu0 %6182 }
 0xb28   : > { %v13724_v55 = vsel %vm10166_vm6, %v6173_v26, %v13524_v49  ;;  %v13731_v30 = vsel %vm16578_vm11, %v6183_v15, %v13526_v57  ;;  %vm16756_vm6 = vnez %v16593_v5  ;;  %v16760_v5 = vld [vmem:[#allocation119_spill] sm:$0xff]  ;;  %v16770_v15 = vld [vmem:[#allocation120_spill] sm:$0xff] }
 0xb29   : > { %6252 = vrot.lane.b32.xlu1 %v13724_v55, %s9662_s29  ;;  %vm16761_vm10 = vcmp.eq.s32.totalorder %v16760_v5, 1  ;;  %vm16771_vm12 = vcmp.eq.s32.totalorder %v16770_v15, 1  ;;  %v16844_v15 = vld [vmem:[#allocation157_spill] sm:$0xff] }
 0xb2a   : > { %v16849_v5 = vld [vmem:[#allocation189_spill] sm:$0xff] }
 0xb2b   : > { %v6185_v2 = vpop.permute.xlu1 %6184  ;;  %v6179_v41 = vpop.permute.xlu0 %6178 }
 0xb2c   : > { %v13736_v43 = vsel %vm16585_vm9, %v6179_v41, %v13532_v33  ;;  %v13745_v56 = vsel %vm16751_vm1, %v6185_v2, %v13534_v45  ;;  %vm16765_vm9 = vcmp.eq.s32.totalorder %v16764_v59, 1 }
 0xb2d   : > { %6262 = vrot.lane.b32.xlu1 %v13731_v30, %s9662_s29  ;;  %6258 = vrot.lane.b32.xlu0 %v13736_v43, %s9662_s29 }
 0xb2f   : > { %v6181_v48 = vpop.permute.xlu1 %6180  ;;  %v6191_v49 = vpop.permute.xlu0 %6190 }
 0xb30   : > { %v13750_v47 = vsel %vm16752_vm2, %v6181_v48, %v13540_v1  ;;  %v13759_v57 = vsel %vm16753_vm3, %v6191_v49, %v13542_v21  ;;  %v16762_v21 = vld [vmem:[#allocation107_spill] sm:$0xff]  ;;  %v16772_v48 = vld [vmem:[#allocation137_spill] sm:$0xff] }
 0xb31   : > { %6260 = vrot.lane.b32.xlu1 %v13750_v47, %s9662_s29  ;;  %6264 = vrot.lane.b32.xlu0 %v13745_v56, %s9662_s29  ;;  %vm16763_vm11 = vcmp.eq.s32.totalorder %v16762_v21, 1  ;;  %vm16773_vm13 = vcmp.eq.s32.totalorder %v16772_v48, 1 }
 0xb33   : > { %v6193_v24 = vpop.permute.xlu1 %6192  ;;  %v6187_v33 = vpop.permute.xlu0 %6186 }
 0xb34   : > { %v13764_v45 = vsel %vm16754_vm4, %v6187_v33, %v13548_v63  ;;  %v13773_v28 = vsel %vm16755_vm5, %v6193_v24, %v13550_v62  ;;  %v16776_v33 = vld [vmem:[#allocation138_spill] sm:$0xff] }
 0xb35   : > { %6270 = vrot.lane.b32.xlu1 %v13759_v57, %s9662_s29  ;;  %6266 = vrot.lane.b32.xlu0 %v13764_v45, %s9662_s29  ;;  %vm16777_vm0 = vcmp.eq.s32.totalorder %v16776_v33, 1  ;;  %v16843_v33 = vld [vmem:[#allocation188_spill] sm:$0xff] }
 0xb37   : > { %v6189_v1 = vpop.permute.xlu1 %6188 }
 0xb38   : > { %v13778_v20 = vsel %vm16756_vm6, %v6189_v1, %v13556_v17 }
 0xb39   : > { %6268 = vrot.lane.b32.xlu1 %v13778_v20, %s9662_s29  ;;  %6272 = vrot.lane.b32.xlu0 %v13773_v28, %s9662_s29 }
 0xb3b   : > { %v4987_v63 = vpop.permute.xlu0 %4986 }
 0xb3c   : > { %v13787_v61 = vsel %vm16758_vm7, %v4987_v63, %v13563_v32  ;;  %vm16790_vm7 = vcmp.eq.s32.totalorder %v16608_v50, 1 }
 0xb3d   : > { %5066 = vrot.lane.b32.xlu0 %v13787_v61, %s16759_s14 }
 0xb3f   : > { %v4983_v23 = vpop.permute.xlu0 %4982 }
 0xb40   : > { %v13794_v17 = vsel %vm16761_vm10, %v4983_v23, %v13570_v34  ;;  %vm16791_vm10 = vcmp.eq.s32.totalorder %v16606_v0, 1 }
 0xb41   : > { %5062 = vrot.lane.b32.xlu0 %v13794_v17, %s16759_s14 }
 0xb43   : > { %v4989_v62 = vpop.permute.xlu1 %4988 }
 0xb44   : > { %v13801_v27 = vsel %vm16763_vm11, %v4989_v62, %v13577_v37  ;;  %v16780_v62 = vld [vmem:[#allocation125_spill] sm:$0xff]  ;;  %vm16792_vm11 = vcmp.eq.s32.totalorder %v16610_v51, 1 }
 0xb45   : > { %5068 = vrot.lane.b32.xlu1 %v13801_v27, %s16759_s14  ;;  %vm16781_vm2 = vcmp.eq.s32.totalorder %v16780_v62, 1 }
 0xb47   : > { %v4985_v32 = vpop.permute.xlu1 %4984 }
 0xb48   : > { %v13808_v58 = vsel %vm16765_vm9, %v4985_v32, %v13584_v10  ;;  %vm16793_vm9 = vcmp.eq.s32.totalorder %v16613_v3, 1 }
 0xb49   : > { %5064 = vrot.lane.b32.xlu1 %v13808_v58, %s16759_s14 }
 0xb5f   : > { %v4995_v34 = vpop.permute.xlu0 %4994 }
 0xb60   : > { %v13815_v42 = vsel %vm16767_vm14, %v4995_v34, %v13591_v11  ;;  %v16782_v34 = vld [vmem:[#allocation127_spill] sm:$0xff]  ;;  %vm16794_vm14 = vcmp.eq.s32.totalorder %v16234_v38, 1 }
 0xb61   : > { %5074 = vrot.lane.b32.xlu0 %v13815_v42, %s16759_s14  ;;  %vm16783_vm3 = vcmp.eq.s32.totalorder %v16782_v34, 1 }
 0xb64   : > { %v4991_v37 = vpop.permute.xlu0 %4990 }
 0xb65   : > { %v13822_v26 = vsel %vm16769_vm8, %v4991_v37, %v13598_v60  ;;  %v16774_v60 = vld [vmem:[#allocation123_spill] sm:$0xff]  ;;  %vm16795_vm8 = vcmp.eq.s32.totalorder %v16624_v40, 1 }
 0xb66   : > { %5070 = vrot.lane.b32.xlu0 %v13822_v26, %s16759_s14  ;;  %vm16775_vm15 = vcmp.eq.s32.totalorder %v16774_v60, 1  ;;  %v16847_v60 = vld [vmem:[#allocation165_spill] sm:$0xff] }
 0xb68   : > { %v4997_v10 = vpop.permute.xlu1 %4996 }
 0xb69   : > { %v13829_v2 = vsel %vm16771_vm12, %v4997_v10, %v13605_v52  ;;  %vm16796_vm12 = vcmp.eq.s32.totalorder %v16626_v13, 1  ;;  %v16799_v13 = vld [vmem:[#allocation79_spill] sm:$0xff] }
 0xb6a   : > { %5076 = vrot.lane.b32.xlu1 %v13829_v2, %s16759_s14 }
 0xb6b   : > { %v5003_v11 = vpop.permute.xlu0 %5002 }
 0xb6c   : > { %v4993_v41 = vpop.permute.xlu1 %4992  ;;  %v13836_v49 = vsel %vm16773_vm13, %v5003_v11, %v13612_v9 }
 0xb6d   : > { %v13841_v24 = vsel %vm16775_vm15, %v4993_v41, %v13617_v44  ;;  %5082 = vrot.lane.b32.xlu0 %v13836_v49, %s16759_s14  ;;  %v16778_v44 = vld [vmem:[#allocation140_spill] sm:$0xff]  ;;  %vm16800_vm15 = vcmp.eq.s32.totalorder %v16799_v13, 1 }
 0xb6e   : > { %5072 = vrot.lane.b32.xlu1 %v13841_v24, %s16759_s14  ;;  %vm16779_vm1 = vcmp.eq.s32.totalorder %v16778_v44, 1  ;;  %v16786_v41 = vld [vmem:[#allocation128_spill] sm:$0xff] }
 0xb6f   : > { %v4999_v52 = vpop.permute.xlu0 %4998  ;;  %vm16787_vm5 = vcmp.eq.s32.totalorder %v16786_v41, 1  ;;  %v16841_v44 = vld [vmem:[#allocation164_spill] sm:$0xff] }
 0xb70   : > { %v13850_v1 = vsel %vm16777_vm0, %v4999_v52, %v13626_v6 }
 0xb71   : > { %5078 = vrot.lane.b32.xlu0 %v13850_v1, %s16759_s14 }
 0xb73   : > { %v5011_v9 = vpop.permute.xlu0 %5010 }
 0xb74   : > { %v5005_v63 = vpop.permute.xlu1 %5004  ;;  %v13857_v23 = vsel %vm16779_vm1, %v5011_v9, %v13633_v29  ;;  %v16784_v29 = vld [vmem:[#allocation142_spill] sm:$0xff]  ;;  %v16788_v9 = vld [vmem:[#allocation129_spill] sm:$0xff] }
 0xb75   : > { %v13862_v32 = vsel %vm16781_vm2, %v5005_v63, %v13638_v35  ;;  %5090 = vrot.lane.b32.xlu0 %v13857_v23, %s16759_s14  ;;  %vm16785_vm4 = vcmp.eq.s32.totalorder %v16784_v29, 1  ;;  %vm16789_vm6 = vcmp.eq.s32.totalorder %v16788_v9, 1 }
 0xb76   : > { %5084 = vrot.lane.b32.xlu1 %v13862_v32, %s16759_s14 }
 0xb78   : > { %v5001_v6 = vpop.permute.xlu1 %5000  ;;  %v5007_v10 = vpop.permute.xlu0 %5006 }
 0xb79   : > { %v13871_v37 = vsel %vm16783_vm3, %v5001_v6, %v13647_v4  ;;  %v13876_v11 = vsel %vm16785_vm4, %v5007_v10, %v13652_v53 }
 0xb7a   : > { %5080 = vrot.lane.b32.xlu1 %v13871_v37, %s16759_s14  ;;  %5086 = vrot.lane.b32.xlu0 %v13876_v11, %s16759_s14 }
 0xb7c   : > { %v5013_v35 = vpop.permute.xlu1 %5012 }
 0xb7d   : > { %v13885_v52 = vsel %vm16787_vm5, %v5013_v35, %v13661_v31 }
 0xb7e   : > { %5092 = vrot.lane.b32.xlu1 %v13885_v52, %s16759_s14 }
 0xb80   : > { %v5009_v4 = vpop.permute.xlu1 %5008  ;;  %v6243_v63 = vpop.permute.xlu0 %6242 }
 0xb81   : > { %v13892_v53 = vsel %vm16789_vm6, %v5009_v4, %v13668_v25  ;;  %v13899_v10 = vsel %vm16790_vm7, %v6243_v63, %v13673_v16 }
 0xb82   : > { %5088 = vrot.lane.b32.xlu1 %v13892_v53, %s16759_s14 }
 0xb84   : > { %v6247_v6 = vpop.permute.xlu1 %6246  ;;  %v6249_v35 = vpop.permute.xlu0 %6248 }
 0xb85   : > { %v13904_v31 = vsel %vm16791_vm10, %v6247_v6, %v13682_v19  ;;  %v13913_v4 = vsel %vm16792_vm11, %v6249_v35, %v13687_v54  ;;  %v16801_v6 = vld [vmem:[#allocation80_spill] sm:$0xff] }
 0xb86   : > { %6326 = vrot.lane.b32.xlu0 %v13904_v31, %s9663_s21  ;;  %6322 = vrot.lane.b32.xlu1 %v13899_v10, %s9663_s21  ;;  %vm16802_vm0 = vcmp.eq.s32.totalorder %v16801_v6, 1  ;;  %v16811_v6 = vld [vmem:[#allocation145_spill] sm:$0xff] }
 0xb87   : > { %vm16812_vm5 = vcmp.eq.s32.totalorder %v16811_v6, 1 }
 0xb88   : > { %v6245_v25 = vpop.permute.xlu1 %6244 }
 0xb89   : > { %v13918_v50 = vsel %vm16793_vm9, %v6245_v25, %v13696_v7  ;;  %v16797_v7 = vld [vmem:[#allocation70_spill] sm:$0xff] }
 0xb8a   : > { %6324 = vrot.lane.b32.xlu0 %v13918_v50, %s9663_s21  ;;  %6328 = vrot.lane.b32.xlu1 %v13913_v4, %s9663_s21  ;;  %vm16798_vm13 = vcmp.eq.s32.totalorder %v16797_v7, 1 }
 0xb93   : > { %v6255_v0 = vpop.permute.xlu1 %6254 }
 0xb94   : > { %v13927_v16 = vsel %vm16794_vm14, %v6255_v0, %v13703_v22 }
 0xb95   : > { %6334 = vrot.lane.b32.xlu1 %v13927_v16, %s9663_s21 }
 0xb97   : > { %v6251_v51 = vpop.permute.xlu1 %6250  ;;  %v6257_v19 = vpop.permute.xlu0 %6256 }
 0xb98   : > { %v13934_v3 = vsel %vm16795_vm8, %v6251_v51, %v13715_v36  ;;  %v13939_v54 = vsel %vm16796_vm12, %v6257_v19, %v13710_v14  ;;  %v16805_v51 = vld [vmem:[#allocation72_spill] sm:$0xff] }
 0xb99   : > { %6330 = vrot.lane.b32.xlu1 %v13934_v3, %s9663_s21  ;;  %6336 = vrot.lane.b32.xlu0 %v13939_v54, %s9663_s21  ;;  %vm16806_vm2 = vcmp.eq.s32.totalorder %v16805_v51, 1  ;;  %v16815_v51 = vld [vmem:[#allocation132_spill] sm:$0xff] }
 0xb9a   : > { %vm16816_vm7 = vcmp.eq.s32.totalorder %v16815_v51, 1 }
 0xb9b   : > { %v6253_v38 = vpop.permute.xlu1 %6252 }
 0xb9c   : > { %v13948_v22 = vsel %vm16798_vm13, %v6253_v38, %v13724_v55  ;;  %v16803_v55 = vld [vmem:[#allocation71_spill] sm:$0xff] }
 0xb9d   : > { %6332 = vrot.lane.b32.xlu0 %v13948_v22, %s9663_s21  ;;  %vm16804_vm1 = vcmp.eq.s32.totalorder %v16803_v55, 1 }
 0xb9f   : > { %v6263_v40 = vpop.permute.xlu1 %6262  ;;  %v6259_v36 = vpop.permute.xlu0 %6258 }
 0xba0   : > { %v13955_v14 = vsel %vm16800_vm15, %v6263_v40, %v13731_v30  ;;  %v13962_v35 = vsel %vm16802_vm0, %v6259_v36, %v13736_v43  ;;  %v16809_v36 = vld [vmem:[#allocation143_spill] sm:$0xff] }
 0xba1   : > { %6342 = vrot.lane.b32.xlu0 %v13955_v14, %s9663_s21  ;;  %vm16810_vm4 = vcmp.eq.s32.totalorder %v16809_v36, 1 }
 0xba3   : > { %v6265_v63 = vpop.permute.xlu0 %6264  ;;  %v6261_v0 = vpop.permute.xlu1 %6260 }
 0xba4   : > { %v13967_v25 = vsel %vm16804_vm1, %v6265_v63, %v13745_v56  ;;  %v13976_v19 = vsel %vm16806_vm2, %v6261_v0, %v13750_v47  ;;  %v16807_v56 = vld [vmem:[#allocation82_spill] sm:$0xff] }
 0xba5   : > { %6338 = vrot.lane.b32.xlu0 %v13962_v35, %s9663_s21  ;;  %6344 = vrot.lane.b32.xlu1 %v13967_v25, %s9663_s21  ;;  %vm16808_vm3 = vcmp.eq.s32.totalorder %v16807_v56, 1  ;;  %v16813_v0 = vld [vmem:[#allocation130_spill] sm:$0xff] }
 0xba6   : > { %vm16814_vm6 = vcmp.eq.s32.totalorder %v16813_v0, 1 }
 0xba7   : > { %v6267_v30 = vpop.permute.xlu0 %6266  ;;  %v13987_v7 = vpop.permute.xlu1 %6270 }
 0xba8   : > { %v13985_v38 = vsel %vm16808_vm3, %v6267_v30, %v13764_v45 }
 0xba9   : > { %6340 = vrot.lane.b32.xlu1 %v13976_v19, %s9663_s21 }
 0xbab   : > { %v13980_v43 = vpop.permute.xlu0 %6272  ;;  %v13995_v13 = vpop.permute.xlu1 %6268 }
 0xbad   : > { %6346 = vrot.lane.b32.xlu1 %v13985_v38, %s9663_s21 }
 0xbaf   : > { %v5067_v40 = vpop.permute.xlu0 %5066 }
 0xbb0   : > { %v5112_v47 = vsel %vm16810_vm4, %v5067_v40, %v13787_v61  ;;  %v16817_v40 = vld [vmem:[#allocation158_spill] sm:$0xff]  ;;  %vm16842_vm4 = vcmp.eq.s32.totalorder %v16841_v44, 1 }
 0xbb1   : > { %5146 = vrot.lane.b32.xlu0 %v5112_v47, %s9666_s13  ;;  %vm16818_vm10 = vcmp.eq.s32.totalorder %v16817_v40, 1  ;;  %v16823_v40 = vld [vmem:[#allocation160_spill] sm:$0xff] }
 0xbb2   : > { %vm16824_vm14 = vcmp.eq.s32.totalorder %v16823_v40, 1  ;;  %v16831_v40 = vld [vmem:[#allocation150_spill] sm:$0xff] }
 0xbb3   : > { %v5063_v63 = vpop.permute.xlu0 %5062  ;;  %vm16832_vm15 = vcmp.eq.s32.totalorder %v16831_v40, 1 }
 0xbb4   : > { %v14000_v45 = vsel %vm16812_vm5, %v5063_v63, %v13794_v17  ;;  %vm16846_vm5 = vcmp.gt.s32.totalorder %v16844_v15, %v16845_v18 }
 0xbb5   : > { %5142 = vrot.lane.b32.xlu0 %v14000_v45, %s9666_s13 }
 0xbb7   : > { %v5069_v55 = vpop.permute.xlu1 %5068 }
 0xbb8   : > { %v14007_v30 = vsel %vm16814_vm6, %v5069_v55, %v13801_v27  ;;  %v16819_v55 = vld [vmem:[#allocation159_spill] sm:$0xff]  ;;  %vm16848_vm6 = vcmp.eq.s32.totalorder %v16847_v60, 1 }
 0xbb9   : > { %5148 = vrot.lane.b32.xlu1 %v14007_v30, %s9666_s13  ;;  %vm16820_vm11 = vcmp.eq.s32.totalorder %v16819_v55, 1 }
 0xbbb   : > { %v5065_v61 = vpop.permute.xlu1 %5064 }
 0xbbc   : > { %v14014_v56 = vsel %vm16816_vm7, %v5065_v61, %v13808_v58  ;;  %v16821_v61 = vld [vmem:[#allocation147_spill] sm:$0xff] }
 0xbbd   : > { %5144 = vrot.lane.b32.xlu1 %v14014_v56, %s9666_s13  ;;  %vm16822_vm9 = vcmp.eq.s32.totalorder %v16821_v61, 1 }
 0xbd3   : > { %v5075_v17 = vpop.permute.xlu0 %5074 }
 0xbd4   : > { %v14021_v63 = vsel %vm16818_vm10, %v5075_v17, %v13815_v42 }
 0xbd5   : > { %5154 = vrot.lane.b32.xlu0 %v14021_v63, %s9666_s13 }
 0xbd8   : > { %v5071_v27 = vpop.permute.xlu0 %5070 }
 0xbd9   : > { %v14028_v6 = vsel %vm16820_vm11, %v5071_v27, %v13822_v26  ;;  %v16825_v26 = vld [vmem:[#allocation149_spill] sm:$0xff] }
 0xbda   : > { %5150 = vrot.lane.b32.xlu0 %v14028_v6, %s9666_s13  ;;  %vm16826_vm8 = vcmp.eq.s32.totalorder %v16825_v26, 1 }
 0xbdc   : > { %v5077_v58 = vpop.permute.xlu1 %5076 }
 0xbdd   : > { %v14035_v51 = vsel %vm16822_vm9, %v5077_v58, %v13829_v2  ;;  %v16827_v58 = vld [vmem:[#allocation161_spill] sm:$0xff] }
 0xbde   : > { %5156 = vrot.lane.b32.xlu1 %v14035_v51, %s9666_s13  ;;  %vm16828_vm12 = vcmp.eq.s32.totalorder %v16827_v58, 1 }
 0xbdf   : > { %v5083_v42 = vpop.permute.xlu0 %5082 }
 0xbe0   : > { %v5073_v17 = vpop.permute.xlu1 %5072  ;;  %v14042_v55 = vsel %vm16824_vm14, %v5083_v42, %v13836_v49 }
 0xbe1   : > { %v14047_v27 = vsel %vm16826_vm8, %v5073_v17, %v13841_v24  ;;  %5162 = vrot.lane.b32.xlu0 %v14042_v55, %s9666_s13  ;;  %v16829_v24 = vld [vmem:[#allocation162_spill] sm:$0xff] }
 0xbe2   : > { %5152 = vrot.lane.b32.xlu1 %v14047_v27, %s9666_s13  ;;  %vm16830_vm13 = vcmp.eq.s32.totalorder %v16829_v24, 1 }
 0xbe3   : > { %v5079_v2 = vpop.permute.xlu0 %5078 }
 0xbe4   : > { %v14056_v61 = vsel %vm16828_vm12, %v5079_v2, %v13850_v1  ;;  %v16833_v2 = vld [vmem:[#allocation151_spill] sm:$0xff] }
 0xbe5   : > { %5158 = vrot.lane.b32.xlu0 %v14056_v61, %s9666_s13  ;;  %vm16834_vm0 = vcmp.eq.s32.totalorder %v16833_v2, 1 }
 0xbe7   : > { %v5091_v49 = vpop.permute.xlu0 %5090 }
 0xbe8   : > { %v5085_v42 = vpop.permute.xlu1 %5084  ;;  %v14063_v17 = vsel %vm16830_vm13, %v5091_v49, %v13857_v23  ;;  %v16835_v23 = vld [vmem:[#allocation163_spill] sm:$0xff] }
 0xbe9   : > { %v14068_v26 = vsel %vm16832_vm15, %v5085_v42, %v13862_v32  ;;  %5170 = vrot.lane.b32.xlu0 %v14063_v17, %s9666_s13  ;;  %vm16836_vm1 = vcmp.eq.s32.totalorder %v16835_v23, 1  ;;  %v16837_v42 = vld [vmem:[#allocation152_spill] sm:$0xff] }
 0xbea   : > { %5164 = vrot.lane.b32.xlu1 %v14068_v26, %s9666_s13  ;;  %vm16838_vm2 = vcmp.eq.s32.totalorder %v16837_v42, 1 }
 0xbec   : > { %v5081_v1 = vpop.permute.xlu1 %5080  ;;  %v5087_v24 = vpop.permute.xlu0 %5086 }
 0xbed   : > { %v14077_v58 = vsel %vm16834_vm0, %v5081_v1, %v13871_v37  ;;  %v14082_v49 = vsel %vm16836_vm1, %v5087_v24, %v13876_v11  ;;  %v16839_v1 = vld [vmem:[#allocation153_spill] sm:$0xff] }
 0xbee   : > { %5160 = vrot.lane.b32.xlu1 %v14077_v58, %s9666_s13  ;;  %5166 = vrot.lane.b32.xlu0 %v14082_v49, %s9666_s13  ;;  %vm16840_vm3 = vcmp.eq.s32.totalorder %v16839_v1, 1 }
 0xbf0   : > { %v5093_v32 = vpop.permute.xlu1 %5092 }
 0xbf1   : > { %v14091_v40 = vsel %vm16838_vm2, %v5093_v32, %v13885_v52 }
 0xbf2   : > { %5172 = vrot.lane.b32.xlu1 %v14091_v40, %s9666_s13 }
 0xbf4   : > { %v5089_v37 = vpop.permute.xlu1 %5088 }
 0xbf5   : > { %v14098_v11 = vsel %vm16840_vm3, %v5089_v37, %v13892_v53 }
 0xbf6   : > { %5168 = vrot.lane.b32.xlu1 %v14098_v11, %s9666_s13 }
 0xbf8   : > { %v14102_v24 = vpop.permute.xlu0 %6326  ;;  %v14104_v23 = vpop.permute.xlu1 %6322 }
 0xbfc   : > { %v14106_v2 = vpop.permute.xlu0 %6324  ;;  %v14108_v52 = vpop.permute.xlu1 %6328 }
 0xc07   : > { %v14112_v42 = vpop.permute.xlu1 %6334 }
 0xc0b   : > { %v14110_v32 = vpop.permute.xlu0 %6336  ;;  %v14116_v1 = vpop.permute.xlu1 %6330 }
 0xc0f   : > { %v14114_v0 = vpop.permute.xlu0 %6332 }
 0xc13   : > { %v14118_v53 = vpop.permute.xlu0 %6342 }
 0xc17   : > { %v14120_v37 = vpop.permute.xlu1 %6344  ;;  %v14122_v36 = vpop.permute.xlu0 %6338 }
 0xc1b   : > { %v14124_v41 = vpop.permute.xlu1 %6340 }
 0xc1f   : > { %v14129_v48 = vpop.permute.xlu1 %6346 }
 0xc23   : > { %v5147_v29 = vpop.permute.xlu0 %5146 }
 0xc24   : > { %v5192_v9 = vsel %vm16842_vm4, %v5147_v29, %v5112_v47  ;;  %v16850_v29 = vld [vmem:[#allocation9_spill] sm:$0xff] }
 0xc25   : > { %v5329_v62 = vadd.f32 %v16843_v33, %v5192_v9  ;;  %vm16851_vm7 = vcmp.gt.s32.totalorder %v16844_v15, %v16850_v29  ;;  %v16852_v9 = vld [vmem:[#allocation154_spill] sm:$0xff] }
 0xc26   : > { %vm16853_vm10 = vcmp.eq.s32.totalorder %v16852_v9, 1 }
 0xc27   : > { %v5143_v34 = vpop.permute.xlu0 %5142  ;;  %v14134_v12 = vsel %vm16846_vm5, -1e+09, %v5329_v62  ;;  %v16854_v62 = vld [vmem:[#allocation191_spill] sm:$0xff] }
 0xc28   : > { %v5190_v21 = vsel %vm16848_vm6, %v5143_v34, %v14000_v45  ;;  %5403 = vmax.xlane.f32.xlu1 %v14134_v12  ;;  %v16855_v34 = vld [vmem:[#allocation10_spill] sm:$0xff] }
 0xc29   : > { %v5321_v8 = vadd.f32 %v16849_v5, %v5190_v21  ;;  %vm16856_vm11 = vcmp.gt.s32.totalorder %v16844_v15, %v16855_v34  ;;  %v16857_v5 = vld [vmem:[#allocation156_spill] sm:$0xff]  ;;  %v16864_v34 = vld [vmem:[#allocation194_spill] sm:$0xff] }
 0xc2a   : > { %vm16858_vm9 = vcmp.eq.s32.totalorder %v16857_v5, 1 }
 0xc2b   : > { %v5149_v44 = vpop.permute.xlu1 %5148  ;;  %v14144_v33 = vsel %vm16851_vm7, -1e+09, %v5321_v8  ;;  %v16859_v8 = vld [vmem:[#allocation193_spill] sm:$0xff] }
 0xc2c   : > { %v5193_v47 = vsel %vm16853_vm10, %v5149_v44, %v14007_v30  ;;  %5399 = vmax.xlane.f32.xlu0 %v14144_v33  ;;  %v16860_v44 = vld [vmem:[#allocation11_spill] sm:$0xff] }
 0xc2d   : > { %v5332_v18 = vadd.f32 %v16854_v62, %v5193_v47  ;;  %vm16861_vm14 = vcmp.gt.s32.totalorder %v16844_v15, %v16860_v44  ;;  %v16862_v62 = vld [vmem:[#allocation53_spill] sm:$0xff]  ;;  %v16869_v44 = vld [vmem:[#allocation196_spill] sm:$0xff] }
 0xc2e   : > { %vm16863_vm8 = vcmp.eq.s32.totalorder %v16862_v62, 1  ;;  %v16870_v62 = vld [vmem:[#allocation19_spill] sm:$0xff] }
 0xc2f   : > { %v5145_v60 = vpop.permute.xlu1 %5144  ;;  %v14154_v45 = vsel %vm16856_vm11, -1e+09, %v5332_v18  ;;  %vm16871_vm15 = vcmp.gt.s32.totalorder %v16844_v15, %v16870_v62 }
 0xc30   : > { %v5191_v21 = vsel %vm16858_vm9, %v5145_v60, %v14014_v56  ;;  %5405 = vmax.xlane.f32.xlu0 %v14154_v45  ;;  %v16865_v60 = vld [vmem:[#allocation17_spill] sm:$0xff] }
 0xc31   : > { %v5324_v29 = vadd.f32 %v16859_v8, %v5191_v21  ;;  %vm16866_vm12 = vcmp.gt.s32.totalorder %v16844_v15, %v16865_v60 }
 0xc33   : > { %v14164_v30 = vsel %vm16861_vm14, -1e+09, %v5324_v29  ;;  %v16867_v29 = vld [vmem:[#allocation166_spill] sm:$0xff] }
 0xc34   : > { %5401 = vmax.xlane.f32.xlu1 %v14164_v30  ;;  %vm16868_vm13 = vcmp.eq.s32.totalorder %v16867_v29, 1 }
 0xc47   : > { %v5155_v47 = vpop.permute.xlu0 %5154 }
 0xc48   : > { %v5196_v18 = vsel %vm16863_vm8, %v5155_v47, %v14021_v63  ;;  %v16874_v47 = vld [vmem:[#allocation198_spill] sm:$0xff] }
 0xc49   : > { %v5345_v9 = vadd.f32 %v16864_v34, %v5196_v18  ;;  %v16872_v34 = vld [vmem:[#allocation54_spill] sm:$0xff] }
 0xc4a   : > { %vm16873_vm0 = vcmp.eq.s32.totalorder %v16872_v34, 1  ;;  %v16883_v34 = vld [vmem:[#allocation22_spill] sm:$0xff] }
 0xc4b   : > { %v14174_v56 = vsel %vm16866_vm12, -1e+09, %v5345_v9  ;;  %vm16884_vm4 = vcmp.gt.s32.totalorder %v16844_v15, %v16883_v34 }
 0xc4c   : > { %v5151_v21 = vpop.permute.xlu0 %5150  ;;  %5411 = vmax.xlane.f32.xlu0 %v14174_v56 }
 0xc4d   : > { %v5194_v8 = vsel %vm16868_vm13, %v5151_v21, %v14028_v6  ;;  %v16875_v6 = vld [vmem:[#allocation57_spill] sm:$0xff]  ;;  %v16877_v21 = vld [vmem:[#allocation20_spill] sm:$0xff] }
 0xc4e   : > { %v5337_v5 = vadd.f32 %v16869_v44, %v5194_v8  ;;  %vm16876_vm1 = vcmp.eq.s32.totalorder %v16875_v6, 1  ;;  %vm16878_vm2 = vcmp.gt.s32.totalorder %v16844_v15, %v16877_v21  ;;  %v16887_v6 = vld [vmem:[#allocation18_spill] sm:$0xff] }
 0xc4f   : > { %vm16888_vm6 = vcmp.gt.s32.totalorder %v16844_v15, %v16887_v6 }
 0xc50   : > { %v5157_v59 = vpop.permute.xlu1 %5156  ;;  %v14184_v63 = vsel %vm16871_vm15, -1e+09, %v5337_v5  ;;  %v16879_v5 = vld [vmem:[#allocation167_spill] sm:$0xff] }
 0xc51   : > { %v5197_v9 = vsel %vm16873_vm0, %v5157_v59, %v14035_v51  ;;  %5407 = vmax.xlane.f32.xlu1 %v14184_v63  ;;  %vm16880_vm3 = vcmp.eq.s32.totalorder %v16879_v5, 1  ;;  %v16881_v59 = vld [vmem:[#allocation201_spill] sm:$0xff] }
 0xc52   : > { %v5348_v18 = vadd.f32 %v16874_v47, %v5197_v9  ;;  %v16882_v9 = vld [vmem:[#allocation199_spill] sm:$0xff] }
 0xc53   : > { %v5163_v60 = vpop.permute.xlu0 %5162 }
 0xc54   : > { %v5153_v39 = vpop.permute.xlu1 %5152  ;;  %v5200_v44 = vsel %vm16876_vm1, %v5163_v60, %v14042_v55  ;;  %v14197_v8 = vsel %vm16878_vm2, -1e+09, %v5348_v18  ;;  %v16885_v60 = vld [vmem:[#allocation58_spill] sm:$0xff] }
 0xc55   : > { %v5195_v62 = vsel %vm16880_vm3, %v5153_v39, %v14047_v27  ;;  %v5361_v51 = vadd.f32 %v16881_v59, %v5200_v44  ;;  %5413 = vmax.xlane.f32.xlu1 %v14197_v8  ;;  %vm16886_vm5 = vcmp.eq.s32.totalorder %v16885_v60, 1  ;;  %v16889_v27 = vld [vmem:[#allocation202_spill] sm:$0xff]  ;;  %v16897_v60 = vld [vmem:[#allocation59_spill] sm:$0xff] }
 0xc56   : > { %v5340_v47 = vadd.f32 %v16882_v9, %v5195_v62  ;;  %v16890_v62 = vld [vmem:[#allocation25_spill] sm:$0xff]  ;;  %v16892_v9 = vld [vmem:[#allocation168_spill] sm:$0xff]  ;;  %vm16898_vm9 = vcmp.eq.s32.totalorder %v16897_v60, 1 }
 0xc57   : > { %v5159_v29 = vpop.permute.xlu0 %5158  ;;  %v14208_v55 = vsel %vm16884_vm4, -1e+09, %v5361_v51  ;;  %vm16891_vm7 = vcmp.gt.s32.totalorder %v16844_v15, %v16890_v62  ;;  %vm16893_vm10 = vcmp.eq.s32.totalorder %v16892_v9, 1  ;;  %v16899_v62 = vld [vmem:[#allocation205_spill] sm:$0xff] }
 0xc58   : > { %v5198_v18 = vsel %vm16886_vm5, %v5159_v29, %v14056_v61  ;;  %v14216_v39 = vsel %vm16888_vm6, -1e+09, %v5340_v47  ;;  %v16894_v29 = vld [vmem:[#allocation204_spill] sm:$0xff]  ;;  %v16914_v9 = vld [vmem:[#allocation169_spill] sm:$0xff] }
 0xc59   : > { %v5353_v44 = vadd.f32 %v16889_v27, %v5198_v18  ;;  %5409 = vmax.xlane.f32.xlu0 %v14216_v39  ;;  %5419 = vmax.xlane.f32.xlu1 %v14208_v55  ;;  %v16895_v18 = vld [vmem:[#allocation21_spill] sm:$0xff]  ;;  %vm16915_vm1 = vcmp.eq.s32.totalorder %v16914_v9, 1 }
 0xc5a   : > { %vm16896_vm11 = vcmp.gt.s32.totalorder %v16844_v15, %v16895_v18  ;;  %v16911_v18 = vld [vmem:[#allocation207_spill] sm:$0xff] }
 0xc5b   : > { %v14224_v59 = vsel %vm16891_vm7, -1e+09, %v5353_v44 }
 0xc5c   : > { %v5165_v51 = vpop.permute.xlu1 %5164 }
 0xc5d   : > { %v5201_v61 = vsel %vm16893_vm10, %v5165_v51, %v14068_v26  ;;  %5415 = vmax.xlane.f32.xlu1 %v14224_v59  ;;  %v16900_v26 = vld [vmem:[#allocation23_spill] sm:$0xff] }
 0xc5e   : > { %v5364_v47 = vadd.f32 %v16894_v29, %v5201_v61  ;;  %vm16901_vm14 = vcmp.gt.s32.totalorder %v16844_v15, %v16900_v26  ;;  %v16902_v61 = vld [vmem:[#allocation74_spill] sm:$0xff]  ;;  %v16909_v26 = vld [vmem:[#allocation60_spill] sm:$0xff] }
 0xc5f   : > { %vm16903_vm8 = vcmp.eq.s32.totalorder %v16902_v61, 1  ;;  %vm16910_vm15 = vcmp.eq.s32.totalorder %v16909_v26, 1 }
 0xc60   : > { %v5161_v34 = vpop.permute.xlu1 %5160  ;;  %v14234_v27 = vsel %vm16896_vm11, -1e+09, %v5364_v47  ;;  %v14251_v29 = vsel %vm16903_vm8, %v13995_v13, %v13778_v20  ;;  %v16908_v20 = vld [vmem:[#allocation206_spill] sm:$0xff] }
 0xc61   : > { %v5199_v44 = vsel %vm16898_vm9, %v5161_v34, %v14077_v58  ;;  %5421 = vmax.xlane.f32.xlu1 %v14234_v27  ;;  %v16904_v58 = vld [vmem:[#allocation81_spill] sm:$0xff] }
 0xc62   : > { %v5356_v6 = vadd.f32 %v16899_v62, %v5199_v44  ;;  %vm16905_vm12 = vcmp.eq.s32.totalorder %v16904_v58, 1  ;;  %v16906_v62 = vld [vmem:[#allocation61_spill] sm:$0xff] }
 0xc63   : > { %v14259_v34 = vsel %vm16905_vm12, %v13987_v7, %v13759_v57  ;;  %vm16907_vm13 = vcmp.eq.s32.totalorder %v16906_v62, 1  ;;  %v16912_v57 = vld [vmem:[#allocation31_spill] sm:$0xff] }
 0xc64   : > { %v14244_v51 = vsel %vm16901_vm14, -1e+09, %v5356_v6  ;;  %v5171_v6 = vpop.permute.xlu0 %5170  ;;  %v5173_v61 = vpop.permute.xlu1 %5172  ;;  %vm16913_vm0 = vcmp.gt.s32.totalorder %v16844_v15, %v16912_v57 }
 0xc65   : > { %5417 = vmax.xlane.f32.xlu1 %v14244_v51  ;;  %v5204_v47 = vsel %vm16907_vm13, %v5171_v6, %v14063_v17  ;;  %v5205_v62 = vsel %vm16915_vm1, %v5173_v61, %v14091_v40  ;;  %v16916_v6 = vld [vmem:[#allocation208_spill] sm:$0xff] }
 0xc66   : > { %v5377_v13 = vadd.f32 %v16908_v20, %v5204_v47  ;;  %v5380_v47 = vadd.f32 %v16916_v6, %v5205_v62  ;;  %v16917_v20 = vld [vmem:[#allocation35_spill] sm:$0xff]  ;;  %v16922_v40 = vld [vmem:[#allocation28_spill] sm:$0xff]  ;;  %v9317_v6 = vld [vmem:[#allocation3] sm:$0xff]  }
 0xc67   : > { %vm16918_vm2 = vcmp.gt.s32.totalorder %v16844_v15, %v16917_v20  ;;  %vm16923_vm4 = vcmp.gt.s32.totalorder %v16844_v15, %v16922_v40  ;;  %v16924_v62 = vld [vmem:[#allocation32_spill] sm:$0xff] }
 0xc68   : > { %v5167_v44 = vpop.permute.xlu0 %5166  ;;  %v14274_v7 = vsel %vm16913_vm0, -1e+09, %v5377_v13  ;;  %v5169_v17 = vpop.permute.xlu1 %5168  ;;  %v14294_v61 = vsel %vm16923_vm4, -1e+09, %v5380_v47  ;;  %vm16925_vm5 = vcmp.gt.s32.totalorder %v16844_v15, %v16924_v62  ;;  %v16928_v47 = vld [vmem:[#allocation76_spill] sm:$0xff]  ;;  %vm16955_vm4 = vcmask 261120  }
 0xc69   : > { %v5202_v60 = vsel %vm16910_vm15, %v5167_v44, %v14082_v49  ;;  %v16921_v44 = vld [vmem:[#allocation209_spill] sm:$0xff]  ;;  %vm16929_vm7 = vcmp.eq.s32.totalorder %v16928_v47, 1 }
 0xc6a   : > { %v5369_v58 = vadd.f32 %v16911_v18, %v5202_v60  ;;  %v16919_v60 = vld [vmem:[#allocation170_spill] sm:$0xff] }
 0xc6b   : > { %vm16920_vm3 = vcmp.eq.s32.totalorder %v16919_v60, 1 }
 0xc6c   : > { %v14284_v49 = vsel %vm16918_vm2, -1e+09, %v5369_v58  ;;  %v5203_v18 = vsel %vm16920_vm3, %v5169_v17, %v14098_v11  ;;  %v16926_v11 = vld [vmem:[#allocation73_spill] sm:$0xff] }
 0xc6d   : > { %v5372_v13 = vadd.f32 %v16921_v44, %v5203_v18  ;;  %vm16927_vm6 = vcmp.eq.s32.totalorder %v16926_v11, 1  ;;  %v14316_v18 = vsel %vm16929_vm7, %v14106_v2, %v13918_v50  ;;  %v16930_v44 = vld [vmem:[#allocation84_spill] sm:$0xff]  ;;  %v16934_v50 = vld [vmem:[#allocation83_spill] sm:$0xff]  ;;  %vm16960_vm7 = vmmov %vm16955_vm4 }
 0xc6e   : > { %v14307_v17 = vsel %vm16927_vm6, %v13980_v43, %v13773_v28  ;;  %vm16931_vm10 = vcmp.eq.s32.totalorder %v16930_v44, 1  ;;  %v16932_v28 = vld [vmem:[#allocation75_spill] sm:$0xff]  ;;  %vm16935_vm9 = vcmp.eq.s32.totalorder %v16934_v50, 1  ;;  %vm16958_vm6 = vmmov %vm16955_vm4 }
 0xc6f   : > { %6348 = vrot.lane.b32.xlu0 %v14251_v29, %s9663_s21  ;;  %v14300_v58 = vsel %vm16925_vm5, -1e+09, %v5372_v13  ;;  %v14322_v13 = vsel %vm16931_vm10, %v14104_v23, %v13899_v10  ;;  %vm16933_vm11 = vcmp.eq.s32.totalorder %v16932_v28, 1  ;;  %v14338_v2 = vsel %vm16935_vm9, %v14102_v24, %v13904_v31  ;;  %v16936_v23 = vld [vmem:[#allocation86_spill] sm:$0xff]  ;;  %vm16957_vm5 = vmmov %vm16955_vm4 }
 0xc70   : > { %v14332_v43 = vsel %vm16933_vm11, %v14108_v52, %v13913_v4  ;;  %vm16937_vm14 = vcmp.eq.s32.totalorder %v16936_v23, 1  ;;  %v16938_v4 = vld [vmem:[#allocation94_spill] sm:$0xff]  ;;  %vm16961_vm10 = vmmov %vm16955_vm4 }
 0xc71   : > { %vm16939_vm8 = vcmp.eq.s32.totalorder %v16938_v4, 1  ;;  %vm16963_vm11 = vmmov %vm16955_vm4 }
 0xc72   : > { %v14354_v52 = vsel %vm16939_vm8, %v14116_v1, %v13934_v3  ;;  %v16942_v3 = vld [vmem:[#allocation93_spill] sm:$0xff]  ;;  %vm16968_vm8 = vmmov %vm16955_vm4 }
 0xc73   : > { %vm16943_vm13 = vcmp.eq.s32.totalorder %v16942_v3, 1 }
 0xc74   : > { %v14372_v1 = vsel %vm16943_vm13, %v14112_v42, %v13927_v16  ;;  %vm16971_vm13 = vmmov %vm16955_vm4 }
 0xc76   : > { %6350 = vrot.lane.b32.xlu1 %v14259_v34, %s9663_s21 }
 0xc8e   : > { %5427 = vmax.xlane.f32.xlu0 %v14274_v7 }
 0xc92   : > { %5423 = vmax.xlane.f32.xlu0 %v14284_v49 }
 0xc96   : > { %5429 = vmax.xlane.f32.xlu0 %v14294_v61 }
 0xc9a   : > { %5425 = vmax.xlane.f32.xlu1 %v14300_v58 }
 0xcab   : > { %6746 = vrot.lane.b32.xlu1 %v9317_v6, %s9667_s17  ;;  %v14348_v6 = vsel %vm16937_vm14, %v14114_v0, %v13948_v22  ;;  %v16940_v22 = vld [vmem:[#allocation85_spill] sm:$0xff]  ;;  %vm16966_vm14 = vmmov %vm16955_vm4 }
 0xcac   : > { %6352 = vrot.lane.b32.xlu0 %v14307_v17, %s9663_s21  ;;  %vm16941_vm12 = vcmp.eq.s32.totalorder %v16940_v22, 1  ;;  %s9668_s21 = smov [#allocation6]  }
 0xcad   : > { %v14365_v0 = vsel %vm16941_vm12, %v14110_v32, %v13939_v54  ;;  %v16944_v32 = vld [vmem:[#allocation88_spill] sm:$0xff] }
 0xcae   : > { %vm16945_vm15 = vcmp.eq.s32.totalorder %v16944_v32, 1 }
 0xcaf   : > { %6404 = vrot.lane.b32.xlu1 %v14316_v18, %s9664_s23 }
 0xcb0   : > { %6402 = vrot.lane.b32.xlu0 %v14322_v13, %s9664_s23 }
 0xcb1   : > { %v5404_v31 = vpop.xlane.xlu1 %5403 }
 0xcb3   : > { %6408 = vrot.lane.b32.xlu1 %v14332_v43, %s9664_s23 }
 0xcb4   : > { %6406 = vrot.lane.b32.xlu0 %v14338_v2, %s9664_s23 }
 0xcb5   : > { %v5400_v10 = vpop.xlane.xlu0 %5399 }
 0xcb6   : > { %v5431_v24 = vsub.f32 %v14144_v33, %v5400_v10  ;;  %v5433_v33 = vsub.f32 %v14134_v12, %v5404_v31  ;;  %v16946_v12 = vld [vmem:[#allocation96_spill] sm:$0xff] }
 0xcb7   : > { %6412 = vrot.lane.b32.xlu1 %v14348_v6, %s9664_s23  ;;  %vm16947_vm0 = vcmp.eq.s32.totalorder %v16946_v12, 1 }
 0xcb8   : > { %6410 = vrot.lane.b32.xlu0 %v14354_v52, %s9664_s23  ;;  %v5447_v44 = vmul.f32 1.442695, %v5431_v24  ;;  %v14390_v42 = vsel %vm16947_vm0, %v14122_v36, %v13962_v35  ;;  %v5451_v50 = vmul.f32 1.442695, %v5433_v33  ;;  %v16950_v35 = vld [vmem:[#allocation95_spill] sm:$0xff]  ;;  %v16956_v24 = vld [vmem:[#allocation192_spill] sm:$0xff]  ;;  %vm16974_vm0 = vmmov %vm16955_vm4 }
 0xcb9   : > { %v5406_v11 = vpop.xlane.xlu0 %5405  ;;  %vm16951_vm2 = vcmp.eq.s32.totalorder %v16950_v35, 1  ;;  %v6781_v22 = vsel %vm16958_vm6, %v16956_v24, 0  ;;  %vm16983_vm6 = vmmov %vm16974_vm0 }
 0xcba   : > { %v5434_v47 = vsub.f32 %v14154_v45, %v5406_v11  ;;  %v14383_v45 = vsel %vm16945_vm15, %v14124_v41, %v13976_v19  ;;  %9406 = vpow2.f32 %v5447_v44  ;;  %v16948_v41 = vld [vmem:[#allocation87_spill] sm:$0xff]  ;;  %v14406_v36 = vsel %vm16951_vm2, %v14118_v53, %v13955_v14  ;;  %vm16973_vm15 = vmmov %vm16955_vm4 }
 0xcbb   : > { %6416 = vrot.lane.b32.xlu1 %v14365_v0, %s9664_s23  ;;  %vm16949_vm1 = vcmp.eq.s32.totalorder %v16948_v41, 1  ;;  %vm16977_vm2 = vmmov %vm16974_vm0 }
 0xcbc   : > { %6414 = vrot.lane.b32.xlu0 %v14372_v1, %s9664_s23  ;;  %v5453_v28 = vmul.f32 1.442695, %v5434_v47  ;;  %v14400_v19 = vsel %vm16949_vm1, %v14120_v37, %v13967_v25  ;;  %v16959_v47 = vld [vmem:[#allocation187_spill] sm:$0xff]  ;;  %vm16976_vm1 = vmmov %vm16974_vm0 }
 0xcbd   : > { %v5402_v54 = vpop.xlane.xlu1 %5401  ;;  %v6778_v41 = vsel %vm16961_vm10, %v16959_v47, 0 }
 0xcbe   : > { %v5432_v16 = vsub.f32 %v14164_v30, %v5402_v54  ;;  %9408 = vpow2.f32 %v5453_v28  ;;  %v16952_v30 = vld [vmem:[#allocation98_spill] sm:$0xff] }
 0xcbf   : > { %6420 = vrot.lane.b32.xlu1 %v14383_v45, %s9664_s23  ;;  %vm16953_vm3 = vcmp.eq.s32.totalorder %v16952_v30, 1 }
 0xcc0   : > { %v5449_v10 = vmul.f32 1.442695, %v5432_v16  ;;  %6418 = vrot.lane.b32.xlu0 %v14390_v42, %s9664_s23  ;;  %v14416_v25 = vsel %vm16953_vm3, %v14129_v48, %v13985_v38  ;;  %v16954_v48 = vld [vmem:[#allocation190_spill] sm:$0xff] }
 0xcc1   : > { %v6784_v38 = vsel %vm16955_vm4, %v16954_v48, 0 }
 0xcc2   : > { %9410 = vpow2.f32 %v5449_v10 }
 0xcc3   : > { %9412 = vpow2.f32 %v5451_v50  ;;  %6424 = vrot.lane.b32.xlu1 %v14400_v19, %s9664_s23 }
 0xcc4   : > { %6422 = vrot.lane.b32.xlu0 %v14406_v36, %s9664_s23 }
 0xcc7   : > { %v14420_v37 = vpop.eup %9406 }
 0xcc8   : > { %6426 = vrot.lane.b32.xlu0 %v14416_v25, %s9664_s23 }
 0xccb   : > { %v14422_v14 = vpop.eup %9408 }
 0xccf   : > { %v14424_v53 = vpop.eup %9410 }
 0xcd0   : > { %v14426_v23 = vpop.eup %9412  ;;  %v5527_v4 = vpack.c.bf16 %v14424_v53, %v14420_v37 }
 0xcd1   : > { %v5528_v31 = vpack.c.bf16 %v14422_v14, %v14426_v23 }
 0xcd2   : > { %8909 = vmatprep.mubr.bf16.mxu1 %v5527_v4  ;;  %v16962_v4 = vld [vmem:[#allocation195_spill] sm:$0xff] }
 0xcd3   : > { %8910 = vmatmul.mubr.bf16.vlgmr.msra.gmra.mxu1 %v5528_v31 }
 0xcd4   : > { %8958 = vmatpush3.bf16.xpose.msra.mxu1 %v6784_v38 }
 0xcd5   : > { %9110 = vmatprep.subr.msk.bf16.mxu1 %vm16957_vm5, %v16956_v24  ;;  %v5412_v3 = vpop.xlane.xlu0 %5411  ;;  %v6775_v24 = vsel %vm16966_vm14, %v16962_v4, 0  ;;  %vm16982_vm5 = vmmov %vm16974_vm0 }
 0xcd6   : > { %v5437_v54 = vsub.f32 %v14174_v56, %v5412_v3  ;;  %v16964_v56 = vld [vmem:[#allocation90_spill] sm:$0xff] }
 0xcd7   : > { %vm16965_vm9 = vcmp.eq.s32.totalorder %v16964_v56, 1 }
 0xcd8   : > { %v5459_v35 = vmul.f32 1.442695, %v5437_v54  ;;  %v16969_v54 = vld [vmem:[#allocation97_spill] sm:$0xff] }
 0xcd9   : > { %vm16970_vm12 = vcmp.eq.s32.totalorder %v16969_v54, 1  ;;  %v16978_v54 = vld [vmem:[#allocation89_spill] sm:$0xff] }
 0xcda   : > { %v5408_v11 = vpop.xlane.xlu1 %5407  ;;  %vm16979_vm3 = vcmp.eq.s32.totalorder %v16978_v54, 1 }
 0xcdb   : > { %v5435_v33 = vsub.f32 %v14184_v63, %v5408_v11 }
 0xcdc   : > { %8960 = vmatpush3.bf16.xpose.msra.mxu1 %v6781_v22 }
 0xcdd   : > { %9111 = vmatprep.subr.msk.bf16.mxu1 %vm16960_vm7, %v16959_v47  ;;  %v5455_v32 = vmul.f32 1.442695, %v5435_v33  ;;  %v16967_v47 = vld [vmem:[#allocation197_spill] sm:$0xff] }
 0xcde   : > { %v5414_v44 = vpop.xlane.xlu1 %5413 }
 0xcdf   : > { %v5438_v28 = vsub.f32 %v14197_v8, %v5414_v44  ;;  %9414 = vpow2.f32 %v5455_v32  ;;  %v6772_v32 = vsel %vm16971_vm13, %v16967_v47, 0 }
 0xce1   : > { %v5461_v50 = vmul.f32 1.442695, %v5438_v28 }
 0xce2   : > { %v5420_v16 = vpop.xlane.xlu1 %5419  ;;  %v5410_v12 = vpop.xlane.xlu0 %5409 }
 0xce3   : > { %v5436_v10 = vsub.f32 %v14216_v39, %v5410_v12  ;;  %9416 = vpow2.f32 %v5461_v50  ;;  %v5441_v11 = vsub.f32 %v14208_v55, %v5420_v16  ;;  %v16972_v12 = vld [vmem:[#allocation203_spill] sm:$0xff] }
 0xce4   : > { %8962 = vmatpush3.bf16.xpose.msra.mxu1 %v6778_v41  ;;  %v6769_v41 = vsel %vm16974_vm0, %v16972_v12, 0 }
 0xce5   : > { %v5457_v30 = vmul.f32 1.442695, %v5436_v10  ;;  %9112 = vmatprep.subr.msk.bf16.mxu1 %vm16963_vm11, %v16962_v4  ;;  %v5467_v44 = vmul.f32 1.442695, %v5441_v11 }
 0xce6   : > { %v5416_v63 = vpop.xlane.xlu1 %5415  ;;  %v6349_v8 = vpop.permute.xlu0 %6348 }
 0xce7   : > { %v14451_v31 = vsel %vm16965_vm9, %v6349_v8, %v14251_v29  ;;  %9418 = vpow2.f32 %v5457_v30  ;;  %v5439_v39 = vsub.f32 %v14224_v59, %v5416_v63 }
 0xce8   : > { %6428 = vrot.lane.b32.xlu1 %v14451_v31, %s9664_s23  ;;  %9420 = vpow2.f32 %v5459_v35  ;;  %v16975_v35 = vld [vmem:[#allocation200_spill] sm:$0xff] }
 0xce9   : > { %v5463_v22 = vmul.f32 1.442695, %v5439_v39 }
 0xcea   : > { %v5422_v48 = vpop.xlane.xlu1 %5421 }
 0xceb   : > { %v5442_v38 = vsub.f32 %v14234_v27, %v5422_v48  ;;  %9422 = vpow2.f32 %v5463_v22  ;;  %v6766_v48 = vsel %vm16977_vm2, %v16975_v35, 0 }
 0xcec   : > { %8964 = vmatpush3.bf16.xpose.msra.mxu1 %v6775_v24  ;;  %v14463_v27 = vpop.eup %9414 }
 0xced   : > { %9113 = vmatprep.subr.msk.bf16.mxu1 %vm16968_vm8, %v16967_v47  ;;  %v5469_v29 = vmul.f32 1.442695, %v5442_v38 }
 0xcee   : > { %v5418_v3 = vpop.xlane.xlu1 %5417 }
 0xcef   : > { %v5440_v33 = vsub.f32 %v14244_v51, %v5418_v3  ;;  %9424 = vpow2.f32 %v5469_v29 }
 0xcf0   : > { %v14472_v16 = vpop.eup %9416 }
 0xcf1   : > { %v5465_v59 = vmul.f32 1.442695, %v5440_v33 }
 0xcf2   : > { %v6351_v28 = vpop.permute.xlu1 %6350 }
 0xcf3   : > { %9426 = vpow2.f32 %v5465_v59  ;;  %v14468_v55 = vsel %vm16970_vm12, %v6351_v28, %v14259_v34 }
 0xcf4   : > { %9428 = vpow2.f32 %v5467_v44  ;;  %6430 = vrot.lane.b32.xlu0 %v14468_v55, %s9664_s23  ;;  %8966 = vmatpush3.bf16.xpose.msra.mxu1 %v6772_v32  ;;  %v14476_v51 = vpop.eup %9418 }
 0xcf5   : > { %9114 = vmatprep.subr.msk.bf16.mxu1 %vm16973_vm15, %v16972_v12  ;;  %v14480_v50 = vpop.eup %9420  ;;  %v5529_v34 = vpack.c.bf16 %v14476_v51, %v14463_v27  ;;  %vm17001_vm15 = vmmov %vm16974_vm0 }
 0xcf6   : > { %v5530_v10 = vpack.c.bf16 %v14472_v16, %v14480_v50 }
 0xcf7   : > { %8913 = vmatprep.mubr.bf16.mxu1 %v5529_v34  ;;  %v16980_v34 = vld [vmem:[#allocation100_spill] sm:$0xff] }
 0xcf8   : > { %8914 = vmatmul.mubr.bf16.gmra.mxu1 %v5530_v10  ;;  %v14490_v30 = vpop.eup %9422  ;;  %vm16981_vm4 = vcmp.eq.s32.totalorder %v16980_v34, 1 }
 0xcfc   : > { %8968 = vmatpush3.bf16.xpose.msra.mxu1 %v6769_v41  ;;  %v14492_v4 = vpop.eup %9424 }
 0xcfd   : > { %9115 = vmatprep.subr.msk.bf16.mxu1 %vm16976_vm1, %v16975_v35  ;;  %v16984_v35 = vld [vmem:[#allocation92_spill] sm:$0xff] }
 0xcfe   : > { %vm16985_vm7 = vcmp.eq.s32.totalorder %v16984_v35, 1  ;;  %v17002_v35 = vld [vmem:[#allocation104_spill] sm:$0xff] }
 0xcff   : > { %vm17003_vm0 = vcmp.eq.s32.totalorder %v17002_v35, 1 }
 0xd00   : > { %v14494_v63 = vpop.eup %9426 }
 0xd01   : > { %v14496_v8 = vpop.eup %9428  ;;  %v5531_v56 = vpack.c.bf16 %v14494_v63, %v14490_v30 }
 0xd02   : > { %v5532_v39 = vpack.c.bf16 %v14492_v4, %v14496_v8 }
 0xd03   : > { %8917 = vmatprep.mubr.bf16.mxu1 %v5531_v56 }
 0xd04   : > { %8918 = vmatmul.mubr.bf16.gmra.mxu1 %v5532_v39  ;;  %v16986_v39 = vld [vmem:[#allocation99_spill] sm:$0xff] }
 0xd05   : > { %8970 = vmatpush3.bf16.xpose.msra.mxu1 %v6766_v48  ;;  %vm16987_vm10 = vcmp.eq.s32.totalorder %v16986_v39, 1  ;;  %v17004_v39 = vld [vmem:[#allocation114_spill] sm:$0xff] }
 0xd06   : > { %vm17005_vm1 = vcmp.eq.s32.totalorder %v17004_v39, 1 }
 0xd17   : > { %v5428_v38 = vpop.xlane.xlu0 %5427 }
 0xd18   : > { %v5445_v29 = vsub.f32 %v14274_v7, %v5428_v38 }
 0xd1a   : > { %v5475_v12 = vmul.f32 1.442695, %v5445_v29 }
 0xd1b   : > { %v5424_v24 = vpop.xlane.xlu0 %5423 }
 0xd1c   : > { %v5443_v11 = vsub.f32 %v14284_v49, %v5424_v24  ;;  %v16988_v24 = vld [vmem:[#allocation91_spill] sm:$0xff] }
 0xd1d   : > { %vm16989_vm11 = vcmp.eq.s32.totalorder %v16988_v24, 1  ;;  %v17006_v24 = vld [vmem:[#allocation103_spill] sm:$0xff] }
 0xd1e   : > { %v5471_v3 = vmul.f32 1.442695, %v5443_v11  ;;  %vm17007_vm2 = vcmp.eq.s32.totalorder %v17006_v24, 1 }
 0xd1f   : > { %v5430_v22 = vpop.xlane.xlu0 %5429 }
 0xd20   : > { %v5446_v47 = vsub.f32 %v14294_v61, %v5430_v22  ;;  %9430 = vpow2.f32 %v5471_v3 }
 0xd22   : > { %v5477_v33 = vmul.f32 1.442695, %v5446_v47 }
 0xd23   : > { %v5426_v44 = vpop.xlane.xlu1 %5425  ;;  %v6353_v59 = vpop.permute.xlu0 %6352 }
 0xd24   : > { %v5444_v28 = vsub.f32 %v14300_v58, %v5426_v44  ;;  %v14511_v32 = vsel %vm16979_vm3, %v6353_v59, %v14307_v17  ;;  %9432 = vpow2.f32 %v5477_v33  ;;  %v16994_v44 = vld [vmem:[#allocation112_spill] sm:$0xff] }
 0xd25   : > { %6432 = vrot.lane.b32.xlu1 %v14511_v32, %s9664_s23  ;;  %vm16995_vm8 = vcmp.eq.s32.totalorder %v16994_v44, 1  ;;  %v17018_v44 = vld [vmem:[#allocation26_spill] sm:$0xff]  ;;  %s9602_s23 = sshll.u32 %s9668_s21, 4  ;;  %s9603_s23 = int_to_ptr.vmem [resolvable:$false] %s9602_s23 }
 0xd26   : > { %v5473_v49 = vmul.f32 1.442695, %v5444_v28  ;;  %s9604_s16 = scalar_lea.vmem %s9603_s23, 4096 }
 0xd27   : > { %v6747_v61 = vpop.permute.xlu1 %6746  ;;  %v6403_v7 = vpop.permute.xlu0 %6402 }
 0xd28   : > { %9434 = vpow2.f32 %v5473_v49  ;;  %v14518_v10 = vsel %vm16981_vm4, %v6403_v7, %v14322_v13  ;;  %9116 = vmatprep.subr.msk.bf16.mxu1 %vm16982_vm5, %v6747_v61  ;;  %v6763_v58 = vsel %vm16983_vm6, %v6747_v61, 0  ;;  %v16996_v61 = vld [vmem:[#allocation101_spill] sm:$0xff]  ;;  %v16998_v7 = vld [vmem:[#allocation115_spill] sm:$0xff]  ;;  %vm17011_vm4 = vmmov %vm16982_vm5 }
 0xd29   : > { %9436 = vpow2.f32 %v5475_v12  ;;  %8972 = vmatpush3.bf16.xpose.msra.mxu1 %v6763_v58  ;;  %6482 = vrot.lane.b32.xlu0 %v14518_v10, %s16720_s15  ;;  %vm16997_vm12 = vcmp.eq.s32.totalorder %v16996_v61, 1  ;;  %vm16999_vm13 = vcmp.eq.s32.totalorder %v16998_v7, 1  ;;  %v17000_v58 = vld [vmem:[#allocation182_spill] sm:$0xff]  ;;  %vm17013_vm5 = vmmov %vm17011_vm4  ;;  %v17025_v61 = vld [vmem:[#allocation116_spill] sm:$0xff] }
 0xd2a   : > { %vm17015_vm6 = vmmov %vm17011_vm4 }
 0xd2b   : > { %v6405_v17 = vpop.permute.xlu1 %6404  ;;  %v6407_v41 = vpop.permute.xlu0 %6406 }
 0xd2c   : > { %v14527_v56 = vsel %vm16985_vm7, %v6405_v17, %v14316_v18  ;;  %v14532_v13 = vsel %vm16987_vm10, %v6407_v41, %v14338_v2  ;;  %v16990_v18 = vld [vmem:[#allocation113_spill] sm:$0xff]  ;;  %vm17017_vm7 = vmmov %vm17011_vm4 }
 0xd2d   : > { %6484 = vrot.lane.b32.xlu1 %v14527_v56, %s16720_s15  ;;  %6486 = vrot.lane.b32.xlu0 %v14532_v13, %s16720_s15  ;;  %vm16991_vm9 = vcmp.eq.s32.totalorder %v16990_v18, 1  ;;  %v14552_v2 = vpop.eup %9430  ;;  %vm17019_vm10 = vmmov %vm17011_vm4 }
 0xd2f   : > { %v6409_v48 = vpop.permute.xlu1 %6408  ;;  %v6411_v38 = vpop.permute.xlu0 %6410 }
 0xd30   : > { %v14541_v11 = vsel %vm16989_vm11, %v6409_v48, %v14332_v43  ;;  %v14546_v22 = vsel %vm16991_vm9, %v6411_v38, %v14354_v52  ;;  %v16992_v43 = vld [vmem:[#allocation102_spill] sm:$0xff]  ;;  %vm17021_vm11 = vmmov %vm17011_vm4 }
 0xd31   : > { %6488 = vrot.lane.b32.xlu1 %v14541_v11, %s16720_s15  ;;  %6490 = vrot.lane.b32.xlu0 %v14546_v22, %s16720_s15  ;;  %v14554_v3 = vpop.eup %9432  ;;  %vm16993_vm14 = vcmp.eq.s32.totalorder %v16992_v43, 1  ;;  %v17014_v43 = vld [vmem:[#allocation24_spill] sm:$0xff]  ;;  %vm17023_vm9 = vmmov %vm17011_vm4 }
 0xd33   : > { %v6413_v47 = vpop.permute.xlu1 %6412  ;;  %v6415_v29 = vpop.permute.xlu0 %6414 }
 0xd34   : > { %v6455_v33 = vsel %vm16993_vm14, %v6413_v47, %v14348_v6  ;;  %v6456_v52 = vsel %vm16995_vm8, %v6415_v29, %v14372_v1  ;;  %v17008_v47 = vld [vmem:[#allocation117_spill] sm:$0xff]  ;;  %vm17024_vm14 = vcmp.eq.s32.totalorder %v16749_v46, 1  ;;  %vm17026_vm8 = vcmp.eq.s32.totalorder %v17025_v61, 1 }
 0xd35   : > { %v14562_v59 = vpop.eup %9434  ;;  %6492 = vrot.lane.b32.xlu1 %v6455_v33, %s16720_s15  ;;  %6494 = vrot.lane.b32.xlu0 %v6456_v52, %s16720_s15  ;;  %vm17009_vm3 = vcmp.eq.s32.totalorder %v17008_v47, 1 }
 0xd36   : > { %v14566_v28 = vpop.eup %9436  ;;  %v5533_v54 = vpack.c.bf16 %v14562_v59, %v14552_v2 }
 0xd37   : > { %v6417_v12 = vpop.permute.xlu1 %6416  ;;  %v6419_v49 = vpop.permute.xlu0 %6418  ;;  %v5534_v6 = vpack.c.bf16 %v14554_v3, %v14566_v28 }
 0xd38   : > { %v6457_v1 = vsel %vm16997_vm12, %v6417_v12, %v14365_v0  ;;  %v14578_v34 = vsel %vm16999_vm13, %v6419_v49, %v14390_v42  ;;  %8921 = vmatprep.mubr.bf16.mxu1 %v5533_v54  ;;  %v17022_v54 = vld [vmem:[#allocation33_spill] sm:$0xff] }
 0xd39   : > { %8922 = vmatmul.mubr.bf16.gmra.mxu1 %v5534_v6  ;;  %6496 = vrot.lane.b32.xlu1 %v6457_v1, %s16720_s15 }
 0xd3a   : > { %6498 = vrot.lane.b32.xlu0 %v14578_v34, %s16720_s15  ;;  %8973 = vmatprep.mubr.msk.bf16.mxu1 %vm17001_vm15, %v17000_v58 }
 0xd3b   : > { %v6421_v17 = vpop.permute.xlu1 %6420  ;;  %v6423_v41 = vpop.permute.xlu0 %6422 }
 0xd3c   : > { %v6459_v0 = vsel %vm17003_vm0, %v6421_v17, %v14383_v45  ;;  %v6460_v42 = vsel %vm17005_vm1, %v6423_v41, %v14406_v36  ;;  %v17010_v45 = vld [vmem:[#allocation181_spill] sm:$0xff]  ;;  %v17012_v36 = vld [vmem:[#allocation183_spill] sm:$0xff] }
 0xd3d   : > { %6500 = vrot.lane.b32.xlu1 %v6459_v0, %s16720_s15  ;;  %v17027_v17 = vld [vmem:[#allocation105_spill] sm:$0xff] }
 0xd3e   : > { %6502 = vrot.lane.b32.xlu0 %v6460_v42, %s16720_s15  ;;  %vm17028_vm12 = vcmp.eq.s32.totalorder %v17027_v17, 1  ;;  %v17045_v17 = vld [vmem:[#allocation127_spill] sm:$0xff] }
 0xd3f   : > { %v6425_v48 = vpop.permute.xlu1 %6424  ;;  %v6427_v38 = vpop.permute.xlu0 %6426 }
 0xd40   : > { %v6461_v18 = vsel %vm17007_vm2, %v6425_v48, %v14400_v19  ;;  %v14599_v29 = vsel %vm17009_vm3, %v6427_v38, %v14416_v25  ;;  %v17016_v19 = vld [vmem:[#allocation27_spill] sm:$0xff]  ;;  %v17020_v25 = vld [vmem:[#allocation29_spill] sm:$0xff]  ;;  %v17031_v38 = vld [vmem:[#allocation118_spill] sm:$0xff] }
 0xd41   : > { %8974 = vmatmul.mubr.msk.bf16.vlgmr.msra.gmra.mxu1 %vm17011_vm4, %v17010_v45  ;;  %6504 = vrot.lane.b32.xlu1 %v6461_v18, %s16720_s15  ;;  %vm17032_vm15 = vcmp.eq.s32.totalorder %v17031_v38, 1  ;;  %v17051_v38 = vld [vmem:[#allocation138_spill] sm:$0xff] }
 0xd42   : > { %6506 = vrot.lane.b32.xlu0 %v14599_v29, %s16720_s15  ;;  %8977 = vmatprep.mubr.msk.bf16.mxu1 %vm17013_vm5, %v17012_v36  ;;  %v17035_v36 = vld [vmem:[#allocation107_spill] sm:$0xff] }
 0xd43   : > { %vm17036_vm1 = vcmp.eq.s32.totalorder %v17035_v36, 1 }
 0xd49   : > { %8978 = vmatmul.mubr.msk.bf16.gmra.mxu1 %vm17015_vm6, %v17014_v43  ;;  %vm17046_vm6 = vcmp.eq.s32.totalorder %v17045_v17, 1  ;;  %v17063_v17 = vld [vmem:[#allocation130_spill] sm:$0xff] }
 0xd4a   : > { %8981 = vmatprep.mubr.msk.bf16.mxu1 %vm17017_vm7, %v17016_v19  ;;  %v17037_v19 = vld [vmem:[#allocation123_spill] sm:$0xff] }
 0xd4b   : > { %vm17038_vm2 = vcmp.eq.s32.totalorder %v17037_v19, 1  ;;  %v9318_v19 = vld [vmem:[#allocation4 + $0x30] sm:$0xff]  }
 0xd51   : > { %8982 = vmatmul.mubr.msk.bf16.gmra.mxu1 %vm17019_vm10, %v17018_v44 }
 0xd52   : > { %8985 = vmatprep.mubr.msk.bf16.mxu1 %vm17021_vm11, %v17020_v25  ;;  %v17039_v25 = vld [vmem:[#allocation135_spill] sm:$0xff]  ;;  %vm17052_vm11 = vcmp.eq.s32.totalorder %v17051_v38, 1 }
 0xd53   : > { %vm17040_vm3 = vcmp.eq.s32.totalorder %v17039_v25, 1  ;;  %v17059_v25 = vld [vmem:[#allocation128_spill] sm:$0xff] }
 0xd59   : > { %8986 = vmatmul.mubr.msk.bf16.gmra.mxu1 %vm17023_vm9, %v17022_v54 }
 0xd5a   : > { %v6429_v12 = vpop.permute.xlu1 %6428 }
 0xd5b   : > { %v6463_v49 = vsel %vm17024_vm14, %v6429_v12, %v14451_v31  ;;  %v17029_v31 = vld [vmem:[#allocation109_spill] sm:$0xff]  ;;  %v17041_v12 = vld [vmem:[#allocation136_spill] sm:$0xff] }
 0xd5c   : > { %6508 = vrot.lane.b32.xlu1 %v6463_v49, %s16720_s15  ;;  %vm17030_vm13 = vcmp.eq.s32.totalorder %v17029_v31, 1  ;;  %vm17042_vm4 = vcmp.eq.s32.totalorder %v17041_v12, 1  ;;  %v17049_v31 = vld [vmem:[#allocation125_spill] sm:$0xff] }
 0xd5d   : > { %vm17050_vm10 = vcmp.eq.s32.totalorder %v17049_v31, 1  ;;  %v17067_v31 = vld [vmem:[#allocation132_spill] sm:$0xff] }
 0xd66   : > { %v6431_v6 = vpop.permute.xlu0 %6430 }
 0xd67   : > { %v6464_v7 = vsel %vm17026_vm8, %v6431_v6, %v14468_v55  ;;  %v17043_v6 = vld [vmem:[#allocation120_spill] sm:$0xff] }
 0xd68   : > { %6510 = vrot.lane.b32.xlu0 %v6464_v7, %s16720_s15  ;;  %vm17044_vm5 = vcmp.eq.s32.totalorder %v17043_v6, 1 }
 0xd97   : > { %v6433_v58 = vpop.permute.xlu1 %6432 }
 0xd98   : > { %v6465_v41 = vsel %vm17028_vm12, %v6433_v58, %v14511_v32  ;;  %v17033_v32 = vld [vmem:[#allocation119_spill] sm:$0xff]  ;;  %vm17060_vm12 = vcmp.eq.s32.totalorder %v17059_v25, 1 }
 0xd99   : > { %6512 = vrot.lane.b32.xlu1 %v6465_v41, %s16720_s15  ;;  %vm17034_vm0 = vcmp.eq.s32.totalorder %v17033_v32, 1  ;;  %s15417_s15 = scalar_lea.hbm %s15472_s7, %s8143_s8 }
 0xd9b   : > { %v6483_v35 = vpop.permute.xlu0 %6482 }
 0xd9c   : > { %v6530_v45 = vsel %vm17034_vm0, %v6483_v35, %v14518_v10 }
 0xd9f   : > { %v6485_v39 = vpop.permute.xlu1 %6484  ;;  %v6487_v46 = vpop.permute.xlu0 %6486 }
 0xda0   : > { %v6531_v48 = vsel %vm17030_vm13, %v6485_v39, %v14527_v56  ;;  %v6532_v55 = vsel %vm17032_vm15, %v6487_v46, %v14532_v13  ;;  %v17047_v39 = vld [vmem:[#allocation137_spill] sm:$0xff]  ;;  %vm17064_vm15 = vcmp.eq.s32.totalorder %v17063_v17, 1 }
 0xda1   : > { %6564 = vrot.lane.b32.xlu1 %v6531_v48, %s16759_s14  ;;  %6566 = vrot.lane.b32.xlu0 %v6532_v55, %s16759_s14  ;;  %vm17048_vm7 = vcmp.eq.s32.totalorder %v17047_v39, 1  ;;  %v17065_v39 = vld [vmem:[#allocation145_spill] sm:$0xff] }
 0xda2   : > { %vm17066_vm0 = vcmp.eq.s32.totalorder %v17065_v39, 1 }
 0xda3   : > { %v6489_v24 = vpop.permute.xlu1 %6488  ;;  %v6491_v47 = vpop.permute.xlu0 %6490 }
 0xda4   : > { %v6533_v43 = vsel %vm17036_vm1, %v6489_v24, %v14541_v11  ;;  %v6534_v11 = vsel %vm17042_vm4, %v6491_v47, %v14546_v22  ;;  %v17053_v47 = vld [vmem:[#allocation129_spill] sm:$0xff]  ;;  %vm17068_vm1 = vcmp.eq.s32.totalorder %v17067_v31, 1 }
 0xda5   : > { %6568 = vrot.lane.b32.xlu1 %v6533_v43, %s16759_s14  ;;  %6562 = vrot.lane.b32.xlu0 %v6530_v45, %s16759_s14  ;;  %vm17054_vm9 = vcmp.eq.s32.totalorder %v17053_v47, 1  ;;  %v17069_v47 = vld [vmem:[#allocation158_spill] sm:$0xff] }
 0xda7   : > { %v6493_v56 = vpop.permute.xlu1 %6492  ;;  %v6495_v13 = vpop.permute.xlu0 %6494 }
 0xda8   : > { %v6535_v44 = vsel %vm17038_vm2, %v6493_v56, %v6455_v33  ;;  %v6536_v54 = vsel %vm17040_vm3, %v6495_v13, %v6456_v52  ;;  %v17055_v56 = vld [vmem:[#allocation140_spill] sm:$0xff]  ;;  %vm17070_vm2 = vcmp.eq.s32.totalorder %v17069_v47, 1  ;;  %v17089_v47 = vld [vmem:[#allocation162_spill] sm:$0xff] }
 0xda9   : > { %6572 = vrot.lane.b32.xlu1 %v6535_v44, %s16759_s14  ;;  %6574 = vrot.lane.b32.xlu0 %v6536_v54, %s16759_s14  ;;  %vm17056_vm14 = vcmp.eq.s32.totalorder %v17055_v56, 1 }
 0xdab   : > { %v6497_v10 = vpop.permute.xlu1 %6496 }
 0xdac   : > { %v6537_v61 = vsel %vm17044_vm5, %v6497_v10, %v6457_v1  ;;  %v6499_v58 = vpop.permute.xlu0 %6498 }
 0xdad   : > { %6576 = vrot.lane.b32.xlu1 %v6537_v61, %s16759_s14  ;;  %6570 = vrot.lane.b32.xlu0 %v6534_v11, %s16759_s14  ;;  %v6538_v24 = vsel %vm17052_vm11, %v6499_v58, %v14578_v34  ;;  %v17057_v34 = vld [vmem:[#allocation142_spill] sm:$0xff]  ;;  %v17061_v58 = vld [vmem:[#allocation143_spill] sm:$0xff] }
 0xdae   : > { %vm17058_vm8 = vcmp.eq.s32.totalorder %v17057_v34, 1  ;;  %vm17062_vm13 = vcmp.eq.s32.totalorder %v17061_v58, 1  ;;  %v17073_v34 = vld [vmem:[#allocation159_spill] sm:$0xff] }
 0xdaf   : > { %v6501_v33 = vpop.permute.xlu1 %6500  ;;  %vm17074_vm4 = vcmp.eq.s32.totalorder %v17073_v34, 1 }
 0xdb0   : > { %v6539_v52 = vsel %vm17046_vm6, %v6501_v33, %v6459_v0  ;;  %v6503_v35 = vpop.permute.xlu0 %6502 }
 0xdb1   : > { %v6540_v46 = vsel %vm17048_vm7, %v6503_v35, %v6460_v42  ;;  %6580 = vrot.lane.b32.xlu1 %v6539_v52, %s16759_s14 }
 0xdb2   : > { %6582 = vrot.lane.b32.xlu0 %v6540_v46, %s16759_s14 }
 0xdb3   : > { %v6505_v22 = vpop.permute.xlu1 %6504 }
 0xdb4   : > { %v6541_v1 = vsel %vm17050_vm10, %v6505_v22, %v6461_v18  ;;  %v6507_v32 = vpop.permute.xlu0 %6506 }
 0xdb5   : > { %6584 = vrot.lane.b32.xlu1 %v6541_v1, %s16759_s14  ;;  %v6542_v13 = vsel %vm17058_vm8, %v6507_v32, %v14599_v29  ;;  %v17071_v32 = vld [vmem:[#allocation147_spill] sm:$0xff] }
 0xdb6   : > { %6578 = vrot.lane.b32.xlu0 %v6538_v24, %s16759_s14  ;;  %vm17072_vm3 = vcmp.eq.s32.totalorder %v17071_v32, 1 }
 0xdce   : > { %v6509_v0 = vpop.permute.xlu1 %6508 }
 0xdcf   : > { %v14674_v42 = vsel %vm17054_vm9, %v6509_v0, %v6463_v49  ;;  %vm17090_vm9 = vcmp.eq.s32.totalorder %v17089_v47, 1 }
 0xdd0   : > { %6588 = vrot.lane.b32.xlu1 %v14674_v42, %s16759_s14 }
 0xdda   : > { %v6511_v36 = vpop.permute.xlu0 %6510 }
 0xddb   : > { %v6544_v18 = vsel %vm17056_vm14, %v6511_v36, %v6464_v7  ;;  %v9319_v7 = vld [vmem:[#allocation4 + $0x38] sm:$0xff]  }
 0xddc   : > { %6590 = vrot.lane.b32.xlu0 %v6544_v18, %s16759_s14 }
 0xde0   : > { %6586 = vrot.lane.b32.xlu0 %v6542_v13, %s16759_s14 }
 0xde4   : > { %7103 = vrot.lane.b32.xlu0 %v9318_v19, %s9667_s17  ;;  %v17075_v19 = vld [vmem:[#allocation149_spill] sm:$0xff] }
 0xde5   : > { %vm17076_vm5 = vcmp.eq.s32.totalorder %v17075_v19, 1 }
 0xe0b   : > { %v6513_v49 = vpop.permute.xlu1 %6512 }
 0xe0c   : > { %v14688_v10 = vsel %vm17060_vm12, %v6513_v49, %v6465_v41 }
 0xe0d   : > { %6592 = vrot.lane.b32.xlu1 %v14688_v10, %s16759_s14 }
 0xe11   : > { %7105 = vrot.lane.b32.xlu1 %v9319_v7, %s9667_s17  ;;  %v17077_v7 = vld [vmem:[#allocation160_spill] sm:$0xff] }
 0xe12   : > { %vm17078_vm6 = vcmp.eq.s32.totalorder %v17077_v7, 1  ;;  %v9321_v7 = vld [vmem:[#allocation4 + $0x10] sm:$0xff]  }
 0xe13   : > { %v6565_v12 = vpop.permute.xlu1 %6564  ;;  %v6567_v6 = vpop.permute.xlu0 %6566 }
 0xe14   : > { %v14695_v29 = vsel %vm17062_vm13, %v6567_v6, %v6532_v55  ;;  %v14713_v38 = vsel %vm17068_vm1, %v6565_v12, %v6531_v48  ;;  %v17079_v12 = vld [vmem:[#allocation150_spill] sm:$0xff] }
 0xe15   : > { %6646 = vrot.lane.b32.xlu0 %v14695_v29, %s9666_s13  ;;  %vm17080_vm7 = vcmp.eq.s32.totalorder %v17079_v12, 1 }
 0xe17   : > { %v6569_v33 = vpop.permute.xlu1 %6568  ;;  %v6563_v35 = vpop.permute.xlu0 %6562 }
 0xe18   : > { %v14701_v41 = vsel %vm17064_vm15, %v6569_v33, %v6533_v43  ;;  %v14705_v22 = vsel %vm17066_vm0, %v6563_v35, %v6530_v45  ;;  %v17081_v33 = vld [vmem:[#allocation161_spill] sm:$0xff] }
 0xe19   : > { %6648 = vrot.lane.b32.xlu1 %v14701_v41, %s9666_s13  ;;  %6642 = vrot.lane.b32.xlu0 %v14705_v22, %s9666_s13  ;;  %vm17082_vm10 = vcmp.eq.s32.totalorder %v17081_v33, 1 }
 0xe1b   : > { %v6573_v55 = vpop.permute.xlu1 %6572  ;;  %v6575_v0 = vpop.permute.xlu0 %6574 }
 0xe1c   : > { %v14717_v43 = vsel %vm17070_vm2, %v6575_v0, %v6536_v54  ;;  %v14737_v49 = vsel %vm17076_vm5, %v6573_v55, %v6535_v44  ;;  %vm17121_vm5 = vcmp.gt.s32.totalorder %v16844_v15, %v16877_v21 }
 0xe1d   : > { %6644 = vrot.lane.b32.xlu1 %v14713_v38, %s9666_s13  ;;  %6654 = vrot.lane.b32.xlu0 %v14717_v43, %s9666_s13 }
 0xe1f   : > { %v6577_v45 = vpop.permute.xlu1 %6576  ;;  %v6571_v56 = vpop.permute.xlu0 %6570 }
 0xe20   : > { %v14725_v36 = vsel %vm17072_vm3, %v6577_v45, %v6537_v61  ;;  %v14729_v48 = vsel %vm17074_vm4, %v6571_v56, %v6534_v11  ;;  %v17092_v56 = vld [vmem:[#allocation163_spill] sm:$0xff] }
 0xe21   : > { %6656 = vrot.lane.b32.xlu1 %v14725_v36, %s9666_s13  ;;  %6650 = vrot.lane.b32.xlu0 %v14729_v48, %s9666_s13  ;;  %vm17093_vm14 = vcmp.eq.s32.totalorder %v17092_v56, 1 }
 0xe23   : > { %v6581_v54 = vpop.permute.xlu1 %6580 }
 0xe24   : > { %v6583_v25 = vpop.permute.xlu0 %6582 }
 0xe25   : > { %v14741_v61 = vsel %vm17078_vm6, %v6583_v25, %v6540_v46  ;;  %6652 = vrot.lane.b32.xlu1 %v14737_v49, %s9666_s13  ;;  %v17083_v46 = vld [vmem:[#allocation151_spill] sm:$0xff]  ;;  %v9320_v25 = vld [vmem:[#allocation4 + $0x20] sm:$0xff]   ;;  %vm17122_vm6 = vcmp.eq.s32.totalorder %v16879_v5, 1 }
 0xe26   : > { %6662 = vrot.lane.b32.xlu0 %v14741_v61, %s9666_s13  ;;  %vm17084_vm11 = vcmp.eq.s32.totalorder %v17083_v46, 1  ;;  %v17127_v5 = vld [vmem:[#allocation21_spill] sm:$0xff] }
 0xe27   : > { %v6585_v11 = vpop.permute.xlu1 %6584  ;;  %v14761_v17 = vsel %vm17084_vm11, %v6581_v54, %v6539_v52  ;;  %vm17128_vm11 = vcmp.gt.s32.totalorder %v16844_v15, %v17127_v5 }
 0xe28   : > { %v14749_v6 = vsel %vm17080_vm7, %v6585_v11, %v6541_v1  ;;  %v6579_v58 = vpop.permute.xlu0 %6578  ;;  %v14765_v1 = vpop.f32.mrf.mxu1 }
 0xe29   : > { %v14753_v44 = vsel %vm17082_vm10, %v6579_v58, %v6538_v24  ;;  %6664 = vrot.lane.b32.xlu1 %v14749_v6, %s9666_s13 }
 0xe2a   : > { %6658 = vrot.lane.b32.xlu0 %v14753_v44, %s9666_s13  ;;  %v14767_v35 = vpop.f32.mrf.mxu1 }
 0xe2c   : > { %v14769_v39 = vpop.f32.mrf.mxu1 }
 0xe2d   : > { %6660 = vrot.lane.b32.xlu1 %v14761_v17, %s9666_s13  ;;  %17085 = vst [vmem:[#allocation106_spill] sm:$0xff] %v14769_v39  ;;  %v17111_v39 = vld [vmem:[#allocation154_spill] sm:$0xff] }
 0xe2e   : > { %v14771_v24 = vpop.f32.mrf.mxu1  ;;  %vm17112_vm0 = vcmp.eq.s32.totalorder %v17111_v39, 1  ;;  %v17117_v39 = vld [vmem:[#allocation54_spill] sm:$0xff] }
 0xe2f   : > { %17086 = vst [vmem:[#allocation70_spill] sm:$0xff] %v14771_v24  ;;  %vm17118_vm3 = vcmp.eq.s32.totalorder %v17117_v39, 1 }
 0xe30   : > { %v14773_v55 = vpop.f32.mrf.mxu1 }
 0xe31   : > { %17087 = vst [vmem:[#allocation79_spill] sm:$0xff] %v14773_v55 }
 0xe32   : > { %v14775_v31 = vpop.f32.mrf.mxu1 }
 0xe33   : > { %17088 = vst [vmem:[#allocation80_spill] sm:$0xff] %v14775_v31  ;;  %v17109_v31 = vld [vmem:[#allocation12_spill] sm:$0xff] }
 0xe34   : > { %v14781_v45 = vpop.f32.mrf.mxu1  ;;  %vm17110_vm15 = vcmp.gt.s32.totalorder %v16844_v15, %v17109_v31  ;;  %v17115_v31 = vld [vmem:[#allocation9_spill] sm:$0xff] }
 0xe35   : > { %17091 = vst [vmem:[#allocation71_spill] sm:$0xff] %v14781_v45  ;;  %vm17116_vm2 = vcmp.gt.s32.totalorder %v16844_v15, %v17115_v31  ;;  %v17125_v31 = vld [vmem:[#allocation168_spill] sm:$0xff] }
 0xe36   : > { %v14789_v54 = vpop.f32.mrf.mxu1  ;;  %vm17126_vm10 = vcmp.eq.s32.totalorder %v17125_v31, 1 }
 0xe37   : > { %17094 = vst [vmem:[#allocation72_spill] sm:$0xff] %v14789_v54 }
 0xe38   : > { %v14793_v19 = vpop.f32.mrf.mxu1 }
 0xe39   : > { %17095 = vst [vmem:[#allocation82_spill] sm:$0xff] %v14793_v19 }
 0xe4e   : > { %v6591_v0 = vpop.permute.xlu0 %6590 }
 0xe4f   : > { %v14779_v52 = vsel %vm17090_vm9, %v6591_v0, %v6544_v18  ;;  %v14796_v18 = vpop.f32.mrf.mxu1 }
 0xe50   : > { %6670 = vrot.lane.b32.xlu0 %v14779_v52, %s9666_s13  ;;  %17096 = vst [vmem:[#allocation188_spill] sm:$0xff] %v14796_v18  ;;  %v17107_v18 = vld [vmem:[#allocation164_spill] sm:$0xff] }
 0xe51   : > { %v14799_v11 = vpop.f32.mrf.mxu1  ;;  %vm17108_vm13 = vcmp.eq.s32.totalorder %v17107_v18, 1  ;;  %v17113_v18 = vld [vmem:[#allocation165_spill] sm:$0xff] }
 0xe52   : > { %v6587_v32 = vpop.permute.xlu0 %6586  ;;  %17097 = vst [vmem:[#allocation157_spill] sm:$0xff] %v14799_v11  ;;  %vm17114_vm1 = vcmp.eq.s32.totalorder %v17113_v18, 1 }
 0xe53   : > { %v14787_v34 = vsel %vm17093_vm14, %v6587_v32, %v6542_v13  ;;  %v14801_v12 = vpop.f32.mrf.mxu1  ;;  %v6589_v32 = vpop.permute.xlu1 %6588 }
 0xe54   : > { %6666 = vrot.lane.b32.xlu0 %v14787_v34, %s9666_s13  ;;  %17098 = vst [vmem:[#allocation189_spill] sm:$0xff] %v14801_v12 }
 0xe55   : > { %v14803_v13 = vpop.f32.mrf.mxu1 }
 0xe56   : > { %17099 = vst [vmem:[#allocation191_spill] sm:$0xff] %v14803_v13  ;;  %v7104_v12 = vpop.permute.xlu0 %7103 }
 0xe57   : > { %v14805_v58 = vpop.f32.mrf.mxu1 }
 0xe58   : > { %7099 = vrot.lane.b32.xlu0 %v9320_v25, %s9667_s17  ;;  %17100 = vst [vmem:[#allocation193_spill] sm:$0xff] %v14805_v58 }
 0xe59   : > { %v14807_v33 = vpop.f32.mrf.mxu1 }
 0xe5a   : > { %17101 = vst [vmem:[#allocation194_spill] sm:$0xff] %v14807_v33  ;;  %v17105_v33 = vld [vmem:[#allocation153_spill] sm:$0xff] }
 0xe5b   : > { %v14809_v46 = vpop.f32.mrf.mxu1  ;;  %vm17106_vm12 = vcmp.eq.s32.totalorder %v17105_v33, 1 }
 0xe5c   : > { %7095 = vrot.lane.b32.xlu0 %v9321_v7, %s9667_s17  ;;  %17102 = vst [vmem:[#allocation196_spill] sm:$0xff] %v14809_v46  ;;  %v17103_v7 = vld [vmem:[#allocation152_spill] sm:$0xff]  ;;  %v14825_v46 = vsel %vm17106_vm12, %v6589_v32, %v14674_v42 }
 0xe5d   : > { %v8975_v0 = vpop.f32.mrf.mxu1  ;;  %vm17104_vm8 = vcmp.eq.s32.totalorder %v17103_v7, 1  ;;  %v9323_v32 = vld [vmem:[#allocation4 + $0x18] sm:$0xff]  }
 0xe5f   : > { %v6820_v47 = vpop.f32.mrf.mxu1 }
 0xe61   : > { %v8976_v56 = vpop.f32.mrf.mxu1 }
 0xe63   : > { %v14811_v19 = vpop.f32.mrf.mxu1 }
 0xe65   : > { %v14820_v58 = vpop.f32.mrf.mxu1 }
 0xe7f   : > { %v6593_v25 = vpop.permute.xlu1 %6592 }
 0xe80   : > { %v14816_v11 = vsel %vm17104_vm8, %v6593_v25, %v14688_v10  ;;  %v9322_v10 = vld [vmem:[#allocation4 + $0x28] sm:$0xff]   ;;  %v6836_v25 = vpop.f32.mrf.mxu1 }
 0xe81   : > { %6672 = vrot.lane.b32.xlu1 %v14816_v11, %s9666_s13 }
 0xe82   : > { %v8980_v54 = vpop.f32.mrf.mxu1 }
 0xe83   : > { %v7106_v13 = vpop.permute.xlu1 %7105 }
 0xe84   : > { %8989 = vmatprep.subr.bf16.mxu0 %v7106_v13 }
 0xe85   : > { %6668 = vrot.lane.b32.xlu1 %v14825_v46, %s9666_s13  ;;  %8990 = vmatpush3.bf16.msra.mxu0 %v7106_v13 }
 0xe86   : > { %8991 = vmatprep.subr.bf16.mxu0 %v7104_v12 }
 0xe87   : > { %v6647_v7 = vpop.permute.xlu0 %6646 }
 0xe88   : > { %v6692_v45 = vsel %vm17108_vm13, %v6647_v7, %v14695_v29 }
 0xe89   : > { %7101 = vrot.lane.b32.xlu1 %v9322_v10, %s9667_s17  ;;  %8992 = vmatpush3.bf16.msra.mxu0 %v7104_v12  ;;  %v6829_v33 = vadd.f32 %v8975_v0, %v6692_v45  ;;  %v9324_v0 = vld [vmem:[#allocation4 + $0x8] sm:$0xff]   ;;  %v6839_v10 = vpop.f32.mrf.mxu1 }
 0xe8b   : > { %v6649_v42 = vpop.permute.xlu1 %6648  ;;  %v6643_v55 = vpop.permute.xlu0 %6642  ;;  %v14836_v13 = vsel %vm17110_vm15, -1e+09, %v6829_v33 }
 0xe8c   : > { %v6693_v24 = vsel %vm17112_vm0, %v6649_v42, %v14701_v41  ;;  %v6690_v29 = vsel %vm17114_vm1, %v6643_v55, %v14705_v22  ;;  %6903 = vmax.xlane.f32.xlu0 %v14836_v13  ;;  %v8983_v22 = vpop.f32.mrf.mxu1 }
 0xe8d   : > { %7097 = vrot.lane.b32.xlu1 %v9323_v32, %s9667_s17  ;;  %v6821_v45 = vadd.f32 %v6820_v47, %v6690_v29  ;;  %v6832_v7 = vadd.f32 %v8976_v56, %v6693_v24  ;;  %v17119_v47 = vld [vmem:[#allocation10_spill] sm:$0xff] }
 0xe8e   : > { %vm17120_vm4 = vcmp.gt.s32.totalorder %v16844_v15, %v17119_v47  ;;  %v6852_v18 = vpop.f32.mrf.mxu1 }
 0xe8f   : > { %v6645_v12 = vpop.permute.xlu1 %6644  ;;  %v14849_v33 = vsel %vm17116_vm2, -1e+09, %v6821_v45  ;;  %v14859_v42 = vsel %vm17120_vm4, -1e+09, %v6832_v7 }
 0xe90   : > { %6899 = vmax.xlane.f32.xlu0 %v14849_v33  ;;  %v8984_v7 = vpop.f32.mrf.mxu1 }
 0xe91   : > { %7093 = vrot.lane.b32.xlu1 %v9324_v0, %s9667_s17  ;;  %v17123_v0 = vld [vmem:[#allocation18_spill] sm:$0xff] }
 0xe92   : > { %vm17124_vm7 = vcmp.gt.s32.totalorder %v16844_v15, %v17123_v0 }
 0xe93   : > { %v6657_v41 = vpop.permute.xlu1 %6656 }
 0xe94   : > { %v6697_v55 = vsel %vm17118_vm3, %v6657_v41, %v14725_v36  ;;  %6905 = vmax.xlane.f32.xlu0 %v14859_v42 }
 0xe95   : > { %v6848_v24 = vadd.f32 %v8980_v54, %v6697_v55  ;;  %v17129_v55 = vld [vmem:[#allocation59_spill] sm:$0xff] }
 0xe96   : > { %vm17130_vm9 = vcmp.eq.s32.totalorder %v17129_v55, 1 }
 0xe97   : > { %v6653_v56 = vpop.permute.xlu1 %6652  ;;  %v14865_v32 = vsel %vm17121_vm5, -1e+09, %v6848_v24 }
 0xe98   : > { %v6695_v29 = vsel %vm17122_vm6, %v6653_v56, %v14737_v49  ;;  %6913 = vmax.xlane.f32.xlu0 %v14865_v32  ;;  %v17131_v56 = vld [vmem:[#allocation23_spill] sm:$0xff] }
 0xe99   : > { %v6840_v36 = vadd.f32 %v6839_v10, %v6695_v29  ;;  %v6855_v10 = vpop.f32.mrf.mxu1  ;;  %vm17132_vm14 = vcmp.gt.s32.totalorder %v16844_v15, %v17131_v56  ;;  %v6655_v29 = vpop.permute.xlu0 %6654  ;;  %v17145_v56 = vld [vmem:[#allocation19_spill] sm:$0xff] }
 0xe9a   : > { %vm17146_vm2 = vcmp.gt.s32.totalorder %v16844_v15, %v17145_v56 }
 0xe9b   : > { %v6665_v45 = vpop.permute.xlu1 %6664  ;;  %v14874_v54 = vsel %vm17124_vm7, -1e+09, %v6840_v36  ;;  %v17133_v36 = vld [vmem:[#allocation156_spill] sm:$0xff]  ;;  %vm17155_vm7 = vcmp.eq.s32.totalorder %v16909_v26, 1  ;;  %v17160_v26 = vld [vmem:[#allocation174_spill] sm:$0xff] }
 0xe9c   : > { %v6701_v21 = vsel %vm17126_vm10, %v6665_v45, %v14749_v6  ;;  %6909 = vmax.xlane.f32.xlu0 %v14874_v54  ;;  %vm17134_vm8 = vcmp.eq.s32.totalorder %v17133_v36, 1  ;;  %vm17156_vm10 = vcmp.gt.s32.totalorder %v16844_v15, %v16912_v57  ;;  %v17161_v57 = vld [vmem:[#allocation175_spill] sm:$0xff] }
 0xe9d   : > { %v6864_v41 = vadd.f32 %v8984_v7, %v6701_v21  ;;  %v6691_v45 = vsel %vm17134_vm8, %v6645_v12, %v14713_v38  ;;  %v6651_v0 = vpop.permute.xlu0 %6650  ;;  %vm17166_vm8 = vcmp.eq.s32.totalorder %v16919_v60, 1 }
 0xe9e   : > { %v6824_v7 = vadd.f32 %v14811_v19, %v6691_v45  ;;  %v17141_v19 = vld [vmem:[#allocation17_spill] sm:$0xff]  ;;  %v17149_v45 = vld [vmem:[#allocation22_spill] sm:$0xff] }
 0xe9f   : > { %v6661_v39 = vpop.permute.xlu1 %6660  ;;  %v14883_v49 = vsel %vm17128_vm11, -1e+09, %v6864_v41  ;;  %vm17142_vm0 = vcmp.gt.s32.totalorder %v16844_v15, %v17141_v19  ;;  %vm17150_vm4 = vcmp.gt.s32.totalorder %v16844_v15, %v17149_v45  ;;  %vm17157_vm11 = vcmp.gt.s32.totalorder %v16844_v15, %v16917_v20  ;;  %v17159_v19 = vld [vmem:[#allocation172_spill] sm:$0xff]  ;;  %v17173_v45 = vld [vmem:[#allocation77_spill] sm:$0xff] }
 0xea0   : > { %v6699_v47 = vsel %vm17130_vm9, %v6661_v39, %v14761_v17  ;;  %6921 = vmax.xlane.f32.xlu0 %v14883_v49  ;;  %v17135_v17 = vld [vmem:[#allocation53_spill] sm:$0xff]  ;;  %v17137_v39 = vld [vmem:[#allocation11_spill] sm:$0xff]  ;;  %v17162_v20 = vld [vmem:[#allocation16_spill] sm:$0xff]  ;;  %vm17163_vm9 = vcmp.eq.s32.totalorder %v16914_v9, 1 }
 0xea1   : > { %v6856_v24 = vadd.f32 %v6855_v10, %v6699_v47  ;;  %vm17136_vm12 = vcmp.eq.s32.totalorder %v17135_v17, 1  ;;  %v6663_v41 = vpop.permute.xlu0 %6662  ;;  %vm17138_vm13 = vcmp.gt.s32.totalorder %v16844_v15, %v17137_v39  ;;  %v17139_v10 = vld [vmem:[#allocation166_spill] sm:$0xff] }
 0xea2   : > { %v6696_v31 = vsel %vm17136_vm12, %v6655_v29, %v14717_v43  ;;  %v14906_v5 = vsel %vm17138_vm13, -1e+09, %v6824_v7  ;;  %vm17140_vm15 = vcmp.eq.s32.totalorder %v17139_v10, 1  ;;  %v17143_v43 = vld [vmem:[#allocation57_spill] sm:$0xff]  ;;  %vm17167_vm12 = vcmp.gt.s32.totalorder %v16844_v15, %v16924_v62 }
 0xea3   : > { %v14892_v6 = vsel %vm17132_vm14, -1e+09, %v6856_v24  ;;  %v6845_v21 = vadd.f32 %v14820_v58, %v6696_v31  ;;  %v6694_v55 = vsel %vm17140_vm15, %v6651_v0, %v14729_v48  ;;  %vm17144_vm1 = vcmp.eq.s32.totalorder %v17143_v43, 1  ;;  %v8987_v0 = vpop.f32.mrf.mxu1  ;;  %v17151_v7 = vld [vmem:[#allocation61_spill] sm:$0xff] }
 0xea4   : > { %6917 = vmax.xlane.f32.xlu0 %v14892_v6  ;;  %v6837_v38 = vadd.f32 %v6836_v25, %v6694_v55  ;;  %v6700_v58 = vsel %vm17144_vm1, %v6663_v41, %v14741_v61  ;;  %v17147_v25 = vld [vmem:[#allocation58_spill] sm:$0xff]  ;;  %vm17152_vm5 = vcmp.eq.s32.totalorder %v17151_v7, 1  ;;  %vm17165_vm14 = vcmp.gt.s32.totalorder %v16844_v15, %v16922_v40  ;;  %v9325_v62 = vld [vmem:[#allocation4] sm:$0xff]  }
 0xea5   : > { %v14915_v12 = vsel %vm17142_vm0, -1e+09, %v6845_v21  ;;  %v6659_v47 = vpop.permute.xlu0 %6658  ;;  %v6861_v24 = vadd.f32 %v8983_v22, %v6700_v58  ;;  %vm17148_vm3 = vcmp.eq.s32.totalorder %v17147_v25, 1  ;;  %v17153_v21 = vld [vmem:[#allocation25_spill] sm:$0xff]  ;;  %v6868_v41 = vpop.f32.mrf.mxu1  ;;  %v17169_v25 = vld [vmem:[#allocation179_spill] sm:$0xff]  ;;  %vm2824_vm13 = vcmask 257024  }
 0xea6   : > { %v14924_v48 = vsel %vm17146_vm2, -1e+09, %v6837_v38  ;;  %v6698_v29 = vsel %vm17148_vm3, %v6659_v47, %v14753_v44  ;;  %vm17154_vm6 = vcmp.gt.s32.totalorder %v16844_v15, %v17153_v21  ;;  %v17158_v38 = vld [vmem:[#allocation51_spill] sm:$0xff]  ;;  %v17177_v7 = vld [vmem:[#allocation141_spill] sm:$0xff]  ;;  %vm4324_vm15 = vcmask 519424  }
 0xea7   : > { %v6853_v36 = vadd.f32 %v6852_v18, %v6698_v29  ;;  %v14933_v61 = vsel %vm17150_vm4, -1e+09, %v6861_v24  ;;  %v8988_v43 = vpop.f32.mrf.mxu1  ;;  %v17171_v29 = vld [vmem:[#allocation63_spill] sm:$0xff]  ;;  %vm5824_vm0 = vcmask 781824   ;;  %vm7324_vm1 = vcmask 1044224  }
 0xea9   : > { %v14942_v44 = vsel %vm17154_vm6, -1e+09, %v6853_v36  ;;  %v17172_v36 = vld [vmem:[#allocation68_spill] sm:$0xff] }
 0xeb5   : > { %6901 = vmax.xlane.f32.xlu1 %v14906_v5 }
 0xeb9   : > { %6911 = vmax.xlane.f32.xlu1 %v14915_v12 }
 0xebd   : > { %6907 = vmax.xlane.f32.xlu1 %v14924_v48 }
 0xec1   : > { %6919 = vmax.xlane.f32.xlu1 %v14933_v61 }
 0xec2   : > { %v6671_v22 = vpop.permute.xlu0 %6670 }
 0xec3   : > { %v6704_v17 = vsel %vm17152_vm5, %v6671_v22, %v14779_v52  ;;  %v17174_v22 = vld [vmem:[#allocation108_spill] sm:$0xff] }
 0xec4   : > { %v6877_v31 = vadd.f32 %v8987_v0, %v6704_v17  ;;  %v17175_v0 = vld [vmem:[#allocation155_spill] sm:$0xff] }
 0xec5   : > { %6915 = vmax.xlane.f32.xlu1 %v14942_v44  ;;  %v17178_v17 = vld [vmem:[#allocation171_spill] sm:$0xff] }
 0xec6   : > { %v6667_v18 = vpop.permute.xlu0 %6666  ;;  %v14951_v55 = vsel %vm17156_vm10, -1e+09, %v6877_v31  ;;  %v17179_v31 = vld [vmem:[#allocation52_spill] sm:$0xff] }
 0xec7   : > { %v6702_v39 = vsel %vm17155_vm7, %v6667_v18, %v14787_v34 }
 0xec8   : > { %v6869_v10 = vadd.f32 %v6868_v41, %v6702_v39 }
 0xec9   : > { %6927 = vmax.xlane.f32.xlu1 %v14951_v55 }
 0xeca   : > { %v14957_v52 = vsel %vm17157_vm11, -1e+09, %v6869_v10  ;;  %v7100_v40 = vpop.permute.xlu0 %7099 }
 0xecd   : > { %6923 = vmax.xlane.f32.xlu1 %v14957_v52 }
 0xed1   : > { %3979 = vadd.xlane.f32.xlu1 %v17158_v38 }
 0xed5   : > { %3983 = vadd.xlane.f32.xlu1 %v17159_v19  ;;  %v17180_v19 = vld [vmem:[#allocation173_spill] sm:$0xff] }
 0xed9   : > { %5479 = vadd.xlane.f32.xlu1 %v14420_v37  ;;  %v17164_v37 = vld [vmem:[#allocation15_spill] sm:$0xff] }
 0xedd   : > { %5483 = vadd.xlane.f32.xlu1 %v14426_v23 }
 0xee1   : > { %3987 = vadd.xlane.f32.xlu1 %v17160_v26 }
 0xee5   : > { %3991 = vadd.xlane.f32.xlu1 %v17161_v57  ;;  %v17181_v57 = vld [vmem:[#allocation176_spill] sm:$0xff] }
 0xee9   : > { %5487 = vadd.xlane.f32.xlu1 %v14463_v27  ;;  %v6871_v27 = vpop.f32.mrf.mxu1 }
 0xeed   : > { %5491 = vadd.xlane.f32.xlu1 %v14480_v50 }
 0xef1   : > { %3995 = vadd.xlane.f32.xlu1 %v17162_v20 }
 0xef3   : > { %v6673_v34 = vpop.permute.xlu1 %6672 }
 0xef4   : > { %v6705_v58 = vsel %vm17163_vm9, %v6673_v34, %v14816_v11  ;;  %v17182_v34 = vld [vmem:[#allocation14_spill] sm:$0xff] }
 0xef5   : > { %v6880_v47 = vadd.f32 %v8988_v43, %v6705_v58  ;;  %3999 = vadd.xlane.f32.xlu1 %v17164_v37 }
 0xef7   : > { %v6669_v23 = vpop.permute.xlu1 %6668  ;;  %v14976_v24 = vsel %vm17165_vm14, -1e+09, %v6880_v47  ;;  %v17183_v47 = vld [vmem:[#allocation13_spill] sm:$0xff] }
 0xef8   : > { %v6703_v50 = vsel %vm17166_vm8, %v6669_v23, %v14825_v46  ;;  %6929 = vmax.xlane.f32.xlu0 %v14976_v24  ;;  %v17168_v46 = vld [vmem:[#allocation177_spill] sm:$0xff]  ;;  %v17184_v23 = vld [vmem:[#allocation178_spill] sm:$0xff] }
 0xef9   : > { %v6872_v56 = vadd.f32 %v6871_v27, %v6703_v50  ;;  %5495 = vadd.xlane.f32.xlu1 %v14490_v30  ;;  %v7096_v30 = vpop.permute.xlu0 %7095 }
 0xefb   : > { %v7102_v9 = vpop.permute.xlu1 %7101  ;;  %v14986_v11 = vsel %vm17167_vm12, -1e+09, %v6872_v56  ;;  %v17185_v56 = vld [vmem:[#allocation180_spill] sm:$0xff] }
 0xefc   : > { %8993 = vmatprep.subr.bf16.mxu0 %v7102_v9  ;;  %6925 = vmax.xlane.f32.xlu0 %v14986_v11 }
 0xefd   : > { %8994 = vmatpush3.bf16.msra.mxu0 %v7102_v9  ;;  %5499 = vadd.xlane.f32.xlu1 %v14496_v8  ;;  %v17170_v8 = vld [vmem:[#allocation67_spill] sm:$0xff] }
 0xefe   : > { %8995 = vmatprep.subr.bf16.mxu0 %v7100_v40 }
 0xeff   : > { %v7098_v60 = vpop.permute.xlu1 %7097 }
 0xf01   : > { %4003 = vadd.xlane.f32.xlu1 %v17168_v46  ;;  %8996 = vmatpush3.bf16.msra.mxu0 %v7100_v40  ;;  %v17186_v46 = vld [vmem:[#allocation36_spill] sm:$0xff] }
 0xf02   : > { %8997 = vmatprep.subr.bf16.mxu0 %v7098_v60 }
 0xf03   : > { %v7094_v15 = vpop.permute.xlu1 %7093 }
 0xf05   : > { %4007 = vadd.xlane.f32.xlu1 %v17169_v25  ;;  %8998 = vmatpush3.bf16.msra.mxu0 %v7098_v60 }
 0xf06   : > { %8999 = vmatprep.subr.bf16.mxu0 %v7096_v30 }
 0xf09   : > { %5503 = vadd.xlane.f32.xlu1 %v14552_v2  ;;  %9000 = vmatpush3.bf16.msra.mxu0 %v7096_v30  ;;  %v17176_v2 = vld [vmem:[#allocation124_spill] sm:$0xff] }
 0xf0a   : > { %9001 = vmatprep.subr.bf16.mxu0 %v7094_v15 }
 0xf0d   : > { %5507 = vadd.xlane.f32.xlu1 %v14566_v28  ;;  %9002 = vmatpush3.bf16.msra.mxu0 %v7094_v15  ;;  %v17187_v15 = vld [vmem:[#allocation34_spill] sm:$0xff] }
 0xf11   : > { %2527 = vadd.xlane.f32.xlu1 %v17170_v8 }
 0xf12   : > { %7091 = vrot.lane.b32.xlu0 %v9325_v62, %s9667_s17 }
 0xf15   : > { %2531 = vadd.xlane.f32.xlu1 %v17171_v29  ;;  %v15003_v28 = vpop.xlane.xlu0 %6903 }
 0xf19   : > { %2535 = vadd.xlane.f32.xlu1 %v17172_v36  ;;  %v6900_v21 = vpop.xlane.xlu0 %6899 }
 0xf1a   : > { %v6931_v18 = vsub.f32 %v14849_v33, %v6900_v21 }
 0xf1c   : > { %v6947_v41 = vmul.f32 1.442695, %v6931_v18 }
 0xf1d   : > { %2539 = vadd.xlane.f32.xlu1 %v17173_v45  ;;  %v6906_v50 = vpop.xlane.xlu0 %6905  ;;  %v17188_v45 = vld [vmem:[#allocation62_spill] sm:$0xff] }
 0xf1e   : > { %9438 = vpow2.f32 %v6947_v41  ;;  %v17190_v41 = vld [vmem:[#allocation66_spill] sm:$0xff] }
 0xf21   : > { %2543 = vadd.xlane.f32.xlu1 %v17174_v22  ;;  %v6914_v60 = vpop.xlane.xlu0 %6913  ;;  %v6934_v22 = vsub.f32 %v14859_v42, %v6906_v50 }
 0xf23   : > { %v6953_v21 = vmul.f32 1.442695, %v6934_v22 }
 0xf25   : > { %2547 = vadd.xlane.f32.xlu1 %v17175_v0  ;;  %v6910_v36 = vpop.xlane.xlu0 %6909 }
 0xf29   : > { %2551 = vadd.xlane.f32.xlu1 %v17176_v2  ;;  %v17189_v2 = vld [vmem:[#allocation64_spill] sm:$0xff] }
 0xf2b   : > { %v15019_v33 = vpop.eup %9438 }
 0xf2d   : > { %2555 = vadd.xlane.f32.xlu1 %v17177_v7  ;;  %v6922_v7 = vpop.xlane.xlu0 %6921 }
 0xf31   : > { %3981 = vadd.xlane.f32.xlu0 %v17178_v17 }
 0xf35   : > { %3985 = vadd.xlane.f32.xlu0 %v17179_v31  ;;  %v6936_v31 = vsub.f32 %v14874_v54, %v6910_v36  ;;  %v6938_v54 = vsub.f32 %v14865_v32, %v6914_v60  ;;  %v17193_v32 = vld [vmem:[#allocation131_spill] sm:$0xff] }
 0xf37   : > { %v6957_v42 = vmul.f32 1.442695, %v6936_v31 }
 0xf39   : > { %5481 = vadd.xlane.f32.xlu0 %v14424_v53 }
 0xf3d   : > { %5485 = vadd.xlane.f32.xlu0 %v14422_v14 }
 0xf3e   : > { %v6902_v39 = vpop.xlane.xlu1 %6901 }
 0xf3f   : > { %v6932_v10 = vsub.f32 %v14906_v5, %v6902_v39 }
 0xf41   : > { %v6949_v38 = vmul.f32 1.442695, %v6932_v10  ;;  %3989 = vadd.xlane.f32.xlu0 %v17180_v19 }
 0xf42   : > { %v15012_v26 = vpop.xlane.xlu1 %6911 }
 0xf43   : > { %9440 = vpow2.f32 %v6949_v38  ;;  %v6937_v38 = vsub.f32 %v14915_v12, %v15012_v26 }
 0xf45   : > { %3993 = vadd.xlane.f32.xlu0 %v17181_v57 }
 0xf46   : > { %v6908_v20 = vpop.xlane.xlu1 %6907 }
 0xf47   : > { %v6935_v0 = vsub.f32 %v14924_v48, %v6908_v20  ;;  %v6918_v48 = vpop.xlane.xlu0 %6917  ;;  %v6959_v20 = vmul.f32 1.442695, %v6937_v38 }
 0xf48   : > { %v6940_v57 = vsub.f32 %v14892_v6, %v6918_v48  ;;  %v6942_v6 = vsub.f32 %v14883_v49, %v6922_v7 }
 0xf49   : > { %5489 = vadd.xlane.f32.xlu0 %v14476_v51  ;;  %v6955_v18 = vmul.f32 1.442695, %v6935_v0 }
 0xf4a   : > { %v15016_v53 = vpop.xlane.xlu1 %6919  ;;  %v6965_v26 = vmul.f32 1.442695, %v6940_v57 }
 0xf4d   : > { %5493 = vadd.xlane.f32.xlu0 %v14472_v16 }
 0xf4e   : > { %v6916_v14 = vpop.xlane.xlu1 %6915 }
 0xf50   : > { %v15021_v5 = vpop.eup %9440 }
 0xf51   : > { %3997 = vadd.xlane.f32.xlu0 %v17182_v34  ;;  %v7027_v43 = vpack.c.bf16 %v15021_v5, %v15019_v33 }
 0xf52   : > { %v15026_v58 = vpop.xlane.xlu1 %6927 }
 0xf53   : > { %9005 = vmatprep.mubr.bf16.mxu0 %v7027_v43  ;;  %v17192_v43 = vld [vmem:[#allocation122_spill] sm:$0xff] }
 0xf55   : > { %4001 = vadd.xlane.f32.xlu0 %v17183_v47 }
 0xf56   : > { %v15029_v51 = vpop.xlane.xlu1 %6923 }
 0xf57   : > { %v6943_v50 = vsub.f32 %v14957_v52, %v15029_v51 }
 0xf59   : > { %5497 = vadd.xlane.f32.xlu0 %v14494_v63 }
 0xf5a   : > { %v3980_v16 = vpop.xlane.xlu1 %3979 }
 0xf5b   : > { %9442 = vrcp.f32 %v3980_v16  ;;  %v6961_v16 = vmul.f32 1.442695, %v6938_v54 }
 0xf5d   : > { %5501 = vadd.xlane.f32.xlu0 %v14492_v4 }
 0xf5e   : > { %v3984_v37 = vpop.xlane.xlu1 %3983 }
 0xf5f   : > { %9444 = vrcp.f32 %v3984_v37 }
 0xf60   : > { %9446 = vpow2.f32 %v6953_v21 }
 0xf61   : > { %4005 = vadd.xlane.f32.xlu0 %v17184_v23  ;;  %9448 = vpow2.f32 %v6955_v18 }
 0xf62   : > { %v15034_v27 = vpop.xlane.xlu1 %5479 }
 0xf65   : > { %4009 = vadd.xlane.f32.xlu0 %v17185_v56 }
 0xf66   : > { %v15037_v9 = vpop.xlane.xlu1 %5483 }
 0xf68   : > { %v9443_v40 = vpop.eup %9442 }
 0xf69   : > { %5505 = vadd.xlane.f32.xlu0 %v14562_v59  ;;  %v4212_v30 = vmul.f32 %v9443_v40, %v17186_v46 }
 0xf6a   : > { %v15040_v63 = vpop.xlane.xlu1 %3987 }
 0xf6b   : > { %v8095_v25 = vpack.c.bf16 %v4212_v30, %v4212_v30  ;;  %v6969_v30 = vmul.f32 1.442695, %v6942_v6 }
 0xf6c   : > { %v9445_v4 = vpop.eup %9444 }
 0xf6d   : > { %5509 = vadd.xlane.f32.xlu0 %v14554_v3  ;;  %v4214_v62 = vmul.f32 %v9445_v4, %v17187_v15  ;;  %4276 = vrot.lane.b32.xlu1 %v8095_v25, %s9667_s17  ;;  %v6933_v3 = vsub.f32 %v14836_v13, %v15003_v28  ;;  %v6939_v13 = vsub.f32 %v14942_v44, %v6916_v14  ;;  %v17191_v28 = vld [vmem:[#allocation65_spill] sm:$0xff]  ;;  %v15083_v40 = vpop.eup %9446  ;;  %v17195_v15 = vld [vmem:[#allocation111_spill] sm:$0xff] }
 0xf6e   : > { %v15046_v8 = vpop.xlane.xlu1 %3991  ;;  %v6941_v44 = vsub.f32 %v14933_v61, %v15016_v53  ;;  %v17194_v61 = vld [vmem:[#allocation110_spill] sm:$0xff]  ;;  %v15086_v46 = vpop.eup %9448 }
 0xf6f   : > { %v8097_v29 = vpack.c.bf16 %v4214_v62, %v4214_v62  ;;  %v6951_v39 = vmul.f32 1.442695, %v6933_v3  ;;  %v6963_v34 = vmul.f32 1.442695, %v6939_v13 }
 0xf70   : > { %v6967_v56 = vmul.f32 1.442695, %v6941_v44 }
 0xf71   : > { %2529 = vadd.xlane.f32.xlu0 %v17188_v45  ;;  %4280 = vrot.lane.b32.xlu1 %v8097_v29, %s9667_s17  ;;  %9450 = vpow2.f32 %v6951_v39  ;;  %v6945_v29 = vsub.f32 %v14951_v55, %v15026_v58 }
 0xf72   : > { %v15050_v59 = vpop.xlane.xlu1 %5487  ;;  %9452 = vpow2.f32 %v6957_v42 }
 0xf73   : > { %9454 = vpow2.f32 %v6959_v20 }
 0xf74   : > { %9456 = vpow2.f32 %v6963_v34 }
 0xf75   : > { %2533 = vadd.xlane.f32.xlu0 %v17189_v2  ;;  %9458 = vpow2.f32 %v6961_v16 }
 0xf76   : > { %v15057_v17 = vpop.xlane.xlu1 %5491  ;;  %9460 = vpow2.f32 %v6965_v26 }
 0xf77   : > { %9462 = vpow2.f32 %v6967_v56 }
 0xf79   : > { %2537 = vadd.xlane.f32.xlu0 %v17190_v41 }
 0xf7a   : > { %v15061_v10 = vpop.xlane.xlu1 %3995 }
 0xf7d   : > { %2541 = vadd.xlane.f32.xlu0 %v17191_v28 }
 0xf7e   : > { %v15068_v19 = vpop.xlane.xlu1 %3999  ;;  %v15090_v49 = vpop.eup %9450 }
 0xf7f   : > { %v15092_v25 = vpop.eup %9452  ;;  %v7028_v52 = vpack.c.bf16 %v15083_v40, %v15090_v49 }
 0xf80   : > { %v7029_v62 = vpack.c.bf16 %v15092_v25, %v15086_v46  ;;  %v15104_v22 = vpop.eup %9454 }
 0xf81   : > { %2545 = vadd.xlane.f32.xlu0 %v17192_v43  ;;  %v6930_v47 = vpop.xlane.xlu0 %6929  ;;  %v15106_v0 = vpop.eup %9456 }
 0xf82   : > { %v15072_v12 = vpop.xlane.xlu1 %5495  ;;  %v6946_v51 = vsub.f32 %v14976_v24, %v6930_v47  ;;  %v6975_v24 = vmul.f32 1.442695, %v6945_v29  ;;  %v15110_v3 = vpop.eup %9458  ;;  %v17196_v47 = vld [vmem:[#allocation126_spill] sm:$0xff] }
 0xf83   : > { %v15112_v7 = vpop.eup %9460  ;;  %v7030_v55 = vpack.c.bf16 %v15110_v3, %v15104_v22 }
 0xf84   : > { %v6977_v45 = vmul.f32 1.442695, %v6946_v51  ;;  %v7031_v58 = vpack.c.bf16 %v15112_v7, %v15106_v0  ;;  %v15120_v21 = vpop.eup %9462 }
 0xf85   : > { %2549 = vadd.xlane.f32.xlu0 %v17193_v32  ;;  %v6926_v14 = vpop.xlane.xlu0 %6925 }
 0xf86   : > { %v6944_v37 = vsub.f32 %v14986_v11, %v6926_v14  ;;  %v15079_v23 = vpop.xlane.xlu1 %5499  ;;  %v6971_v11 = vmul.f32 1.442695, %v6943_v50  ;;  %v17197_v14 = vld [vmem:[#allocation144_spill] sm:$0xff] }
 0xf88   : > { %v6973_v60 = vmul.f32 1.442695, %v6944_v37 }
 0xf89   : > { %2553 = vadd.xlane.f32.xlu0 %v17194_v61  ;;  %v7092_v53 = vpop.permute.xlu0 %7091 }
 0xf8a   : > { %v15088_v4 = vpop.xlane.xlu1 %4003  ;;  %9003 = vmatprep.subr.bf16.mxu0 %v7092_v53  ;;  %9464 = vpow2.f32 %v6973_v60  ;;  %v17198_v60 = vld [vmem:[#allocation139_spill] sm:$0xff] }
 0xf8b   : > { %9004 = vmatpush3.bf16.msra.mxu0 %v7092_v53  ;;  %9466 = vpow2.f32 %v6969_v30 }
 0xf8c   : > { %9468 = vpow2.f32 %v6971_v11 }
 0xf8d   : > { %2557 = vadd.xlane.f32.xlu0 %v17195_v15  ;;  %9470 = vpow2.f32 %v6977_v45  ;;  %v17200_v45 = vld [vmem:[#allocation56_spill] sm:$0xff] }
 0xf8e   : > { %v15102_v36 = vpop.xlane.xlu1 %4007  ;;  %9006 = vmatmul.mubr.bf16.vlgmr.msra.gmra.mxu0 %v7028_v52  ;;  %9472 = vpow2.f32 %v6975_v24  ;;  %v17199_v52 = vld [vmem:[#allocation134_spill] sm:$0xff] }
 0xf8f   : > { %9009 = vmatprep.mubr.bf16.mxu0 %v7029_v62 }
 0xf92   : > { %v15108_v2 = vpop.xlane.xlu1 %5503 }
 0xf96   : > { %v15118_v31 = vpop.xlane.xlu1 %5507  ;;  %9010 = vmatmul.mubr.bf16.gmra.mxu0 %v7030_v55 }
 0xf97   : > { %9013 = vmatprep.mubr.bf16.mxu0 %v7031_v58  ;;  %v15122_v18 = vpop.eup %9464 }
 0xf98   : > { %v15124_v39 = vpop.eup %9466 }
 0xf99   : > { %v15126_v42 = vpop.eup %9468  ;;  %v7032_v48 = vpack.c.bf16 %v15124_v39, %v15120_v21 }
 0xf9a   : > { %v2528_v41 = vpop.xlane.xlu1 %2527  ;;  %v7033_v38 = vpack.c.bf16 %v15122_v18, %v15126_v42  ;;  %v15132_v28 = vpop.eup %9470 }
 0xf9b   : > { %9474 = vrcp.f32 %v2528_v41  ;;  %v15134_v57 = vpop.eup %9472 }
 0xf9c   : > { %v7034_v20 = vpack.c.bf16 %v15132_v28, %v15134_v57 }
 0xf9e   : > { %v2532_v13 = vpop.xlane.xlu1 %2531  ;;  %9014 = vmatmul.mubr.bf16.gmra.mxu0 %v7032_v48  ;;  %v17201_v48 = vld [vmem:[#allocation148_spill] sm:$0xff] }
 0xf9f   : > { %9476 = vrcp.f32 %v2532_v13  ;;  %9017 = vmatprep.mubr.bf16.mxu0 %v7033_v38 }
 0xfa2   : > { %v2536_v54 = vpop.xlane.xlu1 %2535 }
 0xfa3   : > { %9478 = vrcp.f32 %v2536_v54 }
 0xfa6   : > { %v2540_v34 = vpop.xlane.xlu1 %2539  ;;  %9018 = vmatmul.mubr.bf16.gmra.mxu0 %v7034_v20 }
 0xfa7   : > { %9480 = vrcp.f32 %v2540_v34  ;;  %v17202_v34 = vld [vmem:[#allocation48_spill] sm:$0xff] }
 0xfa8   : > { %v9475_v43 = vpop.eup %9474 }
 0xfa9   : > { %v2744_v16 = vmul.f32 %v9475_v43, %v17196_v47 }
 0xfaa   : > { %v2544_v26 = vpop.xlane.xlu1 %2543 }
 0xfab   : > { %9482 = vrcp.f32 %v2544_v26  ;;  %v8079_v44 = vpack.c.bf16 %v2744_v16, %v2744_v16  ;;  %v17203_v26 = vld [vmem:[#allocation47_spill] sm:$0xff] }
 0xfac   : > { %v9477_v32 = vpop.eup %9476 }
 0xfad   : > { %2825 = vst.msk [vmem:[#allocation5] sm:$0xf] %vm2824_vm13, %v8079_v44  ;;  %v2746_v6 = vmul.f32 %v9477_v32, %v17197_v14 }
 0xfae   : > { %v2548_v37 = vpop.xlane.xlu1 %2547 }
 0xfaf   : > { %9484 = vrcp.f32 %v2548_v37  ;;  %v8081_v50 = vpack.c.bf16 %v2746_v6, %v2746_v6  ;;  %v17204_v37 = vld [vmem:[#allocation30_spill] sm:$0xff] }
 0xfb0   : > { %v9479_v56 = vpop.eup %9478 }
 0xfb1   : > { %2827 = vst.msk [vmem:[#allocation5 + $0x8] sm:$0xf] %vm2824_vm13, %v8081_v50  ;;  %v2748_v61 = vmul.f32 %v9479_v56, %v17198_v60 }
 0xfb2   : > { %v2552_v53 = vpop.xlane.xlu1 %2551 }
 0xfb3   : > { %9486 = vrcp.f32 %v2552_v53  ;;  %v8083_v30 = vpack.c.bf16 %v2748_v61, %v2748_v61 }
 0xfb4   : > { %v9481_v11 = vpop.eup %9480 }
 0xfb5   : > { %2829 = vst.msk [vmem:[#allocation5 + $0x10] sm:$0xf] %vm2824_vm13, %v8083_v30  ;;  %v2750_v51 = vmul.f32 %v9481_v11, %v17199_v52 }
 0xfb6   : > { %v2556_v15 = vpop.xlane.xlu1 %2555 }
 0xfb7   : > { %9488 = vrcp.f32 %v2556_v15  ;;  %v8085_v62 = vpack.c.bf16 %v2750_v51, %v2750_v51 }
 0xfb8   : > { %v9483_v29 = vpop.eup %9482  ;;  %9490 = vrcp.f32 %v15034_v27 }
 0xfb9   : > { %2831 = vst.msk [vmem:[#allocation5 + $0x18] sm:$0xf] %vm2824_vm13, %v8085_v62  ;;  %v2752_v24 = vmul.f32 %v9483_v29, %v17200_v45 }
 0xfba   : > { %v3982_v55 = vpop.xlane.xlu0 %3981 }
 0xfbb   : > { %9492 = vrcp.f32 %v3982_v55  ;;  %v8087_v58 = vpack.c.bf16 %v2752_v24, %v2752_v24 }
 0xfbc   : > { %v9485_v41 = vpop.eup %9484  ;;  %9494 = vrcp.f32 %v15037_v9 }
 0xfbd   : > { %2833 = vst.msk [vmem:[#allocation5 + $0x20] sm:$0xf] %vm2824_vm13, %v8087_v58  ;;  %v2754_v38 = vmul.f32 %v9485_v41, %v17201_v48 }
 0xfbe   : > { %v3986_v13 = vpop.xlane.xlu0 %3985 }
 0xfbf   : > { %9496 = vrcp.f32 %v3986_v13  ;;  %v8089_v54 = vpack.c.bf16 %v2754_v38, %v2754_v38 }
 0xfc0   : > { %v9487_v20 = vpop.eup %9486  ;;  %9498 = vrcp.f32 %v15040_v63 }
 0xfc1   : > { %2835 = vst.msk [vmem:[#allocation5 + $0x28] sm:$0xf] %vm2824_vm13, %v8089_v54  ;;  %v2756_v43 = vmul.f32 %v9487_v20, %v17202_v34 }
 0xfc2   : > { %v5482_v27 = vpop.xlane.xlu0 %5481 }
 0xfc3   : > { %9500 = vrcp.f32 %v5482_v27  ;;  %v8091_v47 = vpack.c.bf16 %v2756_v43, %v2756_v43  ;;  %v17209_v43 = vld [vmem:[#allocation39_spill] sm:$0xff] }
 0xfc4   : > { %v9489_v16 = vpop.eup %9488  ;;  %9502 = vrcp.f32 %v15046_v8  ;;  %v17205_v8 = vld [vmem:[#allocation38_spill] sm:$0xff] }
 0xfc5   : > { %2837 = vst.msk [vmem:[#allocation5 + $0x30] sm:$0xf] %vm2824_vm13, %v8091_v47  ;;  %v2758_v44 = vmul.f32 %v9489_v16, %v17203_v26  ;;  %v9491_v32 = vpop.eup %9490  ;;  %v17210_v16 = vld [vmem:[#allocation43_spill] sm:$0xff] }
 0xfc6   : > { %v5486_v9 = vpop.xlane.xlu0 %5485  ;;  %v5712_v61 = vmul.f32 %v9491_v32, %v14767_v35  ;;  %v17206_v35 = vld [vmem:[#allocation70_spill] sm:$0xff] }
 0xfc7   : > { %9504 = vrcp.f32 %v5486_v9  ;;  %v8093_v14 = vpack.c.bf16 %v2758_v44, %v2758_v44 }
 0xfc8   : > { %v9493_v6 = vpop.eup %9492  ;;  %9506 = vrcp.f32 %v15050_v59  ;;  %v8111_v51 = vpack.c.bf16 %v5712_v61, %v5712_v61 }
 0xfc9   : > { %v4213_v50 = vmul.f32 %v9493_v6, %v17204_v37  ;;  %2839 = vst.msk [vmem:[#allocation5 + $0x38] sm:$0xf] %vm2824_vm13, %v8093_v14  ;;  %v9495_v56 = vpop.eup %9494  ;;  %v17211_v6 = vld [vmem:[#allocation80_spill] sm:$0xff] }
 0xfca   : > { %v3990_v63 = vpop.xlane.xlu0 %3989  ;;  %v5714_v59 = vmul.f32 %v9495_v56, %v14765_v1  ;;  %v17208_v1 = vld [vmem:[#allocation106_spill] sm:$0xff] }
 0xfcb   : > { %9508 = vrcp.f32 %v3990_v63  ;;  %v8096_v60 = vpack.c.bf16 %v4213_v50, %v4213_v50  ;;  %v17212_v63 = vld [vmem:[#allocation37_spill] sm:$0xff] }
 0xfcc   : > { %v9497_v53 = vpop.eup %9496  ;;  %9510 = vrcp.f32 %v15057_v17  ;;  %v8113_v55 = vpack.c.bf16 %v5714_v59, %v5714_v59  ;;  %v17207_v17 = vld [vmem:[#allocation40_spill] sm:$0xff] }
 0xfcd   : > { %4278 = vrot.lane.b32.xlu0 %v8096_v60, %s9667_s17  ;;  %v4215_v30 = vmul.f32 %v9497_v53, %v17205_v8  ;;  %v9499_v52 = vpop.eup %9498  ;;  %v17213_v8 = vld [vmem:[#allocation79_spill] sm:$0xff] }
 0xfce   : > { %v3994_v11 = vpop.xlane.xlu0 %3993  ;;  %v4216_v41 = vmul.f32 %v9499_v52, %v17207_v17 }
 0xfcf   : > { %9512 = vrcp.f32 %v3994_v11  ;;  %v8098_v15 = vpack.c.bf16 %v4215_v30, %v4215_v30 }
 0xfd0   : > { %v9501_v62 = vpop.eup %9500  ;;  %v8099_v20 = vpack.c.bf16 %v4216_v41, %v4216_v41 }
 0xfd1   : > { %5776 = vrot.lane.b32.xlu0 %v8111_v51, %s9666_s13  ;;  %4282 = vrot.lane.b32.xlu1 %v8098_v15, %s9667_s17  ;;  %v5713_v29 = vmul.f32 %v9501_v62, %v17206_v35  ;;  %v9503_v24 = vpop.eup %9502  ;;  %v17214_v51 = vld [vmem:[#allocation72_spill] sm:$0xff] }
 0xfd2   : > { %v5490_v45 = vpop.xlane.xlu0 %5489  ;;  %v4218_v27 = vmul.f32 %v9503_v24, %v17209_v43  ;;  %v17215_v24 = vld [vmem:[#allocation71_spill] sm:$0xff] }
 0xfd3   : > { %9514 = vrcp.f32 %v5490_v45  ;;  %v8112_v58 = vpack.c.bf16 %v5713_v29, %v5713_v29 }
 0xfd4   : > { %v9505_v48 = vpop.eup %9504  ;;  %v8101_v32 = vpack.c.bf16 %v4218_v27, %v4218_v27  ;;  %v17216_v27 = vld [vmem:[#allocation133_spill] sm:$0xff] }
 0xfd5   : > { %5780 = vrot.lane.b32.xlu0 %v8113_v55, %s9666_s13  ;;  %5778 = vrot.lane.b32.xlu1 %v8112_v58, %s9666_s13  ;;  %v5715_v38 = vmul.f32 %v9505_v48, %v17208_v1  ;;  %v9507_v54 = vpop.eup %9506 }
 0xfd6   : > { %v5494_v13 = vpop.xlane.xlu0 %5493  ;;  %v5716_v37 = vmul.f32 %v9507_v54, %v17211_v6 }
 0xfd7   : > { %9516 = vrcp.f32 %v5494_v13  ;;  %v8114_v34 = vpack.c.bf16 %v5715_v38, %v5715_v38 }
 0xfd8   : > { %v9509_v47 = vpop.eup %9508  ;;  %v8115_v61 = vpack.c.bf16 %v5716_v37, %v5716_v37 }
 0xfd9   : > { %4284 = vrot.lane.b32.xlu0 %v8099_v20, %s9667_s17  ;;  %5782 = vrot.lane.b32.xlu1 %v8114_v34, %s9666_s13  ;;  %v4217_v26 = vmul.f32 %v9509_v47, %v17210_v16  ;;  %v9511_v9 = vpop.eup %9510 }
 0xfda   : > { %v15176_v44 = vpop.xlane.xlu0 %3997  ;;  %v5718_v30 = vmul.f32 %v9511_v9, %v17213_v8  ;;  %v17220_v8 = vld [vmem:[#allocation46_spill] sm:$0xff] }
 0xfdb   : > { %v8100_v14 = vpack.c.bf16 %v4217_v26, %v4217_v26 }
 0xfdc   : > { %v9513_v50 = vpop.eup %9512  ;;  %v8117_v62 = vpack.c.bf16 %v5718_v30, %v5718_v30 }
 0xfdd   : > { %4288 = vrot.lane.b32.xlu0 %v8101_v32, %s9667_s17  ;;  %4286 = vrot.lane.b32.xlu1 %v8100_v14, %s9667_s17  ;;  %v4219_v56 = vmul.f32 %v9513_v50, %v17212_v63  ;;  %v17217_v32 = vld [vmem:[#allocation121_spill] sm:$0xff] }
 0xfde   : > { %v15182_v60 = vpop.xlane.xlu0 %4001 }
 0xfdf   : > { %v8102_v53 = vpack.c.bf16 %v4219_v56, %v4219_v56  ;;  %v4277_v52 = vpop.permute.xlu1 %4276  ;;  %v17219_v56 = vld [vmem:[#allocation146_spill] sm:$0xff] }
 0xfe0   : > { %v9515_v11 = vpop.eup %9514  ;;  %4325 = vst.msk [vmem:[#allocation5] sm:$0xf] %vm4324_vm15, %v4277_v52 }
 0xfe1   : > { %5784 = vrot.lane.b32.xlu0 %v8115_v61, %s9666_s13  ;;  %4290 = vrot.lane.b32.xlu1 %v8102_v53, %s9667_s17  ;;  %v5717_v15 = vmul.f32 %v9515_v11, %v17214_v51 }
 0xfe2   : > { %v15189_v59 = vpop.xlane.xlu0 %5497 }
 0xfe3   : > { %v8116_v35 = vpack.c.bf16 %v5717_v15, %v5717_v15  ;;  %v4281_v45 = vpop.permute.xlu1 %4280 }
 0xfe4   : > { %v9517_v29 = vpop.eup %9516  ;;  %4327 = vst.msk [vmem:[#allocation5 + $0x8] sm:$0xf] %vm4324_vm15, %v4281_v45 }
 0xfe5   : > { %5788 = vrot.lane.b32.xlu0 %v8117_v62, %s9666_s13  ;;  %5786 = vrot.lane.b32.xlu1 %v8116_v35, %s9666_s13  ;;  %v5719_v55 = vmul.f32 %v9517_v29, %v17215_v24  ;;  %v17223_v62 = vld [vmem:[#allocation49_spill] sm:$0xff]  ;;  %v17225_v35 = vld [vmem:[#allocation44_spill] sm:$0xff] }
 0xfe6   : > { %v15195_v58 = vpop.xlane.xlu0 %5501 }
 0xfe7   : > { %v8118_v17 = vpack.c.bf16 %v5719_v55, %v5719_v55 }
 0xfe9   : > { %5790 = vrot.lane.b32.xlu1 %v8118_v17, %s9666_s13  ;;  %v17228_v17 = vld [vmem:[#allocation41_spill] sm:$0xff] }
 0xfea   : > { %v15198_v41 = vpop.xlane.xlu0 %4005 }
 0xfee   : > { %v15200_v48 = vpop.xlane.xlu0 %4009 }
 0xff2   : > { %v15202_v1 = vpop.xlane.xlu0 %5505 }
 0xff6   : > { %v15204_v38 = vpop.xlane.xlu0 %5509 }
 0xffa   : > { %v2530_v13 = vpop.xlane.xlu0 %2529 }
 0xffb   : > { %9518 = vrcp.f32 %v2530_v13 }
 0xffe   : > { %v2534_v54 = vpop.xlane.xlu0 %2533 }
 0xfff   : > { %9520 = vrcp.f32 %v2534_v54 }
0x1002   : > { %v2538_v20 = vpop.xlane.xlu0 %2537 }
0x1003   : > { %9522 = vrcp.f32 %v2538_v20 }
0x1004   : > { %6985 = vadd.xlane.f32.xlu0 %v15083_v40 }
0x1006   : > { %v2542_v34 = vpop.xlane.xlu0 %2541 }
0x1007   : > { %9524 = vrcp.f32 %v2542_v34 }
0x1008   : > { %v9519_v43 = vpop.eup %9518  ;;  %6981 = vadd.xlane.f32.xlu0 %v15021_v5  ;;  %v17218_v5 = vld [vmem:[#allocation55_spill] sm:$0xff] }
0x1009   : > { %v2745_v47 = vmul.f32 %v9519_v43, %v17216_v27  ;;  %v17230_v27 = vld [vmem:[#allocation189_spill] sm:$0xff] }
0x100a   : > { %v2546_v16 = vpop.xlane.xlu0 %2545 }
0x100b   : > { %9526 = vrcp.f32 %v2546_v16  ;;  %v8080_v26 = vpack.c.bf16 %v2745_v47, %v2745_v47 }
0x100c   : > { %v9521_v9 = vpop.eup %9520  ;;  %6993 = vadd.xlane.f32.xlu0 %v15110_v3 }
0x100d   : > { %6983 = vadd.xlane.f32.xlu1 %v15090_v49  ;;  %2826 = vst.msk [vmem:[#allocation5 + $0x4] sm:$0xf] %vm2824_vm13, %v8080_v26  ;;  %v2747_v14 = vmul.f32 %v9521_v9, %v17217_v32 }
0x100e   : > { %v2550_v40 = vpop.xlane.xlu0 %2549 }
0x100f   : > { %9528 = vrcp.f32 %v2550_v40  ;;  %v8082_v6 = vpack.c.bf16 %v2747_v14, %v2747_v14  ;;  %v17231_v14 = vld [vmem:[#allocation184_spill] sm:$0xff] }
0x1010   : > { %v9523_v37 = vpop.eup %9522  ;;  %6989 = vadd.xlane.f32.xlu0 %v15092_v25 }
0x1011   : > { %6979 = vadd.xlane.f32.xlu1 %v15019_v33  ;;  %2828 = vst.msk [vmem:[#allocation5 + $0xc] sm:$0xf] %vm2824_vm13, %v8082_v6  ;;  %v2749_v50 = vmul.f32 %v9523_v37, %v17218_v5  ;;  %v17232_v6 = vld [vmem:[#allocation157_spill] sm:$0xff] }
0x1012   : > { %v2554_v63 = vpop.xlane.xlu0 %2553 }
0x1013   : > { %9530 = vrcp.f32 %v2554_v63  ;;  %v8084_v3 = vpack.c.bf16 %v2749_v50, %v2749_v50 }
0x1014   : > { %v9525_v49 = vpop.eup %9524  ;;  %7001 = vadd.xlane.f32.xlu0 %v15124_v39 }
0x1015   : > { %6991 = vadd.xlane.f32.xlu1 %v15104_v22  ;;  %2830 = vst.msk [vmem:[#allocation5 + $0x14] sm:$0xf] %vm2824_vm13, %v8084_v3  ;;  %v2751_v61 = vmul.f32 %v9525_v49, %v17219_v56  ;;  %v17221_v22 = vld [vmem:[#allocation45_spill] sm:$0xff] }
0x1016   : > { %v2558_v53 = vpop.xlane.xlu0 %2557  ;;  %v17233_v56 = vld [vmem:[#allocation69_spill] sm:$0xff] }
0x1017   : > { %9532 = vrcp.f32 %v2558_v53  ;;  %v8086_v25 = vpack.c.bf16 %v2751_v61, %v2751_v61  ;;  %v17234_v53 = vld [vmem:[#allocation186_spill] sm:$0xff] }
0x1018   : > { %v9527_v33 = vpop.eup %9526  ;;  %6997 = vadd.xlane.f32.xlu0 %v15112_v7  ;;  %9534 = vrcp.f32 %v15061_v10 }
0x1019   : > { %6987 = vadd.xlane.f32.xlu1 %v15086_v46  ;;  %2832 = vst.msk [vmem:[#allocation5 + $0x1c] sm:$0xf] %vm2824_vm13, %v8086_v25  ;;  %v2753_v30 = vmul.f32 %v9527_v33, %v17220_v8  ;;  %v17222_v46 = vld [vmem:[#allocation50_spill] sm:$0xff]  ;;  %9536 = vrcp.f32 %v15068_v19 }
0x101a   : > { %9538 = vrcp.f32 %v15176_v44 }
0x101b   : > { %v8088_v11 = vpack.c.bf16 %v2753_v30, %v2753_v30  ;;  %9540 = vrcp.f32 %v15072_v12 }
0x101c   : > { %v9529_v39 = vpop.eup %9528  ;;  %7009 = vadd.xlane.f32.xlu0 %v15132_v28  ;;  %9542 = vrcp.f32 %v15182_v60 }
0x101d   : > { %6999 = vadd.xlane.f32.xlu1 %v15120_v21  ;;  %2834 = vst.msk [vmem:[#allocation5 + $0x24] sm:$0xf] %vm2824_vm13, %v8088_v11  ;;  %v2755_v52 = vmul.f32 %v9529_v39, %v17221_v22  ;;  %9544 = vrcp.f32 %v15079_v23  ;;  %v17226_v23 = vld [vmem:[#allocation78_spill] sm:$0xff]  ;;  %v17235_v22 = vld [vmem:[#allocation193_spill] sm:$0xff] }
0x101e   : > { %9546 = vrcp.f32 %v15189_v59 }
0x101f   : > { %v8090_v51 = vpack.c.bf16 %v2755_v52, %v2755_v52  ;;  %9548 = vrcp.f32 %v15088_v4  ;;  %v17227_v4 = vld [vmem:[#allocation188_spill] sm:$0xff] }
0x1020   : > { %v9531_v15 = vpop.eup %9530  ;;  %7005 = vadd.xlane.f32.xlu0 %v15122_v18  ;;  %9550 = vrcp.f32 %v15195_v58 }
0x1021   : > { %6995 = vadd.xlane.f32.xlu1 %v15106_v0  ;;  %2836 = vst.msk [vmem:[#allocation5 + $0x2c] sm:$0xf] %vm2824_vm13, %v8090_v51  ;;  %v2757_v7 = vmul.f32 %v9531_v15, %v17222_v46  ;;  %9552 = vrcp.f32 %v15102_v36  ;;  %v17236_v51 = vld [vmem:[#allocation185_spill] sm:$0xff] }
0x1022   : > { %9554 = vrcp.f32 %v15198_v41 }
0x1023   : > { %v8092_v28 = vpack.c.bf16 %v2757_v7, %v2757_v7  ;;  %9556 = vrcp.f32 %v15108_v2  ;;  %v17229_v2 = vld [vmem:[#allocation82_spill] sm:$0xff] }
0x1024   : > { %v9533_v21 = vpop.eup %9532  ;;  %9558 = vrcp.f32 %v15200_v48 }
0x1025   : > { %7007 = vadd.xlane.f32.xlu1 %v15134_v57  ;;  %2838 = vst.msk [vmem:[#allocation5 + $0x34] sm:$0xf] %vm2824_vm13, %v8092_v28  ;;  %v2759_v10 = vmul.f32 %v9533_v21, %v17223_v62  ;;  %v9535_v19 = vpop.eup %9534  ;;  %v17224_v57 = vld [vmem:[#allocation42_spill] sm:$0xff]  ;;  %9560 = vrcp.f32 %v15202_v1 }
0x1026   : > { %v9537_v0 = vpop.eup %9536  ;;  %v4220_v44 = vmul.f32 %v9535_v19, %v17224_v57  ;;  %v9326_v57 = vld [vmem:[%s15470_s5 + $0x38] sm:$0xff]  }
0x1027   : > { %v8094_v18 = vpack.c.bf16 %v2759_v10, %v2759_v10  ;;  %v9539_v12 = vpop.eup %9538  ;;  %v4222_v29 = vmul.f32 %v9537_v0, %v17225_v35  ;;  %v17237_v10 = vld [vmem:[#allocation196_spill] sm:$0xff]  ;;  %9021 = vmatprep.subr.bf16.mxu1 %v9326_v57 }
0x1028   : > { %v9541_v60 = vpop.eup %9540  ;;  %v4221_v45 = vmul.f32 %v9539_v12, %v17226_v23  ;;  %9022 = vmatpush3.bf16.msra.mxu1 %v9326_v57 }
0x1029   : > { %7003 = vadd.xlane.f32.xlu1 %v15126_v42  ;;  %2840 = vst.msk [vmem:[#allocation5 + $0x3c] sm:$0xf] %vm2824_vm13, %v8094_v18  ;;  %v8103_v42 = vpack.c.bf16 %v4220_v44, %v4220_v44  ;;  %v9543_v59 = vpop.eup %9542  ;;  %v5720_v24 = vmul.f32 %v9541_v60, %v17227_v4  ;;  %v8105_v58 = vpack.c.bf16 %v4222_v29, %v4222_v29  ;;  %v9327_v44 = vld [vmem:[%s15470_s5 + $0x30] sm:$0xff]  }
0x102a   : > { %v9545_v55 = vpop.eup %9544  ;;  %v8104_v36 = vpack.c.bf16 %v4221_v45, %v4221_v45  ;;  %v4223_v13 = vmul.f32 %v9543_v59, %v17228_v17  ;;  %9023 = vmatprep.subr.bf16.mxu1 %v9327_v44 }
0x102b   : > { %v9547_v41 = vpop.eup %9546  ;;  %v8119_v54 = vpack.c.bf16 %v5720_v24, %v5720_v24  ;;  %v5722_v43 = vmul.f32 %v9545_v55, %v17229_v2  ;;  %v9329_v2 = vld [vmem:[%s15470_s5 + $0x20] sm:$0xff]  }
0x102c   : > { %v9549_v20 = vpop.eup %9548  ;;  %v8106_v34 = vpack.c.bf16 %v4223_v13, %v4223_v13  ;;  %v5721_v47 = vmul.f32 %v9547_v41, %v17230_v27  ;;  %9024 = vmatpush3.bf16.msra.mxu1 %v9327_v44  ;;  %v9328_v41 = vld [vmem:[%s15470_s5 + $0x28] sm:$0xff]  }
0x102d   : > { %v9551_v16 = vpop.eup %9550  ;;  %v8121_v9 = vpack.c.bf16 %v5722_v43, %v5722_v43  ;;  %v4224_v40 = vmul.f32 %v9549_v20, %v17231_v14  ;;  %9025 = vmatprep.subr.bf16.mxu1 %v9328_v41 }
0x102e   : > { %v9553_v26 = vpop.eup %9552  ;;  %v8120_v32 = vpack.c.bf16 %v5721_v47, %v5721_v47  ;;  %v5723_v1 = vmul.f32 %v9551_v16, %v17232_v6 }
0x102f   : > { %v9555_v37 = vpop.eup %9554  ;;  %v8107_v3 = vpack.c.bf16 %v4224_v40, %v4224_v40  ;;  %v4226_v61 = vmul.f32 %v9553_v26, %v17233_v56  ;;  %v9332_v56 = vld [vmem:[%s15470_s5 + $0x8] sm:$0xff]  }
0x1030   : > { %v9557_v63 = vpop.eup %9556  ;;  %v8122_v49 = vpack.c.bf16 %v5723_v1, %v5723_v1  ;;  %v4225_v25 = vmul.f32 %v9555_v37, %v17234_v53  ;;  %9026 = vmatpush3.bf16.msra.mxu1 %v9328_v41  ;;  %v9331_v1 = vld [vmem:[%s15470_s5 + $0x10] sm:$0xff]  }
0x1031   : > { %v9559_v33 = vpop.eup %9558  ;;  %v8109_v11 = vpack.c.bf16 %v4226_v61, %v4226_v61  ;;  %v5724_v52 = vmul.f32 %v9557_v63, %v17235_v22  ;;  %9027 = vmatprep.subr.bf16.mxu1 %v9329_v2  ;;  %v9333_v22 = vld [vmem:[%s15470_s5] sm:$0xff]  }
0x1032   : > { %v8108_v39 = vpack.c.bf16 %v4225_v25, %v4225_v25  ;;  %v4227_v15 = vmul.f32 %v9559_v33, %v17236_v51  ;;  %v9561_v46 = vpop.eup %9560 }
0x1033   : > { %v8123_v21 = vpack.c.bf16 %v5724_v52, %v5724_v52  ;;  %v5725_v18 = vmul.f32 %v9561_v46, %v17237_v10 }
0x1034   : > { %v8110_v62 = vpack.c.bf16 %v4227_v15, %v4227_v15  ;;  %9028 = vmatpush3.bf16.msra.mxu1 %v9329_v2 }
0x1035   : > { %v8124_v12 = vpack.c.bf16 %v5725_v18, %v5725_v18 }
0x1036   : > { %4292 = vrot.lane.b32.xlu0 %v8103_v42, %s9667_s17 }
0x103a   : > { %4296 = vrot.lane.b32.xlu0 %v8105_v58, %s9667_s17  ;;  %4294 = vrot.lane.b32.xlu1 %v8104_v36, %s9667_s17 }
0x103e   : > { %5792 = vrot.lane.b32.xlu0 %v8119_v54, %s9666_s13  ;;  %4298 = vrot.lane.b32.xlu1 %v8106_v34, %s9667_s17 }
0x103f   : > { %v4279_v48 = vpop.permute.xlu0 %4278 }
0x1040   : > { %4326 = vst.msk [vmem:[#allocation5 + $0x4] sm:$0xf] %vm4324_vm15, %v4279_v48  ;;  %v9330_v48 = vld [vmem:[%s15470_s5 + $0x18] sm:$0xff]  }
0x1041   : > { %9029 = vmatprep.subr.bf16.mxu1 %v9330_v48 }
0x1042   : > { %5796 = vrot.lane.b32.xlu0 %v8121_v9, %s9666_s13  ;;  %5794 = vrot.lane.b32.xlu1 %v8120_v32, %s9666_s13 }
0x1043   : > { %v4283_v5 = vpop.permute.xlu1 %4282  ;;  %v5777_v50 = vpop.permute.xlu0 %5776  ;;  %9030 = vmatpush3.bf16.msra.mxu1 %v9330_v48 }
0x1044   : > { %4328 = vst.msk [vmem:[#allocation5 + $0xc] sm:$0xf] %vm4324_vm15, %v4283_v5  ;;  %9031 = vmatprep.subr.bf16.mxu1 %v9331_v1 }
0x1045   : > { %5825 = vst.msk [vmem:[#allocation5] sm:$0xf] %vm5824_vm0, %v5777_v50 }
0x1046   : > { %4300 = vrot.lane.b32.xlu0 %v8107_v3, %s9667_s17  ;;  %5798 = vrot.lane.b32.xlu1 %v8122_v49, %s9666_s13 }
0x1047   : > { %v5779_v8 = vpop.permute.xlu1 %5778  ;;  %v5781_v30 = vpop.permute.xlu0 %5780  ;;  %9032 = vmatpush3.bf16.msra.mxu1 %v9331_v1 }
0x1048   : > { %5826 = vst.msk [vmem:[#allocation5 + $0x4] sm:$0xf] %vm5824_vm0, %v5779_v8  ;;  %5827 = vst.msk [vmem:[#allocation5 + $0x8] sm:$0xf] %vm5824_vm0, %v5781_v30  ;;  %9033 = vmatprep.subr.bf16.mxu1 %v9332_v56 }
0x104a   : > { %4304 = vrot.lane.b32.xlu0 %v8109_v11, %s9667_s17  ;;  %4302 = vrot.lane.b32.xlu1 %v8108_v39, %s9667_s17 }
0x104b   : > { %v5783_v7 = vpop.permute.xlu1 %5782  ;;  %v4285_v28 = vpop.permute.xlu0 %4284  ;;  %9034 = vmatpush3.bf16.msra.mxu1 %v9332_v56 }
0x104c   : > { %5828 = vst.msk [vmem:[#allocation5 + $0xc] sm:$0xf] %vm5824_vm0, %v5783_v7  ;;  %9035 = vmatprep.subr.bf16.mxu1 %v9333_v22 }
0x104d   : > { %4329 = vst.msk [vmem:[#allocation5 + $0x10] sm:$0xf] %vm4324_vm15, %v4285_v28 }
0x104e   : > { %5800 = vrot.lane.b32.xlu0 %v8123_v21, %s9666_s13  ;;  %4306 = vrot.lane.b32.xlu1 %v8110_v62, %s9667_s17  ;;  %v9007_v45 = vpop.f32.mrf.mxu0 }
0x104f   : > { %v4287_v19 = vpop.permute.xlu1 %4286  ;;  %v4289_v0 = vpop.permute.xlu0 %4288  ;;  %9036 = vmatpush3.bf16.msra.mxu1 %v9333_v22 }
0x1050   : > { %4330 = vst.msk [vmem:[#allocation5 + $0x14] sm:$0xf] %vm4324_vm15, %v4287_v19  ;;  %4331 = vst.msk [vmem:[#allocation5 + $0x18] sm:$0xf] %vm4324_vm15, %v4289_v0  ;;  %v15300_v59 = vpop.f32.mrf.mxu0 }
0x1052   : > { %5802 = vrot.lane.b32.xlu1 %v8124_v12, %s9666_s13  ;;  %v9008_v4 = vpop.f32.mrf.mxu0 }
0x1053   : > { %v4291_v60 = vpop.permute.xlu1 %4290  ;;  %v5785_v42 = vpop.permute.xlu0 %5784 }
0x1054   : > { %4332 = vst.msk [vmem:[#allocation5 + $0x1c] sm:$0xf] %vm4324_vm15, %v4291_v60  ;;  %v7152_v24 = vpop.f32.mrf.mxu0 }
0x1055   : > { %5829 = vst.msk [vmem:[#allocation5 + $0x10] sm:$0xf] %vm5824_vm0, %v5785_v42 }
0x1056   : > { %v15302_v55 = vpop.f32.mrf.mxu0 }
0x1057   : > { %v5787_v35 = vpop.permute.xlu1 %5786  ;;  %v5789_v29 = vpop.permute.xlu0 %5788 }
0x1058   : > { %5830 = vst.msk [vmem:[#allocation5 + $0x14] sm:$0xf] %vm5824_vm0, %v5787_v35  ;;  %5831 = vst.msk [vmem:[#allocation5 + $0x18] sm:$0xf] %vm5824_vm0, %v5789_v29  ;;  %v15304_v36 = vpop.f32.mrf.mxu0 }
0x105a   : > { %v9012_v13 = vpop.f32.mrf.mxu0 }
0x105b   : > { %v5791_v23 = vpop.permute.xlu1 %5790 }
0x105c   : > { %5832 = vst.msk [vmem:[#allocation5 + $0x1c] sm:$0xf] %vm5824_vm0, %v5791_v23  ;;  %v7168_v34 = vpop.f32.mrf.mxu0 }
0x105e   : > { %v15312_v16 = vpop.f32.mrf.mxu0 }
0x1060   : > { %v15317_v6 = vpop.f32.mrf.mxu0 }
0x1062   : > { %v9016_v49 = vpop.f32.mrf.mxu0 }
0x1064   : > { %v7184_v11 = vpop.f32.mrf.mxu0 }
0x1066   : > { %v15335_v62 = vpop.f32.mrf.mxu0 }
0x1068   : > { %v7197_v42 = vpop.f32.mrf.mxu0 }
0x108d   : > { %v6986_v58 = vpop.xlane.xlu0 %6985 }
0x108e   : > { %9562 = vrcp.f32 %v6986_v58 }
0x1091   : > { %v6982_v17 = vpop.xlane.xlu0 %6981 }
0x1092   : > { %9564 = vrcp.f32 %v6982_v17  ;;  %v9020_v17 = vpop.f32.mrf.mxu0 }
0x1095   : > { %v6994_v54 = vpop.xlane.xlu0 %6993 }
0x1096   : > { %9566 = vrcp.f32 %v6994_v54  ;;  %v6984_v20 = vpop.xlane.xlu1 %6983 }
0x1097   : > { %9568 = vrcp.f32 %v6984_v20 }
0x1099   : > { %v6990_v43 = vpop.xlane.xlu0 %6989 }
0x109a   : > { %9570 = vrcp.f32 %v6990_v43  ;;  %v6980_v27 = vpop.xlane.xlu1 %6979 }
0x109b   : > { %v9563_v47 = vpop.eup %9562  ;;  %9572 = vrcp.f32 %v6980_v27 }
0x109c   : > { %v7215_v26 = vmul.f32 %v9563_v47, %v9008_v4  ;;  %v7200_v47 = vpop.f32.mrf.mxu0 }
0x109d   : > { %v7002_v9 = vpop.xlane.xlu0 %7001 }
0x109e   : > { %9574 = vrcp.f32 %v7002_v9  ;;  %v6992_v32 = vpop.xlane.xlu1 %6991  ;;  %v8130_v14 = vpack.c.bf16 %v7215_v26, %v7215_v26 }
0x109f   : > { %v9565_v40 = vpop.eup %9564  ;;  %9576 = vrcp.f32 %v6992_v32 }
0x10a0   : > { %7282 = vrot.lane.b32.xlu1 %v8130_v14, %s16759_s14  ;;  %v7213_v37 = vmul.f32 %v9565_v40, %v7152_v24  ;;  %9578 = vrcp.f32 %v15204_v38 }
0x10a1   : > { %v6998_v5 = vpop.xlane.xlu0 %6997 }
0x10a2   : > { %9580 = vrcp.f32 %v6998_v5  ;;  %v6988_v50 = vpop.xlane.xlu1 %6987  ;;  %v8128_v63 = vpack.c.bf16 %v7213_v37, %v7213_v37  ;;  %v17239_v5 = vld [vmem:[#allocation191_spill] sm:$0xff] }
0x10a3   : > { %v9567_v3 = vpop.eup %9566  ;;  %9582 = vrcp.f32 %v6988_v50 }
0x10a4   : > { %v9569_v61 = vpop.eup %9568  ;;  %7278 = vrot.lane.b32.xlu1 %v8128_v63, %s16759_s14  ;;  %v7219_v53 = vmul.f32 %v9567_v3, %v9012_v13 }
0x10a5   : > { %v7010_v25 = vpop.xlane.xlu0 %7009  ;;  %v7214_v33 = vmul.f32 %v9569_v61, %v9007_v45 }
0x10a6   : > { %v7000_v38 = vpop.xlane.xlu1 %6999  ;;  %v8134_v8 = vpack.c.bf16 %v7219_v53, %v7219_v53 }
0x10a7   : > { %v9571_v30 = vpop.eup %9570  ;;  %9584 = vrcp.f32 %v7000_v38  ;;  %v8129_v39 = vpack.c.bf16 %v7214_v33, %v7214_v33 }
0x10a8   : > { %v9573_v52 = vpop.eup %9572  ;;  %9586 = vrcp.f32 %v15118_v31  ;;  %7290 = vrot.lane.b32.xlu1 %v8134_v8, %s16759_s14  ;;  %v7217_v51 = vmul.f32 %v9571_v30, %v7168_v34 }
0x10a9   : > { %9588 = vrcp.f32 %v7010_v25  ;;  %7280 = vrot.lane.b32.xlu0 %v8129_v39, %s16759_s14  ;;  %v7006_v15 = vpop.xlane.xlu0 %7005  ;;  %v7212_v46 = vmul.f32 %v9573_v52, %v15300_v59 }
0x10aa   : > { %9590 = vrcp.f32 %v7006_v15  ;;  %v6996_v7 = vpop.xlane.xlu1 %6995  ;;  %v8132_v28 = vpack.c.bf16 %v7217_v51, %v7217_v51 }
0x10ab   : > { %v9575_v21 = vpop.eup %9574  ;;  %9592 = vrcp.f32 %v6996_v7  ;;  %v8127_v10 = vpack.c.bf16 %v7212_v46, %v7212_v46 }
0x10ac   : > { %v9577_v31 = vpop.eup %9576  ;;  %7286 = vrot.lane.b32.xlu1 %v8132_v28, %s16759_s14  ;;  %v7223_v18 = vmul.f32 %v9575_v21, %v9016_v49 }
0x10ad   : > { %7276 = vrot.lane.b32.xlu0 %v8127_v10, %s16759_s14  ;;  %v4293_v19 = vpop.permute.xlu0 %4292  ;;  %v7218_v0 = vmul.f32 %v9577_v31, %v15302_v55  ;;  %v9579_v57 = vpop.eup %9578  ;;  %v17238_v55 = vld [vmem:[#allocation194_spill] sm:$0xff] }
0x10ae   : > { %4333 = vst.msk [vmem:[#allocation5 + $0x20] sm:$0xf] %vm4324_vm15, %v4293_v19  ;;  %v7008_v44 = vpop.xlane.xlu1 %7007  ;;  %v8138_v12 = vpack.c.bf16 %v7223_v18, %v7223_v18  ;;  %v5727_v58 = vmul.f32 %v9579_v57, %v17238_v55 }
0x10af   : > { %v9581_v60 = vpop.eup %9580  ;;  %v8133_v35 = vpack.c.bf16 %v7218_v0, %v7218_v0  ;;  %9594 = vrcp.f32 %v7008_v44 }
0x10b0   : > { %v9583_v29 = vpop.eup %9582  ;;  %7298 = vrot.lane.b32.xlu1 %v8138_v12, %s16759_s14  ;;  %v7221_v23 = vmul.f32 %v9581_v60, %v7184_v11  ;;  %v8126_v43 = vpack.c.bf16 %v5727_v58, %v5727_v58 }
0x10b1   : > { %7288 = vrot.lane.b32.xlu0 %v8133_v35, %s16759_s14  ;;  %v4297_v45 = vpop.permute.xlu0 %4296  ;;  %v7216_v59 = vmul.f32 %v9583_v29, %v15304_v36 }
0x10b2   : > { %4335 = vst.msk [vmem:[#allocation5 + $0x28] sm:$0xf] %vm4324_vm15, %v4297_v45  ;;  %v7004_v4 = vpop.xlane.xlu1 %7003  ;;  %v8136_v24 = vpack.c.bf16 %v7221_v23, %v7221_v23 }
0x10b3   : > { %9596 = vrcp.f32 %v7004_v4  ;;  %v8131_v13 = vpack.c.bf16 %v7216_v59, %v7216_v59 }
0x10b4   : > { %v9585_v41 = vpop.eup %9584  ;;  %7294 = vrot.lane.b32.xlu1 %v8136_v24, %s16759_s14 }
0x10b5   : > { %v9587_v54 = vpop.eup %9586  ;;  %7284 = vrot.lane.b32.xlu0 %v8131_v13, %s16759_s14  ;;  %v5793_v20 = vpop.permute.xlu0 %5792  ;;  %v7222_v34 = vmul.f32 %v9585_v41, %v15312_v16 }
0x10b6   : > { %v9589_v36 = vpop.eup %9588  ;;  %5833 = vst.msk [vmem:[#allocation5 + $0x20] sm:$0xf] %vm5824_vm0, %v5793_v20  ;;  %v4295_v2 = vpop.permute.xlu1 %4294  ;;  %v5726_v50 = vmul.f32 %v9587_v54, %v17239_v5 }
0x10b7   : > { %v9591_v27 = vpop.eup %9590  ;;  %4334 = vst.msk [vmem:[#allocation5 + $0x24] sm:$0xf] %vm4324_vm15, %v4295_v2  ;;  %v8137_v48 = vpack.c.bf16 %v7222_v34, %v7222_v34  ;;  %v7227_v1 = vmul.f32 %v9589_v36, %v9020_v17  ;;  %v8008_v17 = vld [vmem:[%s15471_s6] ss:$0 sm:$0xff] }
0x10b8   : > { %v9593_v26 = vpop.eup %9592  ;;  %5806 = vrot.lane.b32.xlu1 %v8126_v43, %s9666_s13  ;;  %v7225_v9 = vmul.f32 %v9591_v27, %v7200_v47  ;;  %v8125_v56 = vpack.c.bf16 %v5726_v50, %v5726_v50 }
0x10b9   : > { %7296 = vrot.lane.b32.xlu0 %v8137_v48, %s16759_s14  ;;  %v5797_v32 = vpop.permute.xlu0 %5796  ;;  %v7220_v14 = vmul.f32 %v9593_v26, %v15317_v6  ;;  %v8142_v49 = vpack.c.bf16 %v7227_v1, %v7227_v1 }
0x10ba   : > { %5835 = vst.msk [vmem:[#allocation5 + $0x28] sm:$0xf] %vm5824_vm0, %v5797_v32  ;;  %v4299_v16 = vpop.permute.xlu1 %4298  ;;  %v8140_v40 = vpack.c.bf16 %v7225_v9, %v7225_v9 }
0x10bb   : > { %4336 = vst.msk [vmem:[#allocation5 + $0x2c] sm:$0xf] %vm4324_vm15, %v4299_v16  ;;  %v8135_v37 = vpack.c.bf16 %v7220_v14, %v7220_v14 }
0x10bc   : > { %7302 = vrot.lane.b32.xlu1 %v8140_v40, %s16759_s14  ;;  %v9595_v6 = vpop.eup %9594 }
0x10bd   : > { %7292 = vrot.lane.b32.xlu0 %v8135_v37, %s16759_s14  ;;  %v4301_v63 = vpop.permute.xlu0 %4300  ;;  %v7226_v8 = vmul.f32 %v9595_v6, %v15335_v62 }
0x10be   : > { %4337 = vst.msk [vmem:[#allocation5 + $0x30] sm:$0xf] %vm4324_vm15, %v4301_v63  ;;  %v5795_v3 = vpop.permute.xlu1 %5794 }
0x10bf   : > { %5834 = vst.msk [vmem:[#allocation5 + $0x24] sm:$0xf] %vm5824_vm0, %v5795_v3  ;;  %v8141_v39 = vpack.c.bf16 %v7226_v8, %v7226_v8 }
0x10c0   : > { %v9597_v61 = vpop.eup %9596  ;;  %7306 = vrot.lane.b32.xlu1 %v8142_v49, %s16759_s14 }
0x10c1   : > { %5804 = vrot.lane.b32.xlu0 %v8125_v56, %s9666_s13  ;;  %v4305_v53 = vpop.permute.xlu0 %4304  ;;  %v7224_v25 = vmul.f32 %v9597_v61, %v7197_v42  ;;  %s269_s13 = sand.u32 1, %s9650_s25  }
0x10c2   : > { %4339 = vst.msk [vmem:[#allocation5 + $0x38] sm:$0xf] %vm4324_vm15, %v4305_v53  ;;  %v5799_v33 = vpop.permute.xlu1 %5798  ;;  %s15425_s28 = scalar_lea.sflag [#allocation7], %s269_s13 }
0x10c3   : > { %5836 = vst.msk [vmem:[#allocation5 + $0x2c] sm:$0xf] %vm5824_vm0, %v5799_v33  ;;  %v8139_v38 = vpack.c.bf16 %v7224_v25, %v7224_v25 }
0x10c5   : > { %7300 = vrot.lane.b32.xlu0 %v8139_v38, %s16759_s14  ;;  %v5801_v30 = vpop.permute.xlu0 %5800 }
0x10c6   : > { %5837 = vst.msk [vmem:[#allocation5 + $0x30] sm:$0xf] %vm5824_vm0, %v5801_v30  ;;  %v4303_v11 = vpop.permute.xlu1 %4302 }
0x10c7   : > { %4338 = vst.msk [vmem:[#allocation5 + $0x34] sm:$0xf] %vm4324_vm15, %v4303_v11 }
0x10c9   : > { %7304 = vrot.lane.b32.xlu0 %v8141_v39, %s16759_s14  ;;  %s7669_s14 = sshll.u32 %s269_s13, 7 }
0x10ca   : > { %v4307_v22 = vpop.permute.xlu1 %4306  ;;  %s15396_s20 = scalar_lea.vmem [#allocation6], %s7669_s14 }
0x10cb   : > { %4340 = vst.msk [vmem:[#allocation5 + $0x3c] sm:$0xf] %vm4324_vm15, %v4307_v22  ;;  %s7603_s9 = sshll.u32 %s15396_s20, 4  ;;  %s15419_s9 = int_to_ptr.vmem [resolvable:$true] %s7603_s9 }
0x10cc   : > { %s9598_s29 = scalar_lea.vmem %s15419_s9, 2048  ;;  %p9605_p0 = scmp.lt.s32.totalorder %s15419_s9, %s9603_s23 }
0x10cd   : > { %p9599_p11 = scmp.ne.s32.totalorder %s15419_s9, %s9598_s29  ;;  %p9606_p1 = scmp.lt.s32.totalorder %s9604_s16, %s9598_s29 }
0x10ce   : > { %v5803_v52 = vpop.permute.xlu1 %5802 }
0x10cf   : > { %5838 = vst.msk [vmem:[#allocation5 + $0x34] sm:$0xf] %vm5824_vm0, %v5803_v52  ;;  %p9600_p12 = pnand %p9599_p11, %p9749_p5  ;;  %p9607_p2 = por %p9606_p1, %p9605_p0 }
0x10d1   : > { %p9601_p13 = pneg %p9600_p12 }
0x10d3   : > { %p9608_p3 = pnand %p9607_p2, %p9601_p13 }
0x1112   : > { %v7283_v51 = vpop.permute.xlu1 %7282 }
0x1113   : > { %7328 = vst.msk [vmem:[#allocation5 + $0xc] sm:$0xf] %vm7324_vm1, %v7283_v51 }
0x1116   : > { %v7279_v15 = vpop.permute.xlu1 %7278 }
0x1117   : > { %7326 = vst.msk [vmem:[#allocation5 + $0x4] sm:$0xf] %vm7324_vm1, %v7279_v15 }
0x111a   : > { %v7291_v46 = vpop.permute.xlu1 %7290 }
0x111b   : > { %7332 = vst.msk [vmem:[#allocation5 + $0x1c] sm:$0xf] %vm7324_vm1, %v7291_v46  ;;  %v7281_v7 = vpop.permute.xlu0 %7280 }
0x111c   : > { %7327 = vst.msk [vmem:[#allocation5 + $0x8] sm:$0xf] %vm7324_vm1, %v7281_v7 }
0x111e   : > { %v7287_v28 = vpop.permute.xlu1 %7286 }
0x111f   : > { %7330 = vst.msk [vmem:[#allocation5 + $0x14] sm:$0xf] %vm7324_vm1, %v7287_v28  ;;  %v7277_v21 = vpop.permute.xlu0 %7276 }
0x1120   : > { %7325 = vst.msk [vmem:[#allocation5] sm:$0xf] %vm7324_vm1, %v7277_v21 }
0x1122   : > { %v7299_v62 = vpop.permute.xlu1 %7298 }
0x1123   : > { %7336 = vst.msk [vmem:[#allocation5 + $0x2c] sm:$0xf] %vm7324_vm1, %v7299_v62  ;;  %v7289_v10 = vpop.permute.xlu0 %7288  ;;  %v9335_v0 = vld [vmem:[#allocation5 + $0x8] sm:$0xff]  }
0x1124   : > { %7331 = vst.msk [vmem:[#allocation5 + $0x18] sm:$0xf] %vm7324_vm1, %v7289_v10 }
0x1126   : > { %v7295_v31 = vpop.permute.xlu1 %7294 }
0x1127   : > { %7334 = vst.msk [vmem:[#allocation5 + $0x24] sm:$0xf] %vm7324_vm1, %v7295_v31  ;;  %v7285_v18 = vpop.permute.xlu0 %7284  ;;  %v9334_v19 = vld [vmem:[#allocation5] sm:$0xff]  }
0x1128   : > { %7329 = vst.msk [vmem:[#allocation5 + $0x10] sm:$0xf] %vm7324_vm1, %v7285_v18  ;;  %9037 = vmatprep.mubr.bf16.mxu1 %v9334_v19 }
0x1129   : > { %9038 = vmatmul.mubr.bf16.vlgmr.msra.gmra.mxu1 %v9335_v0 }
0x112a   : > { %v5807_v57 = vpop.permute.xlu1 %5806 }
0x112b   : > { %5840 = vst.msk [vmem:[#allocation5 + $0x3c] sm:$0xf] %vm5824_vm0, %v5807_v57  ;;  %v7297_v44 = vpop.permute.xlu0 %7296  ;;  %v9337_v35 = vld [vmem:[#allocation5 + $0x18] sm:$0xff]  }
0x112c   : > { %7335 = vst.msk [vmem:[#allocation5 + $0x28] sm:$0xf] %vm7324_vm1, %v7297_v44 }
0x112e   : > { %v7303_v12 = vpop.permute.xlu1 %7302 }
0x112f   : > { %7338 = vst.msk [vmem:[#allocation5 + $0x34] sm:$0xf] %vm7324_vm1, %v7303_v12  ;;  %v7293_v60 = vpop.permute.xlu0 %7292  ;;  %v9336_v42 = vld [vmem:[#allocation5 + $0x10] sm:$0xff]  }
0x1130   : > { %7333 = vst.msk [vmem:[#allocation5 + $0x20] sm:$0xf] %vm7324_vm1, %v7293_v60  ;;  %9041 = vmatprep.mubr.bf16.mxu1 %v9336_v42 }
0x1131   : > { %9042 = vmatmul.mubr.bf16.gmra.mxu1 %v9337_v35 }
0x1132   : > { %v7307_v29 = vpop.permute.xlu1 %7306 }
0x1133   : > { %7340 = vst.msk [vmem:[#allocation5 + $0x3c] sm:$0xf] %vm7324_vm1, %v7307_v29  ;;  %v5805_v23 = vpop.permute.xlu0 %5804  ;;  %v9339_v4 = vld [vmem:[#allocation5 + $0x28] sm:$0xff]  }
0x1134   : > { %5839 = vst.msk [vmem:[#allocation5 + $0x38] sm:$0xf] %vm5824_vm0, %v5805_v23 }
0x1137   : > { %v7301_v45 = vpop.permute.xlu0 %7300  ;;  %v9338_v59 = vld [vmem:[#allocation5 + $0x20] sm:$0xff]  }
0x1138   : > { %7337 = vst.msk [vmem:[#allocation5 + $0x30] sm:$0xf] %vm7324_vm1, %v7301_v45  ;;  %9045 = vmatprep.mubr.bf16.mxu1 %v9338_v59 }
0x1139   : > { %9046 = vmatmul.mubr.bf16.gmra.mxu1 %v9339_v4 }
0x113b   : > { %v7305_v24 = vpop.permute.xlu0 %7304 }
0x113c   : > { %7339 = vst.msk [vmem:[#allocation5 + $0x38] sm:$0xf] %vm7324_vm1, %v7305_v24 }
0x113f   : > { %v9340_v55 = vld [vmem:[#allocation5 + $0x30] sm:$0xff]  }
0x1140   : > { %9049 = vmatprep.mubr.bf16.mxu1 %v9340_v55 }
0x1143   : > { %v9341_v58 = vld [vmem:[#allocation5 + $0x38] sm:$0xff]  }
0x1144   : > { %9050 = vmatmul.mubr.bf16.gmra.mxu1 %v9341_v58 }
0x11e9   : > { %v9039_v13 = vpop.f32.mrf.mxu1 }
0x11ea   : > { %v7519_v41 = vadd.f32 %v9039_v13, %v8008_v17 }
0x11eb   : > { %v7510_v54 = vpop.f32.mrf.mxu1 }
0x11ec   : > { %7575 = vst [vmem:[%s15396_s20 + $0x10] sm:$0xff] %v7519_v41  ;;  %v7511_v20 = vadd.f32 %v8008_v17, %v7510_v54 }
0x11ed   : > { %v9040_v34 = vpop.f32.mrf.mxu1 }
0x11ee   : > { %7573 = vst [vmem:[%s15396_s20] sm:$0xff] %v7511_v20  ;;  %v7522_v36 = vadd.f32 %v9040_v34, %v8008_v17 }
0x11ef   : > { %v7513_v2 = vpop.f32.mrf.mxu1 }
0x11f0   : > { %7576 = vst [vmem:[%s15396_s20 + $0x18] sm:$0xff] %v7522_v36  ;;  %v7514_v43 = vadd.f32 %v8008_v17, %v7513_v2 }
0x11f1   : > { %v9043_v27 = vpop.f32.mrf.mxu1 }
0x11f2   : > { %7574 = vst [vmem:[%s15396_s20 + $0x8] sm:$0xff] %v7514_v43  ;;  %v7535_v47 = vadd.f32 %v9043_v27, %v8008_v17 }
0x11f3   : > { %v7526_v48 = vpop.f32.mrf.mxu1 }
0x11f4   : > { %7579 = vst [vmem:[%s15396_s20 + $0x30] sm:$0xff] %v7535_v47  ;;  %v7527_v26 = vadd.f32 %v8008_v17, %v7526_v48 }
0x11f5   : > { %v9044_v9 = vpop.f32.mrf.mxu1 }
0x11f6   : > { %7577 = vst [vmem:[%s15396_s20 + $0x20] sm:$0xff] %v7527_v26  ;;  %v7538_v32 = vadd.f32 %v9044_v9, %v8008_v17 }
0x11f7   : > { %v7529_v14 = vpop.f32.mrf.mxu1 }
0x11f8   : > { %7580 = vst [vmem:[%s15396_s20 + $0x38] sm:$0xff] %v7538_v32  ;;  %v7530_v16 = vadd.f32 %v8008_v17, %v7529_v14 }
0x11f9   : > { %v9047_v40 = vpop.f32.mrf.mxu1 }
0x11fa   : > { %7578 = vst [vmem:[%s15396_s20 + $0x28] sm:$0xff] %v7530_v16  ;;  %v7551_v1 = vadd.f32 %v9047_v40, %v8008_v17 }
0x11fb   : > { %v7542_v37 = vpop.f32.mrf.mxu1 }
0x11fc   : > { %7583 = vst [vmem:[%s15396_s20 + $0x50] sm:$0xff] %v7551_v1  ;;  %v7543_v5 = vadd.f32 %v8008_v17, %v7542_v37 }
0x11fd   : > { %v9048_v50 = vpop.f32.mrf.mxu1 }
0x11fe   : > { %7581 = vst [vmem:[%s15396_s20 + $0x40] sm:$0xff] %v7543_v5  ;;  %v7554_v63 = vadd.f32 %v9048_v50, %v8008_v17 }
0x11ff   : > { %v7545_v3 = vpop.f32.mrf.mxu1 }
0x1200   : > { %7584 = vst [vmem:[%s15396_s20 + $0x58] sm:$0xff] %v7554_v63  ;;  %v7546_v49 = vadd.f32 %v8008_v17, %v7545_v3 }
0x1202   : > { %7582 = vst [vmem:[%s15396_s20 + $0x48] sm:$0xff] %v7546_v49 }
0x1204   : > { %v9051_v6 = vpop.f32.mrf.mxu1 }
0x1205   : > { %v7567_v56 = vadd.f32 %v9051_v6, %v8008_v17 }
0x1206   : > { %v7558_v61 = vpop.f32.mrf.mxu1 }
0x1207   : > { %7587 = vst [vmem:[%s15396_s20 + $0x70] sm:$0xff] %v7567_v56  ;;  %v7559_v53 = vadd.f32 %v8008_v17, %v7558_v61 }
0x1208   : > { %v9052_v25 = vpop.f32.mrf.mxu1 }
0x1209   : > { %7585 = vst [vmem:[%s15396_s20 + $0x60] sm:$0xff] %v7559_v53  ;;  %v7570_v33 = vadd.f32 %v9052_v25, %v8008_v17 }
0x120a   : > { %v7561_v38 = vpop.f32.mrf.mxu1 }
0x120b   : > { %7588 = vst [vmem:[%s15396_s20 + $0x78] sm:$0xff] %v7570_v33  ;;  %v7562_v8 = vadd.f32 %v8008_v17, %v7561_v38 }
0x120d   : > { %7586 = vst [vmem:[%s15396_s20 + $0x68] sm:$0xff] %v7562_v8 }
0x120e   : > { %9611 = shalt.err (!%p9608_p3)
}
0x120f   : > { %s9612_s13 = scalar_lea.hbm %s15417_s15, 2048  ;;  %s9616_s18 = scalar_lea.hbm %s15472_s7, 4096 }
0x1210   : > { %p9613_p4 = scmp.ne.s32.totalorder %s15417_s15, %s9612_s13  ;;  %p9617_p9 = scmp.lt.s32.totalorder %s15417_s15, %s15472_s7 }
0x1211   : > { %p9618_p10 = scmp.lt.s32.totalorder %s9616_s18, %s9612_s13 }
0x1212   : > { %p9614_p7 = pnand %p9613_p4, %p9749_p5 }
0x1213   : > { %p9619_p11 = por %p9618_p10, %p9617_p9 }
0x1214   : > { %p9615_p8 = pneg %p9614_p7 }
0x1216   : > { %p9620_p12 = pnand %p9619_p11, %p9615_p8 }
0x1218   : > { %9623 = shalt.err (!%p9620_p12)
}
0x1219   : > { %s9669_s19 = smov 128   ;;  %s9670_s22 = smov 8  }
0x121a   : > { %9117 = dma.vmem_to_hbm [thread:$0]  (%p9749_p5), %s15419_s9, 2048, %s15417_s15, %s15425_s28, %s9669_s19, %s9669_s19, %s9670_s22  }
0x121b PF: > { %p9123_p13 = scmp.ge.s32.totalorder %s9658_s27, 2  ;;  %s7618_s29 = sand.u32 1, %s9646_s24  }
0x121c   : > { %s7619_s21 = scalar_lea.sflag [#allocation7], %s7618_s29 }
0x121d   : > { %p9120_p0 = pnand %p9123_p13, %p9753_p6 }
0x121f   : > { %p9121_p1 = pneg %p9120_p0 }
0x1221   : > { %9641 = dma.done.wait (%p9121_p1), %s7619_s21, 2048  }
0x1222   : > { %9643 = vsyncadd (%p9121_p1), %s7619_s21, 4294965248  ;;  %p17_p2 = scmp.ge.s32.totalorder %s9736_s30, 4   ;;  %s17240_s24 = smov %s9650_s25 }
0x1223   : > { %s17241_s25 = smov %s9654_s26  ;;  %s17242_s26 = smov %s9747_s10 }
0x1224   : > { %s17243_s27 = smov %s9736_s30  ;;  %19 = sbr.rel (!%p17_p2) target bundleno = 3 (0x3), region = 83 }
0x1229   :  { %7624 = vsyncpa [#allocation7], 1 }
0x122a   :  { %7626 = vsyncpa [#allocation7 + $0x1], 1 }

</bundles_post_ra>
